<compile_context>
chip_gen: v6e
topology: v6e:2x2x1
jax: 0.10.0
libtpu: 0.0.40
codegen_flags: <defaults>
</compile_context>

<pallas_src>
import jax
import jax.numpy as jnp
from jax.experimental import pallas as pl
from jax.experimental.pallas import tpu as pltpu


def _round_up(x, m):
    return ((x + m - 1) // m) * m


# ----------------------------------------------------------------------------
# Fused  (W @ patches) + bias -> activation   Pallas kernel (lane-dense output)
# ----------------------------------------------------------------------------
def _make_fused_kernel(act):
    def kernel(w_ref, p_ref, b_ref, o_ref):
        # (Cout, K) @ (K, TM) -> (Cout, TM); TM is the lane dimension.
        acc = jnp.dot(w_ref[...], p_ref[...], preferred_element_type=jnp.float32)
        y = acc + b_ref[...]                       # (Cout, 1) broadcast over lanes
        if act == "leaky":
            y = jnp.where(y > 0, y, 0.2 * y)
        elif act == "relu":
            y = jnp.maximum(y, 0.0)
        elif act == "tanh":
            y = jnp.tanh(y)
        o_ref[...] = y.astype(o_ref.dtype)
    return kernel


def _pick_tiling(M, K):
    """Lane tile TM for the flattened-spatial (M) axis and padded M."""
    if K <= 256:
        cap = 2048
    elif K <= 1024:
        cap = 1024
    else:
        cap = 512
    tm = min(cap, _round_up(M, 128))
    # Keep >= 2 M grid steps for the big layers so v7x can shard the parallel
    # M axis across both TensorCores.
    if M >= 2048 and M <= tm:
        tm //= 2
    return tm, _round_up(M, tm)


def fused_matmul_bias_act(patches, w, bias, act, out_dtype=jnp.bfloat16):
    """patches: (N, P, K, M); w: (P, Cout, K); bias: (Cout,) -> (N, P, Cout, M)."""
    N, P, K, M = patches.shape
    Cout = w.shape[1]
    tm, m_pad = _pick_tiling(M, K)
    if m_pad != M:
        patches = jnp.pad(patches, ((0, 0), (0, 0), (0, 0), (0, m_pad - M)))
    patches = patches.astype(jnp.bfloat16)
    w = w.astype(jnp.bfloat16)
    b = jnp.broadcast_to(bias.astype(jnp.float32).reshape(1, Cout, 1), (P, Cout, 1))

    out = pl.pallas_call(
        _make_fused_kernel(act),
        out_shape=jax.ShapeDtypeStruct((N, P, Cout, m_pad), out_dtype),
        grid_spec=pltpu.PrefetchScalarGridSpec(
            num_scalar_prefetch=0,
            grid=(N, P, m_pad // tm),
            in_specs=[
                pl.BlockSpec((None, Cout, K), lambda n, p, i: (p, 0, 0)),      # weights
                pl.BlockSpec((None, None, K, tm), lambda n, p, i: (n, p, 0, i)),  # patches
                pl.BlockSpec((None, Cout, 1), lambda n, p, i: (p, 0, 0)),      # bias
            ],
            out_specs=pl.BlockSpec((None, None, Cout, tm),
                                   lambda n, p, i: (n, p, 0, i)),
        ),
        compiler_params=pltpu.CompilerParams(
            dimension_semantics=("parallel", "parallel", "parallel"),
            vmem_limit_bytes=48 * 1024 * 1024,
        ),
    )(w, patches, b)
    return out[..., :M]


# ----------------------------------------------------------------------------
# Conv2d(k=4, s=2, p=1)  — channel-first im2col, K order = (kh, kw, cin)
# ----------------------------------------------------------------------------
def conv2d_s2(x, w, scale, bias, act, pad_mode):
    """x: (N, Cin, H, W); w: torch layout (Cout, Cin, 4, 4) -> (N, Cout, H/2, W/2)."""
    N, Cin, H, W = x.shape
    Cout = w.shape[0]
    Ho, Wo = H // 2, W // 2
    if pad_mode == "reflect":
        xp = jnp.pad(x, ((0, 0), (0, 0), (1, 1), (1, 1)), mode="reflect")
    else:
        xp = jnp.pad(x, ((0, 0), (0, 0), (1, 1), (1, 1)))
    taps = [xp[:, :, kh:kh + 2 * Ho:2, kw:kw + 2 * Wo:2]
            for kh in range(4) for kw in range(4)]                  # each (N,Cin,Ho,Wo)
    patches = jnp.stack(taps, axis=1).reshape(N, 1, 16 * Cin, Ho * Wo)
    w_mat = jnp.transpose(w, (0, 2, 3, 1)).reshape(1, Cout, 16 * Cin)
    w_mat = w_mat * scale.reshape(1, Cout, 1)                        # fold BN scale
    out = fused_matmul_bias_act(patches, w_mat, bias, act)           # (N,1,Cout,Ho*Wo)
    return out.reshape(N, Cout, Ho, Wo)


# ----------------------------------------------------------------------------
# ConvTranspose2d(k=4, s=2, p=1) — 4-phase polyphase decomposition (no zero
# dilation).  out[2m+ph, 2n+pw] = sum_{u,v} w[ci,co,3-2u-ph,3-2v-pw] * xpad[m+ph+u, n+pw+v]
# ----------------------------------------------------------------------------
def conv_transpose2d_s2(x, w, scale, bias, act):
    """x: (N, Cin, H, W); w: torch layout (Cin, Cout, 4, 4) -> (N, Cout, 2H, 2W)."""
    N, Cin, H, W = x.shape
    Cout = w.shape[1]
    xp = jnp.pad(x, ((0, 0), (0, 0), (1, 1), (1, 1)))
    pat_list, w_list = [], []
    for ph in range(2):
        for pw in range(2):
            taps = [xp[:, :, ph + u:ph + u + H, pw + v:pw + v + W]
                    for u in range(2) for v in range(2)]             # each (N,Cin,H,W)
            pat_list.append(jnp.stack(taps, axis=1).reshape(N, 4 * Cin, H * W))
            w_ph = w[:, :, 3 - ph::-2, 3 - pw::-2]                   # (Cin,Cout,2,2) [u,v]
            w_list.append(jnp.transpose(w_ph, (1, 2, 3, 0)).reshape(Cout, 4 * Cin))
    patches = jnp.stack(pat_list, axis=1)                            # (N, 4, 4Cin, H*W)
    w_mat = jnp.stack(w_list, axis=0) * scale.reshape(1, Cout, 1)    # (4, Cout, 4Cin)
    out = fused_matmul_bias_act(patches, w_mat, bias, act)           # (N, 4, Cout, H*W)
    out = out.reshape(N, 2, 2, Cout, H, W)
    out = jnp.transpose(out, (0, 3, 4, 1, 5, 2))                     # (N,Cout,H,ph,W,pw)
    return out.reshape(N, Cout, 2 * H, 2 * W)


# ----------------------------------------------------------------------------
# Parameters (deterministic, synthetic) and forward pass
# ----------------------------------------------------------------------------
def init_generator_params(key, in_channels=3, features=8):
    f = features
    keys = iter(jax.random.split(key, 128))

    def nrm(shape, s=0.05):
        return s * jax.random.normal(next(keys), shape, dtype=jnp.float32)

    def bn(c):
        return {"gamma": 1.0 + nrm((c,), 0.1), "beta": nrm((c,), 0.1),
                "mean": nrm((c,), 0.1), "var": jnp.abs(1.0 + nrm((c,), 0.1))}

    p = {"initial": {"w": nrm((f, in_channels, 4, 4)), "b": nrm((f,))}}

    down_dims = [(f, 2 * f), (2 * f, 4 * f), (4 * f, 8 * f),
                 (8 * f, 8 * f), (8 * f, 8 * f), (8 * f, 8 * f)]
    p["down"] = [dict(w=nrm((co, ci, 4, 4)), **bn(co)) for ci, co in down_dims]

    p["bottleneck"] = {"w": nrm((8 * f, 8 * f, 4, 4)), "b": nrm((8 * f,))}

    up_dims = [(8 * f, 8 * f), (16 * f, 8 * f), (16 * f, 8 * f), (16 * f, 8 * f),
               (16 * f, 4 * f), (8 * f, 2 * f), (4 * f, f)]
    p["up"] = [dict(w=nrm((ci, co, 4, 4)), **bn(co)) for ci, co in up_dims]

    p["final"] = {"w": nrm((2 * f, in_channels, 4, 4)), "b": nrm((in_channels,))}
    return p


def _bn_fold(layer, eps=1e-5):
    scale = layer["gamma"] / jnp.sqrt(layer["var"] + eps)
    bias = layer["beta"] - layer["mean"] * scale
    return scale, bias


def generator_forward(params, x_nchw, in_channels=3, features=8):
    f = features
    x = x_nchw.astype(jnp.bfloat16)                 # bf16 activations throughout
    ones = lambda c: jnp.ones((c,), jnp.float32)

    # encoder
    d1 = conv2d_s2(x, params["initial"]["w"], ones(f),
                   params["initial"]["b"], "leaky", "reflect")
    downs = [d1]
    cur = d1
    for layer in params["down"]:
        s, b = _bn_fold(layer)
        cur = conv2d_s2(cur, layer["w"], s, b, "leaky", "reflect")
        downs.append(cur)                           # d2 .. d7

    bott = conv2d_s2(downs[-1], params["bottleneck"]["w"], ones(8 * f),
                     params["bottleneck"]["b"], "relu", "zeros")

    # decoder with skip connections
    up = bott
    skips = downs[::-1]                             # [d7, d6, ..., d1]
    for idx, layer in enumerate(params["up"]):
        s, b = _bn_fold(layer)
        up = conv_transpose2d_s2(up, layer["w"], s, b, "relu")
        # Dropout(0.5): identity in eval mode.
        up = jnp.concatenate([up, skips[idx]], axis=1)

    out = conv_transpose2d_s2(up, params["final"]["w"], ones(in_channels),
                              params["final"]["b"], "tanh")
    return out.astype(jnp.float32)                  # NCHW


if __name__ == "__main__":
    # Spatial 256 is required by the 8 stride-2 downsamples; features kept small.
    in_channels, features = 3, 8
    key = jax.random.PRNGKey(0)
    kp, kx = jax.random.split(key)
    params = init_generator_params(kp, in_channels=in_channels, features=features)
    x = jax.random.normal(kx, (1, in_channels, 256, 256), dtype=jnp.float32)

    fwd = jax.jit(lambda p, a: generator_forward(p, a, in_channels=in_channels,
                                                 features=features))
    y = jax.block_until_ready(fwd(params, x))

    assert y.shape == (1, in_channels, 256, 256), y.shape
    assert bool(jnp.all(jnp.isfinite(y)))
    assert bool(jnp.all(jnp.abs(y) <= 1.0 + 1e-6))      # tanh output range
    print("KERNEL_OK")
</pallas_src>

<mosaic_0001>
module attributes {stable_mosaic.version = 11 : i64} {
  func.func @kernel(%arg0: i32, %arg1: i32, %arg2: i32, %arg3: memref<1x8x48xbf16, #tpu.memory_space<vmem>>, %arg4: memref<1x1x48x2048xbf16, #tpu.memory_space<vmem>>, %arg5: memref<1x8x1xf32, #tpu.memory_space<vmem>>, %arg6: memref<1x1x8x2048xbf16, #tpu.memory_space<vmem>>) attributes {dimension_semantics = [#tpu.dimension_semantics<parallel>, #tpu.dimension_semantics<parallel>, #tpu.dimension_semantics<parallel>], iteration_bounds = array<i64: 1, 1, 8>, scalar_prefetch = 0 : i64, scratch_operands = 0 : i64, tpu.core_type = #tpu.core_type<tc>, window_params = [{transform_indices = @transform_0, window_bounds = array<i64: 1, 8, 48>}, {transform_indices = @transform_1, window_bounds = array<i64: 1, 1, 48, 2048>}, {transform_indices = @transform_2, window_bounds = array<i64: 1, 8, 1>}, {transform_indices = @transform_3, window_bounds = array<i64: 1, 1, 8, 2048>}]} {
    %c0 = arith.constant 0 : index
    %c0_0 = arith.constant 0 : index
    %c0_1 = arith.constant 0 : index
    %0 = vector.load %arg3[%c0, %c0_0, %c0_1] : memref<1x8x48xbf16, #tpu.memory_space<vmem>>, vector<1x8x48xbf16>
    %1 = vector.shape_cast %0 : vector<1x8x48xbf16> to vector<8x48xbf16>
    %c0_2 = arith.constant 0 : index
    %c0_3 = arith.constant 0 : index
    %c0_4 = arith.constant 0 : index
    %c0_5 = arith.constant 0 : index
    %2 = vector.load %arg4[%c0_2, %c0_3, %c0_4, %c0_5] : memref<1x1x48x2048xbf16, #tpu.memory_space<vmem>>, vector<1x1x48x2048xbf16>
    %3 = vector.shape_cast %2 : vector<1x1x48x2048xbf16> to vector<48x2048xbf16>
    %cst = arith.constant dense<0.000000e+00> : vector<8x2048xf32>
    %4 = tpu.matmul %1, %3, %cst {dimension_numbers = #tpu.dot_dimension_numbers<[1], [0], [0], [1], [0, 0, 1, 1], [], []>} : vector<8x48xbf16>, vector<48x2048xbf16>, vector<8x2048xf32> -> vector<8x2048xf32>
    %c0_6 = arith.constant 0 : index
    %c0_7 = arith.constant 0 : index
    %c0_8 = arith.constant 0 : index
    %5 = vector.load %arg5[%c0_6, %c0_7, %c0_8] : memref<1x8x1xf32, #tpu.memory_space<vmem>>, vector<1x8x1xf32>
    %6 = vector.shape_cast %5 : vector<1x8x1xf32> to vector<8x1xf32>
    %7 = vector.broadcast %6 : vector<8x1xf32> to vector<8x2048xf32>
    %8 = arith.addf %4, %7 : vector<8x2048xf32>
    %cst_9 = arith.constant 0.000000e+00 : f32
    %9 = vector.broadcast %cst_9 : f32 to vector<8x2048xf32>
    %10 = arith.cmpf ogt, %8, %9 : vector<8x2048xf32>
    %cst_10 = arith.constant 2.000000e-01 : f32
    %11 = vector.broadcast %cst_10 : f32 to vector<8x2048xf32>
    %12 = arith.mulf %11, %8 : vector<8x2048xf32>
    %13 = arith.select %10, %8, %12 : vector<8x2048xi1>, vector<8x2048xf32>
    %14 = arith.truncf %13 : vector<8x2048xf32> to vector<8x2048xbf16>
    %c0_11 = arith.constant 0 : index
    %c0_12 = arith.constant 0 : index
    %c0_13 = arith.constant 0 : index
    %c0_14 = arith.constant 0 : index
    %15 = vector.load %arg6[%c0_11, %c0_12, %c0_13, %c0_14] : memref<1x1x8x2048xbf16, #tpu.memory_space<vmem>>, vector<1x1x8x2048xbf16>
    %16 = vector.shape_cast %15 : vector<1x1x8x2048xbf16> to vector<8x2048xbf16>
    %17 = vector.shape_cast %14 : vector<8x2048xbf16> to vector<1x1x8x2048xbf16>
    tpu.vector_store %arg6[%c0_11, %c0_12, %c0_13, %c0_14], %17 {strides = array<i32>} : memref<1x1x8x2048xbf16, #tpu.memory_space<vmem>>, vector<1x1x8x2048xbf16>,
    return
  }
  func.func @transform_0(%arg0: i32, %arg1: i32, %arg2: i32) -> (i32, i32, i32) {
    %c0_i32 = arith.constant 0 : i32
    %c0_i32_0 = arith.constant 0 : i32
    %c0_i32_1 = arith.constant 0 : i32
    return %arg1, %c0_i32, %c0_i32_0 : i32, i32, i32
  }
  func.func @transform_1(%arg0: i32, %arg1: i32, %arg2: i32) -> (i32, i32, i32, i32) {
    %c0_i32 = arith.constant 0 : i32
    %c0_i32_0 = arith.constant 0 : i32
    return %arg0, %arg1, %c0_i32, %arg2 : i32, i32, i32, i32
  }
  func.func @transform_2(%arg0: i32, %arg1: i32, %arg2: i32) -> (i32, i32, i32) {
    %c0_i32 = arith.constant 0 : i32
    %c0_i32_0 = arith.constant 0 : i32
    %c0_i32_1 = arith.constant 0 : i32
    return %arg1, %c0_i32, %c0_i32_0 : i32, i32, i32
  }
  func.func @transform_3(%arg0: i32, %arg1: i32, %arg2: i32) -> (i32, i32, i32, i32) {
    %c0_i32 = arith.constant 0 : i32
    %c0_i32_0 = arith.constant 0 : i32
    return %arg0, %arg1, %c0_i32, %arg2 : i32, i32, i32, i32
  }
}

module attributes {stable_mosaic.version = 11 : i64} {
  func.func @kernel(%arg0: i32, %arg1: i32, %arg2: i32, %arg3: memref<1x16x128xbf16, #tpu.memory_space<vmem>>, %arg4: memref<1x1x128x2048xbf16, #tpu.memory_space<vmem>>, %arg5: memref<1x16x1xf32, #tpu.memory_space<vmem>>, %arg6: memref<1x1x16x2048xbf16, #tpu.memory_space<vmem>>) attributes {dimension_semantics = [#tpu.dimension_semantics<parallel>, #tpu.dimension_semantics<parallel>, #tpu.dimension_semantics<parallel>], iteration_bounds = array<i64: 1, 1, 2>, scalar_prefetch = 0 : i64, scratch_operands = 0 : i64, tpu.core_type = #tpu.core_type<tc>, window_params = [{transform_indices = @transform_0, window_bounds = array<i64: 1, 16, 128>}, {transform_indices = @transform_1, window_bounds = array<i64: 1, 1, 128, 2048>}, {transform_indices = @transform_2, window_bounds = array<i64: 1, 16, 1>}, {transform_indices = @transform_3, window_bounds = array<i64: 1, 1, 16, 2048>}]} {
    %c0 = arith.constant 0 : index
    %c0_0 = arith.constant 0 : index
    %c0_1 = arith.constant 0 : index
    %0 = vector.load %arg3[%c0, %c0_0, %c0_1] : memref<1x16x128xbf16, #tpu.memory_space<vmem>>, vector<1x16x128xbf16>
    %1 = vector.shape_cast %0 : vector<1x16x128xbf16> to vector<16x128xbf16>
    %c0_2 = arith.constant 0 : index
    %c0_3 = arith.constant 0 : index
    %c0_4 = arith.constant 0 : index
    %c0_5 = arith.constant 0 : index
    %2 = vector.load %arg4[%c0_2, %c0_3, %c0_4, %c0_5] : memref<1x1x128x2048xbf16, #tpu.memory_space<vmem>>, vector<1x1x128x2048xbf16>
    %3 = vector.shape_cast %2 : vector<1x1x128x2048xbf16> to vector<128x2048xbf16>
    %cst = arith.constant dense<0.000000e+00> : vector<16x2048xf32>
    %4 = tpu.matmul %1, %3, %cst {dimension_numbers = #tpu.dot_dimension_numbers<[1], [0], [0], [1], [0, 0, 1, 1], [], []>} : vector<16x128xbf16>, vector<128x2048xbf16>, vector<16x2048xf32> -> vector<16x2048xf32>
    %c0_6 = arith.constant 0 : index
    %c0_7 = arith.constant 0 : index
    %c0_8 = arith.constant 0 : index
    %5 = vector.load %arg5[%c0_6, %c0_7, %c0_8] : memref<1x16x1xf32, #tpu.memory_space<vmem>>, vector<1x16x1xf32>
    %6 = vector.shape_cast %5 : vector<1x16x1xf32> to vector<16x1xf32>
    %7 = vector.broadcast %6 : vector<16x1xf32> to vector<16x2048xf32>
    %8 = arith.addf %4, %7 : vector<16x2048xf32>
    %cst_9 = arith.constant 0.000000e+00 : f32
    %9 = vector.broadcast %cst_9 : f32 to vector<16x2048xf32>
    %10 = arith.cmpf ogt, %8, %9 : vector<16x2048xf32>
    %cst_10 = arith.constant 2.000000e-01 : f32
    %11 = vector.broadcast %cst_10 : f32 to vector<16x2048xf32>
    %12 = arith.mulf %11, %8 : vector<16x2048xf32>
    %13 = arith.select %10, %8, %12 : vector<16x2048xi1>, vector<16x2048xf32>
    %14 = arith.truncf %13 : vector<16x2048xf32> to vector<16x2048xbf16>
    %c0_11 = arith.constant 0 : index
    %c0_12 = arith.constant 0 : index
    %c0_13 = arith.constant 0 : index
    %c0_14 = arith.constant 0 : index
    %15 = vector.load %arg6[%c0_11, %c0_12, %c0_13, %c0_14] : memref<1x1x16x2048xbf16, #tpu.memory_space<vmem>>, vector<1x1x16x2048xbf16>
    %16 = vector.shape_cast %15 : vector<1x1x16x2048xbf16> to vector<16x2048xbf16>
    %17 = vector.shape_cast %14 : vector<16x2048xbf16> to vector<1x1x16x2048xbf16>
    tpu.vector_store %arg6[%c0_11, %c0_12, %c0_13, %c0_14], %17 {strides = array<i32>} : memref<1x1x16x2048xbf16, #tpu.memory_space<vmem>>, vector<1x1x16x2048xbf16>,
    return
  }
  func.func @transform_0(%arg0: i32, %arg1: i32, %arg2: i32) -> (i32, i32, i32) {
    %c0_i32 = arith.constant 0 : i32
    %c0_i32_0 = arith.constant 0 : i32
    %c0_i32_1 = arith.constant 0 : i32
    return %arg1, %c0_i32, %c0_i32_0 : i32, i32, i32
  }
  func.func @transform_1(%arg0: i32, %arg1: i32, %arg2: i32) -> (i32, i32, i32, i32) {
    %c0_i32 = arith.constant 0 : i32
    %c0_i32_0 = arith.constant 0 : i32
    return %arg0, %arg1, %c0_i32, %arg2 : i32, i32, i32, i32
  }
  func.func @transform_2(%arg0: i32, %arg1: i32, %arg2: i32) -> (i32, i32, i32) {
    %c0_i32 = arith.constant 0 : i32
    %c0_i32_0 = arith.constant 0 : i32
    %c0_i32_1 = arith.constant 0 : i32
    return %arg1, %c0_i32, %c0_i32_0 : i32, i32, i32
  }
  func.func @transform_3(%arg0: i32, %arg1: i32, %arg2: i32) -> (i32, i32, i32, i32) {
    %c0_i32 = arith.constant 0 : i32
    %c0_i32_0 = arith.constant 0 : i32
    return %arg0, %arg1, %c0_i32, %arg2 : i32, i32, i32, i32
  }
}

module attributes {stable_mosaic.version = 11 : i64} {
  func.func @kernel(%arg0: i32, %arg1: i32, %arg2: i32, %arg3: memref<1x32x256xbf16, #tpu.memory_space<vmem>>, %arg4: memref<1x1x256x1024xbf16, #tpu.memory_space<vmem>>, %arg5: memref<1x32x1xf32, #tpu.memory_space<vmem>>, %arg6: memref<1x1x32x1024xbf16, #tpu.memory_space<vmem>>) attributes {dimension_semantics = [#tpu.dimension_semantics<parallel>, #tpu.dimension_semantics<parallel>, #tpu.dimension_semantics<parallel>], iteration_bounds = array<i64: 1, 1, 1>, scalar_prefetch = 0 : i64, scratch_operands = 0 : i64, tpu.core_type = #tpu.core_type<tc>, window_params = [{transform_indices = @transform_0, window_bounds = array<i64: 1, 32, 256>}, {transform_indices = @transform_1, window_bounds = array<i64: 1, 1, 256, 1024>}, {transform_indices = @transform_2, window_bounds = array<i64: 1, 32, 1>}, {transform_indices = @transform_3, window_bounds = array<i64: 1, 1, 32, 1024>}]} {
    %c0 = arith.constant 0 : index
    %c0_0 = arith.constant 0 : index
    %c0_1 = arith.constant 0 : index
    %0 = vector.load %arg3[%c0, %c0_0, %c0_1] : memref<1x32x256xbf16, #tpu.memory_space<vmem>>, vector<1x32x256xbf16>
    %1 = vector.shape_cast %0 : vector<1x32x256xbf16> to vector<32x256xbf16>
    %c0_2 = arith.constant 0 : index
    %c0_3 = arith.constant 0 : index
    %c0_4 = arith.constant 0 : index
    %c0_5 = arith.constant 0 : index
    %2 = vector.load %arg4[%c0_2, %c0_3, %c0_4, %c0_5] : memref<1x1x256x1024xbf16, #tpu.memory_space<vmem>>, vector<1x1x256x1024xbf16>
    %3 = vector.shape_cast %2 : vector<1x1x256x1024xbf16> to vector<256x1024xbf16>
    %cst = arith.constant dense<0.000000e+00> : vector<32x1024xf32>
    %4 = tpu.matmul %1, %3, %cst {dimension_numbers = #tpu.dot_dimension_numbers<[1], [0], [0], [1], [0, 0, 1, 1], [], []>} : vector<32x256xbf16>, vector<256x1024xbf16>, vector<32x1024xf32> -> vector<32x1024xf32>
    %c0_6 = arith.constant 0 : index
    %c0_7 = arith.constant 0 : index
    %c0_8 = arith.constant 0 : index
    %5 = vector.load %arg5[%c0_6, %c0_7, %c0_8] : memref<1x32x1xf32, #tpu.memory_space<vmem>>, vector<1x32x1xf32>
    %6 = vector.shape_cast %5 : vector<1x32x1xf32> to vector<32x1xf32>
    %7 = vector.broadcast %6 : vector<32x1xf32> to vector<32x1024xf32>
    %8 = arith.addf %4, %7 : vector<32x1024xf32>
    %cst_9 = arith.constant 0.000000e+00 : f32
    %9 = vector.broadcast %cst_9 : f32 to vector<32x1024xf32>
    %10 = arith.cmpf ogt, %8, %9 : vector<32x1024xf32>
    %cst_10 = arith.constant 2.000000e-01 : f32
    %11 = vector.broadcast %cst_10 : f32 to vector<32x1024xf32>
    %12 = arith.mulf %11, %8 : vector<32x1024xf32>
    %13 = arith.select %10, %8, %12 : vector<32x1024xi1>, vector<32x1024xf32>
    %14 = arith.truncf %13 : vector<32x1024xf32> to vector<32x1024xbf16>
    %c0_11 = arith.constant 0 : index
    %c0_12 = arith.constant 0 : index
    %c0_13 = arith.constant 0 : index
    %c0_14 = arith.constant 0 : index
    %15 = vector.load %arg6[%c0_11, %c0_12, %c0_13, %c0_14] : memref<1x1x32x1024xbf16, #tpu.memory_space<vmem>>, vector<1x1x32x1024xbf16>
    %16 = vector.shape_cast %15 : vector<1x1x32x1024xbf16> to vector<32x1024xbf16>
    %17 = vector.shape_cast %14 : vector<32x1024xbf16> to vector<1x1x32x1024xbf16>
    tpu.vector_store %arg6[%c0_11, %c0_12, %c0_13, %c0_14], %17 {strides = array<i32>} : memref<1x1x32x1024xbf16, #tpu.memory_space<vmem>>, vector<1x1x32x1024xbf16>,
    return
  }
  func.func @transform_0(%arg0: i32, %arg1: i32, %arg2: i32) -> (i32, i32, i32) {
    %c0_i32 = arith.constant 0 : i32
    %c0_i32_0 = arith.constant 0 : i32
    %c0_i32_1 = arith.constant 0 : i32
    return %arg1, %c0_i32, %c0_i32_0 : i32, i32, i32
  }
  func.func @transform_1(%arg0: i32, %arg1: i32, %arg2: i32) -> (i32, i32, i32, i32) {
    %c0_i32 = arith.constant 0 : i32
    %c0_i32_0 = arith.constant 0 : i32
    return %arg0, %arg1, %c0_i32, %arg2 : i32, i32, i32, i32
  }
  func.func @transform_2(%arg0: i32, %arg1: i32, %arg2: i32) -> (i32, i32, i32) {
    %c0_i32 = arith.constant 0 : i32
    %c0_i32_0 = arith.constant 0 : i32
    %c0_i32_1 = arith.constant 0 : i32
    return %arg1, %c0_i32, %c0_i32_0 : i32, i32, i32
  }
  func.func @transform_3(%arg0: i32, %arg1: i32, %arg2: i32) -> (i32, i32, i32, i32) {
    %c0_i32 = arith.constant 0 : i32
    %c0_i32_0 = arith.constant 0 : i32
    return %arg0, %arg1, %c0_i32, %arg2 : i32, i32, i32, i32
  }
}

module attributes {stable_mosaic.version = 11 : i64} {
  func.func @kernel(%arg0: i32, %arg1: i32, %arg2: i32, %arg3: memref<1x64x512xbf16, #tpu.memory_space<vmem>>, %arg4: memref<1x1x512x256xbf16, #tpu.memory_space<vmem>>, %arg5: memref<1x64x1xf32, #tpu.memory_space<vmem>>, %arg6: memref<1x1x64x256xbf16, #tpu.memory_space<vmem>>) attributes {dimension_semantics = [#tpu.dimension_semantics<parallel>, #tpu.dimension_semantics<parallel>, #tpu.dimension_semantics<parallel>], iteration_bounds = array<i64: 1, 1, 1>, scalar_prefetch = 0 : i64, scratch_operands = 0 : i64, tpu.core_type = #tpu.core_type<tc>, window_params = [{transform_indices = @transform_0, window_bounds = array<i64: 1, 64, 512>}, {transform_indices = @transform_1, window_bounds = array<i64: 1, 1, 512, 256>}, {transform_indices = @transform_2, window_bounds = array<i64: 1, 64, 1>}, {transform_indices = @transform_3, window_bounds = array<i64: 1, 1, 64, 256>}]} {
    %c0 = arith.constant 0 : index
    %c0_0 = arith.constant 0 : index
    %c0_1 = arith.constant 0 : index
    %0 = vector.load %arg3[%c0, %c0_0, %c0_1] : memref<1x64x512xbf16, #tpu.memory_space<vmem>>, vector<1x64x512xbf16>
    %1 = vector.shape_cast %0 : vector<1x64x512xbf16> to vector<64x512xbf16>
    %c0_2 = arith.constant 0 : index
    %c0_3 = arith.constant 0 : index
    %c0_4 = arith.constant 0 : index
    %c0_5 = arith.constant 0 : index
    %2 = vector.load %arg4[%c0_2, %c0_3, %c0_4, %c0_5] : memref<1x1x512x256xbf16, #tpu.memory_space<vmem>>, vector<1x1x512x256xbf16>
    %3 = vector.shape_cast %2 : vector<1x1x512x256xbf16> to vector<512x256xbf16>
    %cst = arith.constant dense<0.000000e+00> : vector<64x256xf32>
    %4 = tpu.matmul %1, %3, %cst {dimension_numbers = #tpu.dot_dimension_numbers<[1], [0], [0], [1], [0, 0, 1, 1], [], []>} : vector<64x512xbf16>, vector<512x256xbf16>, vector<64x256xf32> -> vector<64x256xf32>
    %c0_6 = arith.constant 0 : index
    %c0_7 = arith.constant 0 : index
    %c0_8 = arith.constant 0 : index
    %5 = vector.load %arg5[%c0_6, %c0_7, %c0_8] : memref<1x64x1xf32, #tpu.memory_space<vmem>>, vector<1x64x1xf32>
    %6 = vector.shape_cast %5 : vector<1x64x1xf32> to vector<64x1xf32>
    %7 = vector.broadcast %6 : vector<64x1xf32> to vector<64x256xf32>
    %8 = arith.addf %4, %7 : vector<64x256xf32>
    %cst_9 = arith.constant 0.000000e+00 : f32
    %9 = vector.broadcast %cst_9 : f32 to vector<64x256xf32>
    %10 = arith.cmpf ogt, %8, %9 : vector<64x256xf32>
    %cst_10 = arith.constant 2.000000e-01 : f32
    %11 = vector.broadcast %cst_10 : f32 to vector<64x256xf32>
    %12 = arith.mulf %11, %8 : vector<64x256xf32>
    %13 = arith.select %10, %8, %12 : vector<64x256xi1>, vector<64x256xf32>
    %14 = arith.truncf %13 : vector<64x256xf32> to vector<64x256xbf16>
    %c0_11 = arith.constant 0 : index
    %c0_12 = arith.constant 0 : index
    %c0_13 = arith.constant 0 : index
    %c0_14 = arith.constant 0 : index
    %15 = vector.load %arg6[%c0_11, %c0_12, %c0_13, %c0_14] : memref<1x1x64x256xbf16, #tpu.memory_space<vmem>>, vector<1x1x64x256xbf16>
    %16 = vector.shape_cast %15 : vector<1x1x64x256xbf16> to vector<64x256xbf16>
    %17 = vector.shape_cast %14 : vector<64x256xbf16> to vector<1x1x64x256xbf16>
    tpu.vector_store %arg6[%c0_11, %c0_12, %c0_13, %c0_14], %17 {strides = array<i32>} : memref<1x1x64x256xbf16, #tpu.memory_space<vmem>>, vector<1x1x64x256xbf16>,
    return
  }
  func.func @transform_0(%arg0: i32, %arg1: i32, %arg2: i32) -> (i32, i32, i32) {
    %c0_i32 = arith.constant 0 : i32
    %c0_i32_0 = arith.constant 0 : i32
    %c0_i32_1 = arith.constant 0 : i32
    return %arg1, %c0_i32, %c0_i32_0 : i32, i32, i32
  }
  func.func @transform_1(%arg0: i32, %arg1: i32, %arg2: i32) -> (i32, i32, i32, i32) {
    %c0_i32 = arith.constant 0 : i32
    %c0_i32_0 = arith.constant 0 : i32
    return %arg0, %arg1, %c0_i32, %arg2 : i32, i32, i32, i32
  }
  func.func @transform_2(%arg0: i32, %arg1: i32, %arg2: i32) -> (i32, i32, i32) {
    %c0_i32 = arith.constant 0 : i32
    %c0_i32_0 = arith.constant 0 : i32
    %c0_i32_1 = arith.constant 0 : i32
    return %arg1, %c0_i32, %c0_i32_0 : i32, i32, i32
  }
  func.func @transform_3(%arg0: i32, %arg1: i32, %arg2: i32) -> (i32, i32, i32, i32) {
    %c0_i32 = arith.constant 0 : i32
    %c0_i32_0 = arith.constant 0 : i32
    return %arg0, %arg1, %c0_i32, %arg2 : i32, i32, i32, i32
  }
}

module attributes {stable_mosaic.version = 11 : i64} {
  func.func @kernel(%arg0: i32, %arg1: i32, %arg2: i32, %arg3: memref<1x64x1024xbf16, #tpu.memory_space<vmem>>, %arg4: memref<1x1x1024x128xbf16, #tpu.memory_space<vmem>>, %arg5: memref<1x64x1xf32, #tpu.memory_space<vmem>>, %arg6: memref<1x1x64x128xbf16, #tpu.memory_space<vmem>>) attributes {dimension_semantics = [#tpu.dimension_semantics<parallel>, #tpu.dimension_semantics<parallel>, #tpu.dimension_semantics<parallel>], iteration_bounds = array<i64: 1, 1, 1>, scalar_prefetch = 0 : i64, scratch_operands = 0 : i64, tpu.core_type = #tpu.core_type<tc>, window_params = [{transform_indices = @transform_0, window_bounds = array<i64: 1, 64, 1024>}, {transform_indices = @transform_1, window_bounds = array<i64: 1, 1, 1024, 128>}, {transform_indices = @transform_2, window_bounds = array<i64: 1, 64, 1>}, {transform_indices = @transform_3, window_bounds = array<i64: 1, 1, 64, 128>}]} {
    %c0 = arith.constant 0 : index
    %c0_0 = arith.constant 0 : index
    %c0_1 = arith.constant 0 : index
    %0 = vector.load %arg3[%c0, %c0_0, %c0_1] : memref<1x64x1024xbf16, #tpu.memory_space<vmem>>, vector<1x64x1024xbf16>
    %1 = vector.shape_cast %0 : vector<1x64x1024xbf16> to vector<64x1024xbf16>
    %c0_2 = arith.constant 0 : index
    %c0_3 = arith.constant 0 : index
    %c0_4 = arith.constant 0 : index
    %c0_5 = arith.constant 0 : index
    %2 = vector.load %arg4[%c0_2, %c0_3, %c0_4, %c0_5] : memref<1x1x1024x128xbf16, #tpu.memory_space<vmem>>, vector<1x1x1024x128xbf16>
    %3 = vector.shape_cast %2 : vector<1x1x1024x128xbf16> to vector<1024x128xbf16>
    %cst = arith.constant dense<0.000000e+00> : vector<64x128xf32>
    %4 = tpu.matmul %1, %3, %cst {dimension_numbers = #tpu.dot_dimension_numbers<[1], [0], [0], [1], [0, 0, 1, 1], [], []>} : vector<64x1024xbf16>, vector<1024x128xbf16>, vector<64x128xf32> -> vector<64x128xf32>
    %c0_6 = arith.constant 0 : index
    %c0_7 = arith.constant 0 : index
    %c0_8 = arith.constant 0 : index
    %5 = vector.load %arg5[%c0_6, %c0_7, %c0_8] : memref<1x64x1xf32, #tpu.memory_space<vmem>>, vector<1x64x1xf32>
    %6 = vector.shape_cast %5 : vector<1x64x1xf32> to vector<64x1xf32>
    %7 = vector.broadcast %6 : vector<64x1xf32> to vector<64x128xf32>
    %8 = arith.addf %4, %7 : vector<64x128xf32>
    %cst_9 = arith.constant 0.000000e+00 : f32
    %9 = vector.broadcast %cst_9 : f32 to vector<64x128xf32>
    %10 = arith.cmpf ogt, %8, %9 : vector<64x128xf32>
    %cst_10 = arith.constant 2.000000e-01 : f32
    %11 = vector.broadcast %cst_10 : f32 to vector<64x128xf32>
    %12 = arith.mulf %11, %8 : vector<64x128xf32>
    %13 = arith.select %10, %8, %12 : vector<64x128xi1>, vector<64x128xf32>
    %14 = arith.truncf %13 : vector<64x128xf32> to vector<64x128xbf16>
    %c0_11 = arith.constant 0 : index
    %c0_12 = arith.constant 0 : index
    %c0_13 = arith.constant 0 : index
    %c0_14 = arith.constant 0 : index
    %15 = vector.load %arg6[%c0_11, %c0_12, %c0_13, %c0_14] : memref<1x1x64x128xbf16, #tpu.memory_space<vmem>>, vector<1x1x64x128xbf16>
    %16 = vector.shape_cast %15 : vector<1x1x64x128xbf16> to vector<64x128xbf16>
    %17 = vector.shape_cast %14 : vector<64x128xbf16> to vector<1x1x64x128xbf16>
    tpu.vector_store %arg6[%c0_11, %c0_12, %c0_13, %c0_14], %17 {strides = array<i32>} : memref<1x1x64x128xbf16, #tpu.memory_space<vmem>>, vector<1x1x64x128xbf16>,
    return
  }
  func.func @transform_0(%arg0: i32, %arg1: i32, %arg2: i32) -> (i32, i32, i32) {
    %c0_i32 = arith.constant 0 : i32
    %c0_i32_0 = arith.constant 0 : i32
    %c0_i32_1 = arith.constant 0 : i32
    return %arg1, %c0_i32, %c0_i32_0 : i32, i32, i32
  }
  func.func @transform_1(%arg0: i32, %arg1: i32, %arg2: i32) -> (i32, i32, i32, i32) {
    %c0_i32 = arith.constant 0 : i32
    %c0_i32_0 = arith.constant 0 : i32
    return %arg0, %arg1, %c0_i32, %arg2 : i32, i32, i32, i32
  }
  func.func @transform_2(%arg0: i32, %arg1: i32, %arg2: i32) -> (i32, i32, i32) {
    %c0_i32 = arith.constant 0 : i32
    %c0_i32_0 = arith.constant 0 : i32
    %c0_i32_1 = arith.constant 0 : i32
    return %arg1, %c0_i32, %c0_i32_0 : i32, i32, i32
  }
  func.func @transform_3(%arg0: i32, %arg1: i32, %arg2: i32) -> (i32, i32, i32, i32) {
    %c0_i32 = arith.constant 0 : i32
    %c0_i32_0 = arith.constant 0 : i32
    return %arg0, %arg1, %c0_i32, %arg2 : i32, i32, i32, i32
  }
}

module attributes {stable_mosaic.version = 11 : i64} {
  func.func @kernel(%arg0: i32, %arg1: i32, %arg2: i32, %arg3: memref<1x64x1024xbf16, #tpu.memory_space<vmem>>, %arg4: memref<1x1x1024x128xbf16, #tpu.memory_space<vmem>>, %arg5: memref<1x64x1xf32, #tpu.memory_space<vmem>>, %arg6: memref<1x1x64x128xbf16, #tpu.memory_space<vmem>>) attributes {dimension_semantics = [#tpu.dimension_semantics<parallel>, #tpu.dimension_semantics<parallel>, #tpu.dimension_semantics<parallel>], iteration_bounds = array<i64: 1, 1, 1>, scalar_prefetch = 0 : i64, scratch_operands = 0 : i64, tpu.core_type = #tpu.core_type<tc>, window_params = [{transform_indices = @transform_0, window_bounds = array<i64: 1, 64, 1024>}, {transform_indices = @transform_1, window_bounds = array<i64: 1, 1, 1024, 128>}, {transform_indices = @transform_2, window_bounds = array<i64: 1, 64, 1>}, {transform_indices = @transform_3, window_bounds = array<i64: 1, 1, 64, 128>}]} {
    %c0 = arith.constant 0 : index
    %c0_0 = arith.constant 0 : index
    %c0_1 = arith.constant 0 : index
    %0 = vector.load %arg3[%c0, %c0_0, %c0_1] : memref<1x64x1024xbf16, #tpu.memory_space<vmem>>, vector<1x64x1024xbf16>
    %1 = vector.shape_cast %0 : vector<1x64x1024xbf16> to vector<64x1024xbf16>
    %c0_2 = arith.constant 0 : index
    %c0_3 = arith.constant 0 : index
    %c0_4 = arith.constant 0 : index
    %c0_5 = arith.constant 0 : index
    %2 = vector.load %arg4[%c0_2, %c0_3, %c0_4, %c0_5] : memref<1x1x1024x128xbf16, #tpu.memory_space<vmem>>, vector<1x1x1024x128xbf16>
    %3 = vector.shape_cast %2 : vector<1x1x1024x128xbf16> to vector<1024x128xbf16>
    %cst = arith.constant dense<0.000000e+00> : vector<64x128xf32>
    %4 = tpu.matmul %1, %3, %cst {dimension_numbers = #tpu.dot_dimension_numbers<[1], [0], [0], [1], [0, 0, 1, 1], [], []>} : vector<64x1024xbf16>, vector<1024x128xbf16>, vector<64x128xf32> -> vector<64x128xf32>
    %c0_6 = arith.constant 0 : index
    %c0_7 = arith.constant 0 : index
    %c0_8 = arith.constant 0 : index
    %5 = vector.load %arg5[%c0_6, %c0_7, %c0_8] : memref<1x64x1xf32, #tpu.memory_space<vmem>>, vector<1x64x1xf32>
    %6 = vector.shape_cast %5 : vector<1x64x1xf32> to vector<64x1xf32>
    %7 = vector.broadcast %6 : vector<64x1xf32> to vector<64x128xf32>
    %8 = arith.addf %4, %7 : vector<64x128xf32>
    %cst_9 = arith.constant 0.000000e+00 : f32
    %9 = vector.broadcast %cst_9 : f32 to vector<64x128xf32>
    %10 = arith.maximumf %8, %9 : vector<64x128xf32>
    %11 = arith.truncf %10 : vector<64x128xf32> to vector<64x128xbf16>
    %c0_10 = arith.constant 0 : index
    %c0_11 = arith.constant 0 : index
    %c0_12 = arith.constant 0 : index
    %c0_13 = arith.constant 0 : index
    %12 = vector.load %arg6[%c0_10, %c0_11, %c0_12, %c0_13] : memref<1x1x64x128xbf16, #tpu.memory_space<vmem>>, vector<1x1x64x128xbf16>
    %13 = vector.shape_cast %12 : vector<1x1x64x128xbf16> to vector<64x128xbf16>
    %14 = vector.shape_cast %11 : vector<64x128xbf16> to vector<1x1x64x128xbf16>
    tpu.vector_store %arg6[%c0_10, %c0_11, %c0_12, %c0_13], %14 {strides = array<i32>} : memref<1x1x64x128xbf16, #tpu.memory_space<vmem>>, vector<1x1x64x128xbf16>,
    return
  }
  func.func @transform_0(%arg0: i32, %arg1: i32, %arg2: i32) -> (i32, i32, i32) {
    %c0_i32 = arith.constant 0 : i32
    %c0_i32_0 = arith.constant 0 : i32
    %c0_i32_1 = arith.constant 0 : i32
    return %arg1, %c0_i32, %c0_i32_0 : i32, i32, i32
  }
  func.func @transform_1(%arg0: i32, %arg1: i32, %arg2: i32) -> (i32, i32, i32, i32) {
    %c0_i32 = arith.constant 0 : i32
    %c0_i32_0 = arith.constant 0 : i32
    return %arg0, %arg1, %c0_i32, %arg2 : i32, i32, i32, i32
  }
  func.func @transform_2(%arg0: i32, %arg1: i32, %arg2: i32) -> (i32, i32, i32) {
    %c0_i32 = arith.constant 0 : i32
    %c0_i32_0 = arith.constant 0 : i32
    %c0_i32_1 = arith.constant 0 : i32
    return %arg1, %c0_i32, %c0_i32_0 : i32, i32, i32
  }
  func.func @transform_3(%arg0: i32, %arg1: i32, %arg2: i32) -> (i32, i32, i32, i32) {
    %c0_i32 = arith.constant 0 : i32
    %c0_i32_0 = arith.constant 0 : i32
    return %arg0, %arg1, %c0_i32, %arg2 : i32, i32, i32, i32
  }
}

module attributes {stable_mosaic.version = 11 : i64} {
  func.func @kernel(%arg0: i32, %arg1: i32, %arg2: i32, %arg3: memref<1x64x256xbf16, #tpu.memory_space<vmem>>, %arg4: memref<1x1x256x128xbf16, #tpu.memory_space<vmem>>, %arg5: memref<1x64x1xf32, #tpu.memory_space<vmem>>, %arg6: memref<1x1x64x128xbf16, #tpu.memory_space<vmem>>) attributes {dimension_semantics = [#tpu.dimension_semantics<parallel>, #tpu.dimension_semantics<parallel>, #tpu.dimension_semantics<parallel>], iteration_bounds = array<i64: 1, 4, 1>, scalar_prefetch = 0 : i64, scratch_operands = 0 : i64, tpu.core_type = #tpu.core_type<tc>, window_params = [{transform_indices = @transform_0, window_bounds = array<i64: 1, 64, 256>}, {transform_indices = @transform_1, window_bounds = array<i64: 1, 1, 256, 128>}, {transform_indices = @transform_2, window_bounds = array<i64: 1, 64, 1>}, {transform_indices = @transform_3, window_bounds = array<i64: 1, 1, 64, 128>}]} {
    %c0 = arith.constant 0 : index
    %c0_0 = arith.constant 0 : index
    %c0_1 = arith.constant 0 : index
    %0 = vector.load %arg3[%c0, %c0_0, %c0_1] : memref<1x64x256xbf16, #tpu.memory_space<vmem>>, vector<1x64x256xbf16>
    %1 = vector.shape_cast %0 : vector<1x64x256xbf16> to vector<64x256xbf16>
    %c0_2 = arith.constant 0 : index
    %c0_3 = arith.constant 0 : index
    %c0_4 = arith.constant 0 : index
    %c0_5 = arith.constant 0 : index
    %2 = vector.load %arg4[%c0_2, %c0_3, %c0_4, %c0_5] : memref<1x1x256x128xbf16, #tpu.memory_space<vmem>>, vector<1x1x256x128xbf16>
    %3 = vector.shape_cast %2 : vector<1x1x256x128xbf16> to vector<256x128xbf16>
    %cst = arith.constant dense<0.000000e+00> : vector<64x128xf32>
    %4 = tpu.matmul %1, %3, %cst {dimension_numbers = #tpu.dot_dimension_numbers<[1], [0], [0], [1], [0, 0, 1, 1], [], []>} : vector<64x256xbf16>, vector<256x128xbf16>, vector<64x128xf32> -> vector<64x128xf32>
    %c0_6 = arith.constant 0 : index
    %c0_7 = arith.constant 0 : index
    %c0_8 = arith.constant 0 : index
    %5 = vector.load %arg5[%c0_6, %c0_7, %c0_8] : memref<1x64x1xf32, #tpu.memory_space<vmem>>, vector<1x64x1xf32>
    %6 = vector.shape_cast %5 : vector<1x64x1xf32> to vector<64x1xf32>
    %7 = vector.broadcast %6 : vector<64x1xf32> to vector<64x128xf32>
    %8 = arith.addf %4, %7 : vector<64x128xf32>
    %cst_9 = arith.constant 0.000000e+00 : f32
    %9 = vector.broadcast %cst_9 : f32 to vector<64x128xf32>
    %10 = arith.maximumf %8, %9 : vector<64x128xf32>
    %11 = arith.truncf %10 : vector<64x128xf32> to vector<64x128xbf16>
    %c0_10 = arith.constant 0 : index
    %c0_11 = arith.constant 0 : index
    %c0_12 = arith.constant 0 : index
    %c0_13 = arith.constant 0 : index
    %12 = vector.load %arg6[%c0_10, %c0_11, %c0_12, %c0_13] : memref<1x1x64x128xbf16, #tpu.memory_space<vmem>>, vector<1x1x64x128xbf16>
    %13 = vector.shape_cast %12 : vector<1x1x64x128xbf16> to vector<64x128xbf16>
    %14 = vector.shape_cast %11 : vector<64x128xbf16> to vector<1x1x64x128xbf16>
    tpu.vector_store %arg6[%c0_10, %c0_11, %c0_12, %c0_13], %14 {strides = array<i32>} : memref<1x1x64x128xbf16, #tpu.memory_space<vmem>>, vector<1x1x64x128xbf16>,
    return
  }
  func.func @transform_0(%arg0: i32, %arg1: i32, %arg2: i32) -> (i32, i32, i32) {
    %c0_i32 = arith.constant 0 : i32
    %c0_i32_0 = arith.constant 0 : i32
    %c0_i32_1 = arith.constant 0 : i32
    return %arg1, %c0_i32, %c0_i32_0 : i32, i32, i32
  }
  func.func @transform_1(%arg0: i32, %arg1: i32, %arg2: i32) -> (i32, i32, i32, i32) {
    %c0_i32 = arith.constant 0 : i32
    %c0_i32_0 = arith.constant 0 : i32
    return %arg0, %arg1, %c0_i32, %arg2 : i32, i32, i32, i32
  }
  func.func @transform_2(%arg0: i32, %arg1: i32, %arg2: i32) -> (i32, i32, i32) {
    %c0_i32 = arith.constant 0 : i32
    %c0_i32_0 = arith.constant 0 : i32
    %c0_i32_1 = arith.constant 0 : i32
    return %arg1, %c0_i32, %c0_i32_0 : i32, i32, i32
  }
  func.func @transform_3(%arg0: i32, %arg1: i32, %arg2: i32) -> (i32, i32, i32, i32) {
    %c0_i32 = arith.constant 0 : i32
    %c0_i32_0 = arith.constant 0 : i32
    return %arg0, %arg1, %c0_i32, %arg2 : i32, i32, i32, i32
  }
}

module attributes {stable_mosaic.version = 11 : i64} {
  func.func @kernel(%arg0: i32, %arg1: i32, %arg2: i32, %arg3: memref<1x64x512xbf16, #tpu.memory_space<vmem>>, %arg4: memref<1x1x512x128xbf16, #tpu.memory_space<vmem>>, %arg5: memref<1x64x1xf32, #tpu.memory_space<vmem>>, %arg6: memref<1x1x64x128xbf16, #tpu.memory_space<vmem>>) attributes {dimension_semantics = [#tpu.dimension_semantics<parallel>, #tpu.dimension_semantics<parallel>, #tpu.dimension_semantics<parallel>], iteration_bounds = array<i64: 1, 4, 1>, scalar_prefetch = 0 : i64, scratch_operands = 0 : i64, tpu.core_type = #tpu.core_type<tc>, window_params = [{transform_indices = @transform_0, window_bounds = array<i64: 1, 64, 512>}, {transform_indices = @transform_1, window_bounds = array<i64: 1, 1, 512, 128>}, {transform_indices = @transform_2, window_bounds = array<i64: 1, 64, 1>}, {transform_indices = @transform_3, window_bounds = array<i64: 1, 1, 64, 128>}]} {
    %c0 = arith.constant 0 : index
    %c0_0 = arith.constant 0 : index
    %c0_1 = arith.constant 0 : index
    %0 = vector.load %arg3[%c0, %c0_0, %c0_1] : memref<1x64x512xbf16, #tpu.memory_space<vmem>>, vector<1x64x512xbf16>
    %1 = vector.shape_cast %0 : vector<1x64x512xbf16> to vector<64x512xbf16>
    %c0_2 = arith.constant 0 : index
    %c0_3 = arith.constant 0 : index
    %c0_4 = arith.constant 0 : index
    %c0_5 = arith.constant 0 : index
    %2 = vector.load %arg4[%c0_2, %c0_3, %c0_4, %c0_5] : memref<1x1x512x128xbf16, #tpu.memory_space<vmem>>, vector<1x1x512x128xbf16>
    %3 = vector.shape_cast %2 : vector<1x1x512x128xbf16> to vector<512x128xbf16>
    %cst = arith.constant dense<0.000000e+00> : vector<64x128xf32>
    %4 = tpu.matmul %1, %3, %cst {dimension_numbers = #tpu.dot_dimension_numbers<[1], [0], [0], [1], [0, 0, 1, 1], [], []>} : vector<64x512xbf16>, vector<512x128xbf16>, vector<64x128xf32> -> vector<64x128xf32>
    %c0_6 = arith.constant 0 : index
    %c0_7 = arith.constant 0 : index
    %c0_8 = arith.constant 0 : index
    %5 = vector.load %arg5[%c0_6, %c0_7, %c0_8] : memref<1x64x1xf32, #tpu.memory_space<vmem>>, vector<1x64x1xf32>
    %6 = vector.shape_cast %5 : vector<1x64x1xf32> to vector<64x1xf32>
    %7 = vector.broadcast %6 : vector<64x1xf32> to vector<64x128xf32>
    %8 = arith.addf %4, %7 : vector<64x128xf32>
    %cst_9 = arith.constant 0.000000e+00 : f32
    %9 = vector.broadcast %cst_9 : f32 to vector<64x128xf32>
    %10 = arith.maximumf %8, %9 : vector<64x128xf32>
    %11 = arith.truncf %10 : vector<64x128xf32> to vector<64x128xbf16>
    %c0_10 = arith.constant 0 : index
    %c0_11 = arith.constant 0 : index
    %c0_12 = arith.constant 0 : index
    %c0_13 = arith.constant 0 : index
    %12 = vector.load %arg6[%c0_10, %c0_11, %c0_12, %c0_13] : memref<1x1x64x128xbf16, #tpu.memory_space<vmem>>, vector<1x1x64x128xbf16>
    %13 = vector.shape_cast %12 : vector<1x1x64x128xbf16> to vector<64x128xbf16>
    %14 = vector.shape_cast %11 : vector<64x128xbf16> to vector<1x1x64x128xbf16>
    tpu.vector_store %arg6[%c0_10, %c0_11, %c0_12, %c0_13], %14 {strides = array<i32>} : memref<1x1x64x128xbf16, #tpu.memory_space<vmem>>, vector<1x1x64x128xbf16>,
    return
  }
  func.func @transform_0(%arg0: i32, %arg1: i32, %arg2: i32) -> (i32, i32, i32) {
    %c0_i32 = arith.constant 0 : i32
    %c0_i32_0 = arith.constant 0 : i32
    %c0_i32_1 = arith.constant 0 : i32
    return %arg1, %c0_i32, %c0_i32_0 : i32, i32, i32
  }
  func.func @transform_1(%arg0: i32, %arg1: i32, %arg2: i32) -> (i32, i32, i32, i32) {
    %c0_i32 = arith.constant 0 : i32
    %c0_i32_0 = arith.constant 0 : i32
    return %arg0, %arg1, %c0_i32, %arg2 : i32, i32, i32, i32
  }
  func.func @transform_2(%arg0: i32, %arg1: i32, %arg2: i32) -> (i32, i32, i32) {
    %c0_i32 = arith.constant 0 : i32
    %c0_i32_0 = arith.constant 0 : i32
    %c0_i32_1 = arith.constant 0 : i32
    return %arg1, %c0_i32, %c0_i32_0 : i32, i32, i32
  }
  func.func @transform_3(%arg0: i32, %arg1: i32, %arg2: i32) -> (i32, i32, i32, i32) {
    %c0_i32 = arith.constant 0 : i32
    %c0_i32_0 = arith.constant 0 : i32
    return %arg0, %arg1, %c0_i32, %arg2 : i32, i32, i32, i32
  }
}

module attributes {stable_mosaic.version = 11 : i64} {
  func.func @kernel(%arg0: i32, %arg1: i32, %arg2: i32, %arg3: memref<1x32x512xbf16, #tpu.memory_space<vmem>>, %arg4: memref<1x1x512x256xbf16, #tpu.memory_space<vmem>>, %arg5: memref<1x32x1xf32, #tpu.memory_space<vmem>>, %arg6: memref<1x1x32x256xbf16, #tpu.memory_space<vmem>>) attributes {dimension_semantics = [#tpu.dimension_semantics<parallel>, #tpu.dimension_semantics<parallel>, #tpu.dimension_semantics<parallel>], iteration_bounds = array<i64: 1, 4, 1>, scalar_prefetch = 0 : i64, scratch_operands = 0 : i64, tpu.core_type = #tpu.core_type<tc>, window_params = [{transform_indices = @transform_0, window_bounds = array<i64: 1, 32, 512>}, {transform_indices = @transform_1, window_bounds = array<i64: 1, 1, 512, 256>}, {transform_indices = @transform_2, window_bounds = array<i64: 1, 32, 1>}, {transform_indices = @transform_3, window_bounds = array<i64: 1, 1, 32, 256>}]} {
    %c0 = arith.constant 0 : index
    %c0_0 = arith.constant 0 : index
    %c0_1 = arith.constant 0 : index
    %0 = vector.load %arg3[%c0, %c0_0, %c0_1] : memref<1x32x512xbf16, #tpu.memory_space<vmem>>, vector<1x32x512xbf16>
    %1 = vector.shape_cast %0 : vector<1x32x512xbf16> to vector<32x512xbf16>
    %c0_2 = arith.constant 0 : index
    %c0_3 = arith.constant 0 : index
    %c0_4 = arith.constant 0 : index
    %c0_5 = arith.constant 0 : index
    %2 = vector.load %arg4[%c0_2, %c0_3, %c0_4, %c0_5] : memref<1x1x512x256xbf16, #tpu.memory_space<vmem>>, vector<1x1x512x256xbf16>
    %3 = vector.shape_cast %2 : vector<1x1x512x256xbf16> to vector<512x256xbf16>
    %cst = arith.constant dense<0.000000e+00> : vector<32x256xf32>
    %4 = tpu.matmul %1, %3, %cst {dimension_numbers = #tpu.dot_dimension_numbers<[1], [0], [0], [1], [0, 0, 1, 1], [], []>} : vector<32x512xbf16>, vector<512x256xbf16>, vector<32x256xf32> -> vector<32x256xf32>
    %c0_6 = arith.constant 0 : index
    %c0_7 = arith.constant 0 : index
    %c0_8 = arith.constant 0 : index
    %5 = vector.load %arg5[%c0_6, %c0_7, %c0_8] : memref<1x32x1xf32, #tpu.memory_space<vmem>>, vector<1x32x1xf32>
    %6 = vector.shape_cast %5 : vector<1x32x1xf32> to vector<32x1xf32>
    %7 = vector.broadcast %6 : vector<32x1xf32> to vector<32x256xf32>
    %8 = arith.addf %4, %7 : vector<32x256xf32>
    %cst_9 = arith.constant 0.000000e+00 : f32
    %9 = vector.broadcast %cst_9 : f32 to vector<32x256xf32>
    %10 = arith.maximumf %8, %9 : vector<32x256xf32>
    %11 = arith.truncf %10 : vector<32x256xf32> to vector<32x256xbf16>
    %c0_10 = arith.constant 0 : index
    %c0_11 = arith.constant 0 : index
    %c0_12 = arith.constant 0 : index
    %c0_13 = arith.constant 0 : index
    %12 = vector.load %arg6[%c0_10, %c0_11, %c0_12, %c0_13] : memref<1x1x32x256xbf16, #tpu.memory_space<vmem>>, vector<1x1x32x256xbf16>
    %13 = vector.shape_cast %12 : vector<1x1x32x256xbf16> to vector<32x256xbf16>
    %14 = vector.shape_cast %11 : vector<32x256xbf16> to vector<1x1x32x256xbf16>
    tpu.vector_store %arg6[%c0_10, %c0_11, %c0_12, %c0_13], %14 {strides = array<i32>} : memref<1x1x32x256xbf16, #tpu.memory_space<vmem>>, vector<1x1x32x256xbf16>,
    return
  }
  func.func @transform_0(%arg0: i32, %arg1: i32, %arg2: i32) -> (i32, i32, i32) {
    %c0_i32 = arith.constant 0 : i32
    %c0_i32_0 = arith.constant 0 : i32
    %c0_i32_1 = arith.constant 0 : i32
    return %arg1, %c0_i32, %c0_i32_0 : i32, i32, i32
  }
  func.func @transform_1(%arg0: i32, %arg1: i32, %arg2: i32) -> (i32, i32, i32, i32) {
    %c0_i32 = arith.constant 0 : i32
    %c0_i32_0 = arith.constant 0 : i32
    return %arg0, %arg1, %c0_i32, %arg2 : i32, i32, i32, i32
  }
  func.func @transform_2(%arg0: i32, %arg1: i32, %arg2: i32) -> (i32, i32, i32) {
    %c0_i32 = arith.constant 0 : i32
    %c0_i32_0 = arith.constant 0 : i32
    %c0_i32_1 = arith.constant 0 : i32
    return %arg1, %c0_i32, %c0_i32_0 : i32, i32, i32
  }
  func.func @transform_3(%arg0: i32, %arg1: i32, %arg2: i32) -> (i32, i32, i32, i32) {
    %c0_i32 = arith.constant 0 : i32
    %c0_i32_0 = arith.constant 0 : i32
    return %arg0, %arg1, %c0_i32, %arg2 : i32, i32, i32, i32
  }
}

module attributes {stable_mosaic.version = 11 : i64} {
  func.func @kernel(%arg0: i32, %arg1: i32, %arg2: i32, %arg3: memref<1x16x256xbf16, #tpu.memory_space<vmem>>, %arg4: memref<1x1x256x1024xbf16, #tpu.memory_space<vmem>>, %arg5: memref<1x16x1xf32, #tpu.memory_space<vmem>>, %arg6: memref<1x1x16x1024xbf16, #tpu.memory_space<vmem>>) attributes {dimension_semantics = [#tpu.dimension_semantics<parallel>, #tpu.dimension_semantics<parallel>, #tpu.dimension_semantics<parallel>], iteration_bounds = array<i64: 1, 4, 1>, scalar_prefetch = 0 : i64, scratch_operands = 0 : i64, tpu.core_type = #tpu.core_type<tc>, window_params = [{transform_indices = @transform_0, window_bounds = array<i64: 1, 16, 256>}, {transform_indices = @transform_1, window_bounds = array<i64: 1, 1, 256, 1024>}, {transform_indices = @transform_2, window_bounds = array<i64: 1, 16, 1>}, {transform_indices = @transform_3, window_bounds = array<i64: 1, 1, 16, 1024>}]} {
    %c0 = arith.constant 0 : index
    %c0_0 = arith.constant 0 : index
    %c0_1 = arith.constant 0 : index
    %0 = vector.load %arg3[%c0, %c0_0, %c0_1] : memref<1x16x256xbf16, #tpu.memory_space<vmem>>, vector<1x16x256xbf16>
    %1 = vector.shape_cast %0 : vector<1x16x256xbf16> to vector<16x256xbf16>
    %c0_2 = arith.constant 0 : index
    %c0_3 = arith.constant 0 : index
    %c0_4 = arith.constant 0 : index
    %c0_5 = arith.constant 0 : index
    %2 = vector.load %arg4[%c0_2, %c0_3, %c0_4, %c0_5] : memref<1x1x256x1024xbf16, #tpu.memory_space<vmem>>, vector<1x1x256x1024xbf16>
    %3 = vector.shape_cast %2 : vector<1x1x256x1024xbf16> to vector<256x1024xbf16>
    %cst = arith.constant dense<0.000000e+00> : vector<16x1024xf32>
    %4 = tpu.matmul %1, %3, %cst {dimension_numbers = #tpu.dot_dimension_numbers<[1], [0], [0], [1], [0, 0, 1, 1], [], []>} : vector<16x256xbf16>, vector<256x1024xbf16>, vector<16x1024xf32> -> vector<16x1024xf32>
    %c0_6 = arith.constant 0 : index
    %c0_7 = arith.constant 0 : index
    %c0_8 = arith.constant 0 : index
    %5 = vector.load %arg5[%c0_6, %c0_7, %c0_8] : memref<1x16x1xf32, #tpu.memory_space<vmem>>, vector<1x16x1xf32>
    %6 = vector.shape_cast %5 : vector<1x16x1xf32> to vector<16x1xf32>
    %7 = vector.broadcast %6 : vector<16x1xf32> to vector<16x1024xf32>
    %8 = arith.addf %4, %7 : vector<16x1024xf32>
    %cst_9 = arith.constant 0.000000e+00 : f32
    %9 = vector.broadcast %cst_9 : f32 to vector<16x1024xf32>
    %10 = arith.maximumf %8, %9 : vector<16x1024xf32>
    %11 = arith.truncf %10 : vector<16x1024xf32> to vector<16x1024xbf16>
    %c0_10 = arith.constant 0 : index
    %c0_11 = arith.constant 0 : index
    %c0_12 = arith.constant 0 : index
    %c0_13 = arith.constant 0 : index
    %12 = vector.load %arg6[%c0_10, %c0_11, %c0_12, %c0_13] : memref<1x1x16x1024xbf16, #tpu.memory_space<vmem>>, vector<1x1x16x1024xbf16>
    %13 = vector.shape_cast %12 : vector<1x1x16x1024xbf16> to vector<16x1024xbf16>
    %14 = vector.shape_cast %11 : vector<16x1024xbf16> to vector<1x1x16x1024xbf16>
    tpu.vector_store %arg6[%c0_10, %c0_11, %c0_12, %c0_13], %14 {strides = array<i32>} : memref<1x1x16x1024xbf16, #tpu.memory_space<vmem>>, vector<1x1x16x1024xbf16>,
    return
  }
  func.func @transform_0(%arg0: i32, %arg1: i32, %arg2: i32) -> (i32, i32, i32) {
    %c0_i32 = arith.constant 0 : i32
    %c0_i32_0 = arith.constant 0 : i32
    %c0_i32_1 = arith.constant 0 : i32
    return %arg1, %c0_i32, %c0_i32_0 : i32, i32, i32
  }
  func.func @transform_1(%arg0: i32, %arg1: i32, %arg2: i32) -> (i32, i32, i32, i32) {
    %c0_i32 = arith.constant 0 : i32
    %c0_i32_0 = arith.constant 0 : i32
    return %arg0, %arg1, %c0_i32, %arg2 : i32, i32, i32, i32
  }
  func.func @transform_2(%arg0: i32, %arg1: i32, %arg2: i32) -> (i32, i32, i32) {
    %c0_i32 = arith.constant 0 : i32
    %c0_i32_0 = arith.constant 0 : i32
    %c0_i32_1 = arith.constant 0 : i32
    return %arg1, %c0_i32, %c0_i32_0 : i32, i32, i32
  }
  func.func @transform_3(%arg0: i32, %arg1: i32, %arg2: i32) -> (i32, i32, i32, i32) {
    %c0_i32 = arith.constant 0 : i32
    %c0_i32_0 = arith.constant 0 : i32
    return %arg0, %arg1, %c0_i32, %arg2 : i32, i32, i32, i32
  }
}

module attributes {stable_mosaic.version = 11 : i64} {
  func.func @kernel(%arg0: i32, %arg1: i32, %arg2: i32, %arg3: memref<1x8x128xbf16, #tpu.memory_space<vmem>>, %arg4: memref<1x1x128x2048xbf16, #tpu.memory_space<vmem>>, %arg5: memref<1x8x1xf32, #tpu.memory_space<vmem>>, %arg6: memref<1x1x8x2048xbf16, #tpu.memory_space<vmem>>) attributes {dimension_semantics = [#tpu.dimension_semantics<parallel>, #tpu.dimension_semantics<parallel>, #tpu.dimension_semantics<parallel>], iteration_bounds = array<i64: 1, 4, 2>, scalar_prefetch = 0 : i64, scratch_operands = 0 : i64, tpu.core_type = #tpu.core_type<tc>, window_params = [{transform_indices = @transform_0, window_bounds = array<i64: 1, 8, 128>}, {transform_indices = @transform_1, window_bounds = array<i64: 1, 1, 128, 2048>}, {transform_indices = @transform_2, window_bounds = array<i64: 1, 8, 1>}, {transform_indices = @transform_3, window_bounds = array<i64: 1, 1, 8, 2048>}]} {
    %c0 = arith.constant 0 : index
    %c0_0 = arith.constant 0 : index
    %c0_1 = arith.constant 0 : index
    %0 = vector.load %arg3[%c0, %c0_0, %c0_1] : memref<1x8x128xbf16, #tpu.memory_space<vmem>>, vector<1x8x128xbf16>
    %1 = vector.shape_cast %0 : vector<1x8x128xbf16> to vector<8x128xbf16>
    %c0_2 = arith.constant 0 : index
    %c0_3 = arith.constant 0 : index
    %c0_4 = arith.constant 0 : index
    %c0_5 = arith.constant 0 : index
    %2 = vector.load %arg4[%c0_2, %c0_3, %c0_4, %c0_5] : memref<1x1x128x2048xbf16, #tpu.memory_space<vmem>>, vector<1x1x128x2048xbf16>
    %3 = vector.shape_cast %2 : vector<1x1x128x2048xbf16> to vector<128x2048xbf16>
    %cst = arith.constant dense<0.000000e+00> : vector<8x2048xf32>
    %4 = tpu.matmul %1, %3, %cst {dimension_numbers = #tpu.dot_dimension_numbers<[1], [0], [0], [1], [0, 0, 1, 1], [], []>} : vector<8x128xbf16>, vector<128x2048xbf16>, vector<8x2048xf32> -> vector<8x2048xf32>
    %c0_6 = arith.constant 0 : index
    %c0_7 = arith.constant 0 : index
    %c0_8 = arith.constant 0 : index
    %5 = vector.load %arg5[%c0_6, %c0_7, %c0_8] : memref<1x8x1xf32, #tpu.memory_space<vmem>>, vector<1x8x1xf32>
    %6 = vector.shape_cast %5 : vector<1x8x1xf32> to vector<8x1xf32>
    %7 = vector.broadcast %6 : vector<8x1xf32> to vector<8x2048xf32>
    %8 = arith.addf %4, %7 : vector<8x2048xf32>
    %cst_9 = arith.constant 0.000000e+00 : f32
    %9 = vector.broadcast %cst_9 : f32 to vector<8x2048xf32>
    %10 = arith.maximumf %8, %9 : vector<8x2048xf32>
    %11 = arith.truncf %10 : vector<8x2048xf32> to vector<8x2048xbf16>
    %c0_10 = arith.constant 0 : index
    %c0_11 = arith.constant 0 : index
    %c0_12 = arith.constant 0 : index
    %c0_13 = arith.constant 0 : index
    %12 = vector.load %arg6[%c0_10, %c0_11, %c0_12, %c0_13] : memref<1x1x8x2048xbf16, #tpu.memory_space<vmem>>, vector<1x1x8x2048xbf16>
    %13 = vector.shape_cast %12 : vector<1x1x8x2048xbf16> to vector<8x2048xbf16>
    %14 = vector.shape_cast %11 : vector<8x2048xbf16> to vector<1x1x8x2048xbf16>
    tpu.vector_store %arg6[%c0_10, %c0_11, %c0_12, %c0_13], %14 {strides = array<i32>} : memref<1x1x8x2048xbf16, #tpu.memory_space<vmem>>, vector<1x1x8x2048xbf16>,
    return
  }
  func.func @transform_0(%arg0: i32, %arg1: i32, %arg2: i32) -> (i32, i32, i32) {
    %c0_i32 = arith.constant 0 : i32
    %c0_i32_0 = arith.constant 0 : i32
    %c0_i32_1 = arith.constant 0 : i32
    return %arg1, %c0_i32, %c0_i32_0 : i32, i32, i32
  }
  func.func @transform_1(%arg0: i32, %arg1: i32, %arg2: i32) -> (i32, i32, i32, i32) {
    %c0_i32 = arith.constant 0 : i32
    %c0_i32_0 = arith.constant 0 : i32
    return %arg0, %arg1, %c0_i32, %arg2 : i32, i32, i32, i32
  }
  func.func @transform_2(%arg0: i32, %arg1: i32, %arg2: i32) -> (i32, i32, i32) {
    %c0_i32 = arith.constant 0 : i32
    %c0_i32_0 = arith.constant 0 : i32
    %c0_i32_1 = arith.constant 0 : i32
    return %arg1, %c0_i32, %c0_i32_0 : i32, i32, i32
  }
  func.func @transform_3(%arg0: i32, %arg1: i32, %arg2: i32) -> (i32, i32, i32, i32) {
    %c0_i32 = arith.constant 0 : i32
    %c0_i32_0 = arith.constant 0 : i32
    return %arg0, %arg1, %c0_i32, %arg2 : i32, i32, i32, i32
  }
}

module attributes {stable_mosaic.version = 11 : i64} {
  func.func @kernel(%arg0: i32, %arg1: i32, %arg2: i32, %arg3: memref<1x3x64xbf16, #tpu.memory_space<vmem>>, %arg4: memref<1x1x64x2048xbf16, #tpu.memory_space<vmem>>, %arg5: memref<1x3x1xf32, #tpu.memory_space<vmem>>, %arg6: memref<1x1x3x2048xbf16, #tpu.memory_space<vmem>>) attributes {dimension_semantics = [#tpu.dimension_semantics<parallel>, #tpu.dimension_semantics<parallel>, #tpu.dimension_semantics<parallel>], iteration_bounds = array<i64: 1, 4, 8>, scalar_prefetch = 0 : i64, scratch_operands = 0 : i64, tpu.core_type = #tpu.core_type<tc>, window_params = [{transform_indices = @transform_0, window_bounds = array<i64: 1, 3, 64>}, {transform_indices = @transform_1, window_bounds = array<i64: 1, 1, 64, 2048>}, {transform_indices = @transform_2, window_bounds = array<i64: 1, 3, 1>}, {transform_indices = @transform_3, window_bounds = array<i64: 1, 1, 3, 2048>}]} {
    %c0 = arith.constant 0 : index
    %c0_0 = arith.constant 0 : index
    %c0_1 = arith.constant 0 : index
    %0 = vector.load %arg3[%c0, %c0_0, %c0_1] : memref<1x3x64xbf16, #tpu.memory_space<vmem>>, vector<1x3x64xbf16>
    %1 = vector.shape_cast %0 : vector<1x3x64xbf16> to vector<3x64xbf16>
    %c0_2 = arith.constant 0 : index
    %c0_3 = arith.constant 0 : index
    %c0_4 = arith.constant 0 : index
    %c0_5 = arith.constant 0 : index
    %2 = vector.load %arg4[%c0_2, %c0_3, %c0_4, %c0_5] : memref<1x1x64x2048xbf16, #tpu.memory_space<vmem>>, vector<1x1x64x2048xbf16>
    %3 = vector.shape_cast %2 : vector<1x1x64x2048xbf16> to vector<64x2048xbf16>
    %cst = arith.constant dense<0.000000e+00> : vector<3x2048xf32>
    %4 = tpu.matmul %1, %3, %cst {dimension_numbers = #tpu.dot_dimension_numbers<[1], [0], [0], [1], [0, 0, 1, 1], [], []>} : vector<3x64xbf16>, vector<64x2048xbf16>, vector<3x2048xf32> -> vector<3x2048xf32>
    %c0_6 = arith.constant 0 : index
    %c0_7 = arith.constant 0 : index
    %c0_8 = arith.constant 0 : index
    %5 = vector.load %arg5[%c0_6, %c0_7, %c0_8] : memref<1x3x1xf32, #tpu.memory_space<vmem>>, vector<1x3x1xf32>
    %6 = vector.shape_cast %5 : vector<1x3x1xf32> to vector<3x1xf32>
    %7 = vector.broadcast %6 : vector<3x1xf32> to vector<3x2048xf32>
    %8 = arith.addf %4, %7 : vector<3x2048xf32>
    %9 = math.tanh %8 : vector<3x2048xf32>
    %10 = arith.truncf %9 : vector<3x2048xf32> to vector<3x2048xbf16>
    %c0_9 = arith.constant 0 : index
    %c0_10 = arith.constant 0 : index
    %c0_11 = arith.constant 0 : index
    %c0_12 = arith.constant 0 : index
    %11 = vector.load %arg6[%c0_9, %c0_10, %c0_11, %c0_12] : memref<1x1x3x2048xbf16, #tpu.memory_space<vmem>>, vector<1x1x3x2048xbf16>
    %12 = vector.shape_cast %11 : vector<1x1x3x2048xbf16> to vector<3x2048xbf16>
    %13 = vector.shape_cast %10 : vector<3x2048xbf16> to vector<1x1x3x2048xbf16>
    tpu.vector_store %arg6[%c0_9, %c0_10, %c0_11, %c0_12], %13 {strides = array<i32>} : memref<1x1x3x2048xbf16, #tpu.memory_space<vmem>>, vector<1x1x3x2048xbf16>,
    return
  }
  func.func @transform_0(%arg0: i32, %arg1: i32, %arg2: i32) -> (i32, i32, i32) {
    %c0_i32 = arith.constant 0 : i32
    %c0_i32_0 = arith.constant 0 : i32
    %c0_i32_1 = arith.constant 0 : i32
    return %arg1, %c0_i32, %c0_i32_0 : i32, i32, i32
  }
  func.func @transform_1(%arg0: i32, %arg1: i32, %arg2: i32) -> (i32, i32, i32, i32) {
    %c0_i32 = arith.constant 0 : i32
    %c0_i32_0 = arith.constant 0 : i32
    return %arg0, %arg1, %c0_i32, %arg2 : i32, i32, i32, i32
  }
  func.func @transform_2(%arg0: i32, %arg1: i32, %arg2: i32) -> (i32, i32, i32) {
    %c0_i32 = arith.constant 0 : i32
    %c0_i32_0 = arith.constant 0 : i32
    %c0_i32_1 = arith.constant 0 : i32
    return %arg1, %c0_i32, %c0_i32_0 : i32, i32, i32
  }
  func.func @transform_3(%arg0: i32, %arg1: i32, %arg2: i32) -> (i32, i32, i32, i32) {
    %c0_i32 = arith.constant 0 : i32
    %c0_i32_0 = arith.constant 0 : i32
    return %arg0, %arg1, %c0_i32, %arg2 : i32, i32, i32, i32
  }
}

</mosaic_0001>

<bundles_post_ra>
// kernel: _lambda_.16
= control target key start
LH: loop header
LB: loop body
LE: loop exit
PB: predicated region body
PF: predicated region fallthrough
CT: control target
= control target key end

     0   :  { %s1448_s12 = smov 0   ;;  %s1450_s13 = smov 0   ;;  %s1724_s0 = inlined_call_operand.vmem [shape: bf16[1,8,48], index: 0, kind: input, shape index: {}]   ;;  %s1725_s1 = inlined_call_operand.vmem [shape: bf16[1,1,48,16384], index: 1, kind: input, shape index: {}]   ;;  %s1726_s2 = inlined_call_operand.vmem [shape: f32[1,8,1], index: 2, kind: input, shape index: {}]   ;;  %s1727_s3 = inlined_call_operand.vmem [shape: bf16[1,1,8,16384], index: 3, kind: output, shape index: {}]  }
   0x1   :  { %s1452_s14 = smov 0   ;;  %s1454_s15 = smov 0  }
   0x2   :  { %s1456_s16 = smov 0  }
   0x3 LB: > { %s25_s17 = sadd.s32 1, %s1421_s15  ;;  %p76_p1 = scmp.ne.s32.totalorder %s1413_s13, %s1409_s12  ;;  %s1425_s16 = sphi %s1456_s16, %s13_s16   ;;  %s1421_s15 = sphi %s1454_s15, %s1731_s15   ;;  %s1417_s14 = sphi %s1452_s14, %s1730_s14   ;;  %s1413_s13 = sphi %s1450_s13, %s1729_s13   ;;  %s1409_s12 = sphi %s1448_s12, %s1728_s12  }
   0x4   : > { %p26_p0 = scmp.ge.s32.totalorder %s25_s17, 8  ;;  %p77_p2 = scmp.eq.s32.totalorder %s1425_s16, 0 }
   0x5   : > { %s69_s19 = sadd.s32 1, %s1413_s13  ;;  %p1262_p5 = scmp.ge.s32.totalorder %s1425_s16, 8 }
   0x6   : > { %s1733_s17 = smov (%p26_p0, %s25_s17), 0  ;;  %p78_p3 = por %p77_p2, %p76_p1 }
   0x7   : > { %s65_s18 = ssub.s32 %s1421_s15, %s1733_s17  ;;  %172 = sbr.rel (%p1262_p5) target bundleno = 41 (0x29), region = 24 }
   0x8   : > { %p67_p4 = scmp.eq.s32.totalorder %s65_s18, 0 }
   0xa   : > { %s1483_s20 = scalar_select %p67_p4, %s1413_s13, %s69_s19  }
   0xc   : > { %175 = sbr.rel (!%p78_p3) target bundleno = 41 (0x29), region = 28  ;;  %s177_s21 = sand.u32 (%p78_p3), 1, %s1413_s13  }
   0xd   : > { %s1334_s22 = sshll.u32 (%p78_p3), %s1421_s15, 6  ;;  %s1343_s23 = smul.u32 (%p78_p3), 384, %s177_s21 }
   0xe   : > { %s1491_s26 = scalar_lea.vmem (%p78_p3), %s1725_s1, %s1334_s22 }
   0xf   : > { %v199_v0 = vld [vmem:[%s1491_s26] sm:$0xff] (%p78_p3)  ;;  %v201_v1 = vld [vmem:[%s1491_s26 + $0x8] sm:$0xff] (%p78_p3)  ;;  %v203_v2 = vld [vmem:[%s1491_s26 + $0x10] sm:$0xff] (%p78_p3)  ;;  %s1499_s27 = scalar_lea.vmem (%p78_p3), [#allocation2], %s1343_s23 }
  0x10   : > { %v205_v3 = vld [vmem:[%s1491_s26 + $0x18] sm:$0xff] (%p78_p3)  ;;  %v207_v4 = vld [vmem:[%s1491_s26 + $0x20] sm:$0xff] (%p78_p3)  ;;  %v209_v5 = vld [vmem:[%s1491_s26 + $0x28] sm:$0xff] (%p78_p3)  ;;  %200 = vst [vmem:[%s1499_s27] sm:$0xff] (%p78_p3), %v199_v0 }
  0x11   : > { %202 = vst [vmem:[%s1499_s27 + $0x8] sm:$0xff] %v201_v1  ;;  %204 = vst [vmem:[%s1499_s27 + $0x10] sm:$0xff] %v203_v2  ;;  %v211_v6 = vld [vmem:[%s1491_s26 + $0x30] sm:$0xff]  ;;  %v213_v7 = vld [vmem:[%s1491_s26 + $0x38] sm:$0xff] }
  0x12   : > { %206 = vst [vmem:[%s1499_s27 + $0x18] sm:$0xff] %v205_v3  ;;  %208 = vst [vmem:[%s1499_s27 + $0x20] sm:$0xff] %v207_v4  ;;  %v215_v8 = vld [vmem:[%s1491_s26 + $0x200] sm:$0xff]  ;;  %v217_v9 = vld [vmem:[%s1491_s26 + $0x208] sm:$0xff] }
  0x13   : > { %210 = vst [vmem:[%s1499_s27 + $0x28] sm:$0xff] %v209_v5  ;;  %212 = vst [vmem:[%s1499_s27 + $0x30] sm:$0xff] %v211_v6  ;;  %v219_v10 = vld [vmem:[%s1491_s26 + $0x210] sm:$0xff]  ;;  %v221_v11 = vld [vmem:[%s1491_s26 + $0x218] sm:$0xff] }
  0x14   : > { %214 = vst [vmem:[%s1499_s27 + $0x38] sm:$0xff] %v213_v7  ;;  %216 = vst [vmem:[%s1499_s27 + $0x40] sm:$0xff] %v215_v8  ;;  %v223_v12 = vld [vmem:[%s1491_s26 + $0x220] sm:$0xff]  ;;  %v225_v13 = vld [vmem:[%s1491_s26 + $0x228] sm:$0xff] }
  0x15   : > { %218 = vst [vmem:[%s1499_s27 + $0x48] sm:$0xff] %v217_v9  ;;  %220 = vst [vmem:[%s1499_s27 + $0x50] sm:$0xff] %v219_v10  ;;  %v227_v14 = vld [vmem:[%s1491_s26 + $0x230] sm:$0xff]  ;;  %v229_v15 = vld [vmem:[%s1491_s26 + $0x238] sm:$0xff] }
  0x16   : > { %222 = vst [vmem:[%s1499_s27 + $0x58] sm:$0xff] %v221_v11  ;;  %224 = vst [vmem:[%s1499_s27 + $0x60] sm:$0xff] %v223_v12  ;;  %v231_v16 = vld [vmem:[%s1491_s26 + $0x400] sm:$0xff]  ;;  %v233_v17 = vld [vmem:[%s1491_s26 + $0x408] sm:$0xff] }
  0x17   : > { %226 = vst [vmem:[%s1499_s27 + $0x68] sm:$0xff] %v225_v13  ;;  %228 = vst [vmem:[%s1499_s27 + $0x70] sm:$0xff] %v227_v14  ;;  %v235_v18 = vld [vmem:[%s1491_s26 + $0x410] sm:$0xff]  ;;  %v237_v19 = vld [vmem:[%s1491_s26 + $0x418] sm:$0xff] }
  0x18   : > { %230 = vst [vmem:[%s1499_s27 + $0x78] sm:$0xff] %v229_v15  ;;  %232 = vst [vmem:[%s1499_s27 + $0x80] sm:$0xff] %v231_v16  ;;  %v239_v20 = vld [vmem:[%s1491_s26 + $0x420] sm:$0xff]  ;;  %v241_v21 = vld [vmem:[%s1491_s26 + $0x428] sm:$0xff] }
  0x19   : > { %234 = vst [vmem:[%s1499_s27 + $0x88] sm:$0xff] %v233_v17  ;;  %236 = vst [vmem:[%s1499_s27 + $0x90] sm:$0xff] %v235_v18  ;;  %v243_v22 = vld [vmem:[%s1491_s26 + $0x430] sm:$0xff]  ;;  %v245_v23 = vld [vmem:[%s1491_s26 + $0x438] sm:$0xff] }
  0x1a   : > { %238 = vst [vmem:[%s1499_s27 + $0x98] sm:$0xff] %v237_v19  ;;  %240 = vst [vmem:[%s1499_s27 + $0xa0] sm:$0xff] %v239_v20  ;;  %v247_v24 = vld [vmem:[%s1491_s26 + $0x600] sm:$0xff]  ;;  %v249_v25 = vld [vmem:[%s1491_s26 + $0x608] sm:$0xff] }
  0x1b   : > { %242 = vst [vmem:[%s1499_s27 + $0xa8] sm:$0xff] %v241_v21  ;;  %244 = vst [vmem:[%s1499_s27 + $0xb0] sm:$0xff] %v243_v22  ;;  %v251_v26 = vld [vmem:[%s1491_s26 + $0x610] sm:$0xff]  ;;  %v253_v27 = vld [vmem:[%s1491_s26 + $0x618] sm:$0xff] }
  0x1c   : > { %246 = vst [vmem:[%s1499_s27 + $0xb8] sm:$0xff] %v245_v23  ;;  %248 = vst [vmem:[%s1499_s27 + $0xc0] sm:$0xff] %v247_v24  ;;  %v255_v28 = vld [vmem:[%s1491_s26 + $0x620] sm:$0xff]  ;;  %v257_v29 = vld [vmem:[%s1491_s26 + $0x628] sm:$0xff] }
  0x1d   : > { %250 = vst [vmem:[%s1499_s27 + $0xc8] sm:$0xff] %v249_v25  ;;  %252 = vst [vmem:[%s1499_s27 + $0xd0] sm:$0xff] %v251_v26  ;;  %v259_v30 = vld [vmem:[%s1491_s26 + $0x630] sm:$0xff]  ;;  %v261_v31 = vld [vmem:[%s1491_s26 + $0x638] sm:$0xff] }
  0x1e   : > { %254 = vst [vmem:[%s1499_s27 + $0xd8] sm:$0xff] %v253_v27  ;;  %256 = vst [vmem:[%s1499_s27 + $0xe0] sm:$0xff] %v255_v28  ;;  %v263_v32 = vld [vmem:[%s1491_s26 + $0x800] sm:$0xff]  ;;  %v265_v33 = vld [vmem:[%s1491_s26 + $0x808] sm:$0xff] }
  0x1f   : > { %258 = vst [vmem:[%s1499_s27 + $0xe8] sm:$0xff] %v257_v29  ;;  %260 = vst [vmem:[%s1499_s27 + $0xf0] sm:$0xff] %v259_v30  ;;  %v267_v34 = vld [vmem:[%s1491_s26 + $0x810] sm:$0xff]  ;;  %v269_v35 = vld [vmem:[%s1491_s26 + $0x818] sm:$0xff] }
  0x20   : > { %262 = vst [vmem:[%s1499_s27 + $0xf8] sm:$0xff] %v261_v31  ;;  %264 = vst [vmem:[%s1499_s27 + $0x100] sm:$0xff] %v263_v32  ;;  %v271_v36 = vld [vmem:[%s1491_s26 + $0x820] sm:$0xff]  ;;  %v273_v37 = vld [vmem:[%s1491_s26 + $0x828] sm:$0xff] }
  0x21   : > { %266 = vst [vmem:[%s1499_s27 + $0x108] sm:$0xff] %v265_v33  ;;  %268 = vst [vmem:[%s1499_s27 + $0x110] sm:$0xff] %v267_v34  ;;  %v275_v38 = vld [vmem:[%s1491_s26 + $0x830] sm:$0xff]  ;;  %v277_v39 = vld [vmem:[%s1491_s26 + $0x838] sm:$0xff] }
  0x22   : > { %270 = vst [vmem:[%s1499_s27 + $0x118] sm:$0xff] %v269_v35  ;;  %272 = vst [vmem:[%s1499_s27 + $0x120] sm:$0xff] %v271_v36  ;;  %v279_v40 = vld [vmem:[%s1491_s26 + $0xa00] sm:$0xff]  ;;  %v281_v41 = vld [vmem:[%s1491_s26 + $0xa08] sm:$0xff] }
  0x23   : > { %274 = vst [vmem:[%s1499_s27 + $0x128] sm:$0xff] %v273_v37  ;;  %276 = vst [vmem:[%s1499_s27 + $0x130] sm:$0xff] %v275_v38  ;;  %v283_v42 = vld [vmem:[%s1491_s26 + $0xa10] sm:$0xff]  ;;  %v285_v43 = vld [vmem:[%s1491_s26 + $0xa18] sm:$0xff] }
  0x24   : > { %278 = vst [vmem:[%s1499_s27 + $0x138] sm:$0xff] %v277_v39  ;;  %280 = vst [vmem:[%s1499_s27 + $0x140] sm:$0xff] %v279_v40  ;;  %v287_v44 = vld [vmem:[%s1491_s26 + $0xa20] sm:$0xff]  ;;  %v289_v45 = vld [vmem:[%s1491_s26 + $0xa28] sm:$0xff] }
  0x25   : > { %282 = vst [vmem:[%s1499_s27 + $0x148] sm:$0xff] %v281_v41  ;;  %284 = vst [vmem:[%s1499_s27 + $0x150] sm:$0xff] %v283_v42  ;;  %v291_v46 = vld [vmem:[%s1491_s26 + $0xa30] sm:$0xff]  ;;  %v293_v47 = vld [vmem:[%s1491_s26 + $0xa38] sm:$0xff] }
  0x26   : > { %286 = vst [vmem:[%s1499_s27 + $0x158] sm:$0xff] %v285_v43  ;;  %288 = vst [vmem:[%s1499_s27 + $0x160] sm:$0xff] %v287_v44 }
  0x27   : > { %290 = vst [vmem:[%s1499_s27 + $0x168] sm:$0xff] %v289_v45  ;;  %292 = vst [vmem:[%s1499_s27 + $0x170] sm:$0xff] %v291_v46 }
  0x28   : > { %294 = vst [vmem:[%s1499_s27 + $0x178] sm:$0xff] %v293_v47 }
  0x29 PF: > { %p1265_p6 = scmp.ge.s32.totalorder %s1425_s16, 1  ;;  %p299_p7 = scmp.lt.s32.totalorder %s1425_s16, 9 }
  0x2b   : > { %p300_p8 = pnand %p1265_p6, %p299_p7 }
  0x2c   : > { %s306_s28 = sand.u32 (!%p300_p8), 1, %s1409_s12   ;;  %s1266_s8 = sshll.u32 (!%p300_p8), %s1417_s14, 4 }
  0x2d   : > { %303 = sbr.rel (%p300_p8) target bundleno = 306 (0x132), region = 51  ;;  %p359_p9 = scmp.lt.s32.totalorder (!%p300_p8), %s1266_s8, 127 }
  0x2e   : > { %s1344_s4 = smul.u32 (!%p300_p8), 384, %s306_s28 }
  0x30   : > { %s1600_s5 = scalar_lea.vmem (!%p300_p8), [#allocation2], %s1344_s4 }
  0x32   : > { %v418_v48 = vld [vmem:[%s1726_s2] sm:$0xff]  ;;  %v1427_v49 = vmov 0   ;;  %v403_v52 = vld [vmem:[%s1600_s5 + $0x108] sm:$0xff]  ;;  %v404_v8 = vld [vmem:[%s1600_s5 + $0x110] sm:$0xff]  ;;  %vm664_vm0 = vcmask 392192   ;;  %s1735_s8 = smov (!%p359_p9, %s1266_s8), 127 }
  0x33   : > { %700 = vmatprep.mubr.bf16.mxu0 %v1427_v49  ;;  %741 = vmatprep.mubr.bf16.mxu1 %v1427_v49  ;;  %v402_v50 = vld [vmem:[%s1600_s5 + $0x100] sm:$0xff]  ;;  %v411_v54 = vld [vmem:[%s1600_s5 + $0x148] sm:$0xff]  ;;  %v412_v9 = vld [vmem:[%s1600_s5 + $0x150] sm:$0xff]  ;;  %s1267_s9 = sshll.u32 %s1735_s8, 2 }
  0x34   : > { %1386 = vset.pattern.permute.xlu0 %v1427_v49  ;;  %v410_v51 = vld [vmem:[%s1600_s5 + $0x140] sm:$0xff]  ;;  %v1303_v58 = vcombine.high %v403_v52, %v411_v54  ;;  %v1302_v59 = vcombine.low %v403_v52, %v411_v54  ;;  %v387_v61 = vld [vmem:[%s1600_s5 + $0x88] sm:$0xff]  ;;  %v405_v10 = vld [vmem:[%s1600_s5 + $0x118] sm:$0xff]  ;;  %v1305_v14 = vcombine.high %v404_v8, %v412_v9  ;;  %v1304_v21 = vcombine.low %v404_v8, %v412_v9  ;;  %s1687_s12 = scalar_lea.vmem %s1727_s3, %s1267_s9 }
  0x35   : > { %421 = vperm.xlu0 %1386, %v418_v48   ;;  %v1301_v53 = vcombine.high %v402_v50, %v410_v51  ;;  %v1300_v55 = vcombine.low %v402_v50, %v410_v51  ;;  %v386_v56 = vld [vmem:[%s1600_s5 + $0x80] sm:$0xff]  ;;  %v395_v62 = vld [vmem:[%s1600_s5 + $0xc8] sm:$0xff]  ;;  %v413_v11 = vld [vmem:[%s1600_s5 + $0x158] sm:$0xff] }
  0x36   : > { %v394_v57 = vld [vmem:[%s1600_s5 + $0xc0] sm:$0xff]  ;;  %v1287_v0 = vcombine.high %v387_v61, %v395_v62  ;;  %v371_v2 = vld [vmem:[%s1600_s5 + $0x8] sm:$0xff]  ;;  %719 = vmatprep.subr.bf16.mxu1 %v1303_v58  ;;  %v1286_v5 = vcombine.low %v387_v61, %v395_v62  ;;  %v1307_v15 = vcombine.high %v405_v10, %v413_v11  ;;  %v388_v16 = vld [vmem:[%s1600_s5 + $0x90] sm:$0xff]  ;;  %v1306_v22 = vcombine.low %v405_v10, %v413_v11 }
  0x37   : > { %v1285_v60 = vcombine.high %v386_v56, %v394_v57  ;;  %v370_v63 = vld [vmem:[%s1600_s5] sm:$0xff]  ;;  %678 = vmatprep.subr.bf16.mxu0 %v1301_v53  ;;  %v379_v3 = vld [vmem:[%s1600_s5 + $0x48] sm:$0xff]  ;;  %v1284_v4 = vcombine.low %v386_v56, %v394_v57  ;;  %720 = vmatpush1.bf16.msra.mxu1 %v1302_v59  ;;  %v396_v17 = vld [vmem:[%s1600_s5 + $0xd0] sm:$0xff] }
  0x38   : > { %v378_v1 = vld [vmem:[%s1600_s5 + $0x40] sm:$0xff]  ;;  %679 = vmatpush1.bf16.msra.mxu0 %v1300_v55  ;;  %721 = vmatprep.subr.bf16.mxu1 %v1287_v0  ;;  %v1271_v7 = vcombine.high %v371_v2, %v379_v3  ;;  %v1270_v13 = vcombine.low %v371_v2, %v379_v3  ;;  %v389_v18 = vld [vmem:[%s1600_s5 + $0x98] sm:$0xff]  ;;  %v1289_v23 = vcombine.high %v388_v16, %v396_v17  ;;  %v372_v25 = vld [vmem:[%s1600_s5 + $0x10] sm:$0xff] }
  0x39   : > { %680 = vmatprep.subr.bf16.mxu0 %v1285_v60  ;;  %v1269_v6 = vcombine.high %v370_v63, %v378_v1  ;;  %v1268_v12 = vcombine.low %v370_v63, %v378_v1  ;;  %v397_v19 = vld [vmem:[%s1600_s5 + $0xd8] sm:$0xff]  ;;  %v1625_v20 = vld [vmem:[%s1724_s0] sm:$0xf]  ;;  %v380_v26 = vld [vmem:[%s1600_s5 + $0x50] sm:$0xff]  ;;  %v1288_v29 = vcombine.low %v388_v16, %v396_v17 }
  0x3a   : > { %v1291_v24 = vcombine.high %v389_v18, %v397_v19  ;;  %v373_v27 = vld [vmem:[%s1600_s5 + $0x18] sm:$0xff]  ;;  %v1290_v30 = vcombine.low %v389_v18, %v397_v19  ;;  %v1273_v31 = vcombine.high %v372_v25, %v380_v26  ;;  %v406_v33 = vld [vmem:[%s1600_s5 + $0x120] sm:$0xff]  ;;  %v407_v35 = vld [vmem:[%s1600_s5 + $0x128] sm:$0xff]  ;;  %v1272_v37 = vcombine.low %v372_v25, %v380_v26 }
  0x3b   : > { %722 = vmatpush1.bf16.msra.mxu1 %v1286_v5  ;;  %v381_v28 = vld [vmem:[%s1600_s5 + $0x58] sm:$0xff]  ;;  %v414_v34 = vld [vmem:[%s1600_s5 + $0x160] sm:$0xff]  ;;  %v415_v36 = vld [vmem:[%s1600_s5 + $0x168] sm:$0xff] }
  0x3c   : > { %681 = vmatpush1.bf16.msra.mxu0 %v1284_v4  ;;  %723 = vmatprep.subr.bf16.mxu1 %v1271_v7  ;;  %v1275_v32 = vcombine.high %v373_v27, %v381_v28  ;;  %v1274_v38 = vcombine.low %v373_v27, %v381_v28  ;;  %v1309_v39 = vcombine.high %v406_v33, %v414_v34  ;;  %v390_v41 = vld [vmem:[%s1600_s5 + $0xa0] sm:$0xff]  ;;  %v391_v43 = vld [vmem:[%s1600_s5 + $0xa8] sm:$0xff]  ;;  %v408_v58 = vld [vmem:[%s1600_s5 + $0x130] sm:$0xff] }
  0x3d   : > { %682 = vmatprep.subr.bf16.mxu0 %v1269_v6  ;;  %v1311_v40 = vcombine.high %v407_v35, %v415_v36  ;;  %v398_v42 = vld [vmem:[%s1600_s5 + $0xe0] sm:$0xff]  ;;  %v399_v44 = vld [vmem:[%s1600_s5 + $0xe8] sm:$0xff]  ;;  %v1308_v45 = vcombine.low %v406_v33, %v414_v34  ;;  %v1310_v46 = vcombine.low %v407_v35, %v415_v36  ;;  %v416_v59 = vld [vmem:[%s1600_s5 + $0x170] sm:$0xff] }
  0x3e   : > { %v1293_v47 = vcombine.high %v390_v41, %v398_v42  ;;  %v1295_v48 = vcombine.high %v391_v43, %v399_v44  ;;  %v374_v50 = vld [vmem:[%s1600_s5 + $0x20] sm:$0xff]  ;;  %v375_v52 = vld [vmem:[%s1600_s5 + $0x28] sm:$0xff]  ;;  %v1292_v54 = vcombine.low %v390_v41, %v398_v42  ;;  %v1294_v55 = vcombine.low %v391_v43, %v399_v44  ;;  %v409_v60 = vld [vmem:[%s1600_s5 + $0x138] sm:$0xff] }
  0x3f   : > { %724 = vmatpush1.bf16.msra.mxu1 %v1270_v13  ;;  %v382_v51 = vld [vmem:[%s1600_s5 + $0x60] sm:$0xff]  ;;  %v383_v53 = vld [vmem:[%s1600_s5 + $0x68] sm:$0xff]  ;;  %v417_v61 = vld [vmem:[%s1600_s5 + $0x178] sm:$0xff]  ;;  %v1313_v0 = vcombine.high %v408_v58, %v416_v59  ;;  %v1312_v6 = vcombine.low %v408_v58, %v416_v59 }
  0x40   : > { %683 = vmatpush1.bf16.msra.mxu0 %v1268_v12  ;;  %801 = vmatprep.subr.bf16.mxu1 %v1307_v15  ;;  %v1277_v56 = vcombine.high %v374_v50, %v382_v51  ;;  %v1279_v57 = vcombine.high %v375_v52, %v383_v53  ;;  %v1276_v62 = vcombine.low %v374_v50, %v382_v51  ;;  %v392_v2 = vld [vmem:[%s1600_s5 + $0xb0] sm:$0xff]  ;;  %v393_v4 = vld [vmem:[%s1600_s5 + $0xb8] sm:$0xff] }
  0x41   : > { %760 = vmatprep.subr.bf16.mxu0 %v1305_v14  ;;  %v1278_v63 = vcombine.low %v375_v52, %v383_v53  ;;  %v1315_v1 = vcombine.high %v409_v60, %v417_v61  ;;  %v400_v3 = vld [vmem:[%s1600_s5 + $0xf0] sm:$0xff]  ;;  %v401_v5 = vld [vmem:[%s1600_s5 + $0xf8] sm:$0xff]  ;;  %v1314_v7 = vcombine.low %v409_v60, %v417_v61 }
  0x42   : > { %1317 = vmatmul.mubr.msk.bf16.vlgmr.msra.gmra.mxu1 %vm664_vm0, %v1625_v20  ;;  %v1297_v8 = vcombine.high %v392_v2, %v400_v3  ;;  %v1299_v9 = vcombine.high %v393_v4, %v401_v5  ;;  %v376_v10 = vld [vmem:[%s1600_s5 + $0x30] sm:$0xff]  ;;  %v377_v12 = vld [vmem:[%s1600_s5 + $0x38] sm:$0xff]  ;;  %v1296_v14 = vcombine.low %v392_v2, %v400_v3  ;;  %v1298_v15 = vcombine.low %v393_v4, %v401_v5 }
  0x43   : > { %1316 = vmatmul.mubr.msk.bf16.vlgmr.msra.gmra.mxu0 %vm664_vm0, %v1625_v20  ;;  %802 = vmatpush1.bf16.msra.mxu1 %v1306_v22  ;;  %v384_v11 = vld [vmem:[%s1600_s5 + $0x70] sm:$0xff]  ;;  %v385_v13 = vld [vmem:[%s1600_s5 + $0x78] sm:$0xff] }
  0x44   : > { %761 = vmatpush1.bf16.msra.mxu0 %v1304_v21  ;;  %803 = vmatprep.subr.bf16.mxu1 %v1291_v24  ;;  %v1281_v16 = vcombine.high %v376_v10, %v384_v11  ;;  %v1283_v17 = vcombine.high %v377_v12, %v385_v13  ;;  %v1280_v18 = vcombine.low %v376_v10, %v384_v11 }
  0x45   : > { %762 = vmatprep.subr.bf16.mxu0 %v1289_v23  ;;  %782 = vmatprep.mubr.bf16.mxu0 %v1427_v49  ;;  %v1282_v19 = vcombine.low %v377_v12, %v385_v13 }
  0x46   : > { %823 = vmatprep.mubr.bf16.mxu1 %v1427_v49 }
  0x47   : > { %804 = vmatpush1.bf16.msra.mxu1 %v1290_v30 }
  0x48   : > { %763 = vmatpush1.bf16.msra.mxu0 %v1288_v29  ;;  %805 = vmatprep.subr.bf16.mxu1 %v1275_v32 }
  0x49   : > { %764 = vmatprep.subr.bf16.mxu0 %v1273_v31 }
  0x4b   : > { %806 = vmatpush1.bf16.msra.mxu1 %v1274_v38 }
  0x4c   : > { %765 = vmatpush1.bf16.msra.mxu0 %v1272_v37  ;;  %883 = vmatprep.subr.bf16.mxu1 %v1311_v40 }
  0x4d   : > { %842 = vmatprep.subr.bf16.mxu0 %v1309_v39 }
  0x4e   : > { %1319 = vmatmul.mubr.msk.bf16.vlgmr.msra.gmra.mxu1 %vm664_vm0, %v1625_v20 }
  0x4f   : > { %1318 = vmatmul.mubr.msk.bf16.vlgmr.msra.gmra.mxu0 %vm664_vm0, %v1625_v20  ;;  %884 = vmatpush1.bf16.msra.mxu1 %v1310_v46 }
  0x50   : > { %843 = vmatpush1.bf16.msra.mxu0 %v1308_v45  ;;  %885 = vmatprep.subr.bf16.mxu1 %v1295_v48 }
  0x51   : > { %844 = vmatprep.subr.bf16.mxu0 %v1293_v47  ;;  %864 = vmatprep.mubr.bf16.mxu0 %v1427_v49 }
  0x52   : > { %905 = vmatprep.mubr.bf16.mxu1 %v1427_v49 }
  0x53   : > { %886 = vmatpush1.bf16.msra.mxu1 %v1294_v55 }
  0x54   : > { %845 = vmatpush1.bf16.msra.mxu0 %v1292_v54  ;;  %887 = vmatprep.subr.bf16.mxu1 %v1279_v57 }
  0x55   : > { %846 = vmatprep.subr.bf16.mxu0 %v1277_v56 }
  0x57   : > { %888 = vmatpush1.bf16.msra.mxu1 %v1278_v63 }
  0x58   : > { %847 = vmatpush1.bf16.msra.mxu0 %v1276_v62  ;;  %965 = vmatprep.subr.bf16.mxu1 %v1315_v1 }
  0x59   : > { %924 = vmatprep.subr.bf16.mxu0 %v1313_v0 }
  0x5a   : > { %1321 = vmatmul.mubr.msk.bf16.vlgmr.msra.gmra.mxu1 %vm664_vm0, %v1625_v20 }
  0x5b   : > { %1320 = vmatmul.mubr.msk.bf16.vlgmr.msra.gmra.mxu0 %vm664_vm0, %v1625_v20  ;;  %966 = vmatpush1.bf16.msra.mxu1 %v1314_v7 }
  0x5c   : > { %925 = vmatpush1.bf16.msra.mxu0 %v1312_v6  ;;  %967 = vmatprep.subr.bf16.mxu1 %v1299_v9 }
  0x5d   : > { %926 = vmatprep.subr.bf16.mxu0 %v1297_v8  ;;  %946 = vmatprep.mubr.bf16.mxu0 %v1427_v49 }
  0x5e   : > { %987 = vmatprep.mubr.bf16.mxu1 %v1427_v49 }
  0x5f   : > { %968 = vmatpush1.bf16.msra.mxu1 %v1298_v15 }
  0x60   : > { %927 = vmatpush1.bf16.msra.mxu0 %v1296_v14  ;;  %969 = vmatprep.subr.bf16.mxu1 %v1283_v17 }
  0x61   : > { %928 = vmatprep.subr.bf16.mxu0 %v1281_v16 }
  0x63   : > { %970 = vmatpush1.bf16.msra.mxu1 %v1282_v19 }
  0x64   : > { %929 = vmatpush1.bf16.msra.mxu0 %v1280_v18 }
  0x66   : > { %1323 = vmatmul.mubr.msk.bf16.vlgmr.msra.gmra.mxu1 %vm664_vm0, %v1625_v20 }
  0x67   : > { %1322 = vmatmul.mubr.msk.bf16.vlgmr.msra.gmra.mxu0 %vm664_vm0, %v1625_v20 }
  0xb0   : > { %v1678_v21 = vpop.permute.xlu0 %421 }
 0x102   : > { %v743_v23 = vpop.f32.mrf.mxu1 }
 0x103   : > { %v702_v22 = vpop.f32.mrf.mxu0  ;;  %v744_v24 = vadd.f32 %v743_v23, %v1678_v21 }
 0x104   : > { %v703_v49 = vadd.f32 %v702_v22, %v1678_v21  ;;  %v745_v28 = vpop.f32.mrf.mxu1 }
 0x105   : > { %v704_v25 = vpop.f32.mrf.mxu0  ;;  %v1014_v29 = vmul.f32 0.2, %v744_v24  ;;  %v746_v20 = vadd.f32 %v745_v28, %v1678_v21  ;;  %vm998_vm2 = vcmp.gt.f32.partialorder %v744_v24, 0.0 }
 0x106   : > { %v1012_v26 = vmul.f32 0.2, %v703_v49  ;;  %v705_v27 = vadd.f32 %v704_v25, %v1678_v21  ;;  %vm996_vm1 = vcmp.gt.f32.partialorder %v703_v49, 0.0  ;;  %v747_v32 = vpop.f32.mrf.mxu1 }
 0x107   : > { %v706_v30 = vpop.f32.mrf.mxu0  ;;  %vm999_vm4 = vcmp.gt.f32.partialorder %v746_v20, 0.0  ;;  %v1015_v33 = vmul.f32 0.2, %v746_v20  ;;  %v1030_v38 = vsel %vm998_vm2, %v744_v24, %v1014_v29 }
 0x108   : > { %vm997_vm3 = vcmp.gt.f32.partialorder %v705_v27, 0.0  ;;  %v1013_v31 = vmul.f32 0.2, %v705_v27  ;;  %v1028_v35 = vsel %vm996_vm1, %v703_v49, %v1012_v26  ;;  %v748_v37 = vpop.f32.mrf.mxu1 }
 0x109   : > { %v707_v34 = vpop.f32.mrf.mxu0  ;;  %v1031_v40 = vsel %vm999_vm4, %v746_v20, %v1015_v33 }
 0x10a   : > { %v1029_v36 = vsel %vm997_vm3, %v705_v27, %v1013_v31  ;;  %v1336_v41 = vpack.c.bf16 %v1031_v40, %v1030_v38 }
 0x10b   : > { %v1335_v39 = vpack.c.bf16 %v1029_v36, %v1028_v35 }
 0x10c   : > { %1109 = vst [vmem:[%s1687_s12 + $0x8] sm:$0xff] %v1336_v41 }
 0x10d   : > { %1108 = vst [vmem:[%s1687_s12] sm:$0xff] %v1335_v39 }
 0x10e   : > { %v825_v44 = vpop.f32.mrf.mxu1 }
 0x10f   : > { %v784_v42 = vpop.f32.mrf.mxu0  ;;  %v826_v45 = vadd.f32 %v825_v44, %v1678_v21 }
 0x110   : > { %v785_v43 = vadd.f32 %v784_v42, %v1678_v21  ;;  %v827_v50 = vpop.f32.mrf.mxu1 }
 0x111   : > { %v786_v46 = vpop.f32.mrf.mxu0  ;;  %v1018_v51 = vmul.f32 0.2, %v826_v45  ;;  %v828_v52 = vadd.f32 %v827_v50, %v1678_v21  ;;  %vm1002_vm6 = vcmp.gt.f32.partialorder %v826_v45, 0.0 }
 0x112   : > { %v1016_v47 = vmul.f32 0.2, %v785_v43  ;;  %v787_v48 = vadd.f32 %v786_v46, %v1678_v21  ;;  %vm1000_vm5 = vcmp.gt.f32.partialorder %v785_v43, 0.0  ;;  %v829_v55 = vpop.f32.mrf.mxu1 }
 0x113   : > { %v788_v53 = vpop.f32.mrf.mxu0  ;;  %vm1003_vm8 = vcmp.gt.f32.partialorder %v828_v52, 0.0  ;;  %v1019_v56 = vmul.f32 0.2, %v828_v52  ;;  %v1034_v61 = vsel %vm1002_vm6, %v826_v45, %v1018_v51 }
 0x114   : > { %vm1001_vm7 = vcmp.gt.f32.partialorder %v787_v48, 0.0  ;;  %v1017_v54 = vmul.f32 0.2, %v787_v48  ;;  %v1032_v58 = vsel %vm1000_vm5, %v785_v43, %v1016_v47  ;;  %v830_v60 = vpop.f32.mrf.mxu1 }
 0x115   : > { %v789_v57 = vpop.f32.mrf.mxu0  ;;  %v1035_v63 = vsel %vm1003_vm8, %v828_v52, %v1019_v56 }
 0x116   : > { %v1033_v59 = vsel %vm1001_vm7, %v787_v48, %v1017_v54  ;;  %v1338_v0 = vpack.c.bf16 %v1035_v63, %v1034_v61 }
 0x117   : > { %v1337_v62 = vpack.c.bf16 %v1033_v59, %v1032_v58 }
 0x118   : > { %1111 = vst [vmem:[%s1687_s12 + $0x18] sm:$0xff] %v1338_v0 }
 0x119   : > { %1110 = vst [vmem:[%s1687_s12 + $0x10] sm:$0xff] %v1337_v62 }
 0x11a   : > { %v907_v3 = vpop.f32.mrf.mxu1 }
 0x11b   : > { %v866_v1 = vpop.f32.mrf.mxu0  ;;  %v908_v4 = vadd.f32 %v907_v3, %v1678_v21 }
 0x11c   : > { %v867_v2 = vadd.f32 %v866_v1, %v1678_v21  ;;  %v909_v8 = vpop.f32.mrf.mxu1 }
 0x11d   : > { %v868_v5 = vpop.f32.mrf.mxu0  ;;  %v1022_v9 = vmul.f32 0.2, %v908_v4  ;;  %v910_v10 = vadd.f32 %v909_v8, %v1678_v21  ;;  %vm1006_vm10 = vcmp.gt.f32.partialorder %v908_v4, 0.0 }
 0x11e   : > { %v1020_v6 = vmul.f32 0.2, %v867_v2  ;;  %v869_v7 = vadd.f32 %v868_v5, %v1678_v21  ;;  %vm1004_vm9 = vcmp.gt.f32.partialorder %v867_v2, 0.0  ;;  %v911_v13 = vpop.f32.mrf.mxu1 }
 0x11f   : > { %v870_v11 = vpop.f32.mrf.mxu0  ;;  %vm1007_vm12 = vcmp.gt.f32.partialorder %v910_v10, 0.0  ;;  %v1023_v14 = vmul.f32 0.2, %v910_v10  ;;  %v1038_v19 = vsel %vm1006_vm10, %v908_v4, %v1022_v9 }
 0x120   : > { %vm1005_vm11 = vcmp.gt.f32.partialorder %v869_v7, 0.0  ;;  %v1021_v12 = vmul.f32 0.2, %v869_v7  ;;  %v1036_v16 = vsel %vm1004_vm9, %v867_v2, %v1020_v6  ;;  %v912_v18 = vpop.f32.mrf.mxu1 }
 0x121   : > { %v871_v15 = vpop.f32.mrf.mxu0  ;;  %v1039_v49 = vsel %vm1007_vm12, %v910_v10, %v1023_v14 }
 0x122   : > { %v1037_v17 = vsel %vm1005_vm11, %v869_v7, %v1021_v12  ;;  %v1340_v23 = vpack.c.bf16 %v1039_v49, %v1038_v19 }
 0x123   : > { %v1339_v22 = vpack.c.bf16 %v1037_v17, %v1036_v16 }
 0x124   : > { %1113 = vst [vmem:[%s1687_s12 + $0x28] sm:$0xff] %v1340_v23 }
 0x125   : > { %1112 = vst [vmem:[%s1687_s12 + $0x20] sm:$0xff] %v1339_v22 }
 0x126   : > { %v989_v26 = vpop.f32.mrf.mxu1 }
 0x127   : > { %v948_v24 = vpop.f32.mrf.mxu0  ;;  %v990_v27 = vadd.f32 %v989_v26, %v1678_v21 }
 0x128   : > { %v949_v25 = vadd.f32 %v948_v24, %v1678_v21  ;;  %v991_v30 = vpop.f32.mrf.mxu1 }
 0x129   : > { %v950_v28 = vpop.f32.mrf.mxu0  ;;  %v1026_v31 = vmul.f32 0.2, %v990_v27  ;;  %v992_v32 = vadd.f32 %v991_v30, %v1678_v21  ;;  %vm1010_vm14 = vcmp.gt.f32.partialorder %v990_v27, 0.0 }
 0x12a   : > { %v1024_v29 = vmul.f32 0.2, %v949_v25  ;;  %v951_v20 = vadd.f32 %v950_v28, %v1678_v21  ;;  %vm1008_vm13 = vcmp.gt.f32.partialorder %v949_v25, 0.0  ;;  %v993_v35 = vpop.f32.mrf.mxu1 }
 0x12b   : > { %v952_v33 = vpop.f32.mrf.mxu0  ;;  %vm1011_vm0 = vcmp.gt.f32.partialorder %v992_v32, 0.0  ;;  %v1027_v36 = vmul.f32 0.2, %v992_v32  ;;  %v1042_v41 = vsel %vm1010_vm14, %v990_v27, %v1026_v31 }
 0x12c   : > { %vm1009_vm15 = vcmp.gt.f32.partialorder %v951_v20, 0.0  ;;  %v1025_v34 = vmul.f32 0.2, %v951_v20  ;;  %v1040_v38 = vsel %vm1008_vm13, %v949_v25, %v1024_v29  ;;  %v994_v40 = vpop.f32.mrf.mxu1 }
 0x12d   : > { %v953_v37 = vpop.f32.mrf.mxu0  ;;  %v1043_v43 = vsel %vm1011_vm0, %v992_v32, %v1027_v36 }
 0x12e   : > { %v1041_v39 = vsel %vm1009_vm15, %v951_v20, %v1025_v34  ;;  %v1342_v44 = vpack.c.bf16 %v1043_v43, %v1042_v41 }
 0x12f   : > { %v1341_v42 = vpack.c.bf16 %v1041_v39, %v1040_v38 }
 0x130   : > { %1115 = vst [vmem:[%s1687_s12 + $0x38] sm:$0xff] %v1342_v44 }
 0x131   : > { %1114 = vst [vmem:[%s1687_s12 + $0x30] sm:$0xff] %v1341_v42 }
 0x132 PF: > { %s13_s16 = sadd.s32 1, %s1425_s16   ;;  %s1728_s12 = smov %s1413_s13 }
 0x133   : > { %p10_p10 = scmp.ge.s32.totalorder %s13_s16, 10   ;;  %s1729_s13 = smov %s1483_s20 }
 0x134   : > { %s1730_s14 = smov %s1421_s15  ;;  %s1731_s15 = smov %s1733_s17 }
 0x135   :  { %12 = sbr.rel (!%p10_p10) target bundleno = 3 (0x3), region = 96 }

// kernel: _lambda_.17
= control target key start
LH: loop header
LB: loop body
LE: loop exit
PB: predicated region body
PF: predicated region fallthrough
CT: control target
= control target key end

     0   :  { %s2306_s12 = smov 0   ;;  %s2308_s13 = smov 0   ;;  %s2870_s0 = inlined_call_operand.vmem [shape: bf16[1,16,128], index: 0, kind: input, shape index: {}]   ;;  %s2871_s1 = inlined_call_operand.vmem [shape: bf16[1,1,128,4096], index: 1, kind: input, shape index: {}]   ;;  %s2872_s2 = inlined_call_operand.vmem [shape: f32[1,16,1], index: 2, kind: input, shape index: {}]   ;;  %s2873_s3 = inlined_call_operand.vmem [shape: bf16[1,1,16,4096], index: 3, kind: output, shape index: {}]  }
   0x1   :  { %s2310_s14 = smov 0   ;;  %s2312_s15 = smov 0  }
   0x2   :  { %s2314_s16 = smov 0  }
   0x3 LB: > { %s25_s17 = sadd.s32 1, %s2279_s15  ;;  %s2022_s18 = sadd.s32 4294967295, %s2283_s16   ;;  %s2283_s16 = sphi %s2314_s16, %s13_s16   ;;  %s2279_s15 = sphi %s2312_s15, %s2878_s15   ;;  %s2275_s14 = sphi %s2310_s14, %s2877_s14   ;;  %s2271_s13 = sphi %s2308_s13, %s2876_s13   ;;  %s2267_s12 = sphi %s2306_s12, %s2875_s12  }
   0x4   : > { %p26_p0 = scmp.ge.s32.totalorder %s25_s17, 2  ;;  %p76_p1 = scmp.ne.s32.totalorder %s2271_s13, %s2267_s12 }
   0x5   : > { %p77_p2 = scmp.eq.s32.totalorder %s2283_s16, 0  ;;  %p136_p4 = scmp.eq.s32.totalorder %s2022_s18, 1 }
   0x6   : > { %s2880_s17 = smov (%p26_p0, %s25_s17), 0  ;;  %s69_s20 = sadd.s32 1, %s2271_s13 }
   0x7   : > { %p78_p3 = por %p77_p2, %p76_p1  ;;  %s65_s19 = ssub.s32 %s2279_s15, %s2880_s17 }
   0x8   : > { %p67_p5 = scmp.eq.s32.totalorder %s65_s19, 0  ;;  %p2341_p6 = por %p136_p4, %p76_p1 }
   0x9   : > { %p2027_p7 = scmp.ge.s32.totalorder %s2283_s16, 2 }
   0xa   : > { %s2346_s22 = scalar_select %p67_p5, %s2271_s13, %s69_s20  }
   0xb   : > { %174 = sbr.rel (%p2027_p7) target bundleno = 84 (0x54), region = 24 }
  0x10   : > { %177 = sbr.rel (!%p78_p3) target bundleno = 84 (0x54), region = 28  ;;  %s179_s23 = sand.u32 (%p78_p3), 1, %s2271_s13  }
  0x11   : > { %s2184_s24 = sshll.u32 (%p78_p3), %s2279_s15, 6  ;;  %s2028_s25 = sshll.u32 (%p78_p3), %s179_s23, 10 }
  0x12   : > { %s2354_s28 = scalar_lea.vmem (%p78_p3), %s2871_s1, %s2184_s24  ;;  %s2359_s29 = scalar_lea.vmem (%p78_p3), [#allocation2], %s2028_s25 }
  0x13   : > { %v201_v0 = vld [vmem:[%s2354_s28] sm:$0xff] (%p78_p3)  ;;  %v203_v1 = vld [vmem:[%s2354_s28 + $0x8] sm:$0xff] (%p78_p3)  ;;  %v205_v2 = vld [vmem:[%s2354_s28 + $0x10] sm:$0xff] (%p78_p3) }
  0x14   : > { %202 = vst [vmem:[%s2359_s29] sm:$0xff] (%p78_p3), %v201_v0  ;;  %204 = vst [vmem:[%s2359_s29 + $0x8] sm:$0xff] (%p78_p3), %v203_v1  ;;  %v207_v3 = vld [vmem:[%s2354_s28 + $0x18] sm:$0xff] (%p78_p3)  ;;  %v209_v4 = vld [vmem:[%s2354_s28 + $0x20] sm:$0xff] (%p78_p3) }
  0x15   : > { %206 = vst [vmem:[%s2359_s29 + $0x10] sm:$0xff] %v205_v2  ;;  %v211_v5 = vld [vmem:[%s2354_s28 + $0x28] sm:$0xff]  ;;  %208 = vst [vmem:[%s2359_s29 + $0x18] sm:$0xff] %v207_v3  ;;  %v213_v6 = vld [vmem:[%s2354_s28 + $0x30] sm:$0xff] }
  0x16   : > { %210 = vst [vmem:[%s2359_s29 + $0x20] sm:$0xff] %v209_v4  ;;  %212 = vst [vmem:[%s2359_s29 + $0x28] sm:$0xff] %v211_v5  ;;  %v215_v7 = vld [vmem:[%s2354_s28 + $0x38] sm:$0xff]  ;;  %v217_v8 = vld [vmem:[%s2354_s28 + $0x80] sm:$0xff] }
  0x17   : > { %214 = vst [vmem:[%s2359_s29 + $0x30] sm:$0xff] %v213_v6  ;;  %216 = vst [vmem:[%s2359_s29 + $0x38] sm:$0xff] %v215_v7  ;;  %v219_v9 = vld [vmem:[%s2354_s28 + $0x88] sm:$0xff]  ;;  %v221_v10 = vld [vmem:[%s2354_s28 + $0x90] sm:$0xff] }
  0x18   : > { %218 = vst [vmem:[%s2359_s29 + $0x40] sm:$0xff] %v217_v8  ;;  %v223_v11 = vld [vmem:[%s2354_s28 + $0x98] sm:$0xff]  ;;  %220 = vst [vmem:[%s2359_s29 + $0x48] sm:$0xff] %v219_v9  ;;  %v225_v12 = vld [vmem:[%s2354_s28 + $0xa0] sm:$0xff] }
  0x19   : > { %222 = vst [vmem:[%s2359_s29 + $0x50] sm:$0xff] %v221_v10  ;;  %224 = vst [vmem:[%s2359_s29 + $0x58] sm:$0xff] %v223_v11  ;;  %v227_v13 = vld [vmem:[%s2354_s28 + $0xa8] sm:$0xff]  ;;  %v229_v14 = vld [vmem:[%s2354_s28 + $0xb0] sm:$0xff] }
  0x1a   : > { %226 = vst [vmem:[%s2359_s29 + $0x60] sm:$0xff] %v225_v12  ;;  %228 = vst [vmem:[%s2359_s29 + $0x68] sm:$0xff] %v227_v13  ;;  %v231_v15 = vld [vmem:[%s2354_s28 + $0xb8] sm:$0xff]  ;;  %v233_v16 = vld [vmem:[%s2354_s28 + $0x100] sm:$0xff] }
  0x1b   : > { %230 = vst [vmem:[%s2359_s29 + $0x70] sm:$0xff] %v229_v14  ;;  %v235_v17 = vld [vmem:[%s2354_s28 + $0x108] sm:$0xff]  ;;  %232 = vst [vmem:[%s2359_s29 + $0x78] sm:$0xff] %v231_v15  ;;  %v237_v18 = vld [vmem:[%s2354_s28 + $0x110] sm:$0xff] }
  0x1c   : > { %234 = vst [vmem:[%s2359_s29 + $0x80] sm:$0xff] %v233_v16  ;;  %236 = vst [vmem:[%s2359_s29 + $0x88] sm:$0xff] %v235_v17  ;;  %v239_v19 = vld [vmem:[%s2354_s28 + $0x118] sm:$0xff]  ;;  %v241_v20 = vld [vmem:[%s2354_s28 + $0x120] sm:$0xff] }
  0x1d   : > { %238 = vst [vmem:[%s2359_s29 + $0x90] sm:$0xff] %v237_v18  ;;  %240 = vst [vmem:[%s2359_s29 + $0x98] sm:$0xff] %v239_v19  ;;  %v243_v21 = vld [vmem:[%s2354_s28 + $0x128] sm:$0xff]  ;;  %v245_v22 = vld [vmem:[%s2354_s28 + $0x130] sm:$0xff] }
  0x1e   : > { %242 = vst [vmem:[%s2359_s29 + $0xa0] sm:$0xff] %v241_v20  ;;  %v247_v23 = vld [vmem:[%s2354_s28 + $0x138] sm:$0xff]  ;;  %244 = vst [vmem:[%s2359_s29 + $0xa8] sm:$0xff] %v243_v21  ;;  %v249_v24 = vld [vmem:[%s2354_s28 + $0x180] sm:$0xff] }
  0x1f   : > { %246 = vst [vmem:[%s2359_s29 + $0xb0] sm:$0xff] %v245_v22  ;;  %248 = vst [vmem:[%s2359_s29 + $0xb8] sm:$0xff] %v247_v23  ;;  %v251_v25 = vld [vmem:[%s2354_s28 + $0x188] sm:$0xff]  ;;  %v253_v26 = vld [vmem:[%s2354_s28 + $0x190] sm:$0xff] }
  0x20   : > { %250 = vst [vmem:[%s2359_s29 + $0xc0] sm:$0xff] %v249_v24  ;;  %252 = vst [vmem:[%s2359_s29 + $0xc8] sm:$0xff] %v251_v25  ;;  %v255_v27 = vld [vmem:[%s2354_s28 + $0x198] sm:$0xff]  ;;  %v257_v28 = vld [vmem:[%s2354_s28 + $0x1a0] sm:$0xff] }
  0x21   : > { %254 = vst [vmem:[%s2359_s29 + $0xd0] sm:$0xff] %v253_v26  ;;  %v259_v29 = vld [vmem:[%s2354_s28 + $0x1a8] sm:$0xff]  ;;  %256 = vst [vmem:[%s2359_s29 + $0xd8] sm:$0xff] %v255_v27  ;;  %v261_v30 = vld [vmem:[%s2354_s28 + $0x1b0] sm:$0xff] }
  0x22   : > { %258 = vst [vmem:[%s2359_s29 + $0xe0] sm:$0xff] %v257_v28  ;;  %260 = vst [vmem:[%s2359_s29 + $0xe8] sm:$0xff] %v259_v29  ;;  %v263_v31 = vld [vmem:[%s2354_s28 + $0x1b8] sm:$0xff]  ;;  %v265_v32 = vld [vmem:[%s2354_s28 + $0x200] sm:$0xff] }
  0x23   : > { %262 = vst [vmem:[%s2359_s29 + $0xf0] sm:$0xff] %v261_v30  ;;  %264 = vst [vmem:[%s2359_s29 + $0xf8] sm:$0xff] %v263_v31  ;;  %v267_v33 = vld [vmem:[%s2354_s28 + $0x208] sm:$0xff]  ;;  %v269_v34 = vld [vmem:[%s2354_s28 + $0x210] sm:$0xff] }
  0x24   : > { %266 = vst [vmem:[%s2359_s29 + $0x100] sm:$0xff] %v265_v32  ;;  %v271_v35 = vld [vmem:[%s2354_s28 + $0x218] sm:$0xff]  ;;  %268 = vst [vmem:[%s2359_s29 + $0x108] sm:$0xff] %v267_v33  ;;  %v273_v36 = vld [vmem:[%s2354_s28 + $0x220] sm:$0xff] }
  0x25   : > { %270 = vst [vmem:[%s2359_s29 + $0x110] sm:$0xff] %v269_v34  ;;  %272 = vst [vmem:[%s2359_s29 + $0x118] sm:$0xff] %v271_v35  ;;  %v275_v37 = vld [vmem:[%s2354_s28 + $0x228] sm:$0xff]  ;;  %v277_v38 = vld [vmem:[%s2354_s28 + $0x230] sm:$0xff] }
  0x26   : > { %274 = vst [vmem:[%s2359_s29 + $0x120] sm:$0xff] %v273_v36  ;;  %276 = vst [vmem:[%s2359_s29 + $0x128] sm:$0xff] %v275_v37  ;;  %v279_v39 = vld [vmem:[%s2354_s28 + $0x238] sm:$0xff]  ;;  %v281_v40 = vld [vmem:[%s2354_s28 + $0x280] sm:$0xff] }
  0x27   : > { %278 = vst [vmem:[%s2359_s29 + $0x130] sm:$0xff] %v277_v38  ;;  %v283_v41 = vld [vmem:[%s2354_s28 + $0x288] sm:$0xff]  ;;  %280 = vst [vmem:[%s2359_s29 + $0x138] sm:$0xff] %v279_v39  ;;  %v285_v42 = vld [vmem:[%s2354_s28 + $0x290] sm:$0xff] }
  0x28   : > { %282 = vst [vmem:[%s2359_s29 + $0x140] sm:$0xff] %v281_v40  ;;  %284 = vst [vmem:[%s2359_s29 + $0x148] sm:$0xff] %v283_v41  ;;  %v287_v43 = vld [vmem:[%s2354_s28 + $0x298] sm:$0xff]  ;;  %v289_v44 = vld [vmem:[%s2354_s28 + $0x2a0] sm:$0xff] }
  0x29   : > { %286 = vst [vmem:[%s2359_s29 + $0x150] sm:$0xff] %v285_v42  ;;  %288 = vst [vmem:[%s2359_s29 + $0x158] sm:$0xff] %v287_v43  ;;  %v291_v45 = vld [vmem:[%s2354_s28 + $0x2a8] sm:$0xff]  ;;  %v293_v46 = vld [vmem:[%s2354_s28 + $0x2b0] sm:$0xff] }
  0x2a   : > { %290 = vst [vmem:[%s2359_s29 + $0x160] sm:$0xff] %v289_v44  ;;  %v295_v47 = vld [vmem:[%s2354_s28 + $0x2b8] sm:$0xff]  ;;  %292 = vst [vmem:[%s2359_s29 + $0x168] sm:$0xff] %v291_v45  ;;  %v297_v48 = vld [vmem:[%s2354_s28 + $0x300] sm:$0xff] }
  0x2b   : > { %294 = vst [vmem:[%s2359_s29 + $0x170] sm:$0xff] %v293_v46  ;;  %296 = vst [vmem:[%s2359_s29 + $0x178] sm:$0xff] %v295_v47  ;;  %v299_v49 = vld [vmem:[%s2354_s28 + $0x308] sm:$0xff]  ;;  %v301_v50 = vld [vmem:[%s2354_s28 + $0x310] sm:$0xff] }
  0x2c   : > { %298 = vst [vmem:[%s2359_s29 + $0x180] sm:$0xff] %v297_v48  ;;  %300 = vst [vmem:[%s2359_s29 + $0x188] sm:$0xff] %v299_v49  ;;  %v303_v51 = vld [vmem:[%s2354_s28 + $0x318] sm:$0xff]  ;;  %v305_v52 = vld [vmem:[%s2354_s28 + $0x320] sm:$0xff] }
  0x2d   : > { %302 = vst [vmem:[%s2359_s29 + $0x190] sm:$0xff] %v301_v50  ;;  %v307_v53 = vld [vmem:[%s2354_s28 + $0x328] sm:$0xff]  ;;  %304 = vst [vmem:[%s2359_s29 + $0x198] sm:$0xff] %v303_v51  ;;  %v309_v54 = vld [vmem:[%s2354_s28 + $0x330] sm:$0xff] }
  0x2e   : > { %306 = vst [vmem:[%s2359_s29 + $0x1a0] sm:$0xff] %v305_v52  ;;  %308 = vst [vmem:[%s2359_s29 + $0x1a8] sm:$0xff] %v307_v53  ;;  %v311_v55 = vld [vmem:[%s2354_s28 + $0x338] sm:$0xff]  ;;  %v313_v56 = vld [vmem:[%s2354_s28 + $0x380] sm:$0xff] }
  0x2f   : > { %310 = vst [vmem:[%s2359_s29 + $0x1b0] sm:$0xff] %v309_v54  ;;  %312 = vst [vmem:[%s2359_s29 + $0x1b8] sm:$0xff] %v311_v55  ;;  %v315_v57 = vld [vmem:[%s2354_s28 + $0x388] sm:$0xff]  ;;  %v317_v58 = vld [vmem:[%s2354_s28 + $0x390] sm:$0xff] }
  0x30   : > { %314 = vst [vmem:[%s2359_s29 + $0x1c0] sm:$0xff] %v313_v56  ;;  %v319_v59 = vld [vmem:[%s2354_s28 + $0x398] sm:$0xff]  ;;  %316 = vst [vmem:[%s2359_s29 + $0x1c8] sm:$0xff] %v315_v57  ;;  %v321_v60 = vld [vmem:[%s2354_s28 + $0x3a0] sm:$0xff] }
  0x31   : > { %318 = vst [vmem:[%s2359_s29 + $0x1d0] sm:$0xff] %v317_v58  ;;  %320 = vst [vmem:[%s2359_s29 + $0x1d8] sm:$0xff] %v319_v59  ;;  %v323_v61 = vld [vmem:[%s2354_s28 + $0x3a8] sm:$0xff]  ;;  %v325_v62 = vld [vmem:[%s2354_s28 + $0x3b0] sm:$0xff] }
  0x32   : > { %322 = vst [vmem:[%s2359_s29 + $0x1e0] sm:$0xff] %v321_v60  ;;  %324 = vst [vmem:[%s2359_s29 + $0x1e8] sm:$0xff] %v323_v61  ;;  %v327_v63 = vld [vmem:[%s2354_s28 + $0x3b8] sm:$0xff]  ;;  %v329_v0 = vld [vmem:[%s2354_s28 + $0x400] sm:$0xff] }
  0x33   : > { %326 = vst [vmem:[%s2359_s29 + $0x1f0] sm:$0xff] %v325_v62  ;;  %v331_v1 = vld [vmem:[%s2354_s28 + $0x408] sm:$0xff]  ;;  %328 = vst [vmem:[%s2359_s29 + $0x1f8] sm:$0xff] %v327_v63  ;;  %v333_v2 = vld [vmem:[%s2354_s28 + $0x410] sm:$0xff] }
  0x34   : > { %330 = vst [vmem:[%s2359_s29 + $0x200] sm:$0xff] %v329_v0  ;;  %332 = vst [vmem:[%s2359_s29 + $0x208] sm:$0xff] %v331_v1  ;;  %v335_v3 = vld [vmem:[%s2354_s28 + $0x418] sm:$0xff]  ;;  %v337_v4 = vld [vmem:[%s2354_s28 + $0x420] sm:$0xff] }
  0x35   : > { %334 = vst [vmem:[%s2359_s29 + $0x210] sm:$0xff] %v333_v2  ;;  %336 = vst [vmem:[%s2359_s29 + $0x218] sm:$0xff] %v335_v3  ;;  %v339_v5 = vld [vmem:[%s2354_s28 + $0x428] sm:$0xff]  ;;  %v341_v6 = vld [vmem:[%s2354_s28 + $0x430] sm:$0xff] }
  0x36   : > { %338 = vst [vmem:[%s2359_s29 + $0x220] sm:$0xff] %v337_v4  ;;  %v343_v7 = vld [vmem:[%s2354_s28 + $0x438] sm:$0xff]  ;;  %340 = vst [vmem:[%s2359_s29 + $0x228] sm:$0xff] %v339_v5  ;;  %v345_v8 = vld [vmem:[%s2354_s28 + $0x480] sm:$0xff] }
  0x37   : > { %342 = vst [vmem:[%s2359_s29 + $0x230] sm:$0xff] %v341_v6  ;;  %344 = vst [vmem:[%s2359_s29 + $0x238] sm:$0xff] %v343_v7  ;;  %v347_v9 = vld [vmem:[%s2354_s28 + $0x488] sm:$0xff]  ;;  %v349_v10 = vld [vmem:[%s2354_s28 + $0x490] sm:$0xff] }
  0x38   : > { %346 = vst [vmem:[%s2359_s29 + $0x240] sm:$0xff] %v345_v8  ;;  %348 = vst [vmem:[%s2359_s29 + $0x248] sm:$0xff] %v347_v9  ;;  %v351_v11 = vld [vmem:[%s2354_s28 + $0x498] sm:$0xff]  ;;  %v353_v12 = vld [vmem:[%s2354_s28 + $0x4a0] sm:$0xff] }
  0x39   : > { %350 = vst [vmem:[%s2359_s29 + $0x250] sm:$0xff] %v349_v10  ;;  %v355_v13 = vld [vmem:[%s2354_s28 + $0x4a8] sm:$0xff]  ;;  %352 = vst [vmem:[%s2359_s29 + $0x258] sm:$0xff] %v351_v11  ;;  %v357_v14 = vld [vmem:[%s2354_s28 + $0x4b0] sm:$0xff] }
  0x3a   : > { %354 = vst [vmem:[%s2359_s29 + $0x260] sm:$0xff] %v353_v12  ;;  %356 = vst [vmem:[%s2359_s29 + $0x268] sm:$0xff] %v355_v13  ;;  %v359_v15 = vld [vmem:[%s2354_s28 + $0x4b8] sm:$0xff]  ;;  %v361_v16 = vld [vmem:[%s2354_s28 + $0x500] sm:$0xff] }
  0x3b   : > { %358 = vst [vmem:[%s2359_s29 + $0x270] sm:$0xff] %v357_v14  ;;  %360 = vst [vmem:[%s2359_s29 + $0x278] sm:$0xff] %v359_v15  ;;  %v363_v17 = vld [vmem:[%s2354_s28 + $0x508] sm:$0xff]  ;;  %v365_v18 = vld [vmem:[%s2354_s28 + $0x510] sm:$0xff] }
  0x3c   : > { %362 = vst [vmem:[%s2359_s29 + $0x280] sm:$0xff] %v361_v16  ;;  %v367_v19 = vld [vmem:[%s2354_s28 + $0x518] sm:$0xff]  ;;  %364 = vst [vmem:[%s2359_s29 + $0x288] sm:$0xff] %v363_v17  ;;  %v369_v20 = vld [vmem:[%s2354_s28 + $0x520] sm:$0xff] }
  0x3d   : > { %366 = vst [vmem:[%s2359_s29 + $0x290] sm:$0xff] %v365_v18  ;;  %368 = vst [vmem:[%s2359_s29 + $0x298] sm:$0xff] %v367_v19  ;;  %v371_v21 = vld [vmem:[%s2354_s28 + $0x528] sm:$0xff]  ;;  %v373_v22 = vld [vmem:[%s2354_s28 + $0x530] sm:$0xff] }
  0x3e   : > { %370 = vst [vmem:[%s2359_s29 + $0x2a0] sm:$0xff] %v369_v20  ;;  %372 = vst [vmem:[%s2359_s29 + $0x2a8] sm:$0xff] %v371_v21  ;;  %v375_v23 = vld [vmem:[%s2354_s28 + $0x538] sm:$0xff]  ;;  %v377_v24 = vld [vmem:[%s2354_s28 + $0x580] sm:$0xff] }
  0x3f   : > { %374 = vst [vmem:[%s2359_s29 + $0x2b0] sm:$0xff] %v373_v22  ;;  %v379_v25 = vld [vmem:[%s2354_s28 + $0x588] sm:$0xff]  ;;  %376 = vst [vmem:[%s2359_s29 + $0x2b8] sm:$0xff] %v375_v23  ;;  %v381_v26 = vld [vmem:[%s2354_s28 + $0x590] sm:$0xff] }
  0x40   : > { %378 = vst [vmem:[%s2359_s29 + $0x2c0] sm:$0xff] %v377_v24  ;;  %380 = vst [vmem:[%s2359_s29 + $0x2c8] sm:$0xff] %v379_v25  ;;  %v383_v27 = vld [vmem:[%s2354_s28 + $0x598] sm:$0xff]  ;;  %v385_v28 = vld [vmem:[%s2354_s28 + $0x5a0] sm:$0xff] }
  0x41   : > { %382 = vst [vmem:[%s2359_s29 + $0x2d0] sm:$0xff] %v381_v26  ;;  %384 = vst [vmem:[%s2359_s29 + $0x2d8] sm:$0xff] %v383_v27  ;;  %v387_v29 = vld [vmem:[%s2354_s28 + $0x5a8] sm:$0xff]  ;;  %v389_v30 = vld [vmem:[%s2354_s28 + $0x5b0] sm:$0xff] }
  0x42   : > { %386 = vst [vmem:[%s2359_s29 + $0x2e0] sm:$0xff] %v385_v28  ;;  %v391_v31 = vld [vmem:[%s2354_s28 + $0x5b8] sm:$0xff]  ;;  %388 = vst [vmem:[%s2359_s29 + $0x2e8] sm:$0xff] %v387_v29  ;;  %v393_v32 = vld [vmem:[%s2354_s28 + $0x600] sm:$0xff] }
  0x43   : > { %390 = vst [vmem:[%s2359_s29 + $0x2f0] sm:$0xff] %v389_v30  ;;  %392 = vst [vmem:[%s2359_s29 + $0x2f8] sm:$0xff] %v391_v31  ;;  %v395_v33 = vld [vmem:[%s2354_s28 + $0x608] sm:$0xff]  ;;  %v397_v34 = vld [vmem:[%s2354_s28 + $0x610] sm:$0xff] }
  0x44   : > { %394 = vst [vmem:[%s2359_s29 + $0x300] sm:$0xff] %v393_v32  ;;  %396 = vst [vmem:[%s2359_s29 + $0x308] sm:$0xff] %v395_v33  ;;  %v399_v35 = vld [vmem:[%s2354_s28 + $0x618] sm:$0xff]  ;;  %v401_v36 = vld [vmem:[%s2354_s28 + $0x620] sm:$0xff] }
  0x45   : > { %398 = vst [vmem:[%s2359_s29 + $0x310] sm:$0xff] %v397_v34  ;;  %v403_v37 = vld [vmem:[%s2354_s28 + $0x628] sm:$0xff]  ;;  %400 = vst [vmem:[%s2359_s29 + $0x318] sm:$0xff] %v399_v35  ;;  %v405_v38 = vld [vmem:[%s2354_s28 + $0x630] sm:$0xff] }
  0x46   : > { %402 = vst [vmem:[%s2359_s29 + $0x320] sm:$0xff] %v401_v36  ;;  %404 = vst [vmem:[%s2359_s29 + $0x328] sm:$0xff] %v403_v37  ;;  %v407_v39 = vld [vmem:[%s2354_s28 + $0x638] sm:$0xff]  ;;  %v409_v40 = vld [vmem:[%s2354_s28 + $0x680] sm:$0xff] }
  0x47   : > { %406 = vst [vmem:[%s2359_s29 + $0x330] sm:$0xff] %v405_v38  ;;  %408 = vst [vmem:[%s2359_s29 + $0x338] sm:$0xff] %v407_v39  ;;  %v411_v41 = vld [vmem:[%s2354_s28 + $0x688] sm:$0xff]  ;;  %v413_v42 = vld [vmem:[%s2354_s28 + $0x690] sm:$0xff] }
  0x48   : > { %410 = vst [vmem:[%s2359_s29 + $0x340] sm:$0xff] %v409_v40  ;;  %v415_v43 = vld [vmem:[%s2354_s28 + $0x698] sm:$0xff]  ;;  %412 = vst [vmem:[%s2359_s29 + $0x348] sm:$0xff] %v411_v41  ;;  %v417_v44 = vld [vmem:[%s2354_s28 + $0x6a0] sm:$0xff] }
  0x49   : > { %414 = vst [vmem:[%s2359_s29 + $0x350] sm:$0xff] %v413_v42  ;;  %416 = vst [vmem:[%s2359_s29 + $0x358] sm:$0xff] %v415_v43  ;;  %v419_v45 = vld [vmem:[%s2354_s28 + $0x6a8] sm:$0xff]  ;;  %v421_v46 = vld [vmem:[%s2354_s28 + $0x6b0] sm:$0xff] }
  0x4a   : > { %418 = vst [vmem:[%s2359_s29 + $0x360] sm:$0xff] %v417_v44  ;;  %420 = vst [vmem:[%s2359_s29 + $0x368] sm:$0xff] %v419_v45  ;;  %v423_v47 = vld [vmem:[%s2354_s28 + $0x6b8] sm:$0xff]  ;;  %v425_v48 = vld [vmem:[%s2354_s28 + $0x700] sm:$0xff] }
  0x4b   : > { %422 = vst [vmem:[%s2359_s29 + $0x370] sm:$0xff] %v421_v46  ;;  %v427_v49 = vld [vmem:[%s2354_s28 + $0x708] sm:$0xff]  ;;  %424 = vst [vmem:[%s2359_s29 + $0x378] sm:$0xff] %v423_v47  ;;  %v429_v50 = vld [vmem:[%s2354_s28 + $0x710] sm:$0xff] }
  0x4c   : > { %426 = vst [vmem:[%s2359_s29 + $0x380] sm:$0xff] %v425_v48  ;;  %428 = vst [vmem:[%s2359_s29 + $0x388] sm:$0xff] %v427_v49  ;;  %v431_v51 = vld [vmem:[%s2354_s28 + $0x718] sm:$0xff]  ;;  %v433_v52 = vld [vmem:[%s2354_s28 + $0x720] sm:$0xff] }
  0x4d   : > { %430 = vst [vmem:[%s2359_s29 + $0x390] sm:$0xff] %v429_v50  ;;  %432 = vst [vmem:[%s2359_s29 + $0x398] sm:$0xff] %v431_v51  ;;  %v435_v53 = vld [vmem:[%s2354_s28 + $0x728] sm:$0xff]  ;;  %v437_v54 = vld [vmem:[%s2354_s28 + $0x730] sm:$0xff] }
  0x4e   : > { %434 = vst [vmem:[%s2359_s29 + $0x3a0] sm:$0xff] %v433_v52  ;;  %v439_v55 = vld [vmem:[%s2354_s28 + $0x738] sm:$0xff]  ;;  %436 = vst [vmem:[%s2359_s29 + $0x3a8] sm:$0xff] %v435_v53  ;;  %v441_v56 = vld [vmem:[%s2354_s28 + $0x780] sm:$0xff] }
  0x4f   : > { %438 = vst [vmem:[%s2359_s29 + $0x3b0] sm:$0xff] %v437_v54  ;;  %440 = vst [vmem:[%s2359_s29 + $0x3b8] sm:$0xff] %v439_v55  ;;  %v443_v57 = vld [vmem:[%s2354_s28 + $0x788] sm:$0xff]  ;;  %v445_v58 = vld [vmem:[%s2354_s28 + $0x790] sm:$0xff] }
  0x50   : > { %442 = vst [vmem:[%s2359_s29 + $0x3c0] sm:$0xff] %v441_v56  ;;  %444 = vst [vmem:[%s2359_s29 + $0x3c8] sm:$0xff] %v443_v57  ;;  %v447_v59 = vld [vmem:[%s2354_s28 + $0x798] sm:$0xff]  ;;  %v449_v60 = vld [vmem:[%s2354_s28 + $0x7a0] sm:$0xff] }
  0x51   : > { %446 = vst [vmem:[%s2359_s29 + $0x3d0] sm:$0xff] %v445_v58  ;;  %v451_v61 = vld [vmem:[%s2354_s28 + $0x7a8] sm:$0xff]  ;;  %448 = vst [vmem:[%s2359_s29 + $0x3d8] sm:$0xff] %v447_v59  ;;  %v453_v62 = vld [vmem:[%s2354_s28 + $0x7b0] sm:$0xff] }
  0x52   : > { %450 = vst [vmem:[%s2359_s29 + $0x3e0] sm:$0xff] %v449_v60  ;;  %452 = vst [vmem:[%s2359_s29 + $0x3e8] sm:$0xff] %v451_v61  ;;  %v455_v63 = vld [vmem:[%s2354_s28 + $0x7b8] sm:$0xff] }
  0x53   : > { %454 = vst [vmem:[%s2359_s29 + $0x3f0] sm:$0xff] %v453_v62  ;;  %456 = vst [vmem:[%s2359_s29 + $0x3f8] sm:$0xff] %v455_v63 }
  0x54 PF: > { %p2031_p8 = scmp.ge.s32.totalorder %s2283_s16, 1  ;;  %p461_p9 = scmp.lt.s32.totalorder %s2283_s16, 3 }
  0x56   : > { %p462_p10 = pnand %p2031_p8, %p461_p9 }
  0x57   : > { %s468_s30 = sand.u32 (!%p462_p10), 1, %s2267_s12  }
  0x58   : > { %465 = sbr.rel (%p462_p10) target bundleno = 441 (0x1b9), region = 51  ;;  %s2032_s4 = sshll.u32 (!%p462_p10), %s468_s30, 10 }
  0x59   : > { %s2625_s7 = scalar_lea.vmem (!%p462_p10), [#allocation2], %s2032_s4  ;;  %s2033_s18 = sshll.u32 (!%p462_p10), %s468_s30, 7 }
  0x5a   : > { %s2790_s12 = scalar_lea.vmem (!%p462_p10), [#allocation3], %s2033_s18 }
  0x5d   : > { %v2285_v0 = vmov 0   ;;  %v643_v1 = vld [vmem:[%s2872_s2] sm:$0xff]  ;;  %v628_v4 = vld [vmem:[%s2625_s7 + $0x388] sm:$0xff]  ;;  %s2201_s19 = sshll.u32 (%p2341_p6), %s2275_s14, 6 }
  0x5e   : > { %1333 = vmatprep.mubr.bf16.mxu0 %v2285_v0  ;;  %1376 = vmatprep.mubr.bf16.mxu1 %v2285_v0  ;;  %v627_v2 = vld [vmem:[%s2625_s7 + $0x380] sm:$0xff]  ;;  %v636_v6 = vld [vmem:[%s2625_s7 + $0x3c8] sm:$0xff]  ;;  %s1866_s24 = scalar_lea.vmem (%p2341_p6), %s2873_s3, %s2201_s19 }
  0x5f   : > { %2243 = vset.pattern.permute.xlu0 %v2285_v0  ;;  %v635_v3 = vld [vmem:[%s2625_s7 + $0x3c0] sm:$0xff]  ;;  %v2150_v10 = vcombine.high %v628_v4, %v636_v6  ;;  %v2149_v11 = vcombine.low %v628_v4, %v636_v6  ;;  %v612_v13 = vld [vmem:[%s2625_s7 + $0x308] sm:$0xff]  ;;  %v630_v4 = vld [vmem:[%s2625_s7 + $0x398] sm:$0xff] }
  0x60   : > { %647 = vperm.xlu0 %2243, %v643_v1   ;;  %v2148_v5 = vcombine.high %v627_v2, %v635_v3  ;;  %v2147_v7 = vcombine.low %v627_v2, %v635_v3  ;;  %v611_v8 = vld [vmem:[%s2625_s7 + $0x300] sm:$0xff]  ;;  %v620_v14 = vld [vmem:[%s2625_s7 + $0x348] sm:$0xff]  ;;  %v629_v2 = vld [vmem:[%s2625_s7 + $0x390] sm:$0xff] }
  0x61   : > { %v619_v9 = vld [vmem:[%s2625_s7 + $0x340] sm:$0xff]  ;;  %v2134_v16 = vcombine.high %v612_v13, %v620_v14  ;;  %v596_v18 = vld [vmem:[%s2625_s7 + $0x288] sm:$0xff]  ;;  %1344 = vmatprep.subr.bf16.mxu1 %v2150_v10  ;;  %v2133_v22 = vcombine.low %v612_v13, %v620_v14  ;;  %v637_v3 = vld [vmem:[%s2625_s7 + $0x3d0] sm:$0xff] }
  0x62   : > { %v2132_v12 = vcombine.high %v611_v8, %v619_v9  ;;  %v595_v15 = vld [vmem:[%s2625_s7 + $0x280] sm:$0xff]  ;;  %1301 = vmatprep.subr.bf16.mxu0 %v2148_v5  ;;  %v604_v19 = vld [vmem:[%s2625_s7 + $0x2c8] sm:$0xff]  ;;  %v2131_v20 = vcombine.low %v611_v8, %v619_v9  ;;  %1345 = vmatpush1.bf16.msra.mxu1 %v2149_v11  ;;  %v638_v5 = vld [vmem:[%s2625_s7 + $0x3d8] sm:$0xff]  ;;  %v2152_v8 = vcombine.high %v629_v2, %v637_v3 }
  0x63   : > { %v603_v17 = vld [vmem:[%s2625_s7 + $0x2c0] sm:$0xff]  ;;  %1302 = vmatpush1.bf16.msra.mxu0 %v2147_v7  ;;  %v644_v21 = vld [vmem:[%s2872_s2 + $0x8] sm:$0xff]  ;;  %1346 = vmatprep.subr.bf16.mxu1 %v2134_v16  ;;  %v2118_v24 = vcombine.high %v596_v18, %v604_v19  ;;  %v2117_v30 = vcombine.low %v596_v18, %v604_v19  ;;  %v2154_v9 = vcombine.high %v630_v4, %v638_v5  ;;  %v613_v10 = vld [vmem:[%s2625_s7 + $0x310] sm:$0xff] }
  0x64   : > { %1303 = vmatprep.subr.bf16.mxu0 %v2132_v12  ;;  %v2116_v23 = vcombine.high %v595_v15, %v603_v17  ;;  %v579_v25 = vld [vmem:[%s2625_s7 + $0x200] sm:$0xff]  ;;  %v580_v27 = vld [vmem:[%s2625_s7 + $0x208] sm:$0xff]  ;;  %652 = vperm.xlu0 %2243, %v644_v21   ;;  %v2115_v29 = vcombine.low %v595_v15, %v603_v17  ;;  %v621_v11 = vld [vmem:[%s2625_s7 + $0x350] sm:$0xff]  ;;  %v2151_v15 = vcombine.low %v629_v2, %v637_v3 }
  0x65   : > { %v587_v26 = vld [vmem:[%s2625_s7 + $0x240] sm:$0xff]  ;;  %v588_v28 = vld [vmem:[%s2625_s7 + $0x248] sm:$0xff]  ;;  %v614_v13 = vld [vmem:[%s2625_s7 + $0x318] sm:$0xff]  ;;  %v2153_v16 = vcombine.low %v630_v4, %v638_v5  ;;  %v2136_v17 = vcombine.high %v613_v10, %v621_v11 }
  0x66   : > { %1347 = vmatpush1.bf16.msra.mxu1 %v2133_v22  ;;  %v2100_v31 = vcombine.high %v579_v25, %v587_v26  ;;  %v2102_v32 = vcombine.high %v580_v27, %v588_v28  ;;  %v563_v33 = vld [vmem:[%s2625_s7 + $0x180] sm:$0xff]  ;;  %v564_v35 = vld [vmem:[%s2625_s7 + $0x188] sm:$0xff]  ;;  %v2099_v37 = vcombine.low %v579_v25, %v587_v26  ;;  %v2101_v38 = vcombine.low %v580_v27, %v588_v28  ;;  %v622_v14 = vld [vmem:[%s2625_s7 + $0x358] sm:$0xff] }
  0x67   : > { %1304 = vmatpush1.bf16.msra.mxu0 %v2131_v20  ;;  %1348 = vmatprep.subr.bf16.mxu1 %v2118_v24  ;;  %v571_v34 = vld [vmem:[%s2625_s7 + $0x1c0] sm:$0xff]  ;;  %v572_v36 = vld [vmem:[%s2625_s7 + $0x1c8] sm:$0xff]  ;;  %v2138_v18 = vcombine.high %v614_v13, %v622_v14  ;;  %v597_v19 = vld [vmem:[%s2625_s7 + $0x290] sm:$0xff]  ;;  %v2137_v24 = vcombine.low %v614_v13, %v622_v14 }
  0x68   : > { %1305 = vmatprep.subr.bf16.mxu0 %v2116_v23  ;;  %v2084_v39 = vcombine.high %v563_v33, %v571_v34  ;;  %v2086_v40 = vcombine.high %v564_v35, %v572_v36  ;;  %v547_v41 = vld [vmem:[%s2625_s7 + $0x100] sm:$0xff]  ;;  %v548_v43 = vld [vmem:[%s2625_s7 + $0x108] sm:$0xff]  ;;  %v2083_v45 = vcombine.low %v563_v33, %v571_v34  ;;  %v2085_v46 = vcombine.low %v564_v35, %v572_v36  ;;  %v605_v20 = vld [vmem:[%s2625_s7 + $0x2d0] sm:$0xff] }
  0x69   : > { %v555_v42 = vld [vmem:[%s2625_s7 + $0x140] sm:$0xff]  ;;  %v556_v44 = vld [vmem:[%s2625_s7 + $0x148] sm:$0xff]  ;;  %v598_v21 = vld [vmem:[%s2625_s7 + $0x298] sm:$0xff]  ;;  %v2135_v23 = vcombine.low %v613_v10, %v621_v11  ;;  %v2120_v25 = vcombine.high %v597_v19, %v605_v20 }
  0x6a   : > { %1349 = vmatpush1.bf16.msra.mxu1 %v2117_v30  ;;  %v2068_v47 = vcombine.high %v547_v41, %v555_v42  ;;  %v2070_v48 = vcombine.high %v548_v43, %v556_v44  ;;  %v531_v49 = vld [vmem:[%s2625_s7 + $0x80] sm:$0xff]  ;;  %v532_v51 = vld [vmem:[%s2625_s7 + $0x88] sm:$0xff]  ;;  %v2067_v53 = vcombine.low %v547_v41, %v555_v42  ;;  %v2069_v54 = vcombine.low %v548_v43, %v556_v44  ;;  %v606_v22 = vld [vmem:[%s2625_s7 + $0x2d8] sm:$0xff] }
  0x6b   : > { %1306 = vmatpush1.bf16.msra.mxu0 %v2115_v29  ;;  %1350 = vmatprep.subr.bf16.mxu1 %v2102_v32  ;;  %v539_v50 = vld [vmem:[%s2625_s7 + $0xc0] sm:$0xff]  ;;  %v540_v52 = vld [vmem:[%s2625_s7 + $0xc8] sm:$0xff]  ;;  %v2122_v26 = vcombine.high %v598_v21, %v606_v22  ;;  %v581_v27 = vld [vmem:[%s2625_s7 + $0x210] sm:$0xff]  ;;  %v2121_v32 = vcombine.low %v598_v21, %v606_v22 }
  0x6c   : > { %1307 = vmatprep.subr.bf16.mxu0 %v2100_v31  ;;  %v2052_v55 = vcombine.high %v531_v49, %v539_v50  ;;  %v2054_v56 = vcombine.high %v532_v51, %v540_v52  ;;  %v515_v57 = vld [vmem:[%s2625_s7] sm:$0xff]  ;;  %v516_v59 = vld [vmem:[%s2625_s7 + $0x8] sm:$0xff]  ;;  %v2051_v61 = vcombine.low %v531_v49, %v539_v50  ;;  %v2053_v62 = vcombine.low %v532_v51, %v540_v52  ;;  %v589_v28 = vld [vmem:[%s2625_s7 + $0x250] sm:$0xff] }
  0x6d   : > { %v523_v58 = vld [vmem:[%s2625_s7 + $0x40] sm:$0xff]  ;;  %v524_v60 = vld [vmem:[%s2625_s7 + $0x48] sm:$0xff]  ;;  %v582_v29 = vld [vmem:[%s2625_s7 + $0x218] sm:$0xff]  ;;  %v2119_v31 = vcombine.low %v597_v19, %v605_v20  ;;  %v2104_v33 = vcombine.high %v581_v27, %v589_v28 }
  0x6e   : > { %1351 = vmatpush1.bf16.msra.mxu1 %v2101_v38  ;;  %v2036_v63 = vcombine.high %v515_v57, %v523_v58  ;;  %v2038_v1 = vcombine.high %v516_v59, %v524_v60  ;;  %v2035_v6 = vcombine.low %v515_v57, %v523_v58  ;;  %v2037_v7 = vcombine.low %v516_v59, %v524_v60  ;;  %v2671_v12 = vld [vmem:[%s2870_s0] sm:$0xff]   ;;  %v590_v30 = vld [vmem:[%s2625_s7 + $0x258] sm:$0xff]  ;;  %v565_v35 = vld [vmem:[%s2625_s7 + $0x190] sm:$0xff] }
  0x6f   : > { %1308 = vmatpush1.bf16.msra.mxu0 %v2099_v37  ;;  %1352 = vmatprep.subr.bf16.mxu1 %v2086_v40  ;;  %v2106_v34 = vcombine.high %v582_v29, %v590_v30  ;;  %v573_v36 = vld [vmem:[%s2625_s7 + $0x1d0] sm:$0xff]  ;;  %v566_v37 = vld [vmem:[%s2625_s7 + $0x198] sm:$0xff]  ;;  %v2105_v40 = vcombine.low %v582_v29, %v590_v30  ;;  %v631_v4 = vld [vmem:[%s2625_s7 + $0x3a0] sm:$0xff] }
  0x70   : > { %1309 = vmatprep.subr.bf16.mxu0 %v2084_v39  ;;  %v574_v38 = vld [vmem:[%s2625_s7 + $0x1d8] sm:$0xff]  ;;  %v2103_v39 = vcombine.low %v581_v27, %v589_v28  ;;  %v2088_v41 = vcombine.high %v565_v35, %v573_v36  ;;  %v549_v43 = vld [vmem:[%s2625_s7 + $0x110] sm:$0xff]  ;;  %v639_v5 = vld [vmem:[%s2625_s7 + $0x3e0] sm:$0xff] }
  0x71   : > { %v2090_v42 = vcombine.high %v566_v37, %v574_v38  ;;  %v557_v44 = vld [vmem:[%s2625_s7 + $0x150] sm:$0xff]  ;;  %v2156_v10 = vcombine.high %v631_v4, %v639_v5  ;;  %v615_v13 = vld [vmem:[%s2625_s7 + $0x320] sm:$0xff] }
  0x72   : > { %1353 = vmatpush1.bf16.msra.mxu1 %v2085_v46  ;;  %v558_v46 = vld [vmem:[%s2625_s7 + $0x158] sm:$0xff]  ;;  %v2072_v49 = vcombine.high %v549_v43, %v557_v44  ;;  %v533_v51 = vld [vmem:[%s2625_s7 + $0x90] sm:$0xff]  ;;  %v623_v14 = vld [vmem:[%s2625_s7 + $0x360] sm:$0xff] }
  0x73   : > { %1310 = vmatpush1.bf16.msra.mxu0 %v2083_v45  ;;  %1354 = vmatprep.subr.bf16.mxu1 %v2070_v48  ;;  %v550_v45 = vld [vmem:[%s2625_s7 + $0x118] sm:$0xff]  ;;  %v2089_v48 = vcombine.low %v566_v37, %v574_v38  ;;  %v541_v52 = vld [vmem:[%s2625_s7 + $0xd0] sm:$0xff]  ;;  %v2140_v19 = vcombine.high %v615_v13, %v623_v14  ;;  %v599_v21 = vld [vmem:[%s2625_s7 + $0x2a0] sm:$0xff] }
  0x74   : > { %1311 = vmatprep.subr.bf16.mxu0 %v2068_v47  ;;  %v2087_v47 = vcombine.low %v565_v35, %v573_v36  ;;  %v2074_v50 = vcombine.high %v550_v45, %v558_v46  ;;  %v2056_v57 = vcombine.high %v533_v51, %v541_v52  ;;  %v517_v59 = vld [vmem:[%s2625_s7 + $0x10] sm:$0xff]  ;;  %v607_v22 = vld [vmem:[%s2625_s7 + $0x2e0] sm:$0xff] }
  0x75   : > { %v525_v60 = vld [vmem:[%s2625_s7 + $0x50] sm:$0xff]  ;;  %v2124_v27 = vcombine.high %v599_v21, %v607_v22  ;;  %v583_v29 = vld [vmem:[%s2625_s7 + $0x220] sm:$0xff] }
  0x76   : > { %1355 = vmatpush1.bf16.msra.mxu1 %v2069_v54  ;;  %v542_v54 = vld [vmem:[%s2625_s7 + $0xd8] sm:$0xff]  ;;  %v2040_v2 = vcombine.high %v517_v59, %v525_v60  ;;  %v591_v30 = vld [vmem:[%s2625_s7 + $0x260] sm:$0xff] }
  0x77   : > { %1312 = vmatpush1.bf16.msra.mxu0 %v2067_v53  ;;  %1356 = vmatprep.subr.bf16.mxu1 %v2054_v56  ;;  %v534_v53 = vld [vmem:[%s2625_s7 + $0x98] sm:$0xff]  ;;  %v2073_v56 = vcombine.low %v550_v45, %v558_v46  ;;  %v2108_v35 = vcombine.high %v583_v29, %v591_v30  ;;  %v567_v37 = vld [vmem:[%s2625_s7 + $0x1a0] sm:$0xff] }
  0x78   : > { %1313 = vmatprep.subr.bf16.mxu0 %v2052_v55  ;;  %v2071_v55 = vcombine.low %v549_v43, %v557_v44  ;;  %v2058_v58 = vcombine.high %v534_v53, %v542_v54  ;;  %v575_v38 = vld [vmem:[%s2625_s7 + $0x1e0] sm:$0xff] }
  0x79   : > { %v2092_v43 = vcombine.high %v567_v37, %v575_v38  ;;  %v551_v45 = vld [vmem:[%s2625_s7 + $0x120] sm:$0xff] }
  0x7a   : > { %1357 = vmatpush1.bf16.msra.mxu1 %v2053_v62  ;;  %v526_v62 = vld [vmem:[%s2625_s7 + $0x58] sm:$0xff]  ;;  %v559_v46 = vld [vmem:[%s2625_s7 + $0x160] sm:$0xff] }
  0x7b   : > { %1314 = vmatpush1.bf16.msra.mxu0 %v2051_v61  ;;  %1358 = vmatprep.subr.bf16.mxu1 %v2038_v1  ;;  %v518_v61 = vld [vmem:[%s2625_s7 + $0x18] sm:$0xff]  ;;  %v2057_v1 = vcombine.low %v534_v53, %v542_v54  ;;  %v535_v53 = vld [vmem:[%s2625_s7 + $0xa0] sm:$0xff] }
  0x7c   : > { %1315 = vmatprep.subr.bf16.mxu0 %v2036_v63  ;;  %v2055_v63 = vcombine.low %v533_v51, %v541_v52  ;;  %v2042_v3 = vcombine.high %v518_v61, %v526_v62  ;;  %v2076_v51 = vcombine.high %v551_v45, %v559_v46  ;;  %v543_v54 = vld [vmem:[%s2625_s7 + $0xe0] sm:$0xff] }
  0x7e   : > { %1359 = vmatpush1.bf16.msra.mxu1 %v2037_v7  ;;  %v640_v7 = vld [vmem:[%s2625_s7 + $0x3e8] sm:$0xff] }
  0x7f   : > { %1316 = vmatpush1.bf16.msra.mxu0 %v2035_v6  ;;  %1430 = vmatprep.subr.bf16.mxu1 %v2154_v9  ;;  %v632_v6 = vld [vmem:[%s2625_s7 + $0x3a8] sm:$0xff]  ;;  %v2041_v9 = vcombine.low %v518_v61, %v526_v62  ;;  %v519_v61 = vld [vmem:[%s2625_s7 + $0x20] sm:$0xff] }
  0x80   : > { %1387 = vmatprep.subr.bf16.mxu0 %v2152_v8  ;;  %v2039_v8 = vcombine.low %v517_v59, %v525_v60  ;;  %v2158_v11 = vcombine.high %v632_v6, %v640_v7  ;;  %v2060_v59 = vcombine.high %v535_v53, %v543_v54  ;;  %v527_v62 = vld [vmem:[%s2625_s7 + $0x60] sm:$0xff] }
  0x81   : > { %1377 = vmatmul.mubr.bf16.vlgmr.msra.gmra.mxu1 %v2671_v12 }
  0x82   : > { %1334 = vmatmul.mubr.bf16.vlgmr.msra.gmra.mxu0 %v2671_v12  ;;  %1431 = vmatpush1.bf16.msra.mxu1 %v2153_v16  ;;  %v624_v16 = vld [vmem:[%s2625_s7 + $0x368] sm:$0xff] }
  0x83   : > { %1388 = vmatpush1.bf16.msra.mxu0 %v2151_v15  ;;  %1432 = vmatprep.subr.bf16.mxu1 %v2138_v18  ;;  %v616_v15 = vld [vmem:[%s2625_s7 + $0x328] sm:$0xff]  ;;  %v2157_v18 = vcombine.low %v632_v6, %v640_v7  ;;  %v633_v6 = vld [vmem:[%s2625_s7 + $0x3b0] sm:$0xff] }
  0x84   : > { %1389 = vmatprep.subr.bf16.mxu0 %v2136_v17  ;;  %1419 = vmatprep.mubr.bf16.mxu0 %v2285_v0  ;;  %v2155_v17 = vcombine.low %v631_v4, %v639_v5  ;;  %v2142_v20 = vcombine.high %v616_v15, %v624_v16  ;;  %v2044_v4 = vcombine.high %v519_v61, %v527_v62  ;;  %v641_v7 = vld [vmem:[%s2625_s7 + $0x3f0] sm:$0xff] }
  0x85   : > { %1462 = vmatprep.mubr.bf16.mxu1 %v2285_v0 }
  0x86   : > { %1433 = vmatpush1.bf16.msra.mxu1 %v2137_v24  ;;  %v608_v24 = vld [vmem:[%s2625_s7 + $0x2e8] sm:$0xff] }
  0x87   : > { %1390 = vmatpush1.bf16.msra.mxu0 %v2135_v23  ;;  %1434 = vmatprep.subr.bf16.mxu1 %v2122_v26  ;;  %v600_v23 = vld [vmem:[%s2625_s7 + $0x2a8] sm:$0xff]  ;;  %v2141_v26 = vcombine.low %v616_v15, %v624_v16  ;;  %v617_v15 = vld [vmem:[%s2625_s7 + $0x330] sm:$0xff] }
  0x88   : > { %1391 = vmatprep.subr.bf16.mxu0 %v2120_v25  ;;  %v2139_v25 = vcombine.low %v615_v13, %v623_v14  ;;  %v2126_v28 = vcombine.high %v600_v23, %v608_v24  ;;  %v2160_v13 = vcombine.high %v633_v6, %v641_v7  ;;  %v625_v16 = vld [vmem:[%s2625_s7 + $0x370] sm:$0xff] }
  0x8a   : > { %1435 = vmatpush1.bf16.msra.mxu1 %v2121_v32  ;;  %v592_v32 = vld [vmem:[%s2625_s7 + $0x268] sm:$0xff] }
  0x8b   : > { %1392 = vmatpush1.bf16.msra.mxu0 %v2119_v31  ;;  %1436 = vmatprep.subr.bf16.mxu1 %v2106_v34  ;;  %v584_v31 = vld [vmem:[%s2625_s7 + $0x228] sm:$0xff]  ;;  %v2125_v34 = vcombine.low %v600_v23, %v608_v24  ;;  %v601_v23 = vld [vmem:[%s2625_s7 + $0x2b0] sm:$0xff] }
  0x8c   : > { %1393 = vmatprep.subr.bf16.mxu0 %v2104_v33  ;;  %v2123_v33 = vcombine.low %v599_v21, %v607_v22  ;;  %v2110_v36 = vcombine.high %v584_v31, %v592_v32  ;;  %v2144_v21 = vcombine.high %v617_v15, %v625_v16  ;;  %v609_v24 = vld [vmem:[%s2625_s7 + $0x2f0] sm:$0xff] }
  0x8e   : > { %1437 = vmatpush1.bf16.msra.mxu1 %v2105_v40  ;;  %v576_v40 = vld [vmem:[%s2625_s7 + $0x1e8] sm:$0xff] }
  0x8f   : > { %1394 = vmatpush1.bf16.msra.mxu0 %v2103_v39  ;;  %1438 = vmatprep.subr.bf16.mxu1 %v2090_v42  ;;  %v568_v39 = vld [vmem:[%s2625_s7 + $0x1a8] sm:$0xff]  ;;  %v2109_v42 = vcombine.low %v584_v31, %v592_v32  ;;  %v585_v31 = vld [vmem:[%s2625_s7 + $0x230] sm:$0xff] }
  0x90   : > { %1395 = vmatprep.subr.bf16.mxu0 %v2088_v41  ;;  %v2107_v41 = vcombine.low %v583_v29, %v591_v30  ;;  %v2094_v44 = vcombine.high %v568_v39, %v576_v40  ;;  %v2128_v29 = vcombine.high %v601_v23, %v609_v24  ;;  %v593_v32 = vld [vmem:[%s2625_s7 + $0x270] sm:$0xff] }
  0x92   : > { %1439 = vmatpush1.bf16.msra.mxu1 %v2089_v48  ;;  %v560_v48 = vld [vmem:[%s2625_s7 + $0x168] sm:$0xff] }
  0x93   : > { %1396 = vmatpush1.bf16.msra.mxu0 %v2087_v47  ;;  %1440 = vmatprep.subr.bf16.mxu1 %v2074_v50  ;;  %v552_v47 = vld [vmem:[%s2625_s7 + $0x128] sm:$0xff]  ;;  %v2093_v50 = vcombine.low %v568_v39, %v576_v40  ;;  %v569_v39 = vld [vmem:[%s2625_s7 + $0x1b0] sm:$0xff] }
  0x94   : > { %1397 = vmatprep.subr.bf16.mxu0 %v2072_v49  ;;  %v2091_v49 = vcombine.low %v567_v37, %v575_v38  ;;  %v2078_v52 = vcombine.high %v552_v47, %v560_v48  ;;  %v2112_v37 = vcombine.high %v585_v31, %v593_v32  ;;  %v577_v40 = vld [vmem:[%s2625_s7 + $0x1f0] sm:$0xff] }
  0x96   : > { %1441 = vmatpush1.bf16.msra.mxu1 %v2073_v56  ;;  %v544_v56 = vld [vmem:[%s2625_s7 + $0xe8] sm:$0xff] }
  0x97   : > { %1398 = vmatpush1.bf16.msra.mxu0 %v2071_v55  ;;  %1442 = vmatprep.subr.bf16.mxu1 %v2058_v58  ;;  %v536_v55 = vld [vmem:[%s2625_s7 + $0xa8] sm:$0xff]  ;;  %v2077_v58 = vcombine.low %v552_v47, %v560_v48  ;;  %v561_v47 = vld [vmem:[%s2625_s7 + $0x170] sm:$0xff]  ;;  %v554_v48 = vld [vmem:[%s2625_s7 + $0x138] sm:$0xff] }
  0x98   : > { %1399 = vmatprep.subr.bf16.mxu0 %v2056_v57  ;;  %v2075_v57 = vcombine.low %v551_v45, %v559_v46  ;;  %v2062_v60 = vcombine.high %v536_v55, %v544_v56  ;;  %v553_v46 = vld [vmem:[%s2625_s7 + $0x130] sm:$0xff] }
  0x9a   : > { %1443 = vmatpush1.bf16.msra.mxu1 %v2057_v1  ;;  %v528_v1 = vld [vmem:[%s2625_s7 + $0x68] sm:$0xff] }
  0x9b   : > { %1400 = vmatpush1.bf16.msra.mxu0 %v2055_v63  ;;  %1444 = vmatprep.subr.bf16.mxu1 %v2042_v3  ;;  %v520_v63 = vld [vmem:[%s2625_s7 + $0x28] sm:$0xff]  ;;  %v2061_v3 = vcombine.low %v536_v55, %v544_v56  ;;  %v545_v55 = vld [vmem:[%s2625_s7 + $0xf0] sm:$0xff]  ;;  %v538_v56 = vld [vmem:[%s2625_s7 + $0xb8] sm:$0xff] }
  0x9c   : > { %1401 = vmatprep.subr.bf16.mxu0 %v2040_v2  ;;  %v2059_v2 = vcombine.low %v535_v53, %v543_v54  ;;  %v2046_v5 = vcombine.high %v520_v63, %v528_v1  ;;  %v537_v54 = vld [vmem:[%s2625_s7 + $0xb0] sm:$0xff] }
  0x9e   : > { %1445 = vmatpush1.bf16.msra.mxu1 %v2041_v9  ;;  %v642_v9 = vld [vmem:[%s2625_s7 + $0x3f8] sm:$0xff] }
  0x9f   : > { %1402 = vmatpush1.bf16.msra.mxu0 %v2039_v8  ;;  %1516 = vmatprep.subr.bf16.mxu1 %v2158_v11  ;;  %v634_v8 = vld [vmem:[%s2625_s7 + $0x3b8] sm:$0xff]  ;;  %v2045_v11 = vcombine.low %v520_v63, %v528_v1  ;;  %v529_v63 = vld [vmem:[%s2625_s7 + $0x70] sm:$0xff] }
  0xa0   : > { %1473 = vmatprep.subr.bf16.mxu0 %v2156_v10  ;;  %v2043_v10 = vcombine.low %v519_v61, %v527_v62  ;;  %v2162_v14 = vcombine.high %v634_v8, %v642_v9  ;;  %v521_v62 = vld [vmem:[%s2625_s7 + $0x30] sm:$0xff]  ;;  %v522_v1 = vld [vmem:[%s2625_s7 + $0x38] sm:$0xff] }
  0xa1   : > { %1463 = vmatmul.mubr.bf16.vlgmr.msra.gmra.mxu1 %v2671_v12 }
  0xa2   : > { %1420 = vmatmul.mubr.bf16.vlgmr.msra.gmra.mxu0 %v2671_v12  ;;  %1517 = vmatpush1.bf16.msra.mxu1 %v2157_v18  ;;  %v626_v18 = vld [vmem:[%s2625_s7 + $0x378] sm:$0xff] }
  0xa3   : > { %1474 = vmatpush1.bf16.msra.mxu0 %v2155_v17  ;;  %1518 = vmatprep.subr.bf16.mxu1 %v2142_v20  ;;  %v618_v17 = vld [vmem:[%s2625_s7 + $0x338] sm:$0xff]  ;;  %v2161_v20 = vcombine.low %v634_v8, %v642_v9 }
  0xa4   : > { %1475 = vmatprep.subr.bf16.mxu0 %v2140_v19  ;;  %1505 = vmatprep.mubr.bf16.mxu0 %v2285_v0  ;;  %v2159_v19 = vcombine.low %v633_v6, %v641_v7  ;;  %v2146_v22 = vcombine.high %v618_v17, %v626_v18  ;;  %v2047_v7 = vcombine.low %v521_v62, %v529_v63 }
  0xa5   : > { %1548 = vmatprep.mubr.bf16.mxu1 %v2285_v0 }
  0xa6   : > { %1519 = vmatpush1.bf16.msra.mxu1 %v2141_v26  ;;  %v610_v26 = vld [vmem:[%s2625_s7 + $0x2f8] sm:$0xff] }
  0xa7   : > { %1476 = vmatpush1.bf16.msra.mxu0 %v2139_v25  ;;  %1520 = vmatprep.subr.bf16.mxu1 %v2126_v28  ;;  %v602_v25 = vld [vmem:[%s2625_s7 + $0x2b8] sm:$0xff]  ;;  %v2145_v28 = vcombine.low %v618_v17, %v626_v18 }
  0xa8   : > { %1477 = vmatprep.subr.bf16.mxu0 %v2124_v27  ;;  %v2143_v27 = vcombine.low %v617_v15, %v625_v16  ;;  %v2130_v30 = vcombine.high %v602_v25, %v610_v26 }
  0xaa   : > { %1521 = vmatpush1.bf16.msra.mxu1 %v2125_v34  ;;  %v594_v34 = vld [vmem:[%s2625_s7 + $0x278] sm:$0xff] }
  0xab   : > { %1478 = vmatpush1.bf16.msra.mxu0 %v2123_v33  ;;  %1522 = vmatprep.subr.bf16.mxu1 %v2110_v36  ;;  %v586_v33 = vld [vmem:[%s2625_s7 + $0x238] sm:$0xff]  ;;  %v2129_v36 = vcombine.low %v602_v25, %v610_v26 }
  0xac   : > { %1479 = vmatprep.subr.bf16.mxu0 %v2108_v35  ;;  %v2127_v35 = vcombine.low %v601_v23, %v609_v24  ;;  %v2114_v38 = vcombine.high %v586_v33, %v594_v34 }
  0xae   : > { %1523 = vmatpush1.bf16.msra.mxu1 %v2109_v42  ;;  %v578_v42 = vld [vmem:[%s2625_s7 + $0x1f8] sm:$0xff] }
  0xaf   : > { %1480 = vmatpush1.bf16.msra.mxu0 %v2107_v41  ;;  %1524 = vmatprep.subr.bf16.mxu1 %v2094_v44  ;;  %v570_v41 = vld [vmem:[%s2625_s7 + $0x1b8] sm:$0xff]  ;;  %v2096_v44 = vcombine.high %v569_v39, %v577_v40 }
  0xb0   : > { %1481 = vmatprep.subr.bf16.mxu0 %v2092_v43  ;;  %v2111_v43 = vcombine.low %v585_v31, %v593_v32  ;;  %v2098_v45 = vcombine.high %v570_v41, %v578_v42 }
  0xb2   : > { %1525 = vmatpush1.bf16.msra.mxu1 %v2093_v50  ;;  %v2095_v50 = vcombine.low %v569_v39, %v577_v40 }
  0xb3   : > { %1482 = vmatpush1.bf16.msra.mxu0 %v2091_v49  ;;  %1526 = vmatprep.subr.bf16.mxu1 %v2078_v52  ;;  %v562_v49 = vld [vmem:[%s2625_s7 + $0x178] sm:$0xff]  ;;  %v2080_v52 = vcombine.high %v553_v46, %v561_v47 }
  0xb4   : > { %1483 = vmatprep.subr.bf16.mxu0 %v2076_v51  ;;  %v2097_v51 = vcombine.low %v570_v41, %v578_v42  ;;  %v2082_v53 = vcombine.high %v554_v48, %v562_v49 }
  0xb6   : > { %1527 = vmatpush1.bf16.msra.mxu1 %v2077_v58  ;;  %v2079_v58 = vcombine.low %v553_v46, %v561_v47 }
  0xb7   : > { %1484 = vmatpush1.bf16.msra.mxu0 %v2075_v57  ;;  %1528 = vmatprep.subr.bf16.mxu1 %v2062_v60  ;;  %v546_v57 = vld [vmem:[%s2625_s7 + $0xf8] sm:$0xff]  ;;  %v2064_v60 = vcombine.high %v537_v54, %v545_v55 }
  0xb8   : > { %1485 = vmatprep.subr.bf16.mxu0 %v2060_v59  ;;  %v2081_v59 = vcombine.low %v554_v48, %v562_v49  ;;  %v2066_v61 = vcombine.high %v538_v56, %v546_v57 }
  0xba   : > { %1529 = vmatpush1.bf16.msra.mxu1 %v2061_v3  ;;  %v2063_v3 = vcombine.low %v537_v54, %v545_v55 }
  0xbb   : > { %1486 = vmatpush1.bf16.msra.mxu0 %v2059_v2  ;;  %1530 = vmatprep.subr.bf16.mxu1 %v2046_v5  ;;  %v530_v2 = vld [vmem:[%s2625_s7 + $0x78] sm:$0xff]  ;;  %v2048_v5 = vcombine.high %v521_v62, %v529_v63 }
  0xbc   : > { %1487 = vmatprep.subr.bf16.mxu0 %v2044_v4  ;;  %v2065_v4 = vcombine.low %v538_v56, %v546_v57  ;;  %v2050_v6 = vcombine.high %v522_v1, %v530_v2  ;;  %v2049_v8 = vcombine.low %v522_v1, %v530_v2 }
  0xbe   : > { %1531 = vmatpush1.bf16.msra.mxu1 %v2045_v11 }
  0xbf   : > { %1488 = vmatpush1.bf16.msra.mxu0 %v2043_v10  ;;  %1602 = vmatprep.subr.bf16.mxu1 %v2162_v14 }
  0xc0   : > { %1559 = vmatprep.subr.bf16.mxu0 %v2160_v13 }
  0xc1   : > { %1549 = vmatmul.mubr.bf16.vlgmr.msra.gmra.mxu1 %v2671_v12 }
  0xc2   : > { %1506 = vmatmul.mubr.bf16.vlgmr.msra.gmra.mxu0 %v2671_v12  ;;  %1603 = vmatpush1.bf16.msra.mxu1 %v2161_v20 }
  0xc3   : > { %1560 = vmatpush1.bf16.msra.mxu0 %v2159_v19  ;;  %1604 = vmatprep.subr.bf16.mxu1 %v2146_v22 }
  0xc4   : > { %1561 = vmatprep.subr.bf16.mxu0 %v2144_v21  ;;  %1591 = vmatprep.mubr.bf16.mxu0 %v2285_v0 }
  0xc5   : > { %1634 = vmatprep.mubr.bf16.mxu1 %v2285_v0  ;;  %v2113_v0 = vcombine.low %v586_v33, %v594_v34 }
  0xc6   : > { %1605 = vmatpush1.bf16.msra.mxu1 %v2145_v28 }
  0xc7   : > { %1562 = vmatpush1.bf16.msra.mxu0 %v2143_v27  ;;  %1606 = vmatprep.subr.bf16.mxu1 %v2130_v30 }
  0xc8   : > { %1563 = vmatprep.subr.bf16.mxu0 %v2128_v29 }
  0xca   : > { %1607 = vmatpush1.bf16.msra.mxu1 %v2129_v36 }
  0xcb   : > { %1564 = vmatpush1.bf16.msra.mxu0 %v2127_v35  ;;  %1608 = vmatprep.subr.bf16.mxu1 %v2114_v38 }
  0xcc   : > { %1565 = vmatprep.subr.bf16.mxu0 %v2112_v37 }
  0xce   : > { %1609 = vmatpush1.bf16.msra.mxu1 %v2113_v0 }
  0xcf   : > { %1566 = vmatpush1.bf16.msra.mxu0 %v2111_v43  ;;  %1610 = vmatprep.subr.bf16.mxu1 %v2098_v45 }
  0xd0   : > { %1567 = vmatprep.subr.bf16.mxu0 %v2096_v44 }
  0xd2   : > { %1611 = vmatpush1.bf16.msra.mxu1 %v2097_v51 }
  0xd3   : > { %1568 = vmatpush1.bf16.msra.mxu0 %v2095_v50  ;;  %1612 = vmatprep.subr.bf16.mxu1 %v2082_v53 }
  0xd4   : > { %1569 = vmatprep.subr.bf16.mxu0 %v2080_v52 }
  0xd6   : > { %1613 = vmatpush1.bf16.msra.mxu1 %v2081_v59 }
  0xd7   : > { %1570 = vmatpush1.bf16.msra.mxu0 %v2079_v58  ;;  %1614 = vmatprep.subr.bf16.mxu1 %v2066_v61 }
  0xd8   : > { %1571 = vmatprep.subr.bf16.mxu0 %v2064_v60 }
  0xda   : > { %1615 = vmatpush1.bf16.msra.mxu1 %v2065_v4 }
  0xdb   : > { %1572 = vmatpush1.bf16.msra.mxu0 %v2063_v3  ;;  %1616 = vmatprep.subr.bf16.mxu1 %v2050_v6  ;;  %v2777_v9 = vpop.permute.xlu0 %647 }
  0xdc   : > { %1573 = vmatprep.subr.bf16.mxu0 %v2048_v5 }
  0xde   : > { %1617 = vmatpush1.bf16.msra.mxu1 %v2049_v8 }
  0xdf   : > { %1574 = vmatpush1.bf16.msra.mxu0 %v2047_v7  ;;  %v2781_v16 = vpop.permute.xlu0 %652 }
  0xe1   : > { %1635 = vmatmul.mubr.bf16.vlgmr.msra.gmra.mxu1 %v2671_v12 }
  0xe2   : > { %1592 = vmatmul.mubr.bf16.vlgmr.msra.gmra.mxu0 %v2671_v12 }
 0x141   : > { %v1378_v13 = vpop.f32.mrf.mxu1 }
 0x142   : > { %v1335_v10 = vpop.f32.mrf.mxu0  ;;  %v1379_v14 = vadd.f32 %v1378_v13, %v2777_v9 }
 0x143   : > { %v1336_v11 = vadd.f32 %v1335_v10, %v2777_v9  ;;  %v1380_v19 = vpop.f32.mrf.mxu1 }
 0x144   : > { %v1337_v15 = vpop.f32.mrf.mxu0  ;;  %v1679_v20 = vmul.f32 0.2, %v1379_v14  ;;  %v1381_v12 = vadd.f32 %v1380_v19, %v2777_v9  ;;  %vm1647_vm1 = vcmp.gt.f32.partialorder %v1379_v14, 0.0 }
 0x145   : > { %v1677_v17 = vmul.f32 0.2, %v1336_v11  ;;  %v1338_v18 = vadd.f32 %v1337_v15, %v2777_v9  ;;  %vm1645_vm0 = vcmp.gt.f32.partialorder %v1336_v11, 0.0  ;;  %v1382_v24 = vpop.f32.mrf.mxu1 }
 0x146   : > { %v1339_v21 = vpop.f32.mrf.mxu0  ;;  %vm1648_vm3 = vcmp.gt.f32.partialorder %v1381_v12, 0.0  ;;  %v1680_v25 = vmul.f32 0.2, %v1381_v12  ;;  %v1383_v26 = vadd.f32 %v1382_v24, %v2781_v16  ;;  %v1711_v33 = vsel %vm1647_vm1, %v1379_v14, %v1679_v20 }
 0x147   : > { %vm1646_vm2 = vcmp.gt.f32.partialorder %v1338_v18, 0.0  ;;  %v1678_v22 = vmul.f32 0.2, %v1338_v18  ;;  %v1340_v23 = vadd.f32 %v1339_v21, %v2781_v16  ;;  %v1709_v28 = vsel %vm1645_vm0, %v1336_v11, %v1677_v17  ;;  %v1384_v32 = vpop.f32.mrf.mxu1 }
 0x148   : > { %v1341_v27 = vpop.f32.mrf.mxu0  ;;  %v1712_v35 = vsel %vm1648_vm3, %v1381_v12, %v1680_v25  ;;  %v1695_v38 = vmul.f32 0.2, %v1383_v26  ;;  %v1385_v39 = vadd.f32 %v1384_v32, %v2781_v16  ;;  %vm1663_vm6 = vcmp.gt.f32.partialorder %v1383_v26, 0.0 }
 0x149   : > { %v1710_v29 = vsel %vm1646_vm2, %v1338_v18, %v1678_v22  ;;  %v1693_v30 = vmul.f32 0.2, %v1340_v23  ;;  %v1342_v31 = vadd.f32 %v1341_v27, %v2781_v16  ;;  %vm1661_vm4 = vcmp.gt.f32.partialorder %v1340_v23, 0.0 }
 0x14a   : > { %v2185_v34 = vpack.c.bf16 %v1710_v29, %v1709_v28  ;;  %v2186_v36 = vpack.c.bf16 %v1712_v35, %v1711_v33  ;;  %vm1664_vm7 = vcmp.gt.f32.partialorder %v1385_v39, 0.0  ;;  %v1696_v43 = vmul.f32 0.2, %v1385_v39 }
 0x14b   : > { %vm1662_vm5 = vcmp.gt.f32.partialorder %v1342_v31, 0.0  ;;  %v1694_v37 = vmul.f32 0.2, %v1342_v31  ;;  %v1725_v40 = vsel %vm1661_vm4, %v1340_v23, %v1693_v30  ;;  %v1727_v0 = vsel %vm1663_vm6, %v1383_v26, %v1695_v38 }
 0x14c   : > { %1837 = vst [vmem:[%s2790_s12] sm:$0xff] %v2185_v34  ;;  %1838 = vst [vmem:[%s2790_s12 + $0x8] sm:$0xff] %v2186_v36  ;;  %v1728_v44 = vsel %vm1664_vm7, %v1385_v39, %v1696_v43 }
 0x14d   : > { %v1726_v41 = vsel %vm1662_vm5, %v1342_v31, %v1694_v37  ;;  %v2194_v45 = vpack.c.bf16 %v1728_v44, %v1727_v0 }
 0x14e   : > { %v2193_v42 = vpack.c.bf16 %v1726_v41, %v1725_v40 }
 0x14f   : > { %1846 = vst [vmem:[%s2790_s12 + $0x48] sm:$0xff] %v2194_v45 }
 0x150   : > { %1845 = vst [vmem:[%s2790_s12 + $0x40] sm:$0xff] %v2193_v42 }
 0x161   : > { %v1464_v48 = vpop.f32.mrf.mxu1 }
 0x162   : > { %v1421_v46 = vpop.f32.mrf.mxu0  ;;  %v1465_v49 = vadd.f32 %v1464_v48, %v2777_v9 }
 0x163   : > { %v1422_v47 = vadd.f32 %v1421_v46, %v2777_v9  ;;  %v1466_v53 = vpop.f32.mrf.mxu1 }
 0x164   : > { %v1423_v50 = vpop.f32.mrf.mxu0  ;;  %v1683_v54 = vmul.f32 0.2, %v1465_v49  ;;  %v1467_v55 = vadd.f32 %v1466_v53, %v2777_v9  ;;  %vm1651_vm9 = vcmp.gt.f32.partialorder %v1465_v49, 0.0 }
 0x165   : > { %v1681_v51 = vmul.f32 0.2, %v1422_v47  ;;  %v1424_v52 = vadd.f32 %v1423_v50, %v2777_v9  ;;  %vm1649_vm8 = vcmp.gt.f32.partialorder %v1422_v47, 0.0  ;;  %v1468_v59 = vpop.f32.mrf.mxu1 }
 0x166   : > { %v1425_v56 = vpop.f32.mrf.mxu0  ;;  %vm1652_vm11 = vcmp.gt.f32.partialorder %v1467_v55, 0.0  ;;  %v1684_v60 = vmul.f32 0.2, %v1467_v55  ;;  %v1469_v61 = vadd.f32 %v1468_v59, %v2781_v16  ;;  %v1715_v5 = vsel %vm1651_vm9, %v1465_v49, %v1683_v54 }
 0x167   : > { %vm1650_vm10 = vcmp.gt.f32.partialorder %v1424_v52, 0.0  ;;  %v1682_v57 = vmul.f32 0.2, %v1424_v52  ;;  %v1426_v58 = vadd.f32 %v1425_v56, %v2781_v16  ;;  %v1713_v63 = vsel %vm1649_vm8, %v1422_v47, %v1681_v51  ;;  %v1470_v4 = vpop.f32.mrf.mxu1 }
 0x168   : > { %v1427_v62 = vpop.f32.mrf.mxu0  ;;  %v1716_v7 = vsel %vm1652_vm11, %v1467_v55, %v1684_v60  ;;  %v1699_v11 = vmul.f32 0.2, %v1469_v61  ;;  %v1471_v13 = vadd.f32 %v1470_v4, %v2781_v16  ;;  %vm1667_vm14 = vcmp.gt.f32.partialorder %v1469_v61, 0.0 }
 0x169   : > { %v1714_v1 = vsel %vm1650_vm10, %v1424_v52, %v1682_v57  ;;  %v1697_v2 = vmul.f32 0.2, %v1426_v58  ;;  %v1428_v3 = vadd.f32 %v1427_v62, %v2781_v16  ;;  %vm1665_vm12 = vcmp.gt.f32.partialorder %v1426_v58, 0.0 }
 0x16a   : > { %v2187_v6 = vpack.c.bf16 %v1714_v1, %v1713_v63  ;;  %v2188_v8 = vpack.c.bf16 %v1716_v7, %v1715_v5  ;;  %vm1668_vm15 = vcmp.gt.f32.partialorder %v1471_v13, 0.0  ;;  %v1700_v18 = vmul.f32 0.2, %v1471_v13 }
 0x16b   : > { %vm1666_vm13 = vcmp.gt.f32.partialorder %v1428_v3, 0.0  ;;  %v1698_v10 = vmul.f32 0.2, %v1428_v3  ;;  %v1729_v14 = vsel %vm1665_vm12, %v1426_v58, %v1697_v2  ;;  %v1731_v19 = vsel %vm1667_vm14, %v1469_v61, %v1699_v11 }
 0x16c   : > { %1839 = vst [vmem:[%s2790_s12 + $0x10] sm:$0xff] %v2187_v6  ;;  %1840 = vst [vmem:[%s2790_s12 + $0x18] sm:$0xff] %v2188_v8  ;;  %v1732_v20 = vsel %vm1668_vm15, %v1471_v13, %v1700_v18 }
 0x16d   : > { %v1730_v15 = vsel %vm1666_vm13, %v1428_v3, %v1698_v10  ;;  %v2196_v12 = vpack.c.bf16 %v1732_v20, %v1731_v19 }
 0x16e   : > { %v2195_v17 = vpack.c.bf16 %v1730_v15, %v1729_v14 }
 0x16f   : > { %1848 = vst [vmem:[%s2790_s12 + $0x58] sm:$0xff] %v2196_v12 }
 0x170   : > { %1847 = vst [vmem:[%s2790_s12 + $0x50] sm:$0xff] %v2195_v17 }
 0x181   : > { %v1550_v23 = vpop.f32.mrf.mxu1 }
 0x182   : > { %v1507_v21 = vpop.f32.mrf.mxu0  ;;  %v1551_v24 = vadd.f32 %v1550_v23, %v2777_v9 }
 0x183   : > { %v1508_v22 = vadd.f32 %v1507_v21, %v2777_v9  ;;  %v1552_v28 = vpop.f32.mrf.mxu1 }
 0x184   : > { %v1509_v25 = vpop.f32.mrf.mxu0  ;;  %v1687_v29 = vmul.f32 0.2, %v1551_v24  ;;  %v1553_v30 = vadd.f32 %v1552_v28, %v2777_v9  ;;  %vm1655_vm1 = vcmp.gt.f32.partialorder %v1551_v24, 0.0 }
 0x185   : > { %v1685_v26 = vmul.f32 0.2, %v1508_v22  ;;  %v1510_v27 = vadd.f32 %v1509_v25, %v2777_v9  ;;  %vm1653_vm0 = vcmp.gt.f32.partialorder %v1508_v22, 0.0  ;;  %v1554_v34 = vpop.f32.mrf.mxu1 }
 0x186   : > { %v1511_v31 = vpop.f32.mrf.mxu0  ;;  %vm1656_vm3 = vcmp.gt.f32.partialorder %v1553_v30, 0.0  ;;  %v1688_v35 = vmul.f32 0.2, %v1553_v30  ;;  %v1555_v36 = vadd.f32 %v1554_v34, %v2781_v16  ;;  %v1719_v43 = vsel %vm1655_vm1, %v1551_v24, %v1687_v29 }
 0x187   : > { %vm1654_vm2 = vcmp.gt.f32.partialorder %v1510_v27, 0.0  ;;  %v1686_v32 = vmul.f32 0.2, %v1510_v27  ;;  %v1512_v33 = vadd.f32 %v1511_v31, %v2781_v16  ;;  %v1717_v38 = vsel %vm1653_vm0, %v1508_v22, %v1685_v26  ;;  %v1556_v42 = vpop.f32.mrf.mxu1  ;;  %v1883_v31 = vld [vmem:[%s2790_s12 + $0x10] sm:$0xff] (%p2341_p6) }
 0x188   : > { %v1513_v37 = vpop.f32.mrf.mxu0  ;;  %v1720_v44 = vsel %vm1656_vm3, %v1553_v30, %v1688_v35  ;;  %v1703_v47 = vmul.f32 0.2, %v1555_v36  ;;  %v1557_v48 = vadd.f32 %v1556_v42, %v2781_v16  ;;  %vm1671_vm6 = vcmp.gt.f32.partialorder %v1555_v36, 0.0  ;;  %v1881_v30 = vld [vmem:[%s2790_s12 + $0x8] sm:$0xff] (%p2341_p6)  ;;  %1884 = vst [vmem:[%s1866_s24 + $0x10] sm:$0xff] (%p2341_p6), %v1883_v31 }
 0x189   : > { %v1718_v39 = vsel %vm1654_vm2, %v1510_v27, %v1686_v32  ;;  %v1701_v40 = vmul.f32 0.2, %v1512_v33  ;;  %v1514_v41 = vadd.f32 %v1513_v37, %v2781_v16  ;;  %vm1669_vm4 = vcmp.gt.f32.partialorder %v1512_v33, 0.0  ;;  %v1885_v32 = vld [vmem:[%s2790_s12 + $0x18] sm:$0xff] (%p2341_p6)  ;;  %1882 = vst [vmem:[%s1866_s24 + $0x8] sm:$0xff] (%p2341_p6), %v1881_v30  ;;  %v1895_v37 = vld [vmem:[%s2790_s12 + $0x40] sm:$0xff] (%p2341_p6) }
 0x18a   : > { %v2189_v0 = vpack.c.bf16 %v1718_v39, %v1717_v38  ;;  %v2190_v45 = vpack.c.bf16 %v1720_v44, %v1719_v43  ;;  %vm1672_vm7 = vcmp.gt.f32.partialorder %v1557_v48, 0.0  ;;  %v1704_v52 = vmul.f32 0.2, %v1557_v48  ;;  %1886 = vst [vmem:[%s1866_s24 + $0x18] sm:$0xff] (%p2341_p6), %v1885_v32  ;;  %1896 = vst [vmem:[%s1866_s24 + $0x80] sm:$0xff] (%p2341_p6), %v1895_v37  ;;  %v1897_v38 = vld [vmem:[%s2790_s12 + $0x48] sm:$0xff] (%p2341_p6) }
 0x18b   : > { %vm1670_vm5 = vcmp.gt.f32.partialorder %v1514_v41, 0.0  ;;  %v1702_v46 = vmul.f32 0.2, %v1514_v41  ;;  %v1733_v49 = vsel %vm1669_vm4, %v1512_v33, %v1701_v40  ;;  %v1735_v53 = vsel %vm1671_vm6, %v1555_v36, %v1703_v47  ;;  %v1899_v39 = vld [vmem:[%s2790_s12 + $0x50] sm:$0xff] (%p2341_p6)  ;;  %v1901_v40 = vld [vmem:[%s2790_s12 + $0x58] sm:$0xff] (%p2341_p6)  ;;  %1898 = vst [vmem:[%s1866_s24 + $0x88] sm:$0xff] (%p2341_p6), %v1897_v38 }
 0x18c   : > { %1841 = vst [vmem:[%s2790_s12 + $0x20] sm:$0xff] %v2189_v0  ;;  %1842 = vst [vmem:[%s2790_s12 + $0x28] sm:$0xff] %v2190_v45  ;;  %v1736_v54 = vsel %vm1672_vm7, %v1557_v48, %v1704_v52 }
 0x18d   : > { %v1734_v50 = vsel %vm1670_vm5, %v1514_v41, %v1702_v46  ;;  %v2198_v55 = vpack.c.bf16 %v1736_v54, %v1735_v53  ;;  %1900 = vst [vmem:[%s1866_s24 + $0x90] sm:$0xff] (%p2341_p6), %v1899_v39  ;;  %1902 = vst [vmem:[%s1866_s24 + $0x98] sm:$0xff] (%p2341_p6), %v1901_v40 }
 0x18e   : > { %v2197_v51 = vpack.c.bf16 %v1734_v50, %v1733_v49 }
 0x18f   : > { %1850 = vst [vmem:[%s2790_s12 + $0x68] sm:$0xff] %v2198_v55 }
 0x190   : > { %1849 = vst [vmem:[%s2790_s12 + $0x60] sm:$0xff] %v2197_v51 }
 0x193   : > { %v1887_v33 = vld [vmem:[%s2790_s12 + $0x20] sm:$0xff] (%p2341_p6)  ;;  %v1889_v34 = vld [vmem:[%s2790_s12 + $0x28] sm:$0xff] (%p2341_p6) }
 0x194   : > { %1888 = vst [vmem:[%s1866_s24 + $0x20] sm:$0xff] (%p2341_p6), %v1887_v33  ;;  %1890 = vst [vmem:[%s1866_s24 + $0x28] sm:$0xff] (%p2341_p6), %v1889_v34 }
 0x196   : > { %v1905_v42 = vld [vmem:[%s2790_s12 + $0x68] sm:$0xff] (%p2341_p6) }
 0x197   : > { %v1903_v41 = vld [vmem:[%s2790_s12 + $0x60] sm:$0xff] (%p2341_p6)  ;;  %1906 = vst [vmem:[%s1866_s24 + $0xa8] sm:$0xff] (%p2341_p6), %v1905_v42 }
 0x198   : > { %1904 = vst [vmem:[%s1866_s24 + $0xa0] sm:$0xff] (%p2341_p6), %v1903_v41 }
 0x1a1   : > { %v1636_v58 = vpop.f32.mrf.mxu1 }
 0x1a2   : > { %v1593_v56 = vpop.f32.mrf.mxu0  ;;  %v1637_v59 = vadd.f32 %v1636_v58, %v2777_v9 }
 0x1a3   : > { %v1594_v57 = vadd.f32 %v1593_v56, %v2777_v9  ;;  %v1638_v63 = vpop.f32.mrf.mxu1 }
 0x1a4   : > { %v1595_v60 = vpop.f32.mrf.mxu0  ;;  %v1691_v1 = vmul.f32 0.2, %v1637_v59  ;;  %v1639_v2 = vadd.f32 %v1638_v63, %v2777_v9  ;;  %vm1659_vm9 = vcmp.gt.f32.partialorder %v1637_v59, 0.0 }
 0x1a5   : > { %v1689_v61 = vmul.f32 0.2, %v1594_v57  ;;  %v1596_v62 = vadd.f32 %v1595_v60, %v2777_v9  ;;  %vm1657_vm8 = vcmp.gt.f32.partialorder %v1594_v57, 0.0  ;;  %v1640_v6 = vpop.f32.mrf.mxu1 }
 0x1a6   : > { %v1597_v3 = vpop.f32.mrf.mxu0  ;;  %vm1660_vm11 = vcmp.gt.f32.partialorder %v1639_v2, 0.0  ;;  %v1692_v7 = vmul.f32 0.2, %v1639_v2  ;;  %v1641_v8 = vadd.f32 %v1640_v6, %v2781_v16  ;;  %v1723_v17 = vsel %vm1659_vm9, %v1637_v59, %v1691_v1 }
 0x1a7   : > { %vm1658_vm10 = vcmp.gt.f32.partialorder %v1596_v62, 0.0  ;;  %v1690_v4 = vmul.f32 0.2, %v1596_v62  ;;  %v1598_v5 = vadd.f32 %v1597_v3, %v2781_v16  ;;  %v1721_v11 = vsel %vm1657_vm8, %v1594_v57, %v1689_v61  ;;  %v1642_v9 = vpop.f32.mrf.mxu1 }
 0x1a8   : > { %v1599_v10 = vpop.f32.mrf.mxu0  ;;  %v1724_v19 = vsel %vm1660_vm11, %v1639_v2, %v1692_v7  ;;  %v1707_v21 = vmul.f32 0.2, %v1641_v8  ;;  %v1643_v22 = vadd.f32 %v1642_v9, %v2781_v16  ;;  %vm1675_vm14 = vcmp.gt.f32.partialorder %v1641_v8, 0.0 }
 0x1a9   : > { %v1722_v13 = vsel %vm1658_vm10, %v1596_v62, %v1690_v4  ;;  %v1705_v14 = vmul.f32 0.2, %v1598_v5  ;;  %v1600_v15 = vadd.f32 %v1599_v10, %v2781_v16  ;;  %vm1673_vm12 = vcmp.gt.f32.partialorder %v1598_v5, 0.0  ;;  %v1879_v16 = vld [vmem:[%s2790_s12] sm:$0xff] (%p2341_p6) }
 0x1aa   : > { %v2191_v18 = vpack.c.bf16 %v1722_v13, %v1721_v11  ;;  %v2192_v20 = vpack.c.bf16 %v1724_v19, %v1723_v17  ;;  %vm1676_vm15 = vcmp.gt.f32.partialorder %v1643_v22, 0.0  ;;  %v1708_v26 = vmul.f32 0.2, %v1643_v22  ;;  %1880 = vst [vmem:[%s1866_s24] sm:$0xff] (%p2341_p6), %v1879_v16 }
 0x1ab   : > { %vm1674_vm13 = vcmp.gt.f32.partialorder %v1600_v15, 0.0  ;;  %v1706_v12 = vmul.f32 0.2, %v1600_v15  ;;  %v1737_v23 = vsel %vm1673_vm12, %v1598_v5, %v1705_v14  ;;  %v1739_v27 = vsel %vm1675_vm14, %v1641_v8, %v1707_v21 }
 0x1ac   : > { %1843 = vst [vmem:[%s2790_s12 + $0x30] sm:$0xff] %v2191_v18  ;;  %1844 = vst [vmem:[%s2790_s12 + $0x38] sm:$0xff] %v2192_v20  ;;  %v1740_v28 = vsel %vm1676_vm15, %v1643_v22, %v1708_v26  ;;  %1859 = sbr.rel (!%p2341_p6) target bundleno = 441 (0x1b9), region = 59 }
 0x1ad   : > { %v1738_v24 = vsel %vm1674_vm13, %v1600_v15, %v1706_v12  ;;  %v2200_v29 = vpack.c.bf16 %v1740_v28, %v1739_v27 }
 0x1ae   : > { %v2199_v25 = vpack.c.bf16 %v1738_v24, %v1737_v23 }
 0x1af   : > { %1852 = vst [vmem:[%s2790_s12 + $0x78] sm:$0xff] %v2200_v29 }
 0x1b0   : > { %1851 = vst [vmem:[%s2790_s12 + $0x70] sm:$0xff] %v2199_v25 }
 0x1b3   : > { %v1891_v35 = vld [vmem:[%s2790_s12 + $0x30] sm:$0xff]  ;;  %v1893_v36 = vld [vmem:[%s2790_s12 + $0x38] sm:$0xff] }
 0x1b4   : > { %1892 = vst [vmem:[%s1866_s24 + $0x30] sm:$0xff] %v1891_v35  ;;  %1894 = vst [vmem:[%s1866_s24 + $0x38] sm:$0xff] %v1893_v36 }
 0x1b6   : > { %v1909_v0 = vld [vmem:[%s2790_s12 + $0x78] sm:$0xff] }
 0x1b7   : > { %v1907_v43 = vld [vmem:[%s2790_s12 + $0x70] sm:$0xff]  ;;  %1910 = vst [vmem:[%s1866_s24 + $0xb8] sm:$0xff] %v1909_v0 }
 0x1b8   : > { %1908 = vst [vmem:[%s1866_s24 + $0xb0] sm:$0xff] %v1907_v43 }
 0x1b9 PF: > { %s13_s16 = sadd.s32 1, %s2283_s16   ;;  %s2875_s12 = smov %s2271_s13 }
 0x1ba   : > { %p10_p11 = scmp.ge.s32.totalorder %s13_s16, 4   ;;  %s2876_s13 = smov %s2346_s22 }
 0x1bb   : > { %s2877_s14 = smov %s2279_s15  ;;  %s2878_s15 = smov %s2880_s17 }
 0x1bc   :  { %12 = sbr.rel (!%p10_p11) target bundleno = 3 (0x3), region = 119 }

// kernel: _lambda_.18
= control target key start
LH: loop header
LB: loop body
LE: loop exit
PB: predicated region body
PF: predicated region fallthrough
CT: control target
= control target key end

     0   :  { %v1427_v26 = vmov 0   ;;  %s1972_s1 = inlined_call_operand.vmem [shape: bf16[1,1,256,1024], index: 1, kind: input, shape index: {}]   ;;  %s1973_s0 = inlined_call_operand.vmem [shape: bf16[1,32,256], index: 0, kind: input, shape index: {}]   ;;  %s1974_s2 = inlined_call_operand.vmem [shape: f32[1,32,1], index: 2, kind: input, shape index: {}]   ;;  %s1975_s3 = inlined_call_operand.vmem [shape: bf16[1,1,32,1024], index: 3, kind: output, shape index: {}]  }
   0x1   :  { %v74_v0 = vld [vmem:[%s1972_s1 + $0x1c0] sm:$0xff]  ;;  %v75_v2 = vld [vmem:[%s1972_s1 + $0x1c8] sm:$0xff]  ;;  %1419 = vset.pattern.permute.xlu0 %v1427_v26  ;;  %1420 = vset.pattern.permute.xlu1 %v1427_v26 }
   0x2   :  { %v78_v1 = vld [vmem:[%s1972_s1 + $0x1e0] sm:$0xff]  ;;  %v79_v4 = vld [vmem:[%s1972_s1 + $0x1e8] sm:$0xff] }
   0x3   :  { %v1315_v3 = vcombine.high %v74_v0, %v78_v1  ;;  %v1314_v5 = vcombine.low %v74_v0, %v78_v1  ;;  %v66_v6 = vld [vmem:[%s1972_s1 + $0x180] sm:$0xff]  ;;  %v1317_v8 = vcombine.high %v75_v2, %v79_v4  ;;  %v1316_v9 = vcombine.low %v75_v2, %v79_v4  ;;  %v67_v11 = vld [vmem:[%s1972_s1 + $0x188] sm:$0xff] }
   0x4   :  { %v70_v7 = vld [vmem:[%s1972_s1 + $0x1a0] sm:$0xff]  ;;  %v71_v12 = vld [vmem:[%s1972_s1 + $0x1a8] sm:$0xff] }
   0x5   :  { %v1307_v10 = vcombine.high %v66_v6, %v70_v7  ;;  %v58_v13 = vld [vmem:[%s1972_s1 + $0x140] sm:$0xff]  ;;  %830 = vmatprep.subr.bf16.mxu0 %v1315_v3  ;;  %v1309_v14 = vcombine.high %v67_v11, %v71_v12  ;;  %v59_v16 = vld [vmem:[%s1972_s1 + $0x148] sm:$0xff]  ;;  %883 = vmatprep.subr.bf16.mxu1 %v1317_v8  ;;  %v1306_v18 = vcombine.low %v66_v6, %v70_v7 }
   0x6   :  { %v62_v15 = vld [vmem:[%s1972_s1 + $0x160] sm:$0xff]  ;;  %v63_v17 = vld [vmem:[%s1972_s1 + $0x168] sm:$0xff]  ;;  %831 = vmatpush1.bf16.msra.mxu0 %v1314_v5  ;;  %884 = vmatpush1.bf16.msra.mxu1 %v1316_v9  ;;  %v1308_v19 = vcombine.low %v67_v11, %v71_v12 }
   0x7   :  { %832 = vmatprep.subr.bf16.mxu0 %v1307_v10  ;;  %v1299_v20 = vcombine.high %v58_v13, %v62_v15  ;;  %885 = vmatprep.subr.bf16.mxu1 %v1309_v14  ;;  %v1301_v21 = vcombine.high %v59_v16, %v63_v17  ;;  %v50_v22 = vld [vmem:[%s1972_s1 + $0x100] sm:$0xff]  ;;  %v51_v24 = vld [vmem:[%s1972_s1 + $0x108] sm:$0xff]  ;;  %v1298_v27 = vcombine.low %v58_v13, %v62_v15 }
   0x8   :  { %v54_v23 = vld [vmem:[%s1972_s1 + $0x120] sm:$0xff]  ;;  %v55_v25 = vld [vmem:[%s1972_s1 + $0x128] sm:$0xff]  ;;  %v1300_v28 = vcombine.low %v59_v16, %v63_v17 }
   0x9   :  { %v1291_v29 = vcombine.high %v50_v22, %v54_v23  ;;  %v1293_v30 = vcombine.high %v51_v24, %v55_v25  ;;  %v42_v31 = vld [vmem:[%s1972_s1 + $0xc0] sm:$0xff]  ;;  %v43_v33 = vld [vmem:[%s1972_s1 + $0xc8] sm:$0xff]  ;;  %v1290_v35 = vcombine.low %v50_v22, %v54_v23  ;;  %v1292_v36 = vcombine.low %v51_v24, %v55_v25 }
   0xa   :  { %833 = vmatpush1.bf16.msra.mxu0 %v1306_v18  ;;  %886 = vmatpush1.bf16.msra.mxu1 %v1308_v19  ;;  %v46_v32 = vld [vmem:[%s1972_s1 + $0xe0] sm:$0xff]  ;;  %v47_v34 = vld [vmem:[%s1972_s1 + $0xe8] sm:$0xff] }
   0xb   :  { %834 = vmatprep.subr.bf16.mxu0 %v1299_v20  ;;  %887 = vmatprep.subr.bf16.mxu1 %v1301_v21  ;;  %v1283_v37 = vcombine.high %v42_v31, %v46_v32  ;;  %v1285_v38 = vcombine.high %v43_v33, %v47_v34  ;;  %v34_v39 = vld [vmem:[%s1972_s1 + $0x80] sm:$0xff]  ;;  %v35_v41 = vld [vmem:[%s1972_s1 + $0x88] sm:$0xff]  ;;  %v1282_v43 = vcombine.low %v42_v31, %v46_v32 }
   0xc   :  { %v38_v40 = vld [vmem:[%s1972_s1 + $0xa0] sm:$0xff]  ;;  %v39_v42 = vld [vmem:[%s1972_s1 + $0xa8] sm:$0xff]  ;;  %v1284_v44 = vcombine.low %v43_v33, %v47_v34 }
   0xd   :  { %v1275_v45 = vcombine.high %v34_v39, %v38_v40  ;;  %v1277_v46 = vcombine.high %v35_v41, %v39_v42  ;;  %v26_v47 = vld [vmem:[%s1972_s1 + $0x40] sm:$0xff]  ;;  %v27_v49 = vld [vmem:[%s1972_s1 + $0x48] sm:$0xff]  ;;  %v1274_v51 = vcombine.low %v34_v39, %v38_v40  ;;  %v1276_v52 = vcombine.low %v35_v41, %v39_v42 }
   0xe   :  { %835 = vmatpush1.bf16.msra.mxu0 %v1298_v27  ;;  %888 = vmatpush1.bf16.msra.mxu1 %v1300_v28  ;;  %v30_v48 = vld [vmem:[%s1972_s1 + $0x60] sm:$0xff]  ;;  %v31_v50 = vld [vmem:[%s1972_s1 + $0x68] sm:$0xff] }
   0xf   :  { %836 = vmatprep.subr.bf16.mxu0 %v1291_v29  ;;  %889 = vmatprep.subr.bf16.mxu1 %v1293_v30  ;;  %v1267_v53 = vcombine.high %v26_v47, %v30_v48  ;;  %v1269_v54 = vcombine.high %v27_v49, %v31_v50  ;;  %v18_v55 = vld [vmem:[%s1972_s1] sm:$0xff]  ;;  %v19_v58 = vld [vmem:[%s1972_s1 + $0x8] sm:$0xff]  ;;  %v1266_v60 = vcombine.low %v26_v47, %v30_v48  ;;  %v149_v48 = vld [vmem:[%s1974_s2 + $0x18] sm:$0xff] }
  0x10   :  { %v22_v56 = vld [vmem:[%s1972_s1 + $0x20] sm:$0xff]  ;;  %v23_v59 = vld [vmem:[%s1972_s1 + $0x28] sm:$0xff]  ;;  %v1268_v61 = vcombine.low %v27_v49, %v31_v50 }
  0x11   :  { %v1541_v57 = vld [vmem:[%s1973_s0 + $0x4] ss:$8 sps:$4 sm:$0xff]   ;;  %v1259_v62 = vcombine.high %v18_v55, %v22_v56  ;;  %v1261_v63 = vcombine.high %v19_v58, %v23_v59  ;;  %v1258_v4 = vcombine.low %v18_v55, %v22_v56  ;;  %v1260_v5 = vcombine.low %v19_v58, %v23_v59 }
  0x12   :  { %837 = vmatpush1.bf16.msra.mxu0 %v1290_v35  ;;  %890 = vmatpush1.bf16.msra.mxu1 %v1292_v36  ;;  %v138_v0 = vld [vmem:[%s1972_s1 + $0x3c0] sm:$0xff]  ;;  %v139_v2 = vld [vmem:[%s1972_s1 + $0x3c8] sm:$0xff] }
  0x13   :  { %838 = vmatprep.subr.bf16.mxu0 %v1283_v37  ;;  %891 = vmatprep.subr.bf16.mxu1 %v1285_v38  ;;  %v142_v1 = vld [vmem:[%s1972_s1 + $0x3e0] sm:$0xff]  ;;  %v143_v3 = vld [vmem:[%s1972_s1 + $0x3e8] sm:$0xff] }
  0x14   :  { %862 = vmatprep.mubr.bf16.mxu0 %v1541_v57  ;;  %915 = vmatprep.mubr.bf16.mxu1 %v1541_v57  ;;  %v1379_v6 = vcombine.high %v138_v0, %v142_v1  ;;  %v1381_v7 = vcombine.high %v139_v2, %v143_v3  ;;  %v130_v8 = vld [vmem:[%s1972_s1 + $0x380] sm:$0xff]  ;;  %v131_v10 = vld [vmem:[%s1972_s1 + $0x388] sm:$0xff]  ;;  %v1378_v12 = vcombine.low %v138_v0, %v142_v1 }
  0x15   :  { %v134_v9 = vld [vmem:[%s1972_s1 + $0x3a0] sm:$0xff]  ;;  %v135_v11 = vld [vmem:[%s1972_s1 + $0x3a8] sm:$0xff]  ;;  %v1380_v13 = vcombine.low %v139_v2, %v143_v3 }
  0x16   :  { %839 = vmatpush1.bf16.msra.mxu0 %v1282_v43  ;;  %892 = vmatpush1.bf16.msra.mxu1 %v1284_v44  ;;  %v1371_v14 = vcombine.high %v130_v8, %v134_v9  ;;  %v1373_v15 = vcombine.high %v131_v10, %v135_v11  ;;  %v122_v16 = vld [vmem:[%s1972_s1 + $0x340] sm:$0xff]  ;;  %v123_v18 = vld [vmem:[%s1972_s1 + $0x348] sm:$0xff]  ;;  %v1370_v20 = vcombine.low %v130_v8, %v134_v9  ;;  %v148_v43 = vld [vmem:[%s1974_s2 + $0x10] sm:$0xff] }
  0x17   :  { %840 = vmatprep.subr.bf16.mxu0 %v1275_v45  ;;  %893 = vmatprep.subr.bf16.mxu1 %v1277_v46  ;;  %v126_v17 = vld [vmem:[%s1972_s1 + $0x360] sm:$0xff]  ;;  %v127_v19 = vld [vmem:[%s1972_s1 + $0x368] sm:$0xff]  ;;  %v1372_v21 = vcombine.low %v131_v10, %v135_v11  ;;  %v81_v8 = vld [vmem:[%s1972_s1 + $0x1f8] sm:$0xff] }
  0x18   :  { %v1363_v22 = vcombine.high %v122_v16, %v126_v17  ;;  %v1365_v23 = vcombine.high %v123_v18, %v127_v19  ;;  %v114_v24 = vld [vmem:[%s1972_s1 + $0x300] sm:$0xff]  ;;  %v115_v26 = vld [vmem:[%s1972_s1 + $0x308] sm:$0xff]  ;;  %v1362_v28 = vcombine.low %v122_v16, %v126_v17  ;;  %v1364_v29 = vcombine.low %v123_v18, %v127_v19  ;;  %162 = vperm.xlu1 %1420, %v148_v43   ;;  %v69_v16 = vld [vmem:[%s1972_s1 + $0x198] sm:$0xff] }
  0x19   :  { %v118_v25 = vld [vmem:[%s1972_s1 + $0x320] sm:$0xff]  ;;  %v119_v27 = vld [vmem:[%s1972_s1 + $0x328] sm:$0xff]  ;;  %v73_v17 = vld [vmem:[%s1972_s1 + $0x1b8] sm:$0xff] }
  0x1a   :  { %841 = vmatpush1.bf16.msra.mxu0 %v1274_v51  ;;  %894 = vmatpush1.bf16.msra.mxu1 %v1276_v52  ;;  %v1355_v30 = vcombine.high %v114_v24, %v118_v25  ;;  %v1357_v31 = vcombine.high %v115_v26, %v119_v27  ;;  %v106_v32 = vld [vmem:[%s1972_s1 + $0x2c0] sm:$0xff]  ;;  %v107_v34 = vld [vmem:[%s1972_s1 + $0x2c8] sm:$0xff]  ;;  %v1354_v36 = vcombine.low %v114_v24, %v118_v25  ;;  %v1697_v24 = vld [vmem:[%s1973_s0 + $0x14] ss:$8 sps:$4 sm:$0xff]  }
  0x1b   :  { %842 = vmatprep.subr.bf16.mxu0 %v1267_v53  ;;  %895 = vmatprep.subr.bf16.mxu1 %v1269_v54  ;;  %v110_v33 = vld [vmem:[%s1972_s1 + $0x2e0] sm:$0xff]  ;;  %v111_v35 = vld [vmem:[%s1972_s1 + $0x2e8] sm:$0xff]  ;;  %v1356_v37 = vcombine.low %v115_v26, %v119_v27  ;;  %v61_v25 = vld [vmem:[%s1972_s1 + $0x158] sm:$0xff] }
  0x1c   :  { %v1347_v38 = vcombine.high %v106_v32, %v110_v33  ;;  %v146_v39 = vld [vmem:[%s1974_s2] sm:$0xff]  ;;  %v1349_v40 = vcombine.high %v107_v34, %v111_v35  ;;  %v99_v44 = vld [vmem:[%s1972_s1 + $0x288] sm:$0xff]  ;;  %v1346_v47 = vcombine.low %v106_v32, %v110_v33  ;;  %v1348_v49 = vcombine.low %v107_v34, %v111_v35  ;;  %167 = vperm.xlu1 %1420, %v149_v48   ;;  %v65_v26 = vld [vmem:[%s1972_s1 + $0x178] sm:$0xff] }
  0x1d   :  { %v98_v41 = vld [vmem:[%s1972_s1 + $0x280] sm:$0xff]  ;;  %152 = vperm.xlu0 %1419, %v146_v39   ;;  %v103_v45 = vld [vmem:[%s1972_s1 + $0x2a8] sm:$0xff]  ;;  %v56_v32 = vld [vmem:[%s1972_s1 + $0x130] sm:$0xff] }
  0x1e   :  { %843 = vmatpush1.bf16.msra.mxu0 %v1266_v60  ;;  %896 = vmatpush1.bf16.msra.mxu1 %v1268_v61  ;;  %v102_v42 = vld [vmem:[%s1972_s1 + $0x2a0] sm:$0xff]  ;;  %v147_v46 = vld [vmem:[%s1974_s2 + $0x8] sm:$0xff]  ;;  %v1341_v51 = vcombine.high %v99_v44, %v103_v45  ;;  %v1340_v58 = vcombine.low %v99_v44, %v103_v45  ;;  %v53_v33 = vld [vmem:[%s1972_s1 + $0x118] sm:$0xff] }
  0x1f   :  { %844 = vmatprep.subr.bf16.mxu0 %v1259_v62  ;;  %897 = vmatprep.subr.bf16.mxu1 %v1261_v63  ;;  %v1339_v50 = vcombine.high %v98_v41, %v102_v42  ;;  %v90_v52 = vld [vmem:[%s1972_s1 + $0x240] sm:$0xff]  ;;  %v91_v54 = vld [vmem:[%s1972_s1 + $0x248] sm:$0xff]  ;;  %v1338_v56 = vcombine.low %v98_v41, %v102_v42  ;;  %v57_v34 = vld [vmem:[%s1972_s1 + $0x138] sm:$0xff] }
  0x20   :  { %v94_v53 = vld [vmem:[%s1972_s1 + $0x260] sm:$0xff]  ;;  %v95_v55 = vld [vmem:[%s1972_s1 + $0x268] sm:$0xff]  ;;  %v1724_v35 = vld [vmem:[%s1973_s0 + $0x10] ss:$8 sps:$4 sm:$0xff]   ;;  %v1297_v39 = vcombine.high %v53_v33, %v57_v34  ;;  %v1296_v45 = vcombine.low %v53_v33, %v57_v34 }
  0x21   :  { %157 = vperm.xlu0 %1419, %v147_v46   ;;  %v1331_v59 = vcombine.high %v90_v52, %v94_v53  ;;  %v1333_v60 = vcombine.high %v91_v54, %v95_v55  ;;  %v82_v61 = vld [vmem:[%s1972_s1 + $0x200] sm:$0xff]  ;;  %v83_v63 = vld [vmem:[%s1972_s1 + $0x208] sm:$0xff]  ;;  %v1330_v1 = vcombine.low %v90_v52, %v94_v53  ;;  %v1332_v2 = vcombine.low %v91_v54, %v95_v55  ;;  %v48_v41 = vld [vmem:[%s1972_s1 + $0xf0] sm:$0xff] }
  0x22   :  { %845 = vmatpush1.bf16.msra.mxu0 %v1258_v4  ;;  %898 = vmatpush1.bf16.msra.mxu1 %v1260_v5  ;;  %v86_v62 = vld [vmem:[%s1972_s1 + $0x220] sm:$0xff]  ;;  %v87_v0 = vld [vmem:[%s1972_s1 + $0x228] sm:$0xff]  ;;  %v76_v5 = vld [vmem:[%s1972_s1 + $0x1d0] sm:$0xff] }
  0x23   :  { %846 = vmatprep.subr.bf16.mxu0 %v1379_v6  ;;  %899 = vmatprep.subr.bf16.mxu1 %v1381_v7  ;;  %v1323_v3 = vcombine.high %v82_v61, %v86_v62  ;;  %v1325_v4 = vcombine.high %v83_v63, %v87_v0  ;;  %v80_v6 = vld [vmem:[%s1972_s1 + $0x1f0] sm:$0xff]  ;;  %v77_v7 = vld [vmem:[%s1972_s1 + $0x1d8] sm:$0xff]  ;;  %v1322_v9 = vcombine.low %v82_v61, %v86_v62 }
  0x24   :  { %v1324_v10 = vcombine.low %v83_v63, %v87_v0  ;;  %v1319_v11 = vcombine.high %v76_v5, %v80_v6  ;;  %v1318_v18 = vcombine.low %v76_v5, %v80_v6  ;;  %v1320_v19 = vcombine.low %v77_v7, %v81_v8  ;;  %v45_v42 = vld [vmem:[%s1972_s1 + $0xd8] sm:$0xff]  ;;  %v36_v48 = vld [vmem:[%s1972_s1 + $0x90] sm:$0xff] }
  0x25   :  { %v49_v43 = vld [vmem:[%s1972_s1 + $0xf8] sm:$0xff]  ;;  %v20_v0 = vld [vmem:[%s1972_s1 + $0x10] sm:$0xff] }
  0x26   :  { %847 = vmatpush2.bf16.msra.mxu0 %v1378_v12  ;;  %900 = vmatpush2.bf16.msra.mxu1 %v1380_v13  ;;  %v1321_v12 = vcombine.high %v77_v7, %v81_v8  ;;  %v68_v13 = vld [vmem:[%s1972_s1 + $0x190] sm:$0xff]  ;;  %v1288_v53 = vcombine.low %v45_v42, %v49_v43 }
  0x27   :  { %848 = vmatprep.subr.bf16.mxu0 %v1371_v14  ;;  %901 = vmatprep.subr.bf16.mxu1 %v1373_v15  ;;  %v72_v14 = vld [vmem:[%s1972_s1 + $0x1b0] sm:$0xff]  ;;  %v1680_v15 = vld [vmem:[%s1973_s0] ss:$8 sps:$4 sm:$0xff]  }
  0x28   :  { %v1310_v27 = vcombine.low %v68_v13, %v72_v14  ;;  %v140_v8 = vld [vmem:[%s1972_s1 + $0x3d0] sm:$0xff] }
  0x29   :  { %v116_v34 = vld [vmem:[%s1972_s1 + $0x310] sm:$0xff] }
  0x2a   :  { %849 = vmatpush2.bf16.msra.mxu0 %v1370_v20  ;;  %902 = vmatpush2.bf16.msra.mxu1 %v1372_v21  ;;  %v1311_v20 = vcombine.high %v68_v13, %v72_v14  ;;  %v1313_v21 = vcombine.high %v69_v16, %v73_v17 }
  0x2b   :  { %850 = vmatprep.subr.bf16.mxu0 %v1363_v22  ;;  %903 = vmatprep.subr.bf16.mxu1 %v1365_v23  ;;  %v60_v22 = vld [vmem:[%s1972_s1 + $0x150] sm:$0xff] }
  0x2c   :  { %v64_v23 = vld [vmem:[%s1972_s1 + $0x170] sm:$0xff] }
  0x2e   :  { %851 = vmatpush2.bf16.msra.mxu0 %v1362_v28  ;;  %904 = vmatpush2.bf16.msra.mxu1 %v1364_v29  ;;  %v1312_v28 = vcombine.low %v69_v16, %v73_v17  ;;  %v1303_v29 = vcombine.high %v60_v22, %v64_v23  ;;  %v132_v17 = vld [vmem:[%s1972_s1 + $0x390] sm:$0xff] }
  0x2f   :  { %852 = vmatprep.subr.bf16.mxu0 %v1355_v30  ;;  %905 = vmatprep.subr.bf16.mxu1 %v1357_v31  ;;  %v1305_v30 = vcombine.high %v61_v25, %v65_v26  ;;  %v52_v31 = vld [vmem:[%s1972_s1 + $0x110] sm:$0xff] }
  0x30   :  { %v1294_v44 = vcombine.low %v52_v31, %v56_v32 }
  0x32   :  { %853 = vmatpush2.bf16.msra.mxu0 %v1354_v36  ;;  %906 = vmatpush2.bf16.msra.mxu1 %v1356_v37  ;;  %v1302_v36 = vcombine.low %v60_v22, %v64_v23  ;;  %v1304_v37 = vcombine.low %v61_v25, %v65_v26  ;;  %v124_v26 = vld [vmem:[%s1972_s1 + $0x350] sm:$0xff] }
  0x33   :  { %854 = vmatprep.subr.bf16.mxu0 %v1347_v38  ;;  %907 = vmatprep.subr.bf16.mxu1 %v1349_v40  ;;  %v1295_v38 = vcombine.high %v52_v31, %v56_v32  ;;  %v44_v40 = vld [vmem:[%s1972_s1 + $0xd0] sm:$0xff] }
  0x34   :  { %v1287_v46 = vcombine.high %v44_v40, %v48_v41  ;;  %v1286_v52 = vcombine.low %v44_v40, %v48_v41 }
  0x36   :  { %855 = vmatpush2.bf16.msra.mxu0 %v1346_v47  ;;  %908 = vmatpush2.bf16.msra.mxu1 %v1348_v49  ;;  %v1289_v47 = vcombine.high %v45_v42, %v49_v43  ;;  %v40_v49 = vld [vmem:[%s1972_s1 + $0xb0] sm:$0xff] }
  0x37   :  { %856 = vmatprep.subr.bf16.mxu0 %v1339_v50  ;;  %909 = vmatprep.subr.bf16.mxu1 %v1341_v51  ;;  %v37_v50 = vld [vmem:[%s1972_s1 + $0x98] sm:$0xff]  ;;  %v1279_v54 = vcombine.high %v36_v48, %v40_v49  ;;  %v108_v43 = vld [vmem:[%s1972_s1 + $0x2d0] sm:$0xff] }
  0x38   :  { %v41_v51 = vld [vmem:[%s1972_s1 + $0xb8] sm:$0xff] }
  0x39   :  { %v1281_v55 = vcombine.high %v37_v50, %v41_v51  ;;  %v1280_v61 = vcombine.low %v37_v50, %v41_v51  ;;  %v100_v51 = vld [vmem:[%s1972_s1 + $0x290] sm:$0xff] }
  0x3a   :  { %857 = vmatpush2.bf16.msra.mxu0 %v1338_v56  ;;  %910 = vmatpush2.bf16.msra.mxu1 %v1340_v58  ;;  %v28_v56 = vld [vmem:[%s1972_s1 + $0x50] sm:$0xff] }
  0x3b   :  { %858 = vmatprep.subr.bf16.mxu0 %v1331_v59  ;;  %911 = vmatprep.subr.bf16.mxu1 %v1333_v60  ;;  %v32_v58 = vld [vmem:[%s1972_s1 + $0x70] sm:$0xff]  ;;  %v33_v59 = vld [vmem:[%s1972_s1 + $0x78] sm:$0xff]  ;;  %v1278_v60 = vcombine.low %v36_v48, %v40_v49 }
  0x3c   :  { %v1271_v62 = vcombine.high %v28_v56, %v32_v58 }
  0x3e   :  { %859 = vmatpush2.bf16.msra.mxu0 %v1330_v1  ;;  %912 = vmatpush2.bf16.msra.mxu1 %v1332_v2  ;;  %v24_v1 = vld [vmem:[%s1972_s1 + $0x30] sm:$0xff]  ;;  %v21_v2 = vld [vmem:[%s1972_s1 + $0x18] sm:$0xff] }
  0x3f   :  { %860 = vmatprep.subr.bf16.mxu0 %v1323_v3  ;;  %913 = vmatprep.subr.bf16.mxu1 %v1325_v4  ;;  %v25_v3 = vld [vmem:[%s1972_s1 + $0x38] sm:$0xff]  ;;  %v1270_v4 = vcombine.low %v28_v56, %v32_v58  ;;  %v1263_v6 = vcombine.high %v20_v0, %v24_v1 }
  0x40   :  { %v1265_v7 = vcombine.high %v21_v2, %v25_v3  ;;  %v1264_v13 = vcombine.low %v21_v2, %v25_v3  ;;  %v84_v3 = vld [vmem:[%s1972_s1 + $0x210] sm:$0xff] }
  0x42   :  { %861 = vmatpush2.bf16.msra.mxu0 %v1322_v9  ;;  %914 = vmatpush2.bf16.msra.mxu1 %v1324_v10  ;;  %v144_v9 = vld [vmem:[%s1972_s1 + $0x3f0] sm:$0xff]  ;;  %v141_v10 = vld [vmem:[%s1972_s1 + $0x3d8] sm:$0xff] }
  0x43   :  { %936 = vmatprep.subr.bf16.mxu0 %v1319_v11  ;;  %989 = vmatprep.subr.bf16.mxu1 %v1321_v12  ;;  %v145_v11 = vld [vmem:[%s1972_s1 + $0x3f8] sm:$0xff]  ;;  %v1262_v12 = vcombine.low %v20_v0, %v24_v1  ;;  %v1383_v14 = vcombine.high %v140_v8, %v144_v9 }
  0x44   :  { %v1385_v16 = vcombine.high %v141_v10, %v145_v11  ;;  %v1384_v22 = vcombine.low %v141_v10, %v145_v11 }
  0x45   :  { %863 = vmatmul.mubr.bf16.vlgmr.msra.gmra.mxu0 %v1680_v15  ;;  %916 = vmatmul.mubr.bf16.vlgmr.msra.gmra.mxu1 %v1680_v15 }
  0x46   :  { %937 = vmatpush1.bf16.msra.mxu0 %v1318_v18  ;;  %990 = vmatpush1.bf16.msra.mxu1 %v1320_v19  ;;  %v136_v18 = vld [vmem:[%s1972_s1 + $0x3b0] sm:$0xff]  ;;  %v133_v19 = vld [vmem:[%s1972_s1 + $0x398] sm:$0xff] }
  0x47   :  { %938 = vmatprep.subr.bf16.mxu0 %v1311_v20  ;;  %991 = vmatprep.subr.bf16.mxu1 %v1313_v21  ;;  %v137_v20 = vld [vmem:[%s1972_s1 + $0x3b8] sm:$0xff]  ;;  %v1382_v21 = vcombine.low %v140_v8, %v144_v9  ;;  %v1375_v23 = vcombine.high %v132_v17, %v136_v18 }
  0x48   :  { %872 = vmatprep.mubr.bf16.mxu0 %v1697_v24  ;;  %925 = vmatprep.mubr.bf16.mxu1 %v1697_v24  ;;  %v1377_v25 = vcombine.high %v133_v19, %v137_v20  ;;  %v1376_v31 = vcombine.low %v133_v19, %v137_v20 }
  0x4a   :  { %939 = vmatpush1.bf16.msra.mxu0 %v1310_v27  ;;  %992 = vmatpush1.bf16.msra.mxu1 %v1312_v28  ;;  %v128_v27 = vld [vmem:[%s1972_s1 + $0x370] sm:$0xff]  ;;  %v125_v28 = vld [vmem:[%s1972_s1 + $0x358] sm:$0xff] }
  0x4b   :  { %940 = vmatprep.subr.bf16.mxu0 %v1303_v29  ;;  %993 = vmatprep.subr.bf16.mxu1 %v1305_v30  ;;  %v129_v29 = vld [vmem:[%s1972_s1 + $0x378] sm:$0xff]  ;;  %v1374_v30 = vcombine.low %v132_v17, %v136_v18  ;;  %v1367_v32 = vcombine.high %v124_v26, %v128_v27 }
  0x4c   :  { %v1369_v33 = vcombine.high %v125_v28, %v129_v29  ;;  %v1368_v40 = vcombine.low %v125_v28, %v129_v29 }
  0x4d   :  { %873 = vmatmul.mubr.bf16.gmra.mxu0 %v1724_v35  ;;  %926 = vmatmul.mubr.bf16.gmra.mxu1 %v1724_v35 }
  0x4e   :  { %941 = vmatpush1.bf16.msra.mxu0 %v1302_v36  ;;  %994 = vmatpush1.bf16.msra.mxu1 %v1304_v37  ;;  %v120_v36 = vld [vmem:[%s1972_s1 + $0x330] sm:$0xff]  ;;  %v117_v37 = vld [vmem:[%s1972_s1 + $0x318] sm:$0xff] }
  0x4f   :  { %942 = vmatprep.subr.bf16.mxu0 %v1295_v38  ;;  %995 = vmatprep.subr.bf16.mxu1 %v1297_v39  ;;  %v121_v38 = vld [vmem:[%s1972_s1 + $0x338] sm:$0xff]  ;;  %v1366_v39 = vcombine.low %v124_v26, %v128_v27  ;;  %v1359_v41 = vcombine.high %v116_v34, %v120_v36 }
  0x50   :  { %968 = vmatprep.mubr.bf16.mxu0 %v1541_v57  ;;  %1021 = vmatprep.mubr.bf16.mxu1 %v1541_v57  ;;  %v29_v57 = vld [vmem:[%s1972_s1 + $0x58] sm:$0xff]  ;;  %v1361_v42 = vcombine.high %v117_v37, %v121_v38  ;;  %v1360_v48 = vcombine.low %v117_v37, %v121_v38 }
  0x51   :  { %v1273_v63 = vcombine.high %v29_v57, %v33_v59  ;;  %v1272_v5 = vcombine.low %v29_v57, %v33_v59  ;;  %v92_v59 = vld [vmem:[%s1972_s1 + $0x250] sm:$0xff] }
  0x52   :  { %943 = vmatpush1.bf16.msra.mxu0 %v1294_v44  ;;  %996 = vmatpush1.bf16.msra.mxu1 %v1296_v45  ;;  %v112_v44 = vld [vmem:[%s1972_s1 + $0x2f0] sm:$0xff]  ;;  %v109_v45 = vld [vmem:[%s1972_s1 + $0x2d8] sm:$0xff] }
  0x53   :  { %944 = vmatprep.subr.bf16.mxu0 %v1287_v46  ;;  %997 = vmatprep.subr.bf16.mxu1 %v1289_v47  ;;  %v113_v46 = vld [vmem:[%s1972_s1 + $0x2f8] sm:$0xff]  ;;  %v1358_v47 = vcombine.low %v116_v34, %v120_v36  ;;  %v1351_v49 = vcombine.high %v108_v43, %v112_v44 }
  0x54   :  { %v1353_v50 = vcombine.high %v109_v45, %v113_v46  ;;  %v1352_v56 = vcombine.low %v109_v45, %v113_v46 }
  0x56   :  { %945 = vmatpush1.bf16.msra.mxu0 %v1286_v52  ;;  %998 = vmatpush1.bf16.msra.mxu1 %v1288_v53  ;;  %v104_v52 = vld [vmem:[%s1972_s1 + $0x2b0] sm:$0xff]  ;;  %v101_v53 = vld [vmem:[%s1972_s1 + $0x298] sm:$0xff] }
  0x57   :  { %946 = vmatprep.subr.bf16.mxu0 %v1279_v54  ;;  %999 = vmatprep.subr.bf16.mxu1 %v1281_v55  ;;  %v105_v54 = vld [vmem:[%s1972_s1 + $0x2b8] sm:$0xff]  ;;  %v1350_v55 = vcombine.low %v108_v43, %v112_v44  ;;  %v1343_v58 = vcombine.high %v100_v51, %v104_v52 }
  0x58   :  { %v1345_v57 = vcombine.high %v101_v53, %v105_v54  ;;  %v1344_v0 = vcombine.low %v101_v53, %v105_v54 }
  0x5a   :  { %947 = vmatpush1.bf16.msra.mxu0 %v1278_v60  ;;  %1000 = vmatpush1.bf16.msra.mxu1 %v1280_v61  ;;  %v96_v60 = vld [vmem:[%s1972_s1 + $0x270] sm:$0xff]  ;;  %v93_v61 = vld [vmem:[%s1972_s1 + $0x258] sm:$0xff] }
  0x5b   :  { %948 = vmatprep.subr.bf16.mxu0 %v1271_v62  ;;  %1001 = vmatprep.subr.bf16.mxu1 %v1273_v63  ;;  %v97_v62 = vld [vmem:[%s1972_s1 + $0x278] sm:$0xff]  ;;  %v1342_v63 = vcombine.low %v100_v51, %v104_v52  ;;  %v1335_v1 = vcombine.high %v92_v59, %v96_v60 }
  0x5c   :  { %v1337_v2 = vcombine.high %v93_v61, %v97_v62  ;;  %v1336_v8 = vcombine.low %v93_v61, %v97_v62 }
  0x5e   :  { %949 = vmatpush1.bf16.msra.mxu0 %v1270_v4  ;;  %1002 = vmatpush1.bf16.msra.mxu1 %v1272_v5  ;;  %v88_v4 = vld [vmem:[%s1972_s1 + $0x230] sm:$0xff]  ;;  %v85_v5 = vld [vmem:[%s1972_s1 + $0x218] sm:$0xff] }
  0x5f   :  { %950 = vmatprep.subr.bf16.mxu0 %v1263_v6  ;;  %1003 = vmatprep.subr.bf16.mxu1 %v1265_v7  ;;  %v89_v6 = vld [vmem:[%s1972_s1 + $0x238] sm:$0xff]  ;;  %v1334_v7 = vcombine.low %v92_v59, %v96_v60  ;;  %v1327_v9 = vcombine.high %v84_v3, %v88_v4  ;;  %v1326_v11 = vcombine.low %v84_v3, %v88_v4 }
  0x60   :  { %v1329_v10 = vcombine.high %v85_v5, %v89_v6 }
  0x62   :  { %951 = vmatpush1.bf16.msra.mxu0 %v1262_v12  ;;  %1004 = vmatpush1.bf16.msra.mxu1 %v1264_v13  ;;  %v1328_v12 = vcombine.low %v85_v5, %v89_v6 }
  0x63   :  { %952 = vmatprep.subr.bf16.mxu0 %v1383_v14  ;;  %1005 = vmatprep.subr.bf16.mxu1 %v1385_v16 }
  0x66   :  { %953 = vmatpush2.bf16.msra.mxu0 %v1382_v21  ;;  %1006 = vmatpush2.bf16.msra.mxu1 %v1384_v22 }
  0x67   :  { %954 = vmatprep.subr.bf16.mxu0 %v1375_v23  ;;  %1007 = vmatprep.subr.bf16.mxu1 %v1377_v25 }
  0x6a   :  { %955 = vmatpush2.bf16.msra.mxu0 %v1374_v30  ;;  %1008 = vmatpush2.bf16.msra.mxu1 %v1376_v31 }
  0x6b   :  { %956 = vmatprep.subr.bf16.mxu0 %v1367_v32  ;;  %1009 = vmatprep.subr.bf16.mxu1 %v1369_v33 }
  0x6e   :  { %957 = vmatpush2.bf16.msra.mxu0 %v1366_v39  ;;  %1010 = vmatpush2.bf16.msra.mxu1 %v1368_v40 }
  0x6f   :  { %958 = vmatprep.subr.bf16.mxu0 %v1359_v41  ;;  %1011 = vmatprep.subr.bf16.mxu1 %v1361_v42 }
  0x72   :  { %959 = vmatpush2.bf16.msra.mxu0 %v1358_v47  ;;  %1012 = vmatpush2.bf16.msra.mxu1 %v1360_v48 }
  0x73   :  { %960 = vmatprep.subr.bf16.mxu0 %v1351_v49  ;;  %1013 = vmatprep.subr.bf16.mxu1 %v1353_v50 }
  0x76   :  { %961 = vmatpush2.bf16.msra.mxu0 %v1350_v55  ;;  %1014 = vmatpush2.bf16.msra.mxu1 %v1352_v56 }
  0x77   :  { %962 = vmatprep.subr.bf16.mxu0 %v1343_v58  ;;  %1015 = vmatprep.subr.bf16.mxu1 %v1345_v57 }
  0x7a   :  { %963 = vmatpush2.bf16.msra.mxu0 %v1342_v63  ;;  %1016 = vmatpush2.bf16.msra.mxu1 %v1344_v0 }
  0x7b   :  { %964 = vmatprep.subr.bf16.mxu0 %v1335_v1  ;;  %1017 = vmatprep.subr.bf16.mxu1 %v1337_v2 }
  0x7e   :  { %965 = vmatpush2.bf16.msra.mxu0 %v1334_v7  ;;  %1018 = vmatpush2.bf16.msra.mxu1 %v1336_v8 }
  0x7f   :  { %966 = vmatprep.subr.bf16.mxu0 %v1327_v9  ;;  %1019 = vmatprep.subr.bf16.mxu1 %v1329_v10 }
  0x82   :  { %967 = vmatpush2.bf16.msra.mxu0 %v1326_v11  ;;  %1020 = vmatpush2.bf16.msra.mxu1 %v1328_v12 }
  0x85   :  { %969 = vmatmul.mubr.bf16.vlgmr.msra.gmra.mxu0 %v1680_v15  ;;  %1022 = vmatmul.mubr.bf16.vlgmr.msra.gmra.mxu1 %v1680_v15 }
  0x86   :  { %978 = vmatprep.mubr.bf16.mxu0 %v1697_v24  ;;  %1031 = vmatprep.mubr.bf16.mxu1 %v1697_v24 }
  0x8d   :  { %979 = vmatmul.mubr.bf16.gmra.mxu0 %v1724_v35  ;;  %1032 = vmatmul.mubr.bf16.gmra.mxu1 %v1724_v35 }
  0x93   :  { %v1889_v29 = vpop.permute.xlu1 %162 }
  0x97   :  { %v1904_v55 = vpop.permute.xlu1 %167 }
  0x98   :  { %v1880_v13 = vpop.permute.xlu0 %152 }
  0x9c   :  { %v1884_v20 = vpop.permute.xlu0 %157 }
 0x105   :  { %v864_v14 = vpop.f32.mrf.mxu0  ;;  %v917_v17 = vpop.f32.mrf.mxu1 }
 0x106   :  { %v865_v16 = vadd.f32 %v864_v14, %v1880_v13  ;;  %v918_v18 = vadd.f32 %v917_v17, %v1880_v13 }
 0x107   :  { %v866_v19 = vpop.f32.mrf.mxu0  ;;  %v919_v24 = vpop.f32.mrf.mxu1 }
 0x108   :  { %vm1042_vm0 = vcmp.gt.f32.partialorder %v865_v16, 0.0  ;;  %v1074_v15 = vmul.f32 0.2, %v865_v16  ;;  %v867_v21 = vadd.f32 %v866_v19, %v1880_v13  ;;  %vm1044_vm1 = vcmp.gt.f32.partialorder %v918_v18, 0.0 }
 0x109   :  { %v1076_v22 = vmul.f32 0.2, %v918_v18  ;;  %v920_v35 = vadd.f32 %v919_v24, %v1880_v13  ;;  %v868_v23 = vpop.f32.mrf.mxu0  ;;  %v921_v28 = vpop.f32.mrf.mxu1 }
 0x10a   :  { %v1106_v25 = vsel %vm1042_vm0, %v865_v16, %v1074_v15  ;;  %vm1043_vm2 = vcmp.gt.f32.partialorder %v867_v21, 0.0  ;;  %v1075_v26 = vmul.f32 0.2, %v867_v21  ;;  %v869_v27 = vadd.f32 %v868_v23, %v1884_v20 }
 0x10b   :  { %v1108_v30 = vsel %vm1044_vm1, %v918_v18, %v1076_v22  ;;  %vm1045_vm3 = vcmp.gt.f32.partialorder %v920_v35, 0.0  ;;  %v1077_v31 = vmul.f32 0.2, %v920_v35  ;;  %v922_v32 = vadd.f32 %v921_v28, %v1884_v20  ;;  %v870_v33 = vpop.f32.mrf.mxu0  ;;  %v923_v38 = vpop.f32.mrf.mxu1 }
 0x10c   :  { %v1107_v34 = vsel %vm1043_vm2, %v867_v21, %v1075_v26  ;;  %vm1050_vm4 = vcmp.gt.f32.partialorder %v869_v27, 0.0  ;;  %v1082_v36 = vmul.f32 0.2, %v869_v27  ;;  %v871_v37 = vadd.f32 %v870_v33, %v1884_v20 }
 0x10d   :  { %v1402_v39 = vpack.c.bf16 %v1107_v34, %v1106_v25  ;;  %v1109_v40 = vsel %vm1045_vm3, %v920_v35, %v1077_v31  ;;  %vm1052_vm5 = vcmp.gt.f32.partialorder %v922_v32, 0.0  ;;  %v1084_v41 = vmul.f32 0.2, %v922_v32  ;;  %v874_v42 = vpop.f32.mrf.mxu0  ;;  %v927_v45 = vpop.f32.mrf.mxu1 }
 0x10e   :  { %v1403_v43 = vpack.c.bf16 %v1109_v40, %v1108_v30  ;;  %vm1051_vm6 = vcmp.gt.f32.partialorder %v871_v37, 0.0  ;;  %v1083_v44 = vmul.f32 0.2, %v871_v37  ;;  %v924_v46 = vadd.f32 %v923_v38, %v1884_v20 }
 0x10f   :  { %1234 = vst [vmem:[%s1975_s3] sm:$0xff] %v1402_v39  ;;  %v875_v47 = vadd.f32 %v874_v42, %v1889_v29  ;;  %v876_v48 = vpop.f32.mrf.mxu0  ;;  %v928_v49 = vadd.f32 %v927_v45, %v1889_v29  ;;  %v1114_v50 = vsel %vm1050_vm4, %v869_v27, %v1082_v36  ;;  %v1116_v51 = vsel %vm1052_vm5, %v922_v32, %v1084_v41  ;;  %v929_v54 = vpop.f32.mrf.mxu1 }
 0x110   :  { %1235 = vst [vmem:[%s1975_s3 + $0x8] sm:$0xff] %v1403_v43  ;;  %v1115_v52 = vsel %vm1051_vm6, %v871_v37, %v1083_v44  ;;  %v877_v53 = vadd.f32 %v876_v48, %v1889_v29  ;;  %vm1053_vm7 = vcmp.gt.f32.partialorder %v924_v46, 0.0  ;;  %v1085_v58 = vmul.f32 0.2, %v924_v46 }
 0x111   :  { %v1406_v56 = vpack.c.bf16 %v1115_v52, %v1114_v50  ;;  %vm1058_vm8 = vcmp.gt.f32.partialorder %v875_v47, 0.0  ;;  %v878_v57 = vpop.f32.mrf.mxu0  ;;  %v1090_v59 = vmul.f32 0.2, %v875_v47  ;;  %v930_v61 = vadd.f32 %v929_v54, %v1889_v29  ;;  %v931_v62 = vpop.f32.mrf.mxu1 }
 0x112   :  { %vm1059_vm9 = vcmp.gt.f32.partialorder %v877_v53, 0.0  ;;  %v1091_v60 = vmul.f32 0.2, %v877_v53  ;;  %v1117_v63 = vsel %vm1053_vm7, %v924_v46, %v1085_v58  ;;  %vm1060_vm10 = vcmp.gt.f32.partialorder %v928_v49, 0.0 }
 0x113   :  { %1238 = vst [vmem:[%s1975_s3 + $0x20] sm:$0xff] %v1406_v56  ;;  %v1092_v0 = vmul.f32 0.2, %v928_v49  ;;  %v879_v1 = vadd.f32 %v878_v57, %v1904_v55  ;;  %v880_v2 = vpop.f32.mrf.mxu0  ;;  %v1407_v3 = vpack.c.bf16 %v1117_v63, %v1116_v51  ;;  %v1122_v4 = vsel %vm1058_vm8, %v875_v47, %v1090_v59  ;;  %v933_v6 = vpop.f32.mrf.mxu1 }
 0x114   :  { %v1123_v5 = vsel %vm1059_vm9, %v877_v53, %v1091_v60  ;;  %vm1061_vm11 = vcmp.gt.f32.partialorder %v930_v61, 0.0  ;;  %v1093_v8 = vmul.f32 0.2, %v930_v61  ;;  %v881_v10 = vadd.f32 %v880_v2, %v1904_v55 }
 0x115   :  { %v1410_v7 = vpack.c.bf16 %v1123_v5, %v1122_v4  ;;  %v1124_v9 = vsel %vm1060_vm10, %v928_v49, %v1092_v0  ;;  %1239 = vst [vmem:[%s1975_s3 + $0x28] sm:$0xff] %v1407_v3  ;;  %vm1066_vm12 = vcmp.gt.f32.partialorder %v879_v1, 0.0  ;;  %v1098_v11 = vmul.f32 0.2, %v879_v1 }
 0x116   :  { %v932_v12 = vadd.f32 %v931_v62, %v1904_v55  ;;  %v934_v14 = vadd.f32 %v933_v6, %v1904_v55  ;;  %v1125_v16 = vsel %vm1061_vm11, %v930_v61, %v1093_v8  ;;  %vm1067_vm13 = vcmp.gt.f32.partialorder %v881_v10, 0.0 }
 0x117   :  { %1242 = vst [vmem:[%s1975_s3 + $0x40] sm:$0xff] %v1410_v7  ;;  %v1099_v17 = vmul.f32 0.2, %v881_v10  ;;  %v1411_v18 = vpack.c.bf16 %v1125_v16, %v1124_v9  ;;  %v1130_v19 = vsel %vm1066_vm12, %v879_v1, %v1098_v11 }
 0x118   :  { %vm1068_vm14 = vcmp.gt.f32.partialorder %v932_v12, 0.0  ;;  %vm1069_vm15 = vcmp.gt.f32.partialorder %v934_v14, 0.0  ;;  %v1100_v21 = vmul.f32 0.2, %v932_v12  ;;  %v1101_v24 = vmul.f32 0.2, %v934_v14 }
 0x119   :  { %v1131_v15 = vsel %vm1067_vm13, %v881_v10, %v1099_v17  ;;  %1243 = vst [vmem:[%s1975_s3 + $0x48] sm:$0xff] %v1411_v18 }
 0x11a   :  { %v1414_v22 = vpack.c.bf16 %v1131_v15, %v1130_v19  ;;  %v1132_v35 = vsel %vm1068_vm14, %v932_v12, %v1100_v21  ;;  %v1133_v23 = vsel %vm1069_vm15, %v934_v14, %v1101_v24 }
 0x11b   :  { %v1415_v25 = vpack.c.bf16 %v1133_v23, %v1132_v35 }
 0x11c   :  { %1246 = vst [vmem:[%s1975_s3 + $0x60] sm:$0xff] %v1414_v22 }
 0x11d   :  { %1247 = vst [vmem:[%s1975_s3 + $0x68] sm:$0xff] %v1415_v25 }
 0x145   :  { %v970_v26 = vpop.f32.mrf.mxu0  ;;  %v1023_v28 = vpop.f32.mrf.mxu1 }
 0x146   :  { %v971_v27 = vadd.f32 %v970_v26, %v1880_v13  ;;  %v1024_v30 = vadd.f32 %v1023_v28, %v1880_v13 }
 0x147   :  { %v972_v31 = vpop.f32.mrf.mxu0  ;;  %v1025_v34 = vpop.f32.mrf.mxu1 }
 0x148   :  { %vm1046_vm0 = vcmp.gt.f32.partialorder %v971_v27, 0.0  ;;  %v1078_v32 = vmul.f32 0.2, %v971_v27  ;;  %v973_v33 = vadd.f32 %v972_v31, %v1880_v13  ;;  %vm1048_vm1 = vcmp.gt.f32.partialorder %v1024_v30, 0.0 }
 0x149   :  { %v1080_v36 = vmul.f32 0.2, %v1024_v30  ;;  %v1026_v37 = vadd.f32 %v1025_v34, %v1880_v13  ;;  %v974_v38 = vpop.f32.mrf.mxu0  ;;  %v1027_v42 = vpop.f32.mrf.mxu1 }
 0x14a   :  { %v1110_v39 = vsel %vm1046_vm0, %v971_v27, %v1078_v32  ;;  %vm1047_vm2 = vcmp.gt.f32.partialorder %v973_v33, 0.0  ;;  %v1079_v40 = vmul.f32 0.2, %v973_v33  ;;  %v975_v41 = vadd.f32 %v974_v38, %v1884_v20 }
 0x14b   :  { %v1112_v43 = vsel %vm1048_vm1, %v1024_v30, %v1080_v36  ;;  %vm1049_vm3 = vcmp.gt.f32.partialorder %v1026_v37, 0.0  ;;  %v1081_v44 = vmul.f32 0.2, %v1026_v37  ;;  %v1028_v45 = vadd.f32 %v1027_v42, %v1884_v20  ;;  %v976_v46 = vpop.f32.mrf.mxu0  ;;  %v1029_v50 = vpop.f32.mrf.mxu1 }
 0x14c   :  { %v1111_v47 = vsel %vm1047_vm2, %v973_v33, %v1079_v40  ;;  %vm1054_vm4 = vcmp.gt.f32.partialorder %v975_v41, 0.0  ;;  %v1086_v48 = vmul.f32 0.2, %v975_v41  ;;  %v977_v49 = vadd.f32 %v976_v46, %v1884_v20 }
 0x14d   :  { %v1404_v13 = vpack.c.bf16 %v1111_v47, %v1110_v39  ;;  %v1113_v51 = vsel %vm1049_vm3, %v1026_v37, %v1081_v44  ;;  %vm1056_vm5 = vcmp.gt.f32.partialorder %v1028_v45, 0.0  ;;  %v1088_v52 = vmul.f32 0.2, %v1028_v45  ;;  %v980_v53 = vpop.f32.mrf.mxu0  ;;  %v1033_v58 = vpop.f32.mrf.mxu1 }
 0x14e   :  { %v1405_v54 = vpack.c.bf16 %v1113_v51, %v1112_v43  ;;  %vm1055_vm6 = vcmp.gt.f32.partialorder %v977_v49, 0.0  ;;  %v1087_v56 = vmul.f32 0.2, %v977_v49  ;;  %v1030_v57 = vadd.f32 %v1029_v50, %v1884_v20 }
 0x14f   :  { %1236 = vst [vmem:[%s1975_s3 + $0x10] sm:$0xff] %v1404_v13  ;;  %v981_v59 = vadd.f32 %v980_v53, %v1889_v29  ;;  %v1034_v60 = vadd.f32 %v1033_v58, %v1889_v29  ;;  %v982_v61 = vpop.f32.mrf.mxu0  ;;  %v1118_v62 = vsel %vm1054_vm4, %v975_v41, %v1086_v48  ;;  %v1120_v63 = vsel %vm1056_vm5, %v1028_v45, %v1088_v52  ;;  %v1035_v2 = vpop.f32.mrf.mxu1 }
 0x150   :  { %1237 = vst [vmem:[%s1975_s3 + $0x18] sm:$0xff] %v1405_v54  ;;  %v1119_v0 = vsel %vm1055_vm6, %v977_v49, %v1087_v56  ;;  %v983_v1 = vadd.f32 %v982_v61, %v1889_v29  ;;  %vm1057_vm7 = vcmp.gt.f32.partialorder %v1030_v57, 0.0  ;;  %v1089_v4 = vmul.f32 0.2, %v1030_v57 }
 0x151   :  { %v1408_v3 = vpack.c.bf16 %v1119_v0, %v1118_v62  ;;  %vm1062_vm8 = vcmp.gt.f32.partialorder %v981_v59, 0.0  ;;  %v984_v20 = vpop.f32.mrf.mxu0  ;;  %v1094_v5 = vmul.f32 0.2, %v981_v59  ;;  %vm1064_vm9 = vcmp.gt.f32.partialorder %v1034_v60, 0.0  ;;  %v1037_v7 = vpop.f32.mrf.mxu1 }
 0x152   :  { %v1096_v6 = vmul.f32 0.2, %v1034_v60  ;;  %vm1063_vm10 = vcmp.gt.f32.partialorder %v983_v1, 0.0  ;;  %v1121_v8 = vsel %vm1057_vm7, %v1030_v57, %v1089_v4  ;;  %v1095_v9 = vmul.f32 0.2, %v983_v1 }
 0x153   :  { %1240 = vst [vmem:[%s1975_s3 + $0x30] sm:$0xff] %v1408_v3  ;;  %v1036_v10 = vadd.f32 %v1035_v2, %v1889_v29  ;;  %v985_v11 = vadd.f32 %v984_v20, %v1904_v55  ;;  %v1409_v12 = vpack.c.bf16 %v1121_v8, %v1120_v63  ;;  %v1038_v14 = vadd.f32 %v1037_v7, %v1904_v55  ;;  %v986_v16 = vpop.f32.mrf.mxu0  ;;  %v1039_v17 = vpop.f32.mrf.mxu1 }
 0x154   :  { %v1126_v18 = vsel %vm1062_vm8, %v981_v59, %v1094_v5  ;;  %v1127_v19 = vsel %vm1063_vm10, %v983_v1, %v1095_v9  ;;  %v1128_v21 = vsel %vm1064_vm9, %v1034_v60, %v1096_v6  ;;  %v987_v23 = vadd.f32 %v986_v16, %v1904_v55 }
 0x155   :  { %vm1065_vm11 = vcmp.gt.f32.partialorder %v1036_v10, 0.0  ;;  %v1097_v15 = vmul.f32 0.2, %v1036_v10  ;;  %1241 = vst [vmem:[%s1975_s3 + $0x38] sm:$0xff] %v1409_v12  ;;  %v1412_v24 = vpack.c.bf16 %v1127_v19, %v1126_v18  ;;  %v1102_v29 = vmul.f32 0.2, %v985_v11 }
 0x156   :  { %v1104_v35 = vmul.f32 0.2, %v1038_v14  ;;  %v1040_v25 = vadd.f32 %v1039_v17, %v1904_v55  ;;  %vm1070_vm12 = vcmp.gt.f32.partialorder %v985_v11, 0.0  ;;  %vm1072_vm13 = vcmp.gt.f32.partialorder %v1038_v14, 0.0 }
 0x157   :  { %v1129_v22 = vsel %vm1065_vm11, %v1036_v10, %v1097_v15  ;;  %1244 = vst [vmem:[%s1975_s3 + $0x50] sm:$0xff] %v1412_v24  ;;  %vm1071_vm14 = vcmp.gt.f32.partialorder %v987_v23, 0.0  ;;  %v1103_v27 = vmul.f32 0.2, %v987_v23  ;;  %v1134_v30 = vsel %vm1070_vm12, %v985_v11, %v1102_v29 }
 0x158   :  { %v1413_v26 = vpack.c.bf16 %v1129_v22, %v1128_v21  ;;  %vm1073_vm15 = vcmp.gt.f32.partialorder %v1040_v25, 0.0  ;;  %v1105_v28 = vmul.f32 0.2, %v1040_v25  ;;  %v1136_v31 = vsel %vm1072_vm13, %v1038_v14, %v1104_v35 }
 0x159   :  { %v1135_v32 = vsel %vm1071_vm14, %v987_v23, %v1103_v27 }
 0x15a   :  { %1245 = vst [vmem:[%s1975_s3 + $0x58] sm:$0xff] %v1413_v26  ;;  %v1137_v33 = vsel %vm1073_vm15, %v1040_v25, %v1105_v28  ;;  %v1416_v55 = vpack.c.bf16 %v1135_v32, %v1134_v30 }
 0x15b   :  { %v1417_v34 = vpack.c.bf16 %v1137_v33, %v1136_v31 }
 0x15c   :  { %1248 = vst [vmem:[%s1975_s3 + $0x70] sm:$0xff] %v1416_v55 }
 0x15d   :  { %1249 = vst [vmem:[%s1975_s3 + $0x78] sm:$0xff] %v1417_v34 }

// kernel: _lambda_.19
= control target key start
LH: loop header
LB: loop body
LE: loop exit
PB: predicated region body
PF: predicated region fallthrough
CT: control target
= control target key end

     0   :  { %v1015_v1 = vmov 0   ;;  %s1324_s1 = inlined_call_operand.vmem [shape: bf16[1,1,512,256], index: 1, kind: input, shape index: {}]   ;;  %s1325_s0 = inlined_call_operand.vmem [shape: bf16[1,64,512], index: 0, kind: input, shape index: {}]   ;;  %s1326_s2 = inlined_call_operand.vmem [shape: f32[1,64,1], index: 2, kind: input, shape index: {}]   ;;  %s1327_s3 = inlined_call_operand.vmem [shape: bf16[1,1,64,256], index: 3, kind: output, shape index: {}]  }
   0x1   :  { %v895_v0 = vld [vmem:[%s1324_s1 + $0x74] ss:$8 sps:$4 sm:$0xff]   ;;  %893 = vset.pattern.permute.xlu0 %v1015_v1  ;;  %894 = vset.pattern.permute.xlu1 %v1015_v1  ;;  %v899_v3 = vld [vmem:[%s1324_s1 + $0x70] ss:$8 sps:$4 sm:$0xff]   ;;  %v901_v5 = vld [vmem:[%s1324_s1 + $0x64] ss:$8 sps:$4 sm:$0xff]  }
   0x2   :  { %v897_v2 = vld [vmem:[%s1324_s1 + $0x174] ss:$8 sps:$4 sm:$0xff]   ;;  %542 = vmatprep.subr.bf16.mxu0 %v895_v0  ;;  %v900_v4 = vld [vmem:[%s1324_s1 + $0x170] ss:$8 sps:$4 sm:$0xff]   ;;  %v903_v6 = vld [vmem:[%s1324_s1 + $0x164] ss:$8 sps:$4 sm:$0xff]  }
   0x3   :  { %615 = vmatprep.subr.bf16.mxu1 %v897_v2  ;;  %543 = vmatpush1.bf16.msra.mxu0 %v899_v3  ;;  %v905_v7 = vld [vmem:[%s1324_s1 + $0x60] ss:$8 sps:$4 sm:$0xff]   ;;  %v907_v9 = vld [vmem:[%s1324_s1 + $0x54] ss:$8 sps:$4 sm:$0xff]   ;;  %v911_v11 = vld [vmem:[%s1324_s1 + $0x50] ss:$8 sps:$4 sm:$0xff]  }
   0x4   :  { %616 = vmatpush1.bf16.msra.mxu1 %v900_v4  ;;  %544 = vmatprep.subr.bf16.mxu0 %v901_v5  ;;  %v906_v8 = vld [vmem:[%s1324_s1 + $0x160] ss:$8 sps:$4 sm:$0xff]   ;;  %v909_v10 = vld [vmem:[%s1324_s1 + $0x154] ss:$8 sps:$4 sm:$0xff]   ;;  %v912_v12 = vld [vmem:[%s1324_s1 + $0x150] ss:$8 sps:$4 sm:$0xff]  }
   0x5   :  { %617 = vmatprep.subr.bf16.mxu1 %v903_v6  ;;  %v913_v13 = vld [vmem:[%s1324_s1 + $0x44] ss:$8 sps:$4 sm:$0xff]   ;;  %v917_v15 = vld [vmem:[%s1324_s1 + $0x40] ss:$8 sps:$4 sm:$0xff]   ;;  %v919_v17 = vld [vmem:[%s1324_s1 + $0x34] ss:$8 sps:$4 sm:$0xff]  }
   0x6   :  { %v915_v14 = vld [vmem:[%s1324_s1 + $0x144] ss:$8 sps:$4 sm:$0xff]   ;;  %v918_v16 = vld [vmem:[%s1324_s1 + $0x140] ss:$8 sps:$4 sm:$0xff]   ;;  %v921_v18 = vld [vmem:[%s1324_s1 + $0x134] ss:$8 sps:$4 sm:$0xff]  }
   0x7   :  { %545 = vmatpush1.bf16.msra.mxu0 %v905_v7  ;;  %v923_v19 = vld [vmem:[%s1324_s1 + $0x30] ss:$8 sps:$4 sm:$0xff]   ;;  %v925_v21 = vld [vmem:[%s1324_s1 + $0x24] ss:$8 sps:$4 sm:$0xff]   ;;  %v929_v23 = vld [vmem:[%s1324_s1 + $0x20] ss:$8 sps:$4 sm:$0xff]  }
   0x8   :  { %618 = vmatpush1.bf16.msra.mxu1 %v906_v8  ;;  %546 = vmatprep.subr.bf16.mxu0 %v907_v9  ;;  %v924_v20 = vld [vmem:[%s1324_s1 + $0x130] ss:$8 sps:$4 sm:$0xff]   ;;  %v927_v22 = vld [vmem:[%s1324_s1 + $0x124] ss:$8 sps:$4 sm:$0xff]   ;;  %v930_v24 = vld [vmem:[%s1324_s1 + $0x120] ss:$8 sps:$4 sm:$0xff]  }
   0x9   :  { %619 = vmatprep.subr.bf16.mxu1 %v909_v10  ;;  %v931_v25 = vld [vmem:[%s1324_s1 + $0x14] ss:$8 sps:$4 sm:$0xff]   ;;  %v935_v27 = vld [vmem:[%s1324_s1 + $0x10] ss:$8 sps:$4 sm:$0xff]   ;;  %v937_v29 = vld [vmem:[%s1324_s1 + $0x4] ss:$8 sps:$4 sm:$0xff]  }
   0xa   :  { %v933_v26 = vld [vmem:[%s1324_s1 + $0x114] ss:$8 sps:$4 sm:$0xff]   ;;  %v936_v28 = vld [vmem:[%s1324_s1 + $0x110] ss:$8 sps:$4 sm:$0xff]   ;;  %v939_v30 = vld [vmem:[%s1324_s1 + $0x104] ss:$8 sps:$4 sm:$0xff]  }
   0xb   :  { %547 = vmatpush1.bf16.msra.mxu0 %v911_v11  ;;  %v941_v31 = vld [vmem:[%s1324_s1] ss:$8 sps:$4 sm:$0xff]   ;;  %v943_v33 = vld [vmem:[%s1324_s1 + $0xf4] ss:$8 sps:$4 sm:$0xff]   ;;  %v947_v35 = vld [vmem:[%s1324_s1 + $0xf0] ss:$8 sps:$4 sm:$0xff]  }
   0xc   :  { %620 = vmatpush1.bf16.msra.mxu1 %v912_v12  ;;  %548 = vmatprep.subr.bf16.mxu0 %v913_v13  ;;  %v942_v32 = vld [vmem:[%s1324_s1 + $0x100] ss:$8 sps:$4 sm:$0xff]   ;;  %v945_v34 = vld [vmem:[%s1324_s1 + $0x1f4] ss:$8 sps:$4 sm:$0xff]   ;;  %v948_v36 = vld [vmem:[%s1324_s1 + $0x1f0] ss:$8 sps:$4 sm:$0xff]  }
   0xd   :  { %621 = vmatprep.subr.bf16.mxu1 %v915_v14  ;;  %v949_v37 = vld [vmem:[%s1324_s1 + $0xe4] ss:$8 sps:$4 sm:$0xff]   ;;  %v953_v39 = vld [vmem:[%s1324_s1 + $0xe0] ss:$8 sps:$4 sm:$0xff]   ;;  %v955_v41 = vld [vmem:[%s1324_s1 + $0xd4] ss:$8 sps:$4 sm:$0xff]  }
   0xe   :  { %v951_v38 = vld [vmem:[%s1324_s1 + $0x1e4] ss:$8 sps:$4 sm:$0xff]   ;;  %v954_v40 = vld [vmem:[%s1324_s1 + $0x1e0] ss:$8 sps:$4 sm:$0xff]   ;;  %v957_v42 = vld [vmem:[%s1324_s1 + $0x1d4] ss:$8 sps:$4 sm:$0xff]  }
   0xf   :  { %549 = vmatpush1.bf16.msra.mxu0 %v917_v15  ;;  %v959_v43 = vld [vmem:[%s1324_s1 + $0xd0] ss:$8 sps:$4 sm:$0xff]   ;;  %v961_v45 = vld [vmem:[%s1324_s1 + $0xc4] ss:$8 sps:$4 sm:$0xff]   ;;  %v965_v47 = vld [vmem:[%s1324_s1 + $0xc0] ss:$8 sps:$4 sm:$0xff]  }
  0x10   :  { %622 = vmatpush1.bf16.msra.mxu1 %v918_v16  ;;  %550 = vmatprep.subr.bf16.mxu0 %v919_v17  ;;  %v960_v44 = vld [vmem:[%s1324_s1 + $0x1d0] ss:$8 sps:$4 sm:$0xff]   ;;  %v963_v46 = vld [vmem:[%s1324_s1 + $0x1c4] ss:$8 sps:$4 sm:$0xff]   ;;  %v966_v48 = vld [vmem:[%s1324_s1 + $0x1c0] ss:$8 sps:$4 sm:$0xff]  }
  0x11   :  { %623 = vmatprep.subr.bf16.mxu1 %v921_v18  ;;  %v967_v49 = vld [vmem:[%s1324_s1 + $0xb4] ss:$8 sps:$4 sm:$0xff]   ;;  %v971_v53 = vld [vmem:[%s1324_s1 + $0xb0] ss:$8 sps:$4 sm:$0xff]   ;;  %v973_v55 = vld [vmem:[%s1324_s1 + $0xa4] ss:$8 sps:$4 sm:$0xff]  }
  0x12   :  { %v993_v50 = vld [vmem:[%s1325_s0 + $0x4] ss:$16 sps:$4 sm:$0xff]   ;;  %v996_v52 = vld [vmem:[%s1325_s0 + $0xc] ss:$16 sps:$4 sm:$0xff]   ;;  %v972_v54 = vld [vmem:[%s1324_s1 + $0x1b0] ss:$8 sps:$4 sm:$0xff]  }
  0x13   :  { %551 = vmatpush1.bf16.msra.mxu0 %v923_v19  ;;  %v969_v51 = vld [vmem:[%s1324_s1 + $0x1b4] ss:$8 sps:$4 sm:$0xff]   ;;  %574 = vmatprep.mubr.bf16.mxu0 %v993_v50  ;;  %v975_v56 = vld [vmem:[%s1324_s1 + $0x1a4] ss:$8 sps:$4 sm:$0xff]   ;;  %v977_v57 = vld [vmem:[%s1324_s1 + $0xa0] ss:$8 sps:$4 sm:$0xff]  }
  0x14   :  { %624 = vmatpush1.bf16.msra.mxu1 %v924_v20  ;;  %552 = vmatprep.subr.bf16.mxu0 %v925_v21  ;;  %v978_v58 = vld [vmem:[%s1324_s1 + $0x1a0] ss:$8 sps:$4 sm:$0xff]   ;;  %v979_v59 = vld [vmem:[%s1324_s1 + $0x94] ss:$8 sps:$4 sm:$0xff]   ;;  %v983_v0 = vld [vmem:[%s1324_s1 + $0x90] ss:$8 sps:$4 sm:$0xff]  }
  0x15   :  { %625 = vmatprep.subr.bf16.mxu1 %v927_v22  ;;  %647 = vmatprep.mubr.bf16.mxu1 %v996_v52  ;;  %v981_v60 = vld [vmem:[%s1324_s1 + $0x194] ss:$8 sps:$4 sm:$0xff]   ;;  %v94_v61 = vld [vmem:[%s1326_s2] sm:$0xff]  ;;  %v95_v63 = vld [vmem:[%s1326_s2 + $0x8] sm:$0xff] }
  0x16   :  { %104 = vperm.xlu0 %893, %v94_v61   ;;  %v96_v62 = vld [vmem:[%s1326_s2 + $0x10] sm:$0xff]  ;;  %v97_v2 = vld [vmem:[%s1326_s2 + $0x18] sm:$0xff]  ;;  %v985_v3 = vld [vmem:[%s1324_s1 + $0x84] ss:$8 sps:$4 sm:$0xff]  }
  0x17   :  { %553 = vmatpush1.bf16.msra.mxu0 %v929_v23  ;;  %114 = vperm.xlu1 %894, %v96_v62   ;;  %v984_v1 = vld [vmem:[%s1324_s1 + $0x190] ss:$8 sps:$4 sm:$0xff]   ;;  %v987_v4 = vld [vmem:[%s1324_s1 + $0x184] ss:$8 sps:$4 sm:$0xff]   ;;  %v989_v6 = vld [vmem:[%s1324_s1 + $0x80] ss:$8 sps:$4 sm:$0xff]  }
  0x18   :  { %626 = vmatpush1.bf16.msra.mxu1 %v930_v24  ;;  %554 = vmatprep.subr.bf16.mxu0 %v931_v25  ;;  %v98_v5 = vld [vmem:[%s1326_s2 + $0x20] sm:$0xff]  ;;  %v99_v8 = vld [vmem:[%s1326_s2 + $0x28] sm:$0xff]  ;;  %v100_v11 = vld [vmem:[%s1326_s2 + $0x30] sm:$0xff] }
  0x19   :  { %627 = vmatprep.subr.bf16.mxu1 %v933_v26  ;;  %v990_v7 = vld [vmem:[%s1324_s1 + $0x180] ss:$8 sps:$4 sm:$0xff]   ;;  %v997_v12 = vld [vmem:[%s1325_s0 + $0x24] ss:$16 sps:$4 sm:$0xff]   ;;  %v999_v13 = vld [vmem:[%s1325_s0 + $0x2c] ss:$16 sps:$4 sm:$0xff]  }
  0x1a   :  { %109 = vperm.xlu0 %893, %v95_v63   ;;  %v991_v9 = vld [vmem:[%s1325_s0] ss:$16 sps:$4 sm:$0xff]   ;;  %v994_v10 = vld [vmem:[%s1325_s0 + $0x8] ss:$16 sps:$4 sm:$0xff]   ;;  %v1003_v17 = vld [vmem:[%s1325_s0 + $0x44] ss:$16 sps:$4 sm:$0xff]  }
  0x1b   :  { %555 = vmatpush1.bf16.msra.mxu0 %v935_v27  ;;  %119 = vperm.xlu1 %894, %v97_v2   ;;  %v101_v14 = vld [vmem:[%s1326_s2 + $0x38] sm:$0xff]  ;;  %v1001_v15 = vld [vmem:[%s1325_s0 + $0x20] ss:$16 sps:$4 sm:$0xff]   ;;  %v1009_v21 = vld [vmem:[%s1325_s0 + $0x64] ss:$16 sps:$4 sm:$0xff]  }
  0x1c   :  { %628 = vmatpush1.bf16.msra.mxu1 %v936_v28  ;;  %556 = vmatprep.subr.bf16.mxu0 %v937_v29  ;;  %v1002_v16 = vld [vmem:[%s1325_s0 + $0x28] ss:$16 sps:$4 sm:$0xff]   ;;  %v1005_v18 = vld [vmem:[%s1325_s0 + $0x4c] ss:$16 sps:$4 sm:$0xff]   ;;  %v1007_v19 = vld [vmem:[%s1325_s0 + $0x40] ss:$16 sps:$4 sm:$0xff]  }
  0x1d   :  { %629 = vmatprep.subr.bf16.mxu1 %v939_v30  ;;  %v1008_v20 = vld [vmem:[%s1325_s0 + $0x48] ss:$16 sps:$4 sm:$0xff]   ;;  %v1011_v22 = vld [vmem:[%s1325_s0 + $0x6c] ss:$16 sps:$4 sm:$0xff]   ;;  %v1013_v23 = vld [vmem:[%s1325_s0 + $0x60] ss:$16 sps:$4 sm:$0xff]  }
  0x1e   :  { %124 = vperm.xlu0 %893, %v98_v5   ;;  %v1014_v24 = vld [vmem:[%s1325_s0 + $0x68] ss:$16 sps:$4 sm:$0xff]  }
  0x1f   :  { %557 = vmatpush1.bf16.msra.mxu0 %v941_v31  ;;  %129 = vperm.xlu1 %894, %v99_v8  }
  0x20   :  { %630 = vmatpush1.bf16.msra.mxu1 %v942_v32  ;;  %558 = vmatprep.subr.bf16.mxu0 %v943_v33 }
  0x21   :  { %631 = vmatprep.subr.bf16.mxu1 %v945_v34 }
  0x22   :  { %134 = vperm.xlu0 %893, %v100_v11  }
  0x23   :  { %559 = vmatpush2.bf16.msra.mxu0 %v947_v35  ;;  %139 = vperm.xlu1 %894, %v101_v14  }
  0x24   :  { %632 = vmatpush2.bf16.msra.mxu1 %v948_v36  ;;  %560 = vmatprep.subr.bf16.mxu0 %v949_v37 }
  0x25   :  { %633 = vmatprep.subr.bf16.mxu1 %v951_v38 }
  0x27   :  { %561 = vmatpush2.bf16.msra.mxu0 %v953_v39 }
  0x28   :  { %634 = vmatpush2.bf16.msra.mxu1 %v954_v40  ;;  %562 = vmatprep.subr.bf16.mxu0 %v955_v41 }
  0x29   :  { %635 = vmatprep.subr.bf16.mxu1 %v957_v42 }
  0x2b   :  { %563 = vmatpush2.bf16.msra.mxu0 %v959_v43 }
  0x2c   :  { %636 = vmatpush2.bf16.msra.mxu1 %v960_v44  ;;  %564 = vmatprep.subr.bf16.mxu0 %v961_v45 }
  0x2d   :  { %637 = vmatprep.subr.bf16.mxu1 %v963_v46 }
  0x2f   :  { %565 = vmatpush2.bf16.msra.mxu0 %v965_v47 }
  0x30   :  { %638 = vmatpush2.bf16.msra.mxu1 %v966_v48  ;;  %566 = vmatprep.subr.bf16.mxu0 %v967_v49 }
  0x31   :  { %639 = vmatprep.subr.bf16.mxu1 %v969_v51 }
  0x33   :  { %567 = vmatpush2.bf16.msra.mxu0 %v971_v53 }
  0x34   :  { %640 = vmatpush2.bf16.msra.mxu1 %v972_v54  ;;  %568 = vmatprep.subr.bf16.mxu0 %v973_v55 }
  0x35   :  { %641 = vmatprep.subr.bf16.mxu1 %v975_v56 }
  0x37   :  { %569 = vmatpush2.bf16.msra.mxu0 %v977_v57 }
  0x38   :  { %642 = vmatpush2.bf16.msra.mxu1 %v978_v58  ;;  %570 = vmatprep.subr.bf16.mxu0 %v979_v59 }
  0x39   :  { %643 = vmatprep.subr.bf16.mxu1 %v981_v60 }
  0x3b   :  { %571 = vmatpush2.bf16.msra.mxu0 %v983_v0 }
  0x3c   :  { %644 = vmatpush2.bf16.msra.mxu1 %v984_v1  ;;  %572 = vmatprep.subr.bf16.mxu0 %v985_v3 }
  0x3d   :  { %645 = vmatprep.subr.bf16.mxu1 %v987_v4 }
  0x3f   :  { %573 = vmatpush2.bf16.msra.mxu0 %v989_v6 }
  0x40   :  { %646 = vmatpush2.bf16.msra.mxu1 %v990_v7 }
  0x42   :  { %575 = vmatmul.mubr.bf16.vlgmr.msra.gmra.mxu0 %v991_v9 }
  0x43   :  { %648 = vmatmul.mubr.bf16.vlgmr.msra.gmra.mxu1 %v994_v10  ;;  %584 = vmatprep.mubr.bf16.mxu0 %v997_v12 }
  0x44   :  { %657 = vmatprep.mubr.bf16.mxu1 %v999_v13 }
  0x4a   :  { %585 = vmatmul.mubr.bf16.gmra.mxu0 %v1001_v15 }
  0x4b   :  { %658 = vmatmul.mubr.bf16.gmra.mxu1 %v1002_v16  ;;  %594 = vmatprep.mubr.bf16.mxu0 %v1003_v17 }
  0x4c   :  { %667 = vmatprep.mubr.bf16.mxu1 %v1005_v18 }
  0x52   :  { %595 = vmatmul.mubr.bf16.gmra.mxu0 %v1007_v19 }
  0x53   :  { %668 = vmatmul.mubr.bf16.gmra.mxu1 %v1008_v20  ;;  %604 = vmatprep.mubr.bf16.mxu0 %v1009_v21 }
  0x54   :  { %677 = vmatprep.mubr.bf16.mxu1 %v1011_v22 }
  0x5a   :  { %605 = vmatmul.mubr.bf16.gmra.mxu0 %v1013_v23 }
  0x5b   :  { %678 = vmatmul.mubr.bf16.gmra.mxu1 %v1014_v24 }
  0x91   :  { %v105_v25 = vpop.permute.xlu0 %104 }
  0x92   :  { %v115_v39 = vpop.permute.xlu1 %114 }
  0x95   :  { %v110_v29 = vpop.permute.xlu0 %109 }
  0x96   :  { %v120_v56 = vpop.permute.xlu1 %119 }
  0x99   :  { %v125_v6 = vpop.permute.xlu0 %124 }
  0x9a   :  { %v130_v19 = vpop.permute.xlu1 %129 }
 0x102   :  { %v576_v26 = vpop.f32.mrf.mxu0 }
 0x103   :  { %v649_v27 = vpop.f32.mrf.mxu1  ;;  %v577_v28 = vadd.f32 %v576_v26, %v105_v25 }
 0x104   :  { %v578_v30 = vpop.f32.mrf.mxu0 }
 0x105   :  { %v651_v31 = vpop.f32.mrf.mxu1  ;;  %v650_v32 = vadd.f32 %v649_v27, %v577_v28  ;;  %v579_v33 = vadd.f32 %v578_v30, %v105_v25 }
 0x106   :  { %v580_v34 = vpop.f32.mrf.mxu0 }
 0x107   :  { %v653_v35 = vpop.f32.mrf.mxu1  ;;  %v704_v36 = vmul.f32 0.2, %v650_v32  ;;  %v652_v37 = vadd.f32 %v651_v31, %v579_v33  ;;  %v581_v38 = vadd.f32 %v580_v34, %v110_v29  ;;  %vm688_vm0 = vcmp.gt.f32.partialorder %v650_v32, 0.0  ;;  %v135_v33 = vpop.permute.xlu0 %134 }
 0x108   :  { %v582_v40 = vpop.f32.mrf.mxu0 }
 0x109   :  { %v655_v41 = vpop.f32.mrf.mxu1  ;;  %vm689_vm1 = vcmp.gt.f32.partialorder %v652_v37, 0.0  ;;  %v705_v42 = vmul.f32 0.2, %v652_v37  ;;  %v654_v43 = vadd.f32 %v653_v35, %v581_v38  ;;  %v583_v44 = vadd.f32 %v582_v40, %v110_v29 }
 0x10a   :  { %v586_v45 = vpop.f32.mrf.mxu0  ;;  %v720_v47 = vsel %vm688_vm0, %v650_v32, %v704_v36 }
 0x10b   :  { %v659_v46 = vpop.f32.mrf.mxu1  ;;  %v721_v48 = vsel %vm689_vm1, %v652_v37, %v705_v42  ;;  %v587_v49 = vadd.f32 %v586_v45, %v115_v39  ;;  %v706_v51 = vmul.f32 0.2, %v654_v43  ;;  %v656_v52 = vadd.f32 %v655_v41, %v583_v44 }
 0x10c   :  { %v884_v50 = vpack.c.bf16 %v721_v48, %v720_v47  ;;  %v588_v53 = vpop.f32.mrf.mxu0  ;;  %vm690_vm2 = vcmp.gt.f32.partialorder %v654_v43, 0.0 }
 0x10d   :  { %v661_v54 = vpop.f32.mrf.mxu1  ;;  %v660_v55 = vadd.f32 %v659_v46, %v587_v49  ;;  %v589_v57 = vadd.f32 %v588_v53, %v115_v39  ;;  %vm691_vm3 = vcmp.gt.f32.partialorder %v656_v52, 0.0  ;;  %v707_v58 = vmul.f32 0.2, %v656_v52  ;;  %v140_v49 = vpop.permute.xlu1 %139 }
 0x10e   :  { %784 = vst [vmem:[%s1327_s3] sm:$0xff] %v884_v50  ;;  %v590_v59 = vpop.f32.mrf.mxu0  ;;  %v722_v0 = vsel %vm690_vm2, %v654_v43, %v706_v51 }
 0x10f   :  { %v663_v60 = vpop.f32.mrf.mxu1  ;;  %v708_v61 = vmul.f32 0.2, %v660_v55  ;;  %v662_v62 = vadd.f32 %v661_v54, %v589_v57  ;;  %v591_v63 = vadd.f32 %v590_v59, %v120_v56  ;;  %v723_v1 = vsel %vm691_vm3, %v656_v52, %v707_v58 }
 0x110   :  { %vm692_vm4 = vcmp.gt.f32.partialorder %v660_v55, 0.0  ;;  %v592_v2 = vpop.f32.mrf.mxu0  ;;  %v885_v4 = vpack.c.bf16 %v723_v1, %v722_v0 }
 0x111   :  { %v665_v3 = vpop.f32.mrf.mxu1  ;;  %vm693_vm5 = vcmp.gt.f32.partialorder %v662_v62, 0.0  ;;  %v709_v5 = vmul.f32 0.2, %v662_v62  ;;  %v664_v7 = vadd.f32 %v663_v60, %v591_v63  ;;  %v593_v8 = vadd.f32 %v592_v2, %v120_v56 }
 0x112   :  { %v596_v9 = vpop.f32.mrf.mxu0  ;;  %785 = vst [vmem:[%s1327_s3 + $0x8] sm:$0xff] %v885_v4  ;;  %v724_v11 = vsel %vm692_vm4, %v660_v55, %v708_v61 }
 0x113   :  { %v669_v10 = vpop.f32.mrf.mxu1  ;;  %v725_v12 = vsel %vm693_vm5, %v662_v62, %v709_v5  ;;  %v597_v13 = vadd.f32 %v596_v9, %v125_v6  ;;  %v710_v15 = vmul.f32 0.2, %v664_v7  ;;  %v666_v16 = vadd.f32 %v665_v3, %v593_v8 }
 0x114   :  { %v886_v14 = vpack.c.bf16 %v725_v12, %v724_v11  ;;  %v598_v17 = vpop.f32.mrf.mxu0  ;;  %vm694_vm6 = vcmp.gt.f32.partialorder %v664_v7, 0.0 }
 0x115   :  { %v671_v18 = vpop.f32.mrf.mxu1  ;;  %v670_v20 = vadd.f32 %v669_v10, %v597_v13  ;;  %v599_v21 = vadd.f32 %v598_v17, %v125_v6  ;;  %vm695_vm7 = vcmp.gt.f32.partialorder %v666_v16, 0.0  ;;  %v711_v22 = vmul.f32 0.2, %v666_v16 }
 0x116   :  { %786 = vst [vmem:[%s1327_s3 + $0x10] sm:$0xff] %v886_v14  ;;  %v600_v23 = vpop.f32.mrf.mxu0  ;;  %v726_v28 = vsel %vm694_vm6, %v664_v7, %v710_v15 }
 0x117   :  { %v673_v24 = vpop.f32.mrf.mxu1  ;;  %v712_v25 = vmul.f32 0.2, %v670_v20  ;;  %v672_v26 = vadd.f32 %v671_v18, %v599_v21  ;;  %v601_v27 = vadd.f32 %v600_v23, %v130_v19  ;;  %v727_v29 = vsel %vm695_vm7, %v666_v16, %v711_v22 }
 0x118   :  { %vm696_vm8 = vcmp.gt.f32.partialorder %v670_v20, 0.0  ;;  %v602_v30 = vpop.f32.mrf.mxu0  ;;  %v887_v32 = vpack.c.bf16 %v727_v29, %v726_v28 }
 0x119   :  { %v675_v31 = vpop.f32.mrf.mxu1  ;;  %vm697_vm9 = vcmp.gt.f32.partialorder %v672_v26, 0.0  ;;  %v713_v34 = vmul.f32 0.2, %v672_v26  ;;  %v674_v35 = vadd.f32 %v673_v24, %v601_v27  ;;  %v603_v36 = vadd.f32 %v602_v30, %v130_v19 }
 0x11a   :  { %v606_v37 = vpop.f32.mrf.mxu0  ;;  %787 = vst [vmem:[%s1327_s3 + $0x18] sm:$0xff] %v887_v32  ;;  %v728_v39 = vsel %vm696_vm8, %v670_v20, %v712_v25 }
 0x11b   :  { %v679_v38 = vpop.f32.mrf.mxu1  ;;  %v729_v40 = vsel %vm697_vm9, %v672_v26, %v713_v34  ;;  %v607_v41 = vadd.f32 %v606_v37, %v135_v33  ;;  %v714_v43 = vmul.f32 0.2, %v674_v35  ;;  %v676_v44 = vadd.f32 %v675_v31, %v603_v36 }
 0x11c   :  { %v888_v42 = vpack.c.bf16 %v729_v40, %v728_v39  ;;  %v608_v45 = vpop.f32.mrf.mxu0  ;;  %vm698_vm10 = vcmp.gt.f32.partialorder %v674_v35, 0.0 }
 0x11d   :  { %v681_v46 = vpop.f32.mrf.mxu1  ;;  %v680_v47 = vadd.f32 %v679_v38, %v607_v41  ;;  %v609_v48 = vadd.f32 %v608_v45, %v135_v33  ;;  %vm699_vm11 = vcmp.gt.f32.partialorder %v676_v44, 0.0  ;;  %v715_v50 = vmul.f32 0.2, %v676_v44 }
 0x11e   :  { %788 = vst [vmem:[%s1327_s3 + $0x20] sm:$0xff] %v888_v42  ;;  %v610_v51 = vpop.f32.mrf.mxu0  ;;  %v730_v56 = vsel %vm698_vm10, %v674_v35, %v714_v43 }
 0x11f   :  { %v716_v52 = vmul.f32 0.2, %v680_v47  ;;  %v682_v53 = vadd.f32 %v681_v46, %v609_v48  ;;  %v611_v54 = vadd.f32 %v610_v51, %v140_v49  ;;  %v683_v55 = vpop.f32.mrf.mxu1  ;;  %v731_v57 = vsel %vm699_vm11, %v676_v44, %v715_v50 }
 0x120   :  { %vm700_vm12 = vcmp.gt.f32.partialorder %v680_v47, 0.0  ;;  %v612_v58 = vpop.f32.mrf.mxu0  ;;  %v889_v59 = vpack.c.bf16 %v731_v57, %v730_v56 }
 0x121   :  { %vm701_vm13 = vcmp.gt.f32.partialorder %v682_v53, 0.0  ;;  %v717_v60 = vmul.f32 0.2, %v682_v53  ;;  %v684_v61 = vadd.f32 %v683_v55, %v611_v54  ;;  %v613_v62 = vadd.f32 %v612_v58, %v140_v49  ;;  %v685_v1 = vpop.f32.mrf.mxu1 }
 0x122   :  { %789 = vst [vmem:[%s1327_s3 + $0x28] sm:$0xff] %v889_v59  ;;  %v732_v63 = vsel %vm700_vm12, %v680_v47, %v716_v52 }
 0x123   :  { %v733_v0 = vsel %vm701_vm13, %v682_v53, %v717_v60  ;;  %v718_v3 = vmul.f32 0.2, %v684_v61  ;;  %v686_v4 = vadd.f32 %v685_v1, %v613_v62  ;;  %vm702_vm14 = vcmp.gt.f32.partialorder %v684_v61, 0.0 }
 0x124   :  { %v890_v2 = vpack.c.bf16 %v733_v0, %v732_v63 }
 0x125   :  { %vm703_vm15 = vcmp.gt.f32.partialorder %v686_v4, 0.0  ;;  %v719_v5 = vmul.f32 0.2, %v686_v4  ;;  %v734_v6 = vsel %vm702_vm14, %v684_v61, %v718_v3 }
 0x126   :  { %790 = vst [vmem:[%s1327_s3 + $0x30] sm:$0xff] %v890_v2 }
 0x127   :  { %v735_v7 = vsel %vm703_vm15, %v686_v4, %v719_v5 }
 0x128   :  { %v891_v8 = vpack.c.bf16 %v735_v7, %v734_v6 }
 0x12a   :  { %791 = vst [vmem:[%s1327_s3 + $0x38] sm:$0xff] %v891_v8 }

// kernel: _lambda_.20
= control target key start
LH: loop header
LB: loop body
LE: loop exit
PB: predicated region body
PF: predicated region fallthrough
CT: control target
= control target key end

     0   :  { %v1457_v1 = vmov 0   ;;  %s1841_s1 = inlined_call_operand.vmem [shape: bf16[1,1,1024,128], index: 1, kind: input, shape index: {}]   ;;  %s1842_s0 = inlined_call_operand.vmem [shape: bf16[1,64,1024], index: 0, kind: input, shape index: {}]   ;;  %s1843_s2 = inlined_call_operand.vmem [shape: f32[1,64,1], index: 2, kind: input, shape index: {}]   ;;  %s1844_s3 = inlined_call_operand.vmem [shape: bf16[1,1,64,128], index: 3, kind: output, shape index: {}]  }
   0x1   :  { %v1393_v0 = vld [vmem:[%s1841_s1 + $0x78] sm:$0xff]   ;;  %1391 = vset.pattern.permute.xlu0 %v1457_v1  ;;  %1392 = vset.pattern.permute.xlu1 %v1457_v1  ;;  %v1397_v5 = vld [vmem:[%s1841_s1 + $0x70] sm:$0xff]   ;;  %v1401_v9 = vld [vmem:[%s1841_s1 + $0x68] sm:$0xff]  }
   0x2   :  { %v1394_v2 = vld [vmem:[%s1841_s1 + $0xf8] sm:$0xff]   ;;  %1230 = vmatprep.subr.bf16.mxu0 %v1393_v0  ;;  %v1398_v6 = vld [vmem:[%s1841_s1 + $0xf0] sm:$0xff]   ;;  %v1402_v10 = vld [vmem:[%s1841_s1 + $0xe8] sm:$0xff]  }
   0x3   :  { %v1395_v3 = vld [vmem:[%s1841_s1 + $0x38] sm:$0xff]   ;;  %1270 = vmatprep.subr.bf16.mxu1 %v1394_v2  ;;  %v1399_v7 = vld [vmem:[%s1841_s1 + $0x30] sm:$0xff]   ;;  %v1403_v11 = vld [vmem:[%s1841_s1 + $0x28] sm:$0xff]  }
   0x4   :  { %v1396_v4 = vld [vmem:[%s1841_s1 + $0xb8] sm:$0xff]   ;;  %1231 = vmatpush3.bf16.msra.mxu0 %v1395_v3  ;;  %v1400_v8 = vld [vmem:[%s1841_s1 + $0xb0] sm:$0xff]   ;;  %v1404_v12 = vld [vmem:[%s1841_s1 + $0xa8] sm:$0xff]  }
   0x5   :  { %1271 = vmatpush3.bf16.msra.mxu1 %v1396_v4  ;;  %1232 = vmatprep.subr.bf16.mxu0 %v1397_v5  ;;  %v1405_v13 = vld [vmem:[%s1841_s1 + $0x60] sm:$0xff]   ;;  %v1409_v17 = vld [vmem:[%s1841_s1 + $0x58] sm:$0xff]   ;;  %v1413_v21 = vld [vmem:[%s1841_s1 + $0x50] sm:$0xff]  }
   0x6   :  { %1272 = vmatprep.subr.bf16.mxu1 %v1398_v6  ;;  %v1406_v14 = vld [vmem:[%s1841_s1 + $0xe0] sm:$0xff]   ;;  %v1410_v18 = vld [vmem:[%s1841_s1 + $0xd8] sm:$0xff]   ;;  %v1414_v22 = vld [vmem:[%s1841_s1 + $0xd0] sm:$0xff]  }
   0x7   :  { %v1407_v15 = vld [vmem:[%s1841_s1 + $0x20] sm:$0xff]   ;;  %v1411_v19 = vld [vmem:[%s1841_s1 + $0x18] sm:$0xff]   ;;  %v1415_v23 = vld [vmem:[%s1841_s1 + $0x10] sm:$0xff]  }
   0x8   :  { %1233 = vmatpush3.bf16.msra.mxu0 %v1399_v7  ;;  %v1408_v16 = vld [vmem:[%s1841_s1 + $0xa0] sm:$0xff]   ;;  %v1412_v20 = vld [vmem:[%s1841_s1 + $0x98] sm:$0xff]   ;;  %v1416_v24 = vld [vmem:[%s1841_s1 + $0x90] sm:$0xff]  }
   0x9   :  { %1273 = vmatpush3.bf16.msra.mxu1 %v1400_v8  ;;  %1234 = vmatprep.subr.bf16.mxu0 %v1401_v9  ;;  %v1417_v25 = vld [vmem:[%s1841_s1 + $0x48] sm:$0xff]   ;;  %v1421_v29 = vld [vmem:[%s1841_s1 + $0x40] sm:$0xff]   ;;  %v1425_v41 = vld [vmem:[%s1841_s1 + $0x178] sm:$0xff]  }
   0xa   :  { %1274 = vmatprep.subr.bf16.mxu1 %v1402_v10  ;;  %v1418_v26 = vld [vmem:[%s1841_s1 + $0xc8] sm:$0xff]   ;;  %v1422_v30 = vld [vmem:[%s1841_s1 + $0xc0] sm:$0xff]   ;;  %v1426_v42 = vld [vmem:[%s1841_s1 + $0x1f8] sm:$0xff]  }
   0xb   :  { %v1419_v27 = vld [vmem:[%s1841_s1 + $0x8] sm:$0xff]   ;;  %v1423_v31 = vld [vmem:[%s1841_s1] sm:$0xff]   ;;  %v1427_v43 = vld [vmem:[%s1841_s1 + $0x138] sm:$0xff]  }
   0xc   :  { %1235 = vmatpush3.bf16.msra.mxu0 %v1403_v11  ;;  %v1420_v28 = vld [vmem:[%s1841_s1 + $0x88] sm:$0xff]   ;;  %v1424_v32 = vld [vmem:[%s1841_s1 + $0x80] sm:$0xff]   ;;  %v1428_v44 = vld [vmem:[%s1841_s1 + $0x1b8] sm:$0xff]  }
   0xd   :  { %1275 = vmatpush3.bf16.msra.mxu1 %v1404_v12  ;;  %1236 = vmatprep.subr.bf16.mxu0 %v1405_v13  ;;  %v15_v33 = vld [vmem:[%s1842_s0] sm:$0xff]  ;;  %v16_v35 = vld [vmem:[%s1842_s0 + $0x8] sm:$0xff]  ;;  %v1429_v45 = vld [vmem:[%s1841_s1 + $0x170] sm:$0xff]  }
   0xe   :  { %1276 = vmatprep.subr.bf16.mxu1 %v1406_v14  ;;  %v19_v34 = vld [vmem:[%s1842_s0 + $0x20] sm:$0xff]  ;;  %v20_v38 = vld [vmem:[%s1842_s0 + $0x28] sm:$0xff]  ;;  %v1430_v46 = vld [vmem:[%s1841_s1 + $0x1f0] sm:$0xff]  }
   0xf   :  { %v1095_v36 = vcombine.low %v15_v33, %v19_v34  ;;  %v1096_v37 = vcombine.high %v15_v33, %v19_v34  ;;  %v1097_v39 = vcombine.low %v16_v35, %v20_v38  ;;  %v1098_v40 = vcombine.high %v16_v35, %v20_v38  ;;  %v1431_v47 = vld [vmem:[%s1841_s1 + $0x130] sm:$0xff]   ;;  %v23_v49 = vld [vmem:[%s1842_s0 + $0x40] sm:$0xff]  ;;  %v24_v52 = vld [vmem:[%s1842_s0 + $0x48] sm:$0xff] }
  0x10   :  { %1237 = vmatpush3.bf16.msra.mxu0 %v1407_v15  ;;  %v1432_v48 = vld [vmem:[%s1841_s1 + $0x1b0] sm:$0xff]   ;;  %v27_v50 = vld [vmem:[%s1842_s0 + $0x60] sm:$0xff]  ;;  %v28_v53 = vld [vmem:[%s1842_s0 + $0x68] sm:$0xff] }
  0x11   :  { %1277 = vmatpush3.bf16.msra.mxu1 %v1408_v16  ;;  %1238 = vmatprep.subr.bf16.mxu0 %v1409_v17  ;;  %v1104_v51 = vcombine.high %v23_v49, %v27_v50  ;;  %v1103_v54 = vcombine.low %v23_v49, %v27_v50  ;;  %v1106_v55 = vcombine.high %v24_v52, %v28_v53  ;;  %v1433_v57 = vld [vmem:[%s1841_s1 + $0x168] sm:$0xff]   ;;  %v1437_v61 = vld [vmem:[%s1841_s1 + $0x160] sm:$0xff]   ;;  %v1441_v9 = vld [vmem:[%s1841_s1 + $0x158] sm:$0xff]  }
  0x12   :  { %1278 = vmatprep.subr.bf16.mxu1 %v1410_v18  ;;  %799 = vmatprep.mubr.bf16.mxu0 %v1096_v37  ;;  %v1105_v56 = vcombine.low %v24_v52, %v28_v53  ;;  %v1434_v58 = vld [vmem:[%s1841_s1 + $0x1e8] sm:$0xff]   ;;  %v1438_v62 = vld [vmem:[%s1841_s1 + $0x1e0] sm:$0xff]   ;;  %v1442_v10 = vld [vmem:[%s1841_s1 + $0x1d8] sm:$0xff]  }
  0x13   :  { %864 = vmatprep.mubr.bf16.mxu1 %v1098_v40  ;;  %v1435_v59 = vld [vmem:[%s1841_s1 + $0x128] sm:$0xff]   ;;  %v1439_v63 = vld [vmem:[%s1841_s1 + $0x120] sm:$0xff]   ;;  %v1443_v11 = vld [vmem:[%s1841_s1 + $0x118] sm:$0xff]  }
  0x14   :  { %1239 = vmatpush3.bf16.msra.mxu0 %v1411_v19  ;;  %v1436_v60 = vld [vmem:[%s1841_s1 + $0x1a8] sm:$0xff]   ;;  %v1440_v0 = vld [vmem:[%s1841_s1 + $0x1a0] sm:$0xff]   ;;  %v1444_v12 = vld [vmem:[%s1841_s1 + $0x198] sm:$0xff]  }
  0x15   :  { %1279 = vmatpush3.bf16.msra.mxu1 %v1412_v20  ;;  %1240 = vmatprep.subr.bf16.mxu0 %v1413_v21  ;;  %v31_v1 = vld [vmem:[%s1842_s0 + $0x80] sm:$0xff]  ;;  %v32_v3 = vld [vmem:[%s1842_s0 + $0x88] sm:$0xff]  ;;  %v1445_v13 = vld [vmem:[%s1841_s1 + $0x150] sm:$0xff]  }
  0x16   :  { %1280 = vmatprep.subr.bf16.mxu1 %v1414_v22  ;;  %v35_v2 = vld [vmem:[%s1842_s0 + $0xa0] sm:$0xff]  ;;  %v36_v4 = vld [vmem:[%s1842_s0 + $0xa8] sm:$0xff]  ;;  %v1446_v14 = vld [vmem:[%s1841_s1 + $0x1d0] sm:$0xff]  }
  0x17   :  { %v1112_v5 = vcombine.high %v31_v1, %v35_v2  ;;  %v1114_v6 = vcombine.high %v32_v3, %v36_v4  ;;  %v1111_v7 = vcombine.low %v31_v1, %v35_v2  ;;  %v1113_v8 = vcombine.low %v32_v3, %v36_v4  ;;  %v1447_v15 = vld [vmem:[%s1841_s1 + $0x110] sm:$0xff]   ;;  %v39_v17 = vld [vmem:[%s1842_s0 + $0xc0] sm:$0xff]  ;;  %v40_v19 = vld [vmem:[%s1842_s0 + $0xc8] sm:$0xff] }
  0x18   :  { %1241 = vmatpush3.bf16.msra.mxu0 %v1415_v23  ;;  %v1448_v16 = vld [vmem:[%s1841_s1 + $0x190] sm:$0xff]   ;;  %v43_v18 = vld [vmem:[%s1842_s0 + $0xe0] sm:$0xff]  ;;  %v44_v21 = vld [vmem:[%s1842_s0 + $0xe8] sm:$0xff] }
  0x19   :  { %1281 = vmatpush3.bf16.msra.mxu1 %v1416_v24  ;;  %1242 = vmatprep.subr.bf16.mxu0 %v1417_v25  ;;  %v1120_v20 = vcombine.high %v39_v17, %v43_v18  ;;  %v1119_v22 = vcombine.low %v39_v17, %v43_v18  ;;  %v1122_v23 = vcombine.high %v40_v19, %v44_v21  ;;  %v1449_v25 = vld [vmem:[%s1841_s1 + $0x148] sm:$0xff]   ;;  %v17_v33 = vld [vmem:[%s1842_s0 + $0x10] sm:$0xff]  ;;  %v18_v37 = vld [vmem:[%s1842_s0 + $0x18] sm:$0xff] }
  0x1a   :  { %1282 = vmatprep.subr.bf16.mxu1 %v1418_v26  ;;  %v1121_v24 = vcombine.low %v40_v19, %v44_v21  ;;  %v1450_v26 = vld [vmem:[%s1841_s1 + $0x1c8] sm:$0xff]   ;;  %v21_v34 = vld [vmem:[%s1842_s0 + $0x30] sm:$0xff]  ;;  %v22_v38 = vld [vmem:[%s1842_s0 + $0x38] sm:$0xff] }
  0x1b   :  { %v1099_v35 = vcombine.low %v17_v33, %v21_v34  ;;  %v1101_v40 = vcombine.low %v18_v37, %v22_v38  ;;  %v37_v49 = vld [vmem:[%s1842_s0 + $0xb0] sm:$0xff]  ;;  %v38_v52 = vld [vmem:[%s1842_s0 + $0xb8] sm:$0xff]  ;;  %v176_v53 = vld [vmem:[%s1843_s2 + $0x8] sm:$0xff] }
  0x1c   :  { %1243 = vmatpush3.bf16.msra.mxu0 %v1419_v27  ;;  %v1451_v27 = vld [vmem:[%s1841_s1 + $0x108] sm:$0xff]   ;;  %v177_v50 = vld [vmem:[%s1843_s2 + $0x10] sm:$0xff]  ;;  %v182_v3 = vld [vmem:[%s1843_s2 + $0x38] sm:$0xff] }
  0x1d   :  { %1283 = vmatpush3.bf16.msra.mxu1 %v1420_v28  ;;  %1244 = vmatprep.subr.bf16.mxu0 %v1421_v29  ;;  %v1452_v28 = vld [vmem:[%s1841_s1 + $0x188] sm:$0xff]   ;;  %v1453_v29 = vld [vmem:[%s1841_s1 + $0x140] sm:$0xff]   ;;  %v181_v1 = vld [vmem:[%s1843_s2 + $0x30] sm:$0xff] }
  0x1e   :  { %1284 = vmatprep.subr.bf16.mxu1 %v1422_v30  ;;  %v1454_v30 = vld [vmem:[%s1841_s1 + $0x1c0] sm:$0xff]   ;;  %195 = vperm.xlu1 %1392, %v177_v50  }
  0x20   :  { %1245 = vmatpush3.bf16.msra.mxu0 %v1423_v31  ;;  %v1455_v31 = vld [vmem:[%s1841_s1 + $0x100] sm:$0xff]  }
  0x21   :  { %1285 = vmatpush3.bf16.msra.mxu1 %v1424_v32  ;;  %1310 = vmatprep.subr.bf16.mxu0 %v1425_v41  ;;  %v1456_v32 = vld [vmem:[%s1841_s1 + $0x180] sm:$0xff]   ;;  %v1102_v41 = vcombine.high %v18_v37, %v22_v38 }
  0x22   :  { %1350 = vmatprep.subr.bf16.mxu1 %v1426_v42  ;;  %v29_v42 = vld [vmem:[%s1842_s0 + $0x70] sm:$0xff] }
  0x23   :  { %800 = vmatmul.mubr.bf16.vlgmr.msra.gmra.mxu0 %v1095_v36  ;;  %v1100_v36 = vcombine.high %v17_v33, %v21_v34 }
  0x24   :  { %865 = vmatmul.mubr.bf16.vlgmr.msra.gmra.mxu1 %v1097_v39  ;;  %1311 = vmatpush3.bf16.msra.mxu0 %v1427_v43  ;;  %v25_v39 = vld [vmem:[%s1842_s0 + $0x50] sm:$0xff]  ;;  %v26_v43 = vld [vmem:[%s1842_s0 + $0x58] sm:$0xff] }
  0x25   :  { %1351 = vmatpush3.bf16.msra.mxu1 %v1428_v44  ;;  %1312 = vmatprep.subr.bf16.mxu0 %v1429_v45  ;;  %v30_v44 = vld [vmem:[%s1842_s0 + $0x78] sm:$0xff]  ;;  %v1108_v45 = vcombine.high %v25_v39, %v29_v42 }
  0x26   :  { %1352 = vmatprep.subr.bf16.mxu1 %v1430_v46  ;;  %807 = vmatprep.mubr.bf16.mxu0 %v1104_v51  ;;  %v1110_v46 = vcombine.high %v26_v43, %v30_v44  ;;  %v34_v51 = vld [vmem:[%s1842_s0 + $0x98] sm:$0xff] }
  0x27   :  { %872 = vmatprep.mubr.bf16.mxu1 %v1106_v55  ;;  %v178_v55 = vld [vmem:[%s1843_s2 + $0x18] sm:$0xff]  ;;  %v1117_v4 = vcombine.low %v34_v51, %v38_v52 }
  0x28   :  { %1313 = vmatpush3.bf16.msra.mxu0 %v1431_v47  ;;  %v175_v47 = vld [vmem:[%s1843_s2] sm:$0xff]  ;;  %200 = vperm.xlu1 %1392, %v178_v55  }
  0x29   :  { %1353 = vmatpush3.bf16.msra.mxu1 %v1432_v48  ;;  %1314 = vmatprep.subr.bf16.mxu0 %v1433_v57  ;;  %v33_v48 = vld [vmem:[%s1842_s0 + $0x90] sm:$0xff] }
  0x2a   :  { %1354 = vmatprep.subr.bf16.mxu1 %v1434_v58  ;;  %185 = vperm.xlu0 %1391, %v175_v47   ;;  %v1116_v57 = vcombine.high %v33_v48, %v37_v49  ;;  %v1118_v58 = vcombine.high %v34_v51, %v38_v52  ;;  %v1115_v2 = vcombine.low %v33_v48, %v37_v49 }
  0x2b   :  { %808 = vmatmul.mubr.bf16.gmra.mxu0 %v1103_v54  ;;  %v1107_v54 = vcombine.low %v25_v39, %v29_v42 }
  0x2c   :  { %873 = vmatmul.mubr.bf16.gmra.mxu1 %v1105_v56  ;;  %1315 = vmatpush3.bf16.msra.mxu0 %v1435_v59  ;;  %v1109_v56 = vcombine.low %v26_v43, %v30_v44  ;;  %v179_v59 = vld [vmem:[%s1843_s2 + $0x20] sm:$0xff] }
  0x2d   :  { %1355 = vmatpush3.bf16.msra.mxu1 %v1436_v60  ;;  %1316 = vmatprep.subr.bf16.mxu0 %v1437_v61  ;;  %v180_v60 = vld [vmem:[%s1843_s2 + $0x28] sm:$0xff]  ;;  %v41_v61 = vld [vmem:[%s1842_s0 + $0xd0] sm:$0xff] }
  0x2e   :  { %1356 = vmatprep.subr.bf16.mxu1 %v1438_v62  ;;  %815 = vmatprep.mubr.bf16.mxu0 %v1112_v5  ;;  %v45_v62 = vld [vmem:[%s1842_s0 + $0xf0] sm:$0xff] }
  0x2f   :  { %880 = vmatprep.mubr.bf16.mxu1 %v1114_v6  ;;  %190 = vperm.xlu0 %1391, %v176_v53   ;;  %v1124_v5 = vcombine.high %v41_v61, %v45_v62 }
  0x30   :  { %1317 = vmatpush3.bf16.msra.mxu0 %v1439_v63  ;;  %v42_v63 = vld [vmem:[%s1842_s0 + $0xd8] sm:$0xff]  ;;  %210 = vperm.xlu1 %1392, %v180_v60  }
  0x31   :  { %1357 = vmatpush3.bf16.msra.mxu1 %v1440_v0  ;;  %1318 = vmatprep.subr.bf16.mxu0 %v1441_v9  ;;  %v46_v0 = vld [vmem:[%s1842_s0 + $0xf8] sm:$0xff] }
  0x32   :  { %1358 = vmatprep.subr.bf16.mxu1 %v1442_v10  ;;  %v1126_v6 = vcombine.high %v42_v63, %v46_v0 }
  0x33   :  { %816 = vmatmul.mubr.bf16.gmra.mxu0 %v1111_v7  ;;  %205 = vperm.xlu0 %1391, %v179_v59   ;;  %v1123_v7 = vcombine.low %v41_v61, %v45_v62 }
  0x34   :  { %881 = vmatmul.mubr.bf16.gmra.mxu1 %v1113_v8  ;;  %1319 = vmatpush3.bf16.msra.mxu0 %v1443_v11  ;;  %v1125_v8 = vcombine.low %v42_v63, %v46_v0 }
  0x35   :  { %1359 = vmatpush3.bf16.msra.mxu1 %v1444_v12  ;;  %1320 = vmatprep.subr.bf16.mxu0 %v1445_v13 }
  0x36   :  { %1360 = vmatprep.subr.bf16.mxu1 %v1446_v14  ;;  %823 = vmatprep.mubr.bf16.mxu0 %v1120_v20 }
  0x37   :  { %888 = vmatprep.mubr.bf16.mxu1 %v1122_v23  ;;  %215 = vperm.xlu0 %1391, %v181_v1  }
  0x38   :  { %1321 = vmatpush3.bf16.msra.mxu0 %v1447_v15  ;;  %220 = vperm.xlu1 %1392, %v182_v3  }
  0x39   :  { %1361 = vmatpush3.bf16.msra.mxu1 %v1448_v16  ;;  %1322 = vmatprep.subr.bf16.mxu0 %v1449_v25 }
  0x3a   :  { %1362 = vmatprep.subr.bf16.mxu1 %v1450_v26 }
  0x3b   :  { %824 = vmatmul.mubr.bf16.gmra.mxu0 %v1119_v22 }
  0x3c   :  { %889 = vmatmul.mubr.bf16.gmra.mxu1 %v1121_v24  ;;  %1323 = vmatpush3.bf16.msra.mxu0 %v1451_v27 }
  0x3d   :  { %1363 = vmatpush3.bf16.msra.mxu1 %v1452_v28  ;;  %1324 = vmatprep.subr.bf16.mxu0 %v1453_v29 }
  0x3e   :  { %1364 = vmatprep.subr.bf16.mxu1 %v1454_v30  ;;  %929 = vmatprep.mubr.bf16.mxu0 %v1100_v36 }
  0x3f   :  { %994 = vmatprep.mubr.bf16.mxu1 %v1102_v41 }
  0x40   :  { %1325 = vmatpush3.bf16.msra.mxu0 %v1455_v31 }
  0x41   :  { %1365 = vmatpush3.bf16.msra.mxu1 %v1456_v32 }
  0x43   :  { %930 = vmatmul.mubr.bf16.vlgmr.msra.gmra.mxu0 %v1099_v35 }
  0x44   :  { %995 = vmatmul.mubr.bf16.vlgmr.msra.gmra.mxu1 %v1101_v40  ;;  %937 = vmatprep.mubr.bf16.mxu0 %v1108_v45 }
  0x45   :  { %1002 = vmatprep.mubr.bf16.mxu1 %v1110_v46 }
  0x4b   :  { %938 = vmatmul.mubr.bf16.gmra.mxu0 %v1107_v54 }
  0x4c   :  { %1003 = vmatmul.mubr.bf16.gmra.mxu1 %v1109_v56  ;;  %945 = vmatprep.mubr.bf16.mxu0 %v1116_v57 }
  0x4d   :  { %1010 = vmatprep.mubr.bf16.mxu1 %v1118_v58 }
  0x53   :  { %946 = vmatmul.mubr.bf16.gmra.mxu0 %v1115_v2 }
  0x54   :  { %1011 = vmatmul.mubr.bf16.gmra.mxu1 %v1117_v4  ;;  %953 = vmatprep.mubr.bf16.mxu0 %v1124_v5 }
  0x55   :  { %1018 = vmatprep.mubr.bf16.mxu1 %v1126_v6 }
  0x5b   :  { %954 = vmatmul.mubr.bf16.gmra.mxu0 %v1123_v7 }
  0x5c   :  { %1019 = vmatmul.mubr.bf16.gmra.mxu1 %v1125_v8 }
  0x99   :  { %v196_v48 = vpop.permute.xlu1 %195 }
  0xa3   :  { %v201_v1 = vpop.permute.xlu1 %200 }
  0xa5   :  { %v186_v36 = vpop.permute.xlu0 %185 }
  0xaa   :  { %v191_v45 = vpop.permute.xlu0 %190 }
  0xe3   :  { %v1246_v9 = vpop.f32.mrf.mxu0 }
  0xe4   :  { %v1286_v10 = vpop.f32.mrf.mxu1 }
  0xe5   :  { %v1247_v11 = vpop.f32.mrf.mxu0 }
  0xe6   :  { %v1287_v12 = vpop.f32.mrf.mxu1  ;;  %v1248_v38 = vadd.f32 %v1247_v11, %v1246_v9 }
  0xe7   :  { %v1249_v13 = vpop.f32.mrf.mxu0  ;;  %v1288_v47 = vadd.f32 %v1287_v12, %v1286_v10 }
  0xe8   :  { %v1289_v14 = vpop.f32.mrf.mxu1  ;;  %v802_v43 = vadd.f32 %v1248_v38, %v186_v36 }
  0xe9   :  { %v1250_v15 = vpop.f32.mrf.mxu0 }
  0xea   :  { %v1290_v16 = vpop.f32.mrf.mxu1  ;;  %v1251_v44 = vadd.f32 %v1250_v15, %v1249_v13  ;;  %v867_v51 = vadd.f32 %v1288_v47, %v802_v43 }
  0xeb   :  { %v1252_v17 = vpop.f32.mrf.mxu0  ;;  %v1291_v57 = vadd.f32 %v1290_v16, %v1289_v14  ;;  %v206_v14 = vpop.permute.xlu0 %205 }
  0xec   :  { %v1292_v18 = vpop.f32.mrf.mxu1  ;;  %v805_v52 = vadd.f32 %v1251_v44, %v191_v45 }
  0xed   :  { %v1253_v19 = vpop.f32.mrf.mxu0 }
  0xee   :  { %v1293_v20 = vpop.f32.mrf.mxu1  ;;  %v1254_v53 = vadd.f32 %v1253_v19, %v1252_v17  ;;  %v870_v63 = vadd.f32 %v1291_v57, %v805_v52 }
  0xef   :  { %v1255_v21 = vpop.f32.mrf.mxu0  ;;  %v1294_v6 = vadd.f32 %v1293_v20, %v1292_v18  ;;  %v216_v57 = vpop.permute.xlu0 %215 }
  0xf0   :  { %v1295_v22 = vpop.f32.mrf.mxu1  ;;  %v810_v0 = vadd.f32 %v1254_v53, %v196_v48 }
  0xf1   :  { %v1256_v23 = vpop.f32.mrf.mxu0 }
  0xf2   :  { %v1296_v24 = vpop.f32.mrf.mxu1  ;;  %v1257_v61 = vadd.f32 %v1256_v23, %v1255_v21  ;;  %v875_v13 = vadd.f32 %v1294_v6, %v810_v0 }
  0xf3   :  { %v1258_v25 = vpop.f32.mrf.mxu0  ;;  %v1297_v21 = vadd.f32 %v1296_v24, %v1295_v22 }
  0xf4   :  { %v1790_v26 = vpop.f32.mrf.mxu1  ;;  %v813_v10 = vadd.f32 %v1257_v61, %v201_v1 }
  0xf5   :  { %v1259_v27 = vpop.f32.mrf.mxu0 }
  0xf6   :  { %v1792_v28 = vpop.f32.mrf.mxu1  ;;  %v1260_v11 = vadd.f32 %v1259_v27, %v1258_v25  ;;  %v878_v20 = vadd.f32 %v1297_v21, %v813_v10  ;;  %v211_v27 = vpop.permute.xlu1 %210 }
  0xf7   :  { %v1794_v29 = vpop.f32.mrf.mxu0  ;;  %v1300_v24 = vadd.f32 %v1792_v28, %v1790_v26 }
  0xf8   :  { %v1796_v30 = vpop.f32.mrf.mxu1  ;;  %v818_v44 = vadd.f32 %v1260_v11, %v206_v14 }
  0xf9   :  { %v1262_v31 = vpop.f32.mrf.mxu0 }
  0xfa   :  { %v1798_v32 = vpop.f32.mrf.mxu1  ;;  %v1263_v45 = vadd.f32 %v1262_v31, %v1794_v29  ;;  %v883_v31 = vadd.f32 %v1300_v24, %v818_v44 }
  0xfb   :  { %v1800_v33 = vpop.f32.mrf.mxu0  ;;  %v1303_v26 = vadd.f32 %v1798_v32, %v1796_v30 }
  0xfc   :  { %v1802_v34 = vpop.f32.mrf.mxu1 }
  0xfd   :  { %v1804_v35 = vpop.f32.mrf.mxu0 }
  0xfe   :  { %v1806_v37 = vpop.f32.mrf.mxu1 }
  0xff   :  { %v1808_v39 = vpop.f32.mrf.mxu0  ;;  %v1306_v10 = vadd.f32 %v1806_v37, %v1802_v34 }
 0x100   :  { %v1810_v40 = vpop.f32.mrf.mxu1 }
 0x101   :  { %v1812_v41 = vpop.f32.mrf.mxu0 }
 0x102   :  { %v1814_v42 = vpop.f32.mrf.mxu1 }
 0x103   :  { %v1326_v46 = vpop.f32.mrf.mxu0  ;;  %v1309_v21 = vadd.f32 %v1814_v42, %v1810_v40 }
 0x104   :  { %v1366_v49 = vpop.f32.mrf.mxu1 }
 0x105   :  { %v1327_v50 = vpop.f32.mrf.mxu0 }
 0x106   :  { %v1328_v54 = vadd.f32 %v1327_v50, %v1326_v46  ;;  %v1367_v55 = vpop.f32.mrf.mxu1 }
 0x107   :  { %v1329_v56 = vpop.f32.mrf.mxu0  ;;  %v1368_v59 = vadd.f32 %v1367_v55, %v1366_v49  ;;  %v821_v55 = vadd.f32 %v1263_v45, %v211_v27 }
 0x108   :  { %v932_v58 = vadd.f32 %v1328_v54, %v867_v51  ;;  %v1369_v60 = vpop.f32.mrf.mxu1 }
 0x109   :  { %v1330_v62 = vpop.f32.mrf.mxu0  ;;  %v886_v0 = vadd.f32 %v1303_v26, %v821_v55 }
 0x10a   :  { %v997_v2 = vadd.f32 %v1368_v59, %v932_v58  ;;  %v1331_v3 = vadd.f32 %v1330_v62, %v1329_v56  ;;  %v1370_v4 = vpop.f32.mrf.mxu1  ;;  %v1266_v56 = vadd.f32 %v1804_v35, %v1800_v33 }
 0x10b   :  { %v1332_v5 = vpop.f32.mrf.mxu0  ;;  %v1371_v8 = vadd.f32 %v1370_v4, %v1369_v60  ;;  %v221_v4 = vpop.permute.xlu1 %220 }
 0x10c   :  { %v935_v7 = vadd.f32 %v1331_v3, %v870_v63  ;;  %v1372_v9 = vpop.f32.mrf.mxu1  ;;  %v1035_v15 = vmul.f32 0.2, %v997_v2  ;;  %vm1027_vm0 = vcmp.gt.f32.partialorder %v997_v2, 0.0  ;;  %v826_v1 = vadd.f32 %v1266_v56, %v216_v57 }
 0x10d   :  { %v1333_v12 = vpop.f32.mrf.mxu0 }
 0x10e   :  { %v1000_v16 = vadd.f32 %v1371_v8, %v935_v7  ;;  %v1334_v17 = vadd.f32 %v1333_v12, %v1332_v5  ;;  %v1373_v19 = vpop.f32.mrf.mxu1  ;;  %v1043_v46 = vsel %vm1027_vm0, %v997_v2, %v1035_v15  ;;  %v1269_v2 = vadd.f32 %v1812_v41, %v1808_v39 }
 0x10f   :  { %v1335_v23 = vpop.f32.mrf.mxu0  ;;  %v1374_v43 = vadd.f32 %v1373_v19, %v1372_v9  ;;  %v891_v41 = vadd.f32 %v1306_v10, %v826_v1 }
 0x110   :  { %vm1028_vm1 = vcmp.gt.f32.partialorder %v1000_v16, 0.0  ;;  %v1036_v36 = vmul.f32 0.2, %v1000_v16  ;;  %v940_v38 = vadd.f32 %v1334_v17, %v875_v13  ;;  %v1375_v18 = vpop.f32.mrf.mxu1  ;;  %v829_v14 = vadd.f32 %v1269_v2, %v221_v4 }
 0x111   :  { %v1336_v25 = vpop.f32.mrf.mxu0 }
 0x112   :  { %v1044_v47 = vsel %vm1028_vm1, %v1000_v16, %v1036_v36  ;;  %v1005_v48 = vadd.f32 %v1374_v43, %v940_v38  ;;  %v1337_v49 = vadd.f32 %v1336_v25, %v1335_v23  ;;  %v1376_v50 = vpop.f32.mrf.mxu1  ;;  %v894_v43 = vadd.f32 %v1309_v21, %v829_v14 }
 0x113   :  { %v1210_v51 = vpack.c.bf16 %v1044_v47, %v1043_v46  ;;  %v1338_v22 = vpop.f32.mrf.mxu0  ;;  %v1377_v53 = vadd.f32 %v1376_v50, %v1375_v18 }
 0x114   :  { %v943_v52 = vadd.f32 %v1337_v49, %v878_v20  ;;  %v1378_v54 = vpop.f32.mrf.mxu1  ;;  %v1037_v58 = vmul.f32 0.2, %v1005_v48  ;;  %vm1029_vm2 = vcmp.gt.f32.partialorder %v1005_v48, 0.0 }
 0x115   :  { %1211 = vst [vmem:[%s1844_s3] sm:$0xff] %v1210_v51   ;;  %v1339_v29 = vpop.f32.mrf.mxu0 }
 0x116   :  { %v1008_v59 = vadd.f32 %v1377_v53, %v943_v52  ;;  %v1340_v60 = vadd.f32 %v1339_v29, %v1338_v22  ;;  %v1379_v61 = vpop.f32.mrf.mxu1  ;;  %v1045_v5 = vsel %vm1029_vm2, %v1005_v48, %v1037_v58 }
 0x117   :  { %v1341_v28 = vpop.f32.mrf.mxu0  ;;  %v1380_v33 = vadd.f32 %v1379_v61, %v1378_v54 }
 0x118   :  { %vm1030_vm3 = vcmp.gt.f32.partialorder %v1008_v59, 0.0  ;;  %v1038_v62 = vmul.f32 0.2, %v1008_v59  ;;  %v948_v63 = vadd.f32 %v1340_v60, %v883_v31  ;;  %v1381_v35 = vpop.f32.mrf.mxu1 }
 0x119   :  { %v1342_v3 = vpop.f32.mrf.mxu0 }
 0x11a   :  { %v1046_v6 = vsel %vm1030_vm3, %v1008_v59, %v1038_v62  ;;  %v1013_v7 = vadd.f32 %v1380_v33, %v948_v63  ;;  %v1343_v8 = vadd.f32 %v1342_v3, %v1341_v28  ;;  %v1382_v9 = vpop.f32.mrf.mxu1 }
 0x11b   :  { %v1215_v30 = vpack.c.bf16 %v1046_v6, %v1045_v5  ;;  %v1344_v32 = vpop.f32.mrf.mxu0  ;;  %v1383_v12 = vadd.f32 %v1382_v9, %v1381_v35 }
 0x11c   :  { %v951_v11 = vadd.f32 %v1343_v8, %v886_v0  ;;  %v1384_v13 = vpop.f32.mrf.mxu1  ;;  %v1039_v15 = vmul.f32 0.2, %v1013_v7  ;;  %vm1031_vm4 = vcmp.gt.f32.partialorder %v1013_v7, 0.0 }
 0x11d   :  { %1227 = vst [vmem:[%s1844_s3 + $0x8] sm:$0xff] %v1215_v30   ;;  %v1345_v39 = vpop.f32.mrf.mxu0 }
 0x11e   :  { %v1016_v16 = vadd.f32 %v1383_v12, %v951_v11  ;;  %v1346_v17 = vadd.f32 %v1345_v39, %v1344_v32  ;;  %v1385_v19 = vpop.f32.mrf.mxu1  ;;  %v1047_v20 = vsel %vm1031_vm4, %v1013_v7, %v1039_v15 }
 0x11f   :  { %v1347_v23 = vpop.f32.mrf.mxu0  ;;  %v1386_v36 = vadd.f32 %v1385_v19, %v1384_v13 }
 0x120   :  { %vm1032_vm5 = vcmp.gt.f32.partialorder %v1016_v16, 0.0  ;;  %v1040_v34 = vmul.f32 0.2, %v1016_v16  ;;  %v956_v37 = vadd.f32 %v1346_v17, %v891_v41  ;;  %v1387_v38 = vpop.f32.mrf.mxu1 }
 0x121   :  { %v1348_v18 = vpop.f32.mrf.mxu0 }
 0x122   :  { %v1048_v44 = vsel %vm1032_vm5, %v1016_v16, %v1040_v34  ;;  %v1021_v45 = vadd.f32 %v1386_v36, %v956_v37  ;;  %v1349_v25 = vadd.f32 %v1348_v18, %v1347_v23  ;;  %v1388_v27 = vpop.f32.mrf.mxu1 }
 0x123   :  { %v1220_v46 = vpack.c.bf16 %v1048_v44, %v1047_v20  ;;  %v1389_v48 = vadd.f32 %v1388_v27, %v1387_v38 }
 0x124   :  { %v959_v47 = vadd.f32 %v1349_v25, %v894_v43  ;;  %v1041_v40 = vmul.f32 0.2, %v1021_v45  ;;  %vm1033_vm6 = vcmp.gt.f32.partialorder %v1021_v45, 0.0 }
 0x125   :  { %1228 = vst [vmem:[%s1844_s3 + $0x10] sm:$0xff] %v1220_v46  }
 0x126   :  { %v1024_v42 = vadd.f32 %v1389_v48, %v959_v47  ;;  %v1049_v50 = vsel %vm1033_vm6, %v1021_v45, %v1041_v40 }
 0x128   :  { %vm1034_vm7 = vcmp.gt.f32.partialorder %v1024_v42, 0.0  ;;  %v1042_v49 = vmul.f32 0.2, %v1024_v42 }
 0x12a   :  { %v1050_v51 = vsel %vm1034_vm7, %v1024_v42, %v1042_v49 }
 0x12b   :  { %v1225_v22 = vpack.c.bf16 %v1050_v51, %v1049_v50 }
 0x12d   :  { %1229 = vst [vmem:[%s1844_s3 + $0x18] sm:$0xff] %v1225_v22  }

// kernel: _lambda_.23
= control target key start
LH: loop header
LB: loop body
LE: loop exit
PB: predicated region body
PF: predicated region fallthrough
CT: control target
= control target key end

     0   :  { %v1441_v1 = vmov 0   ;;  %s1822_s1 = inlined_call_operand.vmem [shape: bf16[1,1,1024,128], index: 1, kind: input, shape index: {}]   ;;  %s1823_s0 = inlined_call_operand.vmem [shape: bf16[1,64,1024], index: 0, kind: input, shape index: {}]   ;;  %s1824_s2 = inlined_call_operand.vmem [shape: f32[1,64,1], index: 2, kind: input, shape index: {}]   ;;  %s1825_s3 = inlined_call_operand.vmem [shape: bf16[1,1,64,128], index: 3, kind: output, shape index: {}]  }
   0x1   :  { %v1377_v0 = vld [vmem:[%s1822_s1 + $0x78] sm:$0xff]   ;;  %1375 = vset.pattern.permute.xlu0 %v1441_v1  ;;  %1376 = vset.pattern.permute.xlu1 %v1441_v1  ;;  %v1381_v5 = vld [vmem:[%s1822_s1 + $0x70] sm:$0xff]   ;;  %v1385_v9 = vld [vmem:[%s1822_s1 + $0x68] sm:$0xff]  }
   0x2   :  { %v1378_v2 = vld [vmem:[%s1822_s1 + $0xf8] sm:$0xff]   ;;  %1214 = vmatprep.subr.bf16.mxu0 %v1377_v0  ;;  %v1382_v6 = vld [vmem:[%s1822_s1 + $0xf0] sm:$0xff]   ;;  %v1386_v10 = vld [vmem:[%s1822_s1 + $0xe8] sm:$0xff]  }
   0x3   :  { %v1379_v3 = vld [vmem:[%s1822_s1 + $0x38] sm:$0xff]   ;;  %1254 = vmatprep.subr.bf16.mxu1 %v1378_v2  ;;  %v1383_v7 = vld [vmem:[%s1822_s1 + $0x30] sm:$0xff]   ;;  %v1387_v11 = vld [vmem:[%s1822_s1 + $0x28] sm:$0xff]  }
   0x4   :  { %v1380_v4 = vld [vmem:[%s1822_s1 + $0xb8] sm:$0xff]   ;;  %1215 = vmatpush3.bf16.msra.mxu0 %v1379_v3  ;;  %v1384_v8 = vld [vmem:[%s1822_s1 + $0xb0] sm:$0xff]   ;;  %v1388_v12 = vld [vmem:[%s1822_s1 + $0xa8] sm:$0xff]  }
   0x5   :  { %1255 = vmatpush3.bf16.msra.mxu1 %v1380_v4  ;;  %1216 = vmatprep.subr.bf16.mxu0 %v1381_v5  ;;  %v1389_v13 = vld [vmem:[%s1822_s1 + $0x60] sm:$0xff]   ;;  %v1393_v17 = vld [vmem:[%s1822_s1 + $0x58] sm:$0xff]   ;;  %v1397_v21 = vld [vmem:[%s1822_s1 + $0x50] sm:$0xff]  }
   0x6   :  { %1256 = vmatprep.subr.bf16.mxu1 %v1382_v6  ;;  %v1390_v14 = vld [vmem:[%s1822_s1 + $0xe0] sm:$0xff]   ;;  %v1394_v18 = vld [vmem:[%s1822_s1 + $0xd8] sm:$0xff]   ;;  %v1398_v22 = vld [vmem:[%s1822_s1 + $0xd0] sm:$0xff]  }
   0x7   :  { %v1391_v15 = vld [vmem:[%s1822_s1 + $0x20] sm:$0xff]   ;;  %v1395_v19 = vld [vmem:[%s1822_s1 + $0x18] sm:$0xff]   ;;  %v1399_v23 = vld [vmem:[%s1822_s1 + $0x10] sm:$0xff]  }
   0x8   :  { %1217 = vmatpush3.bf16.msra.mxu0 %v1383_v7  ;;  %v1392_v16 = vld [vmem:[%s1822_s1 + $0xa0] sm:$0xff]   ;;  %v1396_v20 = vld [vmem:[%s1822_s1 + $0x98] sm:$0xff]   ;;  %v1400_v24 = vld [vmem:[%s1822_s1 + $0x90] sm:$0xff]  }
   0x9   :  { %1257 = vmatpush3.bf16.msra.mxu1 %v1384_v8  ;;  %1218 = vmatprep.subr.bf16.mxu0 %v1385_v9  ;;  %v1401_v25 = vld [vmem:[%s1822_s1 + $0x48] sm:$0xff]   ;;  %v1405_v29 = vld [vmem:[%s1822_s1 + $0x40] sm:$0xff]   ;;  %v1409_v41 = vld [vmem:[%s1822_s1 + $0x178] sm:$0xff]  }
   0xa   :  { %1258 = vmatprep.subr.bf16.mxu1 %v1386_v10  ;;  %v1402_v26 = vld [vmem:[%s1822_s1 + $0xc8] sm:$0xff]   ;;  %v1406_v30 = vld [vmem:[%s1822_s1 + $0xc0] sm:$0xff]   ;;  %v1410_v42 = vld [vmem:[%s1822_s1 + $0x1f8] sm:$0xff]  }
   0xb   :  { %v1403_v27 = vld [vmem:[%s1822_s1 + $0x8] sm:$0xff]   ;;  %v1407_v31 = vld [vmem:[%s1822_s1] sm:$0xff]   ;;  %v1411_v43 = vld [vmem:[%s1822_s1 + $0x138] sm:$0xff]  }
   0xc   :  { %1219 = vmatpush3.bf16.msra.mxu0 %v1387_v11  ;;  %v1404_v28 = vld [vmem:[%s1822_s1 + $0x88] sm:$0xff]   ;;  %v1408_v32 = vld [vmem:[%s1822_s1 + $0x80] sm:$0xff]   ;;  %v1412_v44 = vld [vmem:[%s1822_s1 + $0x1b8] sm:$0xff]  }
   0xd   :  { %1259 = vmatpush3.bf16.msra.mxu1 %v1388_v12  ;;  %1220 = vmatprep.subr.bf16.mxu0 %v1389_v13  ;;  %v15_v33 = vld [vmem:[%s1823_s0] sm:$0xff]  ;;  %v16_v35 = vld [vmem:[%s1823_s0 + $0x8] sm:$0xff]  ;;  %v1413_v45 = vld [vmem:[%s1822_s1 + $0x170] sm:$0xff]  }
   0xe   :  { %1260 = vmatprep.subr.bf16.mxu1 %v1390_v14  ;;  %v19_v34 = vld [vmem:[%s1823_s0 + $0x20] sm:$0xff]  ;;  %v20_v38 = vld [vmem:[%s1823_s0 + $0x28] sm:$0xff]  ;;  %v1414_v46 = vld [vmem:[%s1822_s1 + $0x1f0] sm:$0xff]  }
   0xf   :  { %v1079_v36 = vcombine.low %v15_v33, %v19_v34  ;;  %v1080_v37 = vcombine.high %v15_v33, %v19_v34  ;;  %v1081_v39 = vcombine.low %v16_v35, %v20_v38  ;;  %v1082_v40 = vcombine.high %v16_v35, %v20_v38  ;;  %v1415_v47 = vld [vmem:[%s1822_s1 + $0x130] sm:$0xff]   ;;  %v23_v49 = vld [vmem:[%s1823_s0 + $0x40] sm:$0xff]  ;;  %v24_v52 = vld [vmem:[%s1823_s0 + $0x48] sm:$0xff] }
  0x10   :  { %1221 = vmatpush3.bf16.msra.mxu0 %v1391_v15  ;;  %v1416_v48 = vld [vmem:[%s1822_s1 + $0x1b0] sm:$0xff]   ;;  %v27_v50 = vld [vmem:[%s1823_s0 + $0x60] sm:$0xff]  ;;  %v28_v53 = vld [vmem:[%s1823_s0 + $0x68] sm:$0xff] }
  0x11   :  { %1261 = vmatpush3.bf16.msra.mxu1 %v1392_v16  ;;  %1222 = vmatprep.subr.bf16.mxu0 %v1393_v17  ;;  %v1088_v51 = vcombine.high %v23_v49, %v27_v50  ;;  %v1087_v54 = vcombine.low %v23_v49, %v27_v50  ;;  %v1090_v55 = vcombine.high %v24_v52, %v28_v53  ;;  %v1417_v57 = vld [vmem:[%s1822_s1 + $0x168] sm:$0xff]   ;;  %v1421_v61 = vld [vmem:[%s1822_s1 + $0x160] sm:$0xff]   ;;  %v1425_v9 = vld [vmem:[%s1822_s1 + $0x158] sm:$0xff]  }
  0x12   :  { %1262 = vmatprep.subr.bf16.mxu1 %v1394_v18  ;;  %799 = vmatprep.mubr.bf16.mxu0 %v1080_v37  ;;  %v1089_v56 = vcombine.low %v24_v52, %v28_v53  ;;  %v1418_v58 = vld [vmem:[%s1822_s1 + $0x1e8] sm:$0xff]   ;;  %v1422_v62 = vld [vmem:[%s1822_s1 + $0x1e0] sm:$0xff]   ;;  %v1426_v10 = vld [vmem:[%s1822_s1 + $0x1d8] sm:$0xff]  }
  0x13   :  { %864 = vmatprep.mubr.bf16.mxu1 %v1082_v40  ;;  %v1419_v59 = vld [vmem:[%s1822_s1 + $0x128] sm:$0xff]   ;;  %v1423_v63 = vld [vmem:[%s1822_s1 + $0x120] sm:$0xff]   ;;  %v1427_v11 = vld [vmem:[%s1822_s1 + $0x118] sm:$0xff]  }
  0x14   :  { %1223 = vmatpush3.bf16.msra.mxu0 %v1395_v19  ;;  %v1420_v60 = vld [vmem:[%s1822_s1 + $0x1a8] sm:$0xff]   ;;  %v1424_v0 = vld [vmem:[%s1822_s1 + $0x1a0] sm:$0xff]   ;;  %v1428_v12 = vld [vmem:[%s1822_s1 + $0x198] sm:$0xff]  }
  0x15   :  { %1263 = vmatpush3.bf16.msra.mxu1 %v1396_v20  ;;  %1224 = vmatprep.subr.bf16.mxu0 %v1397_v21  ;;  %v31_v1 = vld [vmem:[%s1823_s0 + $0x80] sm:$0xff]  ;;  %v32_v3 = vld [vmem:[%s1823_s0 + $0x88] sm:$0xff]  ;;  %v1429_v13 = vld [vmem:[%s1822_s1 + $0x150] sm:$0xff]  }
  0x16   :  { %1264 = vmatprep.subr.bf16.mxu1 %v1398_v22  ;;  %v35_v2 = vld [vmem:[%s1823_s0 + $0xa0] sm:$0xff]  ;;  %v36_v4 = vld [vmem:[%s1823_s0 + $0xa8] sm:$0xff]  ;;  %v1430_v14 = vld [vmem:[%s1822_s1 + $0x1d0] sm:$0xff]  }
  0x17   :  { %v1096_v5 = vcombine.high %v31_v1, %v35_v2  ;;  %v1098_v6 = vcombine.high %v32_v3, %v36_v4  ;;  %v1095_v7 = vcombine.low %v31_v1, %v35_v2  ;;  %v1097_v8 = vcombine.low %v32_v3, %v36_v4  ;;  %v1431_v15 = vld [vmem:[%s1822_s1 + $0x110] sm:$0xff]   ;;  %v39_v17 = vld [vmem:[%s1823_s0 + $0xc0] sm:$0xff]  ;;  %v40_v19 = vld [vmem:[%s1823_s0 + $0xc8] sm:$0xff] }
  0x18   :  { %1225 = vmatpush3.bf16.msra.mxu0 %v1399_v23  ;;  %v1432_v16 = vld [vmem:[%s1822_s1 + $0x190] sm:$0xff]   ;;  %v43_v18 = vld [vmem:[%s1823_s0 + $0xe0] sm:$0xff]  ;;  %v44_v21 = vld [vmem:[%s1823_s0 + $0xe8] sm:$0xff] }
  0x19   :  { %1265 = vmatpush3.bf16.msra.mxu1 %v1400_v24  ;;  %1226 = vmatprep.subr.bf16.mxu0 %v1401_v25  ;;  %v1104_v20 = vcombine.high %v39_v17, %v43_v18  ;;  %v1103_v22 = vcombine.low %v39_v17, %v43_v18  ;;  %v1106_v23 = vcombine.high %v40_v19, %v44_v21  ;;  %v1433_v25 = vld [vmem:[%s1822_s1 + $0x148] sm:$0xff]   ;;  %v17_v33 = vld [vmem:[%s1823_s0 + $0x10] sm:$0xff]  ;;  %v18_v37 = vld [vmem:[%s1823_s0 + $0x18] sm:$0xff] }
  0x1a   :  { %1266 = vmatprep.subr.bf16.mxu1 %v1402_v26  ;;  %v1105_v24 = vcombine.low %v40_v19, %v44_v21  ;;  %v1434_v26 = vld [vmem:[%s1822_s1 + $0x1c8] sm:$0xff]   ;;  %v21_v34 = vld [vmem:[%s1823_s0 + $0x30] sm:$0xff]  ;;  %v22_v38 = vld [vmem:[%s1823_s0 + $0x38] sm:$0xff] }
  0x1b   :  { %v1083_v35 = vcombine.low %v17_v33, %v21_v34  ;;  %v1085_v40 = vcombine.low %v18_v37, %v22_v38  ;;  %v37_v49 = vld [vmem:[%s1823_s0 + $0xb0] sm:$0xff]  ;;  %v38_v52 = vld [vmem:[%s1823_s0 + $0xb8] sm:$0xff]  ;;  %v176_v53 = vld [vmem:[%s1824_s2 + $0x8] sm:$0xff] }
  0x1c   :  { %1227 = vmatpush3.bf16.msra.mxu0 %v1403_v27  ;;  %v1435_v27 = vld [vmem:[%s1822_s1 + $0x108] sm:$0xff]   ;;  %v177_v50 = vld [vmem:[%s1824_s2 + $0x10] sm:$0xff]  ;;  %v182_v3 = vld [vmem:[%s1824_s2 + $0x38] sm:$0xff] }
  0x1d   :  { %1267 = vmatpush3.bf16.msra.mxu1 %v1404_v28  ;;  %1228 = vmatprep.subr.bf16.mxu0 %v1405_v29  ;;  %v1436_v28 = vld [vmem:[%s1822_s1 + $0x188] sm:$0xff]   ;;  %v1437_v29 = vld [vmem:[%s1822_s1 + $0x140] sm:$0xff]   ;;  %v181_v1 = vld [vmem:[%s1824_s2 + $0x30] sm:$0xff] }
  0x1e   :  { %1268 = vmatprep.subr.bf16.mxu1 %v1406_v30  ;;  %v1438_v30 = vld [vmem:[%s1822_s1 + $0x1c0] sm:$0xff]   ;;  %195 = vperm.xlu1 %1376, %v177_v50  }
  0x20   :  { %1229 = vmatpush3.bf16.msra.mxu0 %v1407_v31  ;;  %v1439_v31 = vld [vmem:[%s1822_s1 + $0x100] sm:$0xff]  }
  0x21   :  { %1269 = vmatpush3.bf16.msra.mxu1 %v1408_v32  ;;  %1294 = vmatprep.subr.bf16.mxu0 %v1409_v41  ;;  %v1440_v32 = vld [vmem:[%s1822_s1 + $0x180] sm:$0xff]   ;;  %v1086_v41 = vcombine.high %v18_v37, %v22_v38 }
  0x22   :  { %1334 = vmatprep.subr.bf16.mxu1 %v1410_v42  ;;  %v29_v42 = vld [vmem:[%s1823_s0 + $0x70] sm:$0xff] }
  0x23   :  { %800 = vmatmul.mubr.bf16.vlgmr.msra.gmra.mxu0 %v1079_v36  ;;  %v1084_v36 = vcombine.high %v17_v33, %v21_v34 }
  0x24   :  { %865 = vmatmul.mubr.bf16.vlgmr.msra.gmra.mxu1 %v1081_v39  ;;  %1295 = vmatpush3.bf16.msra.mxu0 %v1411_v43  ;;  %v25_v39 = vld [vmem:[%s1823_s0 + $0x50] sm:$0xff]  ;;  %v26_v43 = vld [vmem:[%s1823_s0 + $0x58] sm:$0xff] }
  0x25   :  { %1335 = vmatpush3.bf16.msra.mxu1 %v1412_v44  ;;  %1296 = vmatprep.subr.bf16.mxu0 %v1413_v45  ;;  %v30_v44 = vld [vmem:[%s1823_s0 + $0x78] sm:$0xff]  ;;  %v1092_v45 = vcombine.high %v25_v39, %v29_v42 }
  0x26   :  { %1336 = vmatprep.subr.bf16.mxu1 %v1414_v46  ;;  %807 = vmatprep.mubr.bf16.mxu0 %v1088_v51  ;;  %v1094_v46 = vcombine.high %v26_v43, %v30_v44  ;;  %v34_v51 = vld [vmem:[%s1823_s0 + $0x98] sm:$0xff] }
  0x27   :  { %872 = vmatprep.mubr.bf16.mxu1 %v1090_v55  ;;  %v178_v55 = vld [vmem:[%s1824_s2 + $0x18] sm:$0xff]  ;;  %v1101_v4 = vcombine.low %v34_v51, %v38_v52 }
  0x28   :  { %1297 = vmatpush3.bf16.msra.mxu0 %v1415_v47  ;;  %v175_v47 = vld [vmem:[%s1824_s2] sm:$0xff]  ;;  %200 = vperm.xlu1 %1376, %v178_v55  }
  0x29   :  { %1337 = vmatpush3.bf16.msra.mxu1 %v1416_v48  ;;  %1298 = vmatprep.subr.bf16.mxu0 %v1417_v57  ;;  %v33_v48 = vld [vmem:[%s1823_s0 + $0x90] sm:$0xff] }
  0x2a   :  { %1338 = vmatprep.subr.bf16.mxu1 %v1418_v58  ;;  %185 = vperm.xlu0 %1375, %v175_v47   ;;  %v1100_v57 = vcombine.high %v33_v48, %v37_v49  ;;  %v1102_v58 = vcombine.high %v34_v51, %v38_v52  ;;  %v1099_v2 = vcombine.low %v33_v48, %v37_v49 }
  0x2b   :  { %808 = vmatmul.mubr.bf16.gmra.mxu0 %v1087_v54  ;;  %v1091_v54 = vcombine.low %v25_v39, %v29_v42 }
  0x2c   :  { %873 = vmatmul.mubr.bf16.gmra.mxu1 %v1089_v56  ;;  %1299 = vmatpush3.bf16.msra.mxu0 %v1419_v59  ;;  %v1093_v56 = vcombine.low %v26_v43, %v30_v44  ;;  %v179_v59 = vld [vmem:[%s1824_s2 + $0x20] sm:$0xff] }
  0x2d   :  { %1339 = vmatpush3.bf16.msra.mxu1 %v1420_v60  ;;  %1300 = vmatprep.subr.bf16.mxu0 %v1421_v61  ;;  %v180_v60 = vld [vmem:[%s1824_s2 + $0x28] sm:$0xff]  ;;  %v41_v61 = vld [vmem:[%s1823_s0 + $0xd0] sm:$0xff] }
  0x2e   :  { %1340 = vmatprep.subr.bf16.mxu1 %v1422_v62  ;;  %815 = vmatprep.mubr.bf16.mxu0 %v1096_v5  ;;  %v45_v62 = vld [vmem:[%s1823_s0 + $0xf0] sm:$0xff] }
  0x2f   :  { %880 = vmatprep.mubr.bf16.mxu1 %v1098_v6  ;;  %190 = vperm.xlu0 %1375, %v176_v53   ;;  %v1108_v5 = vcombine.high %v41_v61, %v45_v62 }
  0x30   :  { %1301 = vmatpush3.bf16.msra.mxu0 %v1423_v63  ;;  %v42_v63 = vld [vmem:[%s1823_s0 + $0xd8] sm:$0xff]  ;;  %210 = vperm.xlu1 %1376, %v180_v60  }
  0x31   :  { %1341 = vmatpush3.bf16.msra.mxu1 %v1424_v0  ;;  %1302 = vmatprep.subr.bf16.mxu0 %v1425_v9  ;;  %v46_v0 = vld [vmem:[%s1823_s0 + $0xf8] sm:$0xff] }
  0x32   :  { %1342 = vmatprep.subr.bf16.mxu1 %v1426_v10  ;;  %v1110_v6 = vcombine.high %v42_v63, %v46_v0 }
  0x33   :  { %816 = vmatmul.mubr.bf16.gmra.mxu0 %v1095_v7  ;;  %205 = vperm.xlu0 %1375, %v179_v59   ;;  %v1107_v7 = vcombine.low %v41_v61, %v45_v62 }
  0x34   :  { %881 = vmatmul.mubr.bf16.gmra.mxu1 %v1097_v8  ;;  %1303 = vmatpush3.bf16.msra.mxu0 %v1427_v11  ;;  %v1109_v8 = vcombine.low %v42_v63, %v46_v0 }
  0x35   :  { %1343 = vmatpush3.bf16.msra.mxu1 %v1428_v12  ;;  %1304 = vmatprep.subr.bf16.mxu0 %v1429_v13 }
  0x36   :  { %1344 = vmatprep.subr.bf16.mxu1 %v1430_v14  ;;  %823 = vmatprep.mubr.bf16.mxu0 %v1104_v20 }
  0x37   :  { %888 = vmatprep.mubr.bf16.mxu1 %v1106_v23  ;;  %215 = vperm.xlu0 %1375, %v181_v1  }
  0x38   :  { %1305 = vmatpush3.bf16.msra.mxu0 %v1431_v15  ;;  %220 = vperm.xlu1 %1376, %v182_v3  }
  0x39   :  { %1345 = vmatpush3.bf16.msra.mxu1 %v1432_v16  ;;  %1306 = vmatprep.subr.bf16.mxu0 %v1433_v25 }
  0x3a   :  { %1346 = vmatprep.subr.bf16.mxu1 %v1434_v26 }
  0x3b   :  { %824 = vmatmul.mubr.bf16.gmra.mxu0 %v1103_v22 }
  0x3c   :  { %889 = vmatmul.mubr.bf16.gmra.mxu1 %v1105_v24  ;;  %1307 = vmatpush3.bf16.msra.mxu0 %v1435_v27 }
  0x3d   :  { %1347 = vmatpush3.bf16.msra.mxu1 %v1436_v28  ;;  %1308 = vmatprep.subr.bf16.mxu0 %v1437_v29 }
  0x3e   :  { %1348 = vmatprep.subr.bf16.mxu1 %v1438_v30  ;;  %929 = vmatprep.mubr.bf16.mxu0 %v1084_v36 }
  0x3f   :  { %994 = vmatprep.mubr.bf16.mxu1 %v1086_v41 }
  0x40   :  { %1309 = vmatpush3.bf16.msra.mxu0 %v1439_v31 }
  0x41   :  { %1349 = vmatpush3.bf16.msra.mxu1 %v1440_v32 }
  0x43   :  { %930 = vmatmul.mubr.bf16.vlgmr.msra.gmra.mxu0 %v1083_v35 }
  0x44   :  { %995 = vmatmul.mubr.bf16.vlgmr.msra.gmra.mxu1 %v1085_v40  ;;  %937 = vmatprep.mubr.bf16.mxu0 %v1092_v45 }
  0x45   :  { %1002 = vmatprep.mubr.bf16.mxu1 %v1094_v46 }
  0x4b   :  { %938 = vmatmul.mubr.bf16.gmra.mxu0 %v1091_v54 }
  0x4c   :  { %1003 = vmatmul.mubr.bf16.gmra.mxu1 %v1093_v56  ;;  %945 = vmatprep.mubr.bf16.mxu0 %v1100_v57 }
  0x4d   :  { %1010 = vmatprep.mubr.bf16.mxu1 %v1102_v58 }
  0x53   :  { %946 = vmatmul.mubr.bf16.gmra.mxu0 %v1099_v2 }
  0x54   :  { %1011 = vmatmul.mubr.bf16.gmra.mxu1 %v1101_v4  ;;  %953 = vmatprep.mubr.bf16.mxu0 %v1108_v5 }
  0x55   :  { %1018 = vmatprep.mubr.bf16.mxu1 %v1110_v6 }
  0x5b   :  { %954 = vmatmul.mubr.bf16.gmra.mxu0 %v1107_v7 }
  0x5c   :  { %1019 = vmatmul.mubr.bf16.gmra.mxu1 %v1109_v8 }
  0x99   :  { %v196_v48 = vpop.permute.xlu1 %195 }
  0xa3   :  { %v201_v0 = vpop.permute.xlu1 %200 }
  0xa5   :  { %v186_v36 = vpop.permute.xlu0 %185 }
  0xaa   :  { %v191_v45 = vpop.permute.xlu0 %190 }
  0xe3   :  { %v1230_v9 = vpop.f32.mrf.mxu0 }
  0xe4   :  { %v1270_v10 = vpop.f32.mrf.mxu1 }
  0xe5   :  { %v1231_v11 = vpop.f32.mrf.mxu0 }
  0xe6   :  { %v1271_v12 = vpop.f32.mrf.mxu1  ;;  %v1232_v38 = vadd.f32 %v1231_v11, %v1230_v9 }
  0xe7   :  { %v1233_v13 = vpop.f32.mrf.mxu0  ;;  %v1272_v47 = vadd.f32 %v1271_v12, %v1270_v10 }
  0xe8   :  { %v1273_v14 = vpop.f32.mrf.mxu1  ;;  %v802_v43 = vadd.f32 %v1232_v38, %v186_v36 }
  0xe9   :  { %v1234_v15 = vpop.f32.mrf.mxu0 }
  0xea   :  { %v1274_v16 = vpop.f32.mrf.mxu1  ;;  %v1235_v44 = vadd.f32 %v1234_v15, %v1233_v13  ;;  %v867_v51 = vadd.f32 %v1272_v47, %v802_v43 }
  0xeb   :  { %v1236_v17 = vpop.f32.mrf.mxu0  ;;  %v1275_v57 = vadd.f32 %v1274_v16, %v1273_v14 }
  0xec   :  { %v1276_v18 = vpop.f32.mrf.mxu1  ;;  %v805_v52 = vadd.f32 %v1235_v44, %v191_v45 }
  0xed   :  { %v1237_v19 = vpop.f32.mrf.mxu0 }
  0xee   :  { %v1277_v20 = vpop.f32.mrf.mxu1  ;;  %v1238_v53 = vadd.f32 %v1237_v19, %v1236_v17  ;;  %v870_v62 = vadd.f32 %v1275_v57, %v805_v52  ;;  %v206_v19 = vpop.permute.xlu0 %205 }
  0xef   :  { %v1239_v21 = vpop.f32.mrf.mxu0  ;;  %v1278_v5 = vadd.f32 %v1277_v20, %v1276_v18 }
  0xf0   :  { %v1279_v22 = vpop.f32.mrf.mxu1  ;;  %v810_v63 = vadd.f32 %v1238_v53, %v196_v48 }
  0xf1   :  { %v1240_v23 = vpop.f32.mrf.mxu0 }
  0xf2   :  { %v1280_v24 = vpop.f32.mrf.mxu1  ;;  %v1241_v60 = vadd.f32 %v1240_v23, %v1239_v21  ;;  %v875_v12 = vadd.f32 %v1278_v5, %v810_v63 }
  0xf3   :  { %v1242_v25 = vpop.f32.mrf.mxu0  ;;  %v1281_v17 = vadd.f32 %v1280_v24, %v1279_v22 }
  0xf4   :  { %v1774_v26 = vpop.f32.mrf.mxu1  ;;  %v813_v10 = vadd.f32 %v1241_v60, %v201_v0 }
  0xf5   :  { %v1243_v27 = vpop.f32.mrf.mxu0 }
  0xf6   :  { %v1776_v28 = vpop.f32.mrf.mxu1  ;;  %v1244_v13 = vadd.f32 %v1243_v27, %v1242_v25  ;;  %v878_v44 = vadd.f32 %v1281_v17, %v813_v10 }
  0xf7   :  { %v1245_v29 = vpop.f32.mrf.mxu0  ;;  %v1284_v27 = vadd.f32 %v1776_v28, %v1774_v26 }
  0xf8   :  { %v1778_v30 = vpop.f32.mrf.mxu1  ;;  %v818_v45 = vadd.f32 %v1244_v13, %v206_v19 }
  0xf9   :  { %v1246_v31 = vpop.f32.mrf.mxu0 }
  0xfa   :  { %v1780_v32 = vpop.f32.mrf.mxu1  ;;  %v1247_v18 = vadd.f32 %v1246_v31, %v1245_v29 }
  0xfb   :  { %v1782_v33 = vpop.f32.mrf.mxu0  ;;  %v1287_v26 = vadd.f32 %v1780_v32, %v1778_v30 }
  0xfc   :  { %v1784_v34 = vpop.f32.mrf.mxu1 }
  0xfd   :  { %v1786_v35 = vpop.f32.mrf.mxu0 }
  0xfe   :  { %v1788_v37 = vpop.f32.mrf.mxu1  ;;  %v1250_v31 = vadd.f32 %v1786_v35, %v1782_v33 }
  0xff   :  { %v1790_v39 = vpop.f32.mrf.mxu0  ;;  %v1290_v30 = vadd.f32 %v1788_v37, %v1784_v34 }
 0x100   :  { %v1792_v40 = vpop.f32.mrf.mxu1 }
 0x101   :  { %v1794_v41 = vpop.f32.mrf.mxu0 }
 0x102   :  { %v1796_v42 = vpop.f32.mrf.mxu1  ;;  %v1253_v33 = vadd.f32 %v1794_v41, %v1790_v39 }
 0x103   :  { %v1310_v46 = vpop.f32.mrf.mxu0 }
 0x104   :  { %v1350_v49 = vpop.f32.mrf.mxu1 }
 0x105   :  { %v1311_v50 = vpop.f32.mrf.mxu0 }
 0x106   :  { %v1312_v54 = vadd.f32 %v1311_v50, %v1310_v46  ;;  %v1351_v55 = vpop.f32.mrf.mxu1  ;;  %v211_v46 = vpop.permute.xlu1 %210 }
 0x107   :  { %v1313_v56 = vpop.f32.mrf.mxu0  ;;  %v1352_v1 = vadd.f32 %v1351_v55, %v1350_v49  ;;  %v821_v29 = vadd.f32 %v1247_v18, %v211_v46  ;;  %v216_v55 = vpop.permute.xlu0 %215 }
 0x108   :  { %v932_v58 = vadd.f32 %v1312_v54, %v867_v51  ;;  %v1353_v59 = vpop.f32.mrf.mxu1  ;;  %v883_v54 = vadd.f32 %v1284_v27, %v818_v45  ;;  %v826_v0 = vadd.f32 %v1250_v31, %v216_v55 }
 0x109   :  { %v1314_v61 = vpop.f32.mrf.mxu0  ;;  %v886_v63 = vadd.f32 %v1287_v26, %v821_v29 }
 0x10a   :  { %v1315_v2 = vadd.f32 %v1314_v61, %v1313_v56  ;;  %v1354_v3 = vpop.f32.mrf.mxu1  ;;  %v997_v6 = vadd.f32 %v1352_v1, %v932_v58  ;;  %v221_v5 = vpop.permute.xlu1 %220 }
 0x10b   :  { %v1316_v4 = vpop.f32.mrf.mxu0  ;;  %v1355_v8 = vadd.f32 %v1354_v3, %v1353_v59  ;;  %v829_v39 = vadd.f32 %v1253_v33, %v221_v5 }
 0x10c   :  { %v935_v7 = vadd.f32 %v1315_v2, %v870_v62  ;;  %v1356_v9 = vpop.f32.mrf.mxu1  ;;  %v1027_v23 = vmax.f32 %v997_v6, 0.0 }
 0x10d   :  { %v1317_v11 = vpop.f32.mrf.mxu0 }
 0x10e   :  { %v1000_v14 = vadd.f32 %v1355_v8, %v935_v7  ;;  %v1318_v15 = vadd.f32 %v1317_v11, %v1316_v4  ;;  %v1357_v16 = vpop.f32.mrf.mxu1  ;;  %v891_v11 = vadd.f32 %v1290_v30, %v826_v0 }
 0x10f   :  { %v1319_v21 = vpop.f32.mrf.mxu0  ;;  %v1358_v48 = vadd.f32 %v1357_v16, %v1356_v9 }
 0x110   :  { %v1028_v36 = vmax.f32 %v1000_v14, 0.0  ;;  %v940_v38 = vadd.f32 %v1318_v15, %v875_v12  ;;  %v1359_v43 = vpop.f32.mrf.mxu1  ;;  %v1293_v15 = vadd.f32 %v1796_v42, %v1792_v40 }
 0x111   :  { %v1320_v20 = vpop.f32.mrf.mxu0 }
 0x112   :  { %v1194_v47 = vpack.c.bf16 %v1028_v36, %v1027_v23  ;;  %v1321_v49 = vadd.f32 %v1320_v20, %v1319_v21  ;;  %v1360_v50 = vpop.f32.mrf.mxu1  ;;  %v1005_v22 = vadd.f32 %v1358_v48, %v940_v38  ;;  %v894_v21 = vadd.f32 %v1293_v15, %v829_v39 }
 0x113   :  { %v1322_v25 = vpop.f32.mrf.mxu0  ;;  %v1361_v51 = vadd.f32 %v1360_v50, %v1359_v43 }
 0x114   :  { %1195 = vst [vmem:[%s1825_s3] sm:$0xff] %v1194_v47   ;;  %v943_v24 = vadd.f32 %v1321_v49, %v878_v44  ;;  %v1362_v52 = vpop.f32.mrf.mxu1  ;;  %v1029_v59 = vmax.f32 %v1005_v22, 0.0 }
 0x115   :  { %v1323_v53 = vpop.f32.mrf.mxu0 }
 0x116   :  { %v1008_v56 = vadd.f32 %v1361_v51, %v943_v24  ;;  %v1324_v57 = vadd.f32 %v1323_v53, %v1322_v25  ;;  %v1363_v58 = vpop.f32.mrf.mxu1 }
 0x117   :  { %v1325_v28 = vpop.f32.mrf.mxu0  ;;  %v1364_v2 = vadd.f32 %v1363_v58, %v1362_v52 }
 0x118   :  { %v1030_v60 = vmax.f32 %v1008_v56, 0.0  ;;  %v948_v61 = vadd.f32 %v1324_v57, %v883_v54  ;;  %v1365_v62 = vpop.f32.mrf.mxu1 }
 0x119   :  { %v1326_v1 = vpop.f32.mrf.mxu0 }
 0x11a   :  { %v1199_v35 = vpack.c.bf16 %v1030_v60, %v1029_v59  ;;  %v1327_v3 = vadd.f32 %v1326_v1, %v1325_v28  ;;  %v1366_v4 = vpop.f32.mrf.mxu1  ;;  %v1013_v32 = vadd.f32 %v1364_v2, %v948_v61 }
 0x11b   :  { %v1328_v6 = vpop.f32.mrf.mxu0  ;;  %v1367_v8 = vadd.f32 %v1366_v4, %v1365_v62 }
 0x11c   :  { %1211 = vst [vmem:[%s1825_s3 + $0x8] sm:$0xff] %v1199_v35   ;;  %v951_v7 = vadd.f32 %v1327_v3, %v886_v63  ;;  %v1368_v9 = vpop.f32.mrf.mxu1  ;;  %v1031_v16 = vmax.f32 %v1013_v32, 0.0 }
 0x11d   :  { %v1329_v10 = vpop.f32.mrf.mxu0 }
 0x11e   :  { %v1016_v41 = vadd.f32 %v1367_v8, %v951_v7  ;;  %v1330_v12 = vadd.f32 %v1329_v10, %v1328_v6  ;;  %v1369_v13 = vpop.f32.mrf.mxu1 }
 0x11f   :  { %v1331_v14 = vpop.f32.mrf.mxu0  ;;  %v1370_v36 = vadd.f32 %v1369_v13, %v1368_v9 }
 0x120   :  { %v1032_v34 = vmax.f32 %v1016_v41, 0.0  ;;  %v956_v37 = vadd.f32 %v1330_v12, %v891_v11  ;;  %v1371_v17 = vpop.f32.mrf.mxu1 }
 0x121   :  { %v1332_v19 = vpop.f32.mrf.mxu0 }
 0x122   :  { %v1204_v23 = vpack.c.bf16 %v1032_v34, %v1031_v16  ;;  %v1333_v38 = vadd.f32 %v1332_v19, %v1331_v14  ;;  %v1372_v43 = vpop.f32.mrf.mxu1  ;;  %v1021_v44 = vadd.f32 %v1370_v36, %v956_v37 }
 0x123   :  { %v1373_v20 = vadd.f32 %v1372_v43, %v1371_v17 }
 0x124   :  { %1212 = vst [vmem:[%s1825_s3 + $0x10] sm:$0xff] %v1204_v23   ;;  %v959_v18 = vadd.f32 %v1333_v38, %v894_v21  ;;  %v1033_v46 = vmax.f32 %v1021_v44, 0.0 }
 0x126   :  { %v1024_v45 = vadd.f32 %v1373_v20, %v959_v18 }
 0x128   :  { %v1034_v40 = vmax.f32 %v1024_v45, 0.0 }
 0x12a   :  { %v1209_v42 = vpack.c.bf16 %v1034_v40, %v1033_v46 }
 0x12c   :  { %1213 = vst [vmem:[%s1825_s3 + $0x18] sm:$0xff] %v1209_v42  }

// kernel: _lambda_.24
= control target key start
LH: loop header
LB: loop body
LE: loop exit
PB: predicated region body
PF: predicated region fallthrough
CT: control target
= control target key end

     0   :  { %s981_s12 = smov 0   ;;  %s983_s13 = smov 0   ;;  %s1063_s0 = inlined_call_operand.vmem [shape: bf16[4,64,256], index: 0, kind: input, shape index: {}]   ;;  %s1064_s1 = inlined_call_operand.vmem [shape: bf16[1,4,256,128], index: 1, kind: input, shape index: {}]   ;;  %s1065_s2 = inlined_call_operand.vmem [shape: f32[4,64,1], index: 2, kind: input, shape index: {}]   ;;  %s1066_s3 = inlined_call_operand.vmem [shape: bf16[1,4,64,128], index: 3, kind: output, shape index: {}]  }
   0x1   :  { %s985_s14 = smov 0  }
   0x2 LB: > { %s28_s15 = sadd.s32 1, %s954_s13  ;;  %p747_p0 = scmp.ge.s32.totalorder %s958_s14, 1  ;;  %s958_s14 = sphi %s985_s14, %s13_s14   ;;  %s954_s13 = sphi %s983_s13, %s1068_s13   ;;  %s950_s12 = sphi %s981_s12, %s1067_s12  }
   0x3   : > { %p30_p1 = scmp.ge.s32.totalorder %s28_s15, 4  ;;  %p191_p2 = scmp.lt.s32.totalorder %s958_s14, 5 }
   0x5   : > { %s1070_s15 = smov (%p30_p1, %s28_s15), 0  ;;  %p192_p3 = pnand %p747_p0, %p191_p2 }
   0x6   : > { %p239_p4 = scmp.lt.s32.totalorder (!%p192_p3), %s950_s12, 3 }
   0x7   : > { %195 = sbr.rel (%p192_p3) target bundleno = 264 (0x108), region = 32 }
   0xc   : > { %v960_v0 = vmov 0   ;;  %s1072_s12 = smov (!%p239_p4, %s950_s12), 3 }
   0xd   : > { %907 = vset.pattern.permute.xlu1 %v960_v0  ;;  %906 = vset.pattern.permute.xlu0 %v960_v0  ;;  %s791_s16 = sshll.u32 %s1072_s12, 7  ;;  %s790_s20 = sshll.u32 %s1072_s12, 6 }
   0xe   : > { %s1005_s19 = scalar_lea.vmem %s1064_s1, %s791_s16  ;;  %s1020_s23 = scalar_lea.vmem %s1063_s0, %s790_s20 }
   0xf   : > { %v908_v1 = vld [vmem:[%s1005_s19 + $0x78] sm:$0xff]   ;;  %v910_v3 = vld [vmem:[%s1005_s19 + $0x70] sm:$0xff]   ;;  %v912_v5 = vld [vmem:[%s1005_s19 + $0x68] sm:$0xff]   ;;  %s1029_s26 = scalar_lea.vmem %s1065_s2, %s790_s20  ;;  %s793_s27 = sshll.u32 %s1072_s12, 5 }
  0x10   : > { %v909_v2 = vld [vmem:[%s1005_s19 + $0x38] sm:$0xff]   ;;  %825 = vmatprep.subr.bf16.mxu0 %v908_v1  ;;  %865 = vmatprep.subr.bf16.mxu1 %v908_v1  ;;  %v911_v4 = vld [vmem:[%s1005_s19 + $0x30] sm:$0xff]   ;;  %v913_v6 = vld [vmem:[%s1005_s19 + $0x28] sm:$0xff]   ;;  %s272_s30 = scalar_lea.vmem %s1066_s3, %s793_s27 }
  0x11   : > { %826 = vmatpush3.bf16.msra.mxu0 %v909_v2  ;;  %873 = vmatpush3.bf16.msra.mxu1 %v909_v2  ;;  %v914_v7 = vld [vmem:[%s1005_s19 + $0x60] sm:$0xff]   ;;  %v916_v9 = vld [vmem:[%s1005_s19 + $0x58] sm:$0xff]   ;;  %v918_v11 = vld [vmem:[%s1005_s19 + $0x50] sm:$0xff]  }
  0x12   : > { %827 = vmatprep.subr.bf16.mxu0 %v910_v3  ;;  %866 = vmatprep.subr.bf16.mxu1 %v910_v3  ;;  %v915_v8 = vld [vmem:[%s1005_s19 + $0x20] sm:$0xff]   ;;  %v917_v10 = vld [vmem:[%s1005_s19 + $0x18] sm:$0xff]   ;;  %v919_v14 = vld [vmem:[%s1005_s19 + $0x10] sm:$0xff]  }
  0x13   : > { %v926_v12 = vld [vmem:[%s1020_s23 + $0x4] ss:$8 sps:$4 sm:$0xff]   ;;  %v316_v16 = vld [vmem:[%s1029_s26 + $0x10] sm:$0xff]  ;;  %v317_v19 = vld [vmem:[%s1029_s26 + $0x18] sm:$0xff] }
  0x14   : > { %v929_v13 = vld [vmem:[%s1020_s23 + $0x24] ss:$8 sps:$4 sm:$0xff]   ;;  %530 = vmatprep.mubr.bf16.mxu0 %v926_v12  ;;  %334 = vperm.xlu1 %907, %v316_v16   ;;  %v924_v25 = vld [vmem:[%s1020_s23] ss:$8 sps:$4 sm:$0xff]   ;;  %v930_v27 = vld [vmem:[%s1020_s23 + $0x14] ss:$8 sps:$4 sm:$0xff]  }
  0x15   : > { %828 = vmatpush3.bf16.msra.mxu0 %v911_v4  ;;  %874 = vmatpush3.bf16.msra.mxu1 %v911_v4  ;;  %v920_v15 = vld [vmem:[%s1005_s19 + $0x48] sm:$0xff]   ;;  %v314_v17 = vld [vmem:[%s1029_s26] sm:$0xff]  ;;  %v932_v28 = vld [vmem:[%s1020_s23 + $0x34] ss:$8 sps:$4 sm:$0xff]  }
  0x16   : > { %829 = vmatprep.subr.bf16.mxu0 %v912_v5  ;;  %867 = vmatprep.subr.bf16.mxu1 %v912_v5  ;;  %v921_v18 = vld [vmem:[%s1005_s19 + $0x8] sm:$0xff]   ;;  %v922_v21 = vld [vmem:[%s1005_s19 + $0x40] sm:$0xff]   ;;  %v321_v29 = vld [vmem:[%s1029_s26 + $0x38] sm:$0xff] }
  0x17   : > { %546 = vmatprep.mubr.bf16.mxu1 %v929_v13  ;;  %324 = vperm.xlu0 %906, %v314_v17   ;;  %v315_v20 = vld [vmem:[%s1029_s26 + $0x8] sm:$0xff]  ;;  %v923_v22 = vld [vmem:[%s1005_s19] sm:$0xff]   ;;  %v320_v30 = vld [vmem:[%s1029_s26 + $0x30] sm:$0xff] }
  0x18   : > { %339 = vperm.xlu1 %907, %v317_v19   ;;  %v319_v23 = vld [vmem:[%s1029_s26 + $0x28] sm:$0xff]  ;;  %v318_v24 = vld [vmem:[%s1029_s26 + $0x20] sm:$0xff]  ;;  %v934_v31 = vld [vmem:[%s1020_s23 + $0x10] ss:$8 sps:$4 sm:$0xff]  }
  0x19   : > { %830 = vmatpush3.bf16.msra.mxu0 %v913_v6  ;;  %875 = vmatpush3.bf16.msra.mxu1 %v913_v6  ;;  %v927_v26 = vld [vmem:[%s1020_s23 + $0x20] ss:$8 sps:$4 sm:$0xff]   ;;  %v935_v32 = vld [vmem:[%s1020_s23 + $0x30] ss:$8 sps:$4 sm:$0xff]  }
  0x1a   : > { %831 = vmatprep.subr.bf16.mxu0 %v914_v7  ;;  %868 = vmatprep.subr.bf16.mxu1 %v914_v7 }
  0x1b   : > { %329 = vperm.xlu0 %906, %v315_v20  }
  0x1c   : > { %349 = vperm.xlu1 %907, %v319_v23  }
  0x1d   : > { %832 = vmatpush3.bf16.msra.mxu0 %v915_v8  ;;  %876 = vmatpush3.bf16.msra.mxu1 %v915_v8 }
  0x1e   : > { %833 = vmatprep.subr.bf16.mxu0 %v916_v9  ;;  %869 = vmatprep.subr.bf16.mxu1 %v916_v9 }
  0x1f   : > { %344 = vperm.xlu0 %906, %v318_v24  }
  0x20   : > { %359 = vperm.xlu1 %907, %v321_v29  }
  0x21   : > { %834 = vmatpush3.bf16.msra.mxu0 %v917_v10  ;;  %877 = vmatpush3.bf16.msra.mxu1 %v917_v10 }
  0x22   : > { %835 = vmatprep.subr.bf16.mxu0 %v918_v11  ;;  %870 = vmatprep.subr.bf16.mxu1 %v918_v11 }
  0x23   : > { %354 = vperm.xlu0 %906, %v320_v30  }
  0x25   : > { %836 = vmatpush3.bf16.msra.mxu0 %v919_v14  ;;  %878 = vmatpush3.bf16.msra.mxu1 %v919_v14 }
  0x26   : > { %837 = vmatprep.subr.bf16.mxu0 %v920_v15  ;;  %871 = vmatprep.subr.bf16.mxu1 %v920_v15 }
  0x29   : > { %838 = vmatpush3.bf16.msra.mxu0 %v921_v18  ;;  %879 = vmatpush3.bf16.msra.mxu1 %v921_v18 }
  0x2a   : > { %839 = vmatprep.subr.bf16.mxu0 %v922_v21  ;;  %872 = vmatprep.subr.bf16.mxu1 %v922_v21 }
  0x2d   : > { %840 = vmatpush3.bf16.msra.mxu0 %v923_v22  ;;  %880 = vmatpush3.bf16.msra.mxu1 %v923_v22 }
  0x30   : > { %531 = vmatmul.mubr.bf16.vlgmr.msra.gmra.mxu0 %v924_v25  ;;  %547 = vmatmul.mubr.bf16.vlgmr.msra.gmra.mxu1 %v927_v26 }
  0x31   : > { %538 = vmatprep.mubr.bf16.mxu0 %v930_v27  ;;  %554 = vmatprep.mubr.bf16.mxu1 %v932_v28 }
  0x38   : > { %539 = vmatmul.mubr.bf16.gmra.mxu0 %v934_v31  ;;  %555 = vmatmul.mubr.bf16.gmra.mxu1 %v935_v32 }
  0x8f   : > { %v335_v34 = vpop.permute.xlu1 %334 }
  0x92   : > { %v325_v33 = vpop.permute.xlu0 %324 }
  0x93   : > { %v340_v38 = vpop.permute.xlu1 %339 }
  0x96   : > { %v330_v35 = vpop.permute.xlu0 %329 }
  0x97   : > { %v350_v50 = vpop.permute.xlu1 %349 }
  0x9a   : > { %v345_v45 = vpop.permute.xlu0 %344 }
  0x9b   : > { %v360_v12 = vpop.permute.xlu1 %359 }
  0x9e   : > { %v355_v3 = vpop.permute.xlu0 %354 }
  0xf0   : > { %v841_v36 = vpop.f32.mrf.mxu0  ;;  %v853_v37 = vpop.f32.mrf.mxu1 }
  0xf2   : > { %v842_v39 = vpop.f32.mrf.mxu0  ;;  %v854_v40 = vpop.f32.mrf.mxu1 }
  0xf3   : > { %v843_v41 = vadd.f32 %v842_v39, %v841_v36  ;;  %v855_v42 = vadd.f32 %v854_v40, %v853_v37 }
  0xf4   : > { %v844_v43 = vpop.f32.mrf.mxu0  ;;  %v856_v44 = vpop.f32.mrf.mxu1 }
  0xf5   : > { %v533_v46 = vadd.f32 %v843_v41, %v325_v33  ;;  %v549_v47 = vadd.f32 %v855_v42, %v345_v45 }
  0xf6   : > { %v845_v48 = vpop.f32.mrf.mxu0  ;;  %v857_v49 = vpop.f32.mrf.mxu1 }
  0xf7   : > { %v846_v51 = vadd.f32 %v845_v48, %v844_v43  ;;  %v858_v52 = vadd.f32 %v857_v49, %v856_v44  ;;  %v563_v57 = vmax.f32 %v533_v46, 0.0  ;;  %v567_v58 = vmax.f32 %v549_v47, 0.0 }
  0xf8   : > { %v847_v53 = vpop.f32.mrf.mxu0  ;;  %v859_v54 = vpop.f32.mrf.mxu1 }
  0xf9   : > { %v536_v55 = vadd.f32 %v846_v51, %v330_v35  ;;  %v552_v56 = vadd.f32 %v858_v52, %v350_v50 }
  0xfa   : > { %v848_v59 = vpop.f32.mrf.mxu0  ;;  %v860_v60 = vpop.f32.mrf.mxu1 }
  0xfb   : > { %v564_v61 = vmax.f32 %v536_v55, 0.0  ;;  %v568_v62 = vmax.f32 %v552_v56, 0.0  ;;  %v849_v63 = vadd.f32 %v848_v59, %v847_v53  ;;  %v861_v0 = vadd.f32 %v860_v60, %v859_v54 }
  0xfc   : > { %v850_v1 = vpop.f32.mrf.mxu0  ;;  %v862_v2 = vpop.f32.mrf.mxu1 }
  0xfd   : > { %v805_v4 = vpack.c.bf16 %v564_v61, %v563_v57  ;;  %v815_v5 = vpack.c.bf16 %v568_v62, %v567_v58  ;;  %v541_v8 = vadd.f32 %v849_v63, %v335_v34  ;;  %v557_v9 = vadd.f32 %v861_v0, %v355_v3 }
  0xfe   : > { %v851_v6 = vpop.f32.mrf.mxu0  ;;  %v863_v7 = vpop.f32.mrf.mxu1 }
  0xff   : > { %806 = vst [vmem:[%s272_s30] sm:$0xff] %v805_v4   ;;  %823 = vst [vmem:[%s272_s30 + $0x10] sm:$0xff] %v815_v5   ;;  %v852_v10 = vadd.f32 %v851_v6, %v850_v1  ;;  %v864_v11 = vadd.f32 %v863_v7, %v862_v2  ;;  %v565_v15 = vmax.f32 %v541_v8, 0.0  ;;  %v569_v16 = vmax.f32 %v557_v9, 0.0 }
 0x101   : > { %v544_v13 = vadd.f32 %v852_v10, %v340_v38  ;;  %v560_v14 = vadd.f32 %v864_v11, %v360_v12 }
 0x103   : > { %v566_v17 = vmax.f32 %v544_v13, 0.0  ;;  %v570_v18 = vmax.f32 %v560_v14, 0.0 }
 0x105   : > { %v810_v19 = vpack.c.bf16 %v566_v17, %v565_v15  ;;  %v820_v20 = vpack.c.bf16 %v570_v18, %v569_v16 }
 0x107   : > { %822 = vst [vmem:[%s272_s30 + $0x8] sm:$0xff] %v810_v19   ;;  %824 = vst [vmem:[%s272_s30 + $0x18] sm:$0xff] %v820_v20  }
 0x108 PF: > { %s13_s14 = sadd.s32 1, %s958_s14   ;;  %s1067_s12 = smov %s954_s13 }
 0x109   : > { %p10_p5 = scmp.ge.s32.totalorder %s13_s14, 6   ;;  %s1068_s13 = smov %s1070_s15 }
 0x10b   :  { %12 = sbr.rel (!%p10_p5) target bundleno = 2 (0x2), region = 68 }

// kernel: _lambda_.25
= control target key start
LH: loop header
LB: loop body
LE: loop exit
PB: predicated region body
PF: predicated region fallthrough
CT: control target
= control target key end

     0   :  { %s1298_s12 = smov 0   ;;  %s1300_s13 = smov 0   ;;  %s1401_s0 = inlined_call_operand.vmem [shape: bf16[4,64,512], index: 0, kind: input, shape index: {}]   ;;  %s1402_s1 = inlined_call_operand.vmem [shape: bf16[1,4,512,128], index: 1, kind: input, shape index: {}]   ;;  %s1403_s2 = inlined_call_operand.vmem [shape: f32[4,64,1], index: 2, kind: input, shape index: {}]   ;;  %s1404_s3 = inlined_call_operand.vmem [shape: bf16[1,4,64,128], index: 3, kind: output, shape index: {}]  }
   0x1   :  { %s1302_s14 = smov 0  }
   0x2 LB: > { %s28_s15 = sadd.s32 1, %s1271_s13  ;;  %p988_p0 = scmp.ge.s32.totalorder %s1275_s14, 1  ;;  %s1275_s14 = sphi %s1302_s14, %s13_s14   ;;  %s1271_s13 = sphi %s1300_s13, %s1406_s13   ;;  %s1267_s12 = sphi %s1298_s12, %s1405_s12  }
   0x3   : > { %p30_p1 = scmp.ge.s32.totalorder %s28_s15, 4  ;;  %p191_p2 = scmp.lt.s32.totalorder %s1275_s14, 5 }
   0x5   : > { %s1408_s15 = smov (%p30_p1, %s28_s15), 0  ;;  %p192_p3 = pnand %p988_p0, %p191_p2 }
   0x6   : > { %p239_p4 = scmp.lt.s32.totalorder (!%p192_p3), %s1267_s12, 3 }
   0x7   : > { %195 = sbr.rel (%p192_p3) target bundleno = 283 (0x11b), region = 32 }
   0xc   : > { %v1277_v0 = vmov 0   ;;  %s1410_s12 = smov (!%p239_p4, %s1267_s12), 3 }
   0xd   : > { %1195 = vset.pattern.permute.xlu0 %v1277_v0  ;;  %1196 = vset.pattern.permute.xlu1 %v1277_v0  ;;  %s1056_s16 = sshll.u32 %s1410_s12, 8  ;;  %s1055_s20 = sshll.u32 %s1410_s12, 7 }
   0xe   : > { %s1322_s19 = scalar_lea.vmem %s1402_s1, %s1056_s16  ;;  %s1358_s23 = scalar_lea.vmem %s1401_s0, %s1055_s20 }
   0xf   : > { %v1197_v1 = vld [vmem:[%s1322_s19 + $0x78] sm:$0xff]   ;;  %v1201_v5 = vld [vmem:[%s1322_s19 + $0x70] sm:$0xff]   ;;  %v1205_v9 = vld [vmem:[%s1322_s19 + $0x68] sm:$0xff]   ;;  %s1057_s24 = sshll.u32 %s1410_s12, 6  ;;  %s1058_s28 = sshll.u32 %s1410_s12, 5 }
  0x10   : > { %v1198_v2 = vld [vmem:[%s1322_s19 + $0xf8] sm:$0xff]   ;;  %1090 = vmatprep.subr.bf16.mxu0 %v1197_v1  ;;  %v1202_v6 = vld [vmem:[%s1322_s19 + $0xf0] sm:$0xff]   ;;  %v1206_v10 = vld [vmem:[%s1322_s19 + $0xe8] sm:$0xff]   ;;  %s260_s27 = scalar_lea.vmem %s1403_s2, %s1057_s24  ;;  %s1386_s4 = scalar_lea.vmem %s1404_s3, %s1058_s28 }
  0x11   : > { %v1199_v3 = vld [vmem:[%s1322_s19 + $0x38] sm:$0xff]   ;;  %1130 = vmatprep.subr.bf16.mxu1 %v1198_v2  ;;  %v1203_v7 = vld [vmem:[%s1322_s19 + $0x30] sm:$0xff]   ;;  %v1207_v11 = vld [vmem:[%s1322_s19 + $0x28] sm:$0xff]  }
  0x12   : > { %v1200_v4 = vld [vmem:[%s1322_s19 + $0xb8] sm:$0xff]   ;;  %1091 = vmatpush3.bf16.msra.mxu0 %v1199_v3  ;;  %v1204_v8 = vld [vmem:[%s1322_s19 + $0xb0] sm:$0xff]   ;;  %v1208_v12 = vld [vmem:[%s1322_s19 + $0xa8] sm:$0xff]  }
  0x13   : > { %1131 = vmatpush3.bf16.msra.mxu1 %v1200_v4  ;;  %1092 = vmatprep.subr.bf16.mxu0 %v1201_v5  ;;  %v1209_v13 = vld [vmem:[%s1322_s19 + $0x60] sm:$0xff]   ;;  %v1213_v17 = vld [vmem:[%s1322_s19 + $0x58] sm:$0xff]   ;;  %v1217_v21 = vld [vmem:[%s1322_s19 + $0x50] sm:$0xff]  }
  0x14   : > { %1132 = vmatprep.subr.bf16.mxu1 %v1202_v6  ;;  %v1210_v14 = vld [vmem:[%s1322_s19 + $0xe0] sm:$0xff]   ;;  %v1214_v18 = vld [vmem:[%s1322_s19 + $0xd8] sm:$0xff]   ;;  %v1218_v22 = vld [vmem:[%s1322_s19 + $0xd0] sm:$0xff]  }
  0x15   : > { %v1211_v15 = vld [vmem:[%s1322_s19 + $0x20] sm:$0xff]   ;;  %v1215_v19 = vld [vmem:[%s1322_s19 + $0x18] sm:$0xff]   ;;  %v1219_v23 = vld [vmem:[%s1322_s19 + $0x10] sm:$0xff]  }
  0x16   : > { %1093 = vmatpush3.bf16.msra.mxu0 %v1203_v7  ;;  %v1212_v16 = vld [vmem:[%s1322_s19 + $0xa0] sm:$0xff]   ;;  %v1216_v20 = vld [vmem:[%s1322_s19 + $0x98] sm:$0xff]   ;;  %v1220_v24 = vld [vmem:[%s1322_s19 + $0x90] sm:$0xff]  }
  0x17   : > { %1133 = vmatpush3.bf16.msra.mxu1 %v1204_v8  ;;  %1094 = vmatprep.subr.bf16.mxu0 %v1205_v9  ;;  %v1221_v25 = vld [vmem:[%s1322_s19 + $0x48] sm:$0xff]   ;;  %v1225_v29 = vld [vmem:[%s1322_s19 + $0x40] sm:$0xff]   ;;  %v356_v44 = vld [vmem:[%s260_s27 + $0x10] sm:$0xff] }
  0x18   : > { %1134 = vmatprep.subr.bf16.mxu1 %v1206_v10  ;;  %v1222_v26 = vld [vmem:[%s1322_s19 + $0xc8] sm:$0xff]   ;;  %v1226_v30 = vld [vmem:[%s1322_s19 + $0xc0] sm:$0xff]   ;;  %374 = vperm.xlu1 %1196, %v356_v44   ;;  %v357_v46 = vld [vmem:[%s260_s27 + $0x18] sm:$0xff] }
  0x19   : > { %v1223_v27 = vld [vmem:[%s1322_s19 + $0x8] sm:$0xff]   ;;  %v1227_v31 = vld [vmem:[%s1322_s19] sm:$0xff]   ;;  %v360_v53 = vld [vmem:[%s260_s27 + $0x30] sm:$0xff] }
  0x1a   : > { %1095 = vmatpush3.bf16.msra.mxu0 %v1207_v11  ;;  %v1224_v28 = vld [vmem:[%s1322_s19 + $0x88] sm:$0xff]   ;;  %v1228_v32 = vld [vmem:[%s1322_s19 + $0x80] sm:$0xff]   ;;  %v361_v54 = vld [vmem:[%s260_s27 + $0x38] sm:$0xff] }
  0x1b   : > { %1135 = vmatpush3.bf16.msra.mxu1 %v1208_v12  ;;  %1096 = vmatprep.subr.bf16.mxu0 %v1209_v13  ;;  %v1229_v33 = vld [vmem:[%s1358_s23] ss:$16 sps:$4 sm:$0xff]   ;;  %v1231_v34 = vld [vmem:[%s1358_s23 + $0x4] ss:$16 sps:$4 sm:$0xff]   ;;  %v1232_v35 = vld [vmem:[%s1358_s23 + $0x8] ss:$16 sps:$4 sm:$0xff]  }
  0x1c   : > { %1136 = vmatprep.subr.bf16.mxu1 %v1210_v14  ;;  %v1234_v36 = vld [vmem:[%s1358_s23 + $0xc] ss:$16 sps:$4 sm:$0xff]   ;;  %706 = vmatprep.mubr.bf16.mxu0 %v1231_v34  ;;  %v1235_v37 = vld [vmem:[%s1358_s23 + $0x24] ss:$16 sps:$4 sm:$0xff]   ;;  %v1239_v39 = vld [vmem:[%s1358_s23 + $0x20] ss:$16 sps:$4 sm:$0xff]  }
  0x1d   : > { %771 = vmatprep.mubr.bf16.mxu1 %v1234_v36  ;;  %v1237_v38 = vld [vmem:[%s1358_s23 + $0x2c] ss:$16 sps:$4 sm:$0xff]   ;;  %v1240_v40 = vld [vmem:[%s1358_s23 + $0x28] ss:$16 sps:$4 sm:$0xff]   ;;  %v1241_v41 = vld [vmem:[%s1358_s23 + $0x44] ss:$16 sps:$4 sm:$0xff]   ;;  %379 = vperm.xlu1 %1196, %v357_v46  }
  0x1e   : > { %1097 = vmatpush3.bf16.msra.mxu0 %v1211_v15  ;;  %v1243_v42 = vld [vmem:[%s1358_s23 + $0x4c] ss:$16 sps:$4 sm:$0xff]   ;;  %v354_v43 = vld [vmem:[%s260_s27] sm:$0xff]  ;;  %v1246_v49 = vld [vmem:[%s1358_s23 + $0x48] ss:$16 sps:$4 sm:$0xff]  }
  0x1f   : > { %1137 = vmatpush3.bf16.msra.mxu1 %v1212_v16  ;;  %1098 = vmatprep.subr.bf16.mxu0 %v1213_v17  ;;  %v355_v45 = vld [vmem:[%s260_s27 + $0x8] sm:$0xff]  ;;  %v1245_v47 = vld [vmem:[%s1358_s23 + $0x40] ss:$16 sps:$4 sm:$0xff]   ;;  %v1247_v50 = vld [vmem:[%s1358_s23 + $0x64] ss:$16 sps:$4 sm:$0xff]  }
  0x20   : > { %1138 = vmatprep.subr.bf16.mxu1 %v1214_v18  ;;  %364 = vperm.xlu0 %1195, %v354_v43   ;;  %v358_v48 = vld [vmem:[%s260_s27 + $0x20] sm:$0xff]  ;;  %v359_v51 = vld [vmem:[%s260_s27 + $0x28] sm:$0xff] }
  0x21   : > { %v1249_v52 = vld [vmem:[%s1358_s23 + $0x6c] ss:$16 sps:$4 sm:$0xff]   ;;  %389 = vperm.xlu1 %1196, %v359_v51   ;;  %v1251_v55 = vld [vmem:[%s1358_s23 + $0x60] ss:$16 sps:$4 sm:$0xff]   ;;  %v1252_v56 = vld [vmem:[%s1358_s23 + $0x68] ss:$16 sps:$4 sm:$0xff]  }
  0x22   : > { %1099 = vmatpush3.bf16.msra.mxu0 %v1215_v19 }
  0x23   : > { %1139 = vmatpush3.bf16.msra.mxu1 %v1216_v20  ;;  %1100 = vmatprep.subr.bf16.mxu0 %v1217_v21 }
  0x24   : > { %1140 = vmatprep.subr.bf16.mxu1 %v1218_v22  ;;  %369 = vperm.xlu0 %1195, %v355_v45  }
  0x25   : > { %399 = vperm.xlu1 %1196, %v361_v54  }
  0x26   : > { %1101 = vmatpush3.bf16.msra.mxu0 %v1219_v23 }
  0x27   : > { %1141 = vmatpush3.bf16.msra.mxu1 %v1220_v24  ;;  %1102 = vmatprep.subr.bf16.mxu0 %v1221_v25 }
  0x28   : > { %1142 = vmatprep.subr.bf16.mxu1 %v1222_v26  ;;  %384 = vperm.xlu0 %1195, %v358_v48  }
  0x2a   : > { %1103 = vmatpush3.bf16.msra.mxu0 %v1223_v27 }
  0x2b   : > { %1143 = vmatpush3.bf16.msra.mxu1 %v1224_v28  ;;  %1104 = vmatprep.subr.bf16.mxu0 %v1225_v29 }
  0x2c   : > { %1144 = vmatprep.subr.bf16.mxu1 %v1226_v30  ;;  %394 = vperm.xlu0 %1195, %v360_v53  }
  0x2e   : > { %1105 = vmatpush3.bf16.msra.mxu0 %v1227_v31 }
  0x2f   : > { %1145 = vmatpush3.bf16.msra.mxu1 %v1228_v32 }
  0x31   : > { %707 = vmatmul.mubr.bf16.vlgmr.msra.gmra.mxu0 %v1229_v33 }
  0x32   : > { %772 = vmatmul.mubr.bf16.vlgmr.msra.gmra.mxu1 %v1232_v35  ;;  %714 = vmatprep.mubr.bf16.mxu0 %v1235_v37 }
  0x33   : > { %779 = vmatprep.mubr.bf16.mxu1 %v1237_v38 }
  0x39   : > { %715 = vmatmul.mubr.bf16.gmra.mxu0 %v1239_v39 }
  0x3a   : > { %780 = vmatmul.mubr.bf16.gmra.mxu1 %v1240_v40  ;;  %722 = vmatprep.mubr.bf16.mxu0 %v1241_v41 }
  0x3b   : > { %787 = vmatprep.mubr.bf16.mxu1 %v1243_v42 }
  0x41   : > { %723 = vmatmul.mubr.bf16.gmra.mxu0 %v1245_v47 }
  0x42   : > { %788 = vmatmul.mubr.bf16.gmra.mxu1 %v1246_v49  ;;  %730 = vmatprep.mubr.bf16.mxu0 %v1247_v50 }
  0x43   : > { %795 = vmatprep.mubr.bf16.mxu1 %v1249_v52 }
  0x49   : > { %731 = vmatmul.mubr.bf16.gmra.mxu0 %v1251_v55 }
  0x4a   : > { %796 = vmatmul.mubr.bf16.gmra.mxu1 %v1252_v56 }
  0x93   : > { %v375_v12 = vpop.permute.xlu1 %374 }
  0x98   : > { %v380_v27 = vpop.permute.xlu1 %379 }
  0x9b   : > { %v365_v58 = vpop.permute.xlu0 %364 }
  0x9c   : > { %v390_v48 = vpop.permute.xlu1 %389 }
  0x9f   : > { %v370_v3 = vpop.permute.xlu0 %369 }
  0xa3   : > { %v385_v37 = vpop.permute.xlu0 %384 }
  0xf1   : > { %v1106_v57 = vpop.f32.mrf.mxu0 }
  0xf2   : > { %v1146_v59 = vpop.f32.mrf.mxu1 }
  0xf3   : > { %v1107_v60 = vpop.f32.mrf.mxu0 }
  0xf4   : > { %v1108_v61 = vadd.f32 %v1107_v60, %v1106_v57  ;;  %v1147_v62 = vpop.f32.mrf.mxu1 }
  0xf5   : > { %v1109_v63 = vpop.f32.mrf.mxu0  ;;  %v1148_v4 = vadd.f32 %v1147_v62, %v1146_v59 }
  0xf6   : > { %v709_v0 = vadd.f32 %v1108_v61, %v365_v58  ;;  %v1149_v1 = vpop.f32.mrf.mxu1  ;;  %v395_v58 = vpop.permute.xlu0 %394 }
  0xf7   : > { %v1110_v2 = vpop.f32.mrf.mxu0 }
  0xf8   : > { %v1111_v5 = vadd.f32 %v1110_v2, %v1109_v63  ;;  %v1150_v6 = vpop.f32.mrf.mxu1  ;;  %v774_v8 = vadd.f32 %v1148_v4, %v709_v0 }
  0xf9   : > { %v1112_v7 = vpop.f32.mrf.mxu0  ;;  %v1151_v9 = vadd.f32 %v1150_v6, %v1149_v1 }
  0xfa   : > { %v712_v10 = vadd.f32 %v1111_v5, %v370_v3  ;;  %v1152_v11 = vpop.f32.mrf.mxu1  ;;  %v804_v18 = vmax.f32 %v774_v8, 0.0  ;;  %v400_v5 = vpop.permute.xlu1 %399 }
  0xfb   : > { %v1113_v13 = vpop.f32.mrf.mxu0 }
  0xfc   : > { %v777_v14 = vadd.f32 %v1151_v9, %v712_v10  ;;  %v1114_v15 = vadd.f32 %v1113_v13, %v1112_v7  ;;  %v1153_v16 = vpop.f32.mrf.mxu1 }
  0xfd   : > { %v1115_v17 = vpop.f32.mrf.mxu0  ;;  %v1154_v24 = vadd.f32 %v1153_v16, %v1152_v11 }
  0xfe   : > { %v805_v19 = vmax.f32 %v777_v14, 0.0  ;;  %v717_v20 = vadd.f32 %v1114_v15, %v375_v12  ;;  %v1155_v21 = vpop.f32.mrf.mxu1 }
  0xff   : > { %v1116_v22 = vpop.f32.mrf.mxu0 }
 0x100   : > { %v1070_v23 = vpack.c.bf16 %v805_v19, %v804_v18  ;;  %v1117_v25 = vadd.f32 %v1116_v22, %v1115_v17  ;;  %v1156_v26 = vpop.f32.mrf.mxu1  ;;  %v782_v29 = vadd.f32 %v1154_v24, %v717_v20 }
 0x101   : > { %v1118_v28 = vpop.f32.mrf.mxu0  ;;  %v1157_v31 = vadd.f32 %v1156_v26, %v1155_v21 }
 0x102   : > { %1071 = vst [vmem:[%s1386_s4] sm:$0xff] %v1070_v23   ;;  %v720_v30 = vadd.f32 %v1117_v25, %v380_v27  ;;  %v1158_v32 = vpop.f32.mrf.mxu1  ;;  %v806_v39 = vmax.f32 %v782_v29, 0.0 }
 0x103   : > { %v1119_v33 = vpop.f32.mrf.mxu0 }
 0x104   : > { %v785_v34 = vadd.f32 %v1157_v31, %v720_v30  ;;  %v1120_v35 = vadd.f32 %v1119_v33, %v1118_v28  ;;  %v1159_v36 = vpop.f32.mrf.mxu1 }
 0x105   : > { %v1121_v38 = vpop.f32.mrf.mxu0  ;;  %v1160_v45 = vadd.f32 %v1159_v36, %v1158_v32 }
 0x106   : > { %v807_v40 = vmax.f32 %v785_v34, 0.0  ;;  %v725_v41 = vadd.f32 %v1120_v35, %v385_v37  ;;  %v1161_v42 = vpop.f32.mrf.mxu1 }
 0x107   : > { %v1122_v43 = vpop.f32.mrf.mxu0 }
 0x108   : > { %v1075_v44 = vpack.c.bf16 %v807_v40, %v806_v39  ;;  %v1123_v46 = vadd.f32 %v1122_v43, %v1121_v38  ;;  %v1162_v47 = vpop.f32.mrf.mxu1  ;;  %v790_v50 = vadd.f32 %v1160_v45, %v725_v41 }
 0x109   : > { %v1124_v49 = vpop.f32.mrf.mxu0  ;;  %v1163_v52 = vadd.f32 %v1162_v47, %v1161_v42 }
 0x10a   : > { %1087 = vst [vmem:[%s1386_s4 + $0x8] sm:$0xff] %v1075_v44   ;;  %v728_v51 = vadd.f32 %v1123_v46, %v390_v48  ;;  %v1164_v53 = vpop.f32.mrf.mxu1  ;;  %v808_v60 = vmax.f32 %v790_v50, 0.0 }
 0x10b   : > { %v1125_v54 = vpop.f32.mrf.mxu0 }
 0x10c   : > { %v793_v55 = vadd.f32 %v1163_v52, %v728_v51  ;;  %v1126_v56 = vadd.f32 %v1125_v54, %v1124_v49  ;;  %v1165_v57 = vpop.f32.mrf.mxu1 }
 0x10d   : > { %v1127_v59 = vpop.f32.mrf.mxu0  ;;  %v1166_v2 = vadd.f32 %v1165_v57, %v1164_v53 }
 0x10e   : > { %v809_v61 = vmax.f32 %v793_v55, 0.0  ;;  %v733_v62 = vadd.f32 %v1126_v56, %v395_v58  ;;  %v1167_v63 = vpop.f32.mrf.mxu1 }
 0x10f   : > { %v1128_v0 = vpop.f32.mrf.mxu0 }
 0x110   : > { %v1080_v1 = vpack.c.bf16 %v809_v61, %v808_v60  ;;  %v1129_v3 = vadd.f32 %v1128_v0, %v1127_v59  ;;  %v1168_v4 = vpop.f32.mrf.mxu1  ;;  %v798_v6 = vadd.f32 %v1166_v2, %v733_v62 }
 0x111   : > { %v1169_v8 = vadd.f32 %v1168_v4, %v1167_v63 }
 0x112   : > { %1088 = vst [vmem:[%s1386_s4 + $0x10] sm:$0xff] %v1080_v1   ;;  %v736_v7 = vadd.f32 %v1129_v3, %v400_v5  ;;  %v810_v10 = vmax.f32 %v798_v6, 0.0 }
 0x114   : > { %v801_v9 = vadd.f32 %v1169_v8, %v736_v7 }
 0x116   : > { %v811_v11 = vmax.f32 %v801_v9, 0.0 }
 0x118   : > { %v1085_v12 = vpack.c.bf16 %v811_v11, %v810_v10 }
 0x11a   : > { %1089 = vst [vmem:[%s1386_s4 + $0x18] sm:$0xff] %v1085_v12  }
 0x11b PF: > { %s13_s14 = sadd.s32 1, %s1275_s14   ;;  %s1405_s12 = smov %s1271_s13 }
 0x11c   : > { %p10_p5 = scmp.ge.s32.totalorder %s13_s14, 6   ;;  %s1406_s13 = smov %s1408_s15 }
 0x11e   :  { %12 = sbr.rel (!%p10_p5) target bundleno = 2 (0x2), region = 68 }

// kernel: _lambda_.28
= control target key start
LH: loop header
LB: loop body
LE: loop exit
PB: predicated region body
PF: predicated region fallthrough
CT: control target
= control target key end

     0   :  { %s1294_s12 = smov 0   ;;  %s1296_s13 = smov 0   ;;  %s1424_s0 = inlined_call_operand.vmem [shape: bf16[4,32,512], index: 0, kind: input, shape index: {}]   ;;  %s1425_s1 = inlined_call_operand.vmem [shape: bf16[1,4,512,256], index: 1, kind: input, shape index: {}]   ;;  %s1426_s2 = inlined_call_operand.vmem [shape: f32[4,32,1], index: 2, kind: input, shape index: {}]   ;;  %s1427_s3 = inlined_call_operand.vmem [shape: bf16[1,4,32,256], index: 3, kind: output, shape index: {}]  }
   0x1   :  { %s1298_s14 = smov 0  }
   0x2 LB: > { %s28_s15 = sadd.s32 1, %s1267_s13  ;;  %p1019_p0 = scmp.ge.s32.totalorder %s1271_s14, 1  ;;  %s1271_s14 = sphi %s1298_s14, %s13_s14   ;;  %s1267_s13 = sphi %s1296_s13, %s1429_s13   ;;  %s1263_s12 = sphi %s1294_s12, %s1428_s12  }
   0x3   : > { %p30_p1 = scmp.ge.s32.totalorder %s28_s15, 4  ;;  %p193_p2 = scmp.lt.s32.totalorder %s1271_s14, 5 }
   0x5   : > { %s1431_s15 = smov (%p30_p1, %s28_s15), 0  ;;  %p194_p3 = pnand %p1019_p0, %p193_p2 }
   0x6   : > { %p243_p4 = scmp.lt.s32.totalorder (!%p194_p3), %s1263_s12, 3 }
   0x7   : > { %197 = sbr.rel (%p194_p3) target bundleno = 296 (0x128), region = 32 }
   0xc   : > { %v1273_v0 = vmov 0   ;;  %s1433_s12 = smov (!%p243_p4, %s1263_s12), 3 }
   0xd   : > { %1139 = vset.pattern.permute.xlu0 %v1273_v0  ;;  %1140 = vset.pattern.permute.xlu1 %v1273_v0  ;;  %s1107_s16 = sshll.u32 %s1433_s12, 9  ;;  %s1106_s20 = sshll.u32 %s1433_s12, 6 }
   0xe   : > { %s1318_s19 = scalar_lea.vmem %s1425_s1, %s1107_s16  ;;  %s1369_s23 = scalar_lea.vmem %s1424_s0, %s1106_s20 }
   0xf   : > { %v1141_v1 = vld [vmem:[%s1318_s19 + $0x74] ss:$8 sps:$4 sm:$0xff]   ;;  %v1145_v3 = vld [vmem:[%s1318_s19 + $0x70] ss:$8 sps:$4 sm:$0xff]   ;;  %v1147_v5 = vld [vmem:[%s1318_s19 + $0x64] ss:$8 sps:$4 sm:$0xff]  }
  0x10   : > { %v1143_v2 = vld [vmem:[%s1318_s19 + $0x174] ss:$8 sps:$4 sm:$0xff]   ;;  %737 = vmatprep.subr.bf16.mxu0 %v1141_v1  ;;  %v1146_v4 = vld [vmem:[%s1318_s19 + $0x170] ss:$8 sps:$4 sm:$0xff]   ;;  %v1149_v6 = vld [vmem:[%s1318_s19 + $0x164] ss:$8 sps:$4 sm:$0xff]  }
  0x11   : > { %790 = vmatprep.subr.bf16.mxu1 %v1143_v2  ;;  %738 = vmatpush1.bf16.msra.mxu0 %v1145_v3  ;;  %v1151_v7 = vld [vmem:[%s1318_s19 + $0x60] ss:$8 sps:$4 sm:$0xff]   ;;  %v1153_v9 = vld [vmem:[%s1318_s19 + $0x54] ss:$8 sps:$4 sm:$0xff]   ;;  %v1157_v11 = vld [vmem:[%s1318_s19 + $0x50] ss:$8 sps:$4 sm:$0xff]  }
  0x12   : > { %791 = vmatpush1.bf16.msra.mxu1 %v1146_v4  ;;  %739 = vmatprep.subr.bf16.mxu0 %v1147_v5  ;;  %v1152_v8 = vld [vmem:[%s1318_s19 + $0x160] ss:$8 sps:$4 sm:$0xff]   ;;  %v1155_v10 = vld [vmem:[%s1318_s19 + $0x154] ss:$8 sps:$4 sm:$0xff]   ;;  %v1158_v12 = vld [vmem:[%s1318_s19 + $0x150] ss:$8 sps:$4 sm:$0xff]  }
  0x13   : > { %792 = vmatprep.subr.bf16.mxu1 %v1149_v6  ;;  %v1159_v13 = vld [vmem:[%s1318_s19 + $0x44] ss:$8 sps:$4 sm:$0xff]   ;;  %v1163_v15 = vld [vmem:[%s1318_s19 + $0x40] ss:$8 sps:$4 sm:$0xff]   ;;  %v1165_v17 = vld [vmem:[%s1318_s19 + $0x34] ss:$8 sps:$4 sm:$0xff]  }
  0x14   : > { %v1161_v14 = vld [vmem:[%s1318_s19 + $0x144] ss:$8 sps:$4 sm:$0xff]   ;;  %v1164_v16 = vld [vmem:[%s1318_s19 + $0x140] ss:$8 sps:$4 sm:$0xff]   ;;  %v1167_v18 = vld [vmem:[%s1318_s19 + $0x134] ss:$8 sps:$4 sm:$0xff]  }
  0x15   : > { %740 = vmatpush1.bf16.msra.mxu0 %v1151_v7  ;;  %v1169_v19 = vld [vmem:[%s1318_s19 + $0x30] ss:$8 sps:$4 sm:$0xff]   ;;  %v1171_v21 = vld [vmem:[%s1318_s19 + $0x24] ss:$8 sps:$4 sm:$0xff]   ;;  %v1175_v23 = vld [vmem:[%s1318_s19 + $0x20] ss:$8 sps:$4 sm:$0xff]  }
  0x16   : > { %793 = vmatpush1.bf16.msra.mxu1 %v1152_v8  ;;  %741 = vmatprep.subr.bf16.mxu0 %v1153_v9  ;;  %v1170_v20 = vld [vmem:[%s1318_s19 + $0x130] ss:$8 sps:$4 sm:$0xff]   ;;  %v1173_v22 = vld [vmem:[%s1318_s19 + $0x124] ss:$8 sps:$4 sm:$0xff]   ;;  %v1176_v24 = vld [vmem:[%s1318_s19 + $0x120] ss:$8 sps:$4 sm:$0xff]  }
  0x17   : > { %794 = vmatprep.subr.bf16.mxu1 %v1155_v10  ;;  %v1177_v25 = vld [vmem:[%s1318_s19 + $0x14] ss:$8 sps:$4 sm:$0xff]   ;;  %v1181_v27 = vld [vmem:[%s1318_s19 + $0x10] ss:$8 sps:$4 sm:$0xff]   ;;  %v1183_v29 = vld [vmem:[%s1318_s19 + $0x4] ss:$8 sps:$4 sm:$0xff]  }
  0x18   : > { %v1179_v26 = vld [vmem:[%s1318_s19 + $0x114] ss:$8 sps:$4 sm:$0xff]   ;;  %v1182_v28 = vld [vmem:[%s1318_s19 + $0x110] ss:$8 sps:$4 sm:$0xff]   ;;  %v1185_v30 = vld [vmem:[%s1318_s19 + $0x104] ss:$8 sps:$4 sm:$0xff]  }
  0x19   : > { %742 = vmatpush1.bf16.msra.mxu0 %v1157_v11  ;;  %v1187_v31 = vld [vmem:[%s1318_s19] ss:$8 sps:$4 sm:$0xff]   ;;  %v1189_v33 = vld [vmem:[%s1318_s19 + $0xf4] ss:$8 sps:$4 sm:$0xff]   ;;  %v1193_v35 = vld [vmem:[%s1318_s19 + $0xf0] ss:$8 sps:$4 sm:$0xff]  }
  0x1a   : > { %795 = vmatpush1.bf16.msra.mxu1 %v1158_v12  ;;  %743 = vmatprep.subr.bf16.mxu0 %v1159_v13  ;;  %v1188_v32 = vld [vmem:[%s1318_s19 + $0x100] ss:$8 sps:$4 sm:$0xff]   ;;  %v1191_v34 = vld [vmem:[%s1318_s19 + $0x1f4] ss:$8 sps:$4 sm:$0xff]   ;;  %v1194_v36 = vld [vmem:[%s1318_s19 + $0x1f0] ss:$8 sps:$4 sm:$0xff]  }
  0x1b   : > { %796 = vmatprep.subr.bf16.mxu1 %v1161_v14  ;;  %v1195_v37 = vld [vmem:[%s1318_s19 + $0xe4] ss:$8 sps:$4 sm:$0xff]   ;;  %v1199_v39 = vld [vmem:[%s1318_s19 + $0xe0] ss:$8 sps:$4 sm:$0xff]   ;;  %v1201_v41 = vld [vmem:[%s1318_s19 + $0xd4] ss:$8 sps:$4 sm:$0xff]  }
  0x1c   : > { %v1197_v38 = vld [vmem:[%s1318_s19 + $0x1e4] ss:$8 sps:$4 sm:$0xff]   ;;  %v1200_v40 = vld [vmem:[%s1318_s19 + $0x1e0] ss:$8 sps:$4 sm:$0xff]   ;;  %v1203_v42 = vld [vmem:[%s1318_s19 + $0x1d4] ss:$8 sps:$4 sm:$0xff]  }
  0x1d   : > { %744 = vmatpush1.bf16.msra.mxu0 %v1163_v15  ;;  %v1205_v43 = vld [vmem:[%s1318_s19 + $0xd0] ss:$8 sps:$4 sm:$0xff]   ;;  %v1207_v45 = vld [vmem:[%s1318_s19 + $0xc4] ss:$8 sps:$4 sm:$0xff]   ;;  %v1211_v47 = vld [vmem:[%s1318_s19 + $0xc0] ss:$8 sps:$4 sm:$0xff]  }
  0x1e   : > { %797 = vmatpush1.bf16.msra.mxu1 %v1164_v16  ;;  %745 = vmatprep.subr.bf16.mxu0 %v1165_v17  ;;  %v1206_v44 = vld [vmem:[%s1318_s19 + $0x1d0] ss:$8 sps:$4 sm:$0xff]   ;;  %v1209_v46 = vld [vmem:[%s1318_s19 + $0x1c4] ss:$8 sps:$4 sm:$0xff]   ;;  %v1212_v48 = vld [vmem:[%s1318_s19 + $0x1c0] ss:$8 sps:$4 sm:$0xff]  }
  0x1f   : > { %798 = vmatprep.subr.bf16.mxu1 %v1167_v18  ;;  %s1108_s24 = sshll.u32 %s1433_s12, 5  ;;  %v1213_v49 = vld [vmem:[%s1318_s19 + $0xb4] ss:$8 sps:$4 sm:$0xff]   ;;  %v1217_v53 = vld [vmem:[%s1318_s19 + $0xb0] ss:$8 sps:$4 sm:$0xff]  }
  0x20   : > { %v1239_v50 = vld [vmem:[%s1369_s23 + $0x4] ss:$16 sps:$4 sm:$0xff]   ;;  %v1242_v52 = vld [vmem:[%s1369_s23 + $0xc] ss:$16 sps:$4 sm:$0xff]   ;;  %s266_s27 = scalar_lea.vmem %s1426_s2, %s1108_s24  ;;  %v1218_v54 = vld [vmem:[%s1318_s19 + $0x1b0] ss:$8 sps:$4 sm:$0xff]   ;;  %s1409_s30 = scalar_lea.vmem %s1427_s3, %s1108_s24 }
  0x21   : > { %746 = vmatpush1.bf16.msra.mxu0 %v1169_v19  ;;  %v1215_v51 = vld [vmem:[%s1318_s19 + $0x1b4] ss:$8 sps:$4 sm:$0xff]   ;;  %769 = vmatprep.mubr.bf16.mxu0 %v1239_v50  ;;  %v353_v55 = vld [vmem:[%s266_s27] sm:$0xff]  ;;  %v354_v59 = vld [vmem:[%s266_s27 + $0x8] sm:$0xff] }
  0x22   : > { %799 = vmatpush1.bf16.msra.mxu1 %v1170_v20  ;;  %747 = vmatprep.subr.bf16.mxu0 %v1171_v21  ;;  %v355_v56 = vld [vmem:[%s266_s27 + $0x10] sm:$0xff]  ;;  %v1219_v57 = vld [vmem:[%s1318_s19 + $0xa4] ss:$8 sps:$4 sm:$0xff]   ;;  %v356_v60 = vld [vmem:[%s266_s27 + $0x18] sm:$0xff] }
  0x23   : > { %800 = vmatprep.subr.bf16.mxu1 %v1173_v22  ;;  %822 = vmatprep.mubr.bf16.mxu1 %v1242_v52  ;;  %v1221_v58 = vld [vmem:[%s1318_s19 + $0x1a4] ss:$8 sps:$4 sm:$0xff]   ;;  %v1223_v61 = vld [vmem:[%s1318_s19 + $0xa0] ss:$8 sps:$4 sm:$0xff]   ;;  %v1225_v63 = vld [vmem:[%s1318_s19 + $0x94] ss:$8 sps:$4 sm:$0xff]  }
  0x24   : > { %359 = vperm.xlu0 %1139, %v353_v55   ;;  %369 = vperm.xlu1 %1140, %v355_v56   ;;  %v1224_v62 = vld [vmem:[%s1318_s19 + $0x1a0] ss:$8 sps:$4 sm:$0xff]   ;;  %v1227_v0 = vld [vmem:[%s1318_s19 + $0x194] ss:$8 sps:$4 sm:$0xff]   ;;  %v1229_v1 = vld [vmem:[%s1318_s19 + $0x90] ss:$8 sps:$4 sm:$0xff]  }
  0x25   : > { %748 = vmatpush1.bf16.msra.mxu0 %v1175_v23  ;;  %v1230_v2 = vld [vmem:[%s1318_s19 + $0x190] ss:$8 sps:$4 sm:$0xff]   ;;  %v1231_v3 = vld [vmem:[%s1318_s19 + $0x84] ss:$8 sps:$4 sm:$0xff]   ;;  %v1235_v5 = vld [vmem:[%s1318_s19 + $0x80] ss:$8 sps:$4 sm:$0xff]  }
  0x26   : > { %801 = vmatpush1.bf16.msra.mxu1 %v1176_v24  ;;  %749 = vmatprep.subr.bf16.mxu0 %v1177_v25  ;;  %v1233_v4 = vld [vmem:[%s1318_s19 + $0x184] ss:$8 sps:$4 sm:$0xff]   ;;  %v1236_v6 = vld [vmem:[%s1318_s19 + $0x180] ss:$8 sps:$4 sm:$0xff]  }
  0x27   : > { %802 = vmatprep.subr.bf16.mxu1 %v1179_v26  ;;  %v1237_v7 = vld [vmem:[%s1369_s23] ss:$16 sps:$4 sm:$0xff]   ;;  %v1240_v8 = vld [vmem:[%s1369_s23 + $0x8] ss:$16 sps:$4 sm:$0xff]   ;;  %v1243_v9 = vld [vmem:[%s1369_s23 + $0x24] ss:$16 sps:$4 sm:$0xff]  }
  0x28   : > { %364 = vperm.xlu0 %1139, %v354_v59   ;;  %374 = vperm.xlu1 %1140, %v356_v60   ;;  %v1245_v10 = vld [vmem:[%s1369_s23 + $0x2c] ss:$16 sps:$4 sm:$0xff]   ;;  %v1247_v11 = vld [vmem:[%s1369_s23 + $0x20] ss:$16 sps:$4 sm:$0xff]   ;;  %v1248_v12 = vld [vmem:[%s1369_s23 + $0x28] ss:$16 sps:$4 sm:$0xff]  }
  0x29   : > { %750 = vmatpush1.bf16.msra.mxu0 %v1181_v27 }
  0x2a   : > { %803 = vmatpush1.bf16.msra.mxu1 %v1182_v28  ;;  %751 = vmatprep.subr.bf16.mxu0 %v1183_v29 }
  0x2b   : > { %804 = vmatprep.subr.bf16.mxu1 %v1185_v30 }
  0x2d   : > { %752 = vmatpush1.bf16.msra.mxu0 %v1187_v31 }
  0x2e   : > { %805 = vmatpush1.bf16.msra.mxu1 %v1188_v32  ;;  %753 = vmatprep.subr.bf16.mxu0 %v1189_v33 }
  0x2f   : > { %806 = vmatprep.subr.bf16.mxu1 %v1191_v34 }
  0x31   : > { %754 = vmatpush2.bf16.msra.mxu0 %v1193_v35 }
  0x32   : > { %807 = vmatpush2.bf16.msra.mxu1 %v1194_v36  ;;  %755 = vmatprep.subr.bf16.mxu0 %v1195_v37 }
  0x33   : > { %808 = vmatprep.subr.bf16.mxu1 %v1197_v38 }
  0x35   : > { %756 = vmatpush2.bf16.msra.mxu0 %v1199_v39 }
  0x36   : > { %809 = vmatpush2.bf16.msra.mxu1 %v1200_v40  ;;  %757 = vmatprep.subr.bf16.mxu0 %v1201_v41 }
  0x37   : > { %810 = vmatprep.subr.bf16.mxu1 %v1203_v42 }
  0x39   : > { %758 = vmatpush2.bf16.msra.mxu0 %v1205_v43 }
  0x3a   : > { %811 = vmatpush2.bf16.msra.mxu1 %v1206_v44  ;;  %759 = vmatprep.subr.bf16.mxu0 %v1207_v45 }
  0x3b   : > { %812 = vmatprep.subr.bf16.mxu1 %v1209_v46 }
  0x3d   : > { %760 = vmatpush2.bf16.msra.mxu0 %v1211_v47 }
  0x3e   : > { %813 = vmatpush2.bf16.msra.mxu1 %v1212_v48  ;;  %761 = vmatprep.subr.bf16.mxu0 %v1213_v49 }
  0x3f   : > { %814 = vmatprep.subr.bf16.mxu1 %v1215_v51 }
  0x41   : > { %762 = vmatpush2.bf16.msra.mxu0 %v1217_v53 }
  0x42   : > { %815 = vmatpush2.bf16.msra.mxu1 %v1218_v54  ;;  %763 = vmatprep.subr.bf16.mxu0 %v1219_v57 }
  0x43   : > { %816 = vmatprep.subr.bf16.mxu1 %v1221_v58 }
  0x45   : > { %764 = vmatpush2.bf16.msra.mxu0 %v1223_v61 }
  0x46   : > { %817 = vmatpush2.bf16.msra.mxu1 %v1224_v62  ;;  %765 = vmatprep.subr.bf16.mxu0 %v1225_v63 }
  0x47   : > { %818 = vmatprep.subr.bf16.mxu1 %v1227_v0 }
  0x49   : > { %766 = vmatpush2.bf16.msra.mxu0 %v1229_v1 }
  0x4a   : > { %819 = vmatpush2.bf16.msra.mxu1 %v1230_v2  ;;  %767 = vmatprep.subr.bf16.mxu0 %v1231_v3 }
  0x4b   : > { %820 = vmatprep.subr.bf16.mxu1 %v1233_v4 }
  0x4d   : > { %768 = vmatpush2.bf16.msra.mxu0 %v1235_v5 }
  0x4e   : > { %821 = vmatpush2.bf16.msra.mxu1 %v1236_v6 }
  0x50   : > { %770 = vmatmul.mubr.bf16.vlgmr.msra.gmra.mxu0 %v1237_v7 }
  0x51   : > { %823 = vmatmul.mubr.bf16.vlgmr.msra.gmra.mxu1 %v1240_v8  ;;  %779 = vmatprep.mubr.bf16.mxu0 %v1243_v9 }
  0x52   : > { %832 = vmatprep.mubr.bf16.mxu1 %v1245_v10 }
  0x58   : > { %780 = vmatmul.mubr.bf16.gmra.mxu0 %v1247_v11 }
  0x59   : > { %833 = vmatmul.mubr.bf16.gmra.mxu1 %v1248_v12 }
  0x9f   : > { %v360_v13 = vpop.permute.xlu0 %359  ;;  %v370_v26 = vpop.permute.xlu1 %369 }
  0xa3   : > { %v365_v17 = vpop.permute.xlu0 %364  ;;  %v375_v43 = vpop.permute.xlu1 %374 }
 0x110   : > { %v771_v14 = vpop.f32.mrf.mxu0 }
 0x111   : > { %v824_v15 = vpop.f32.mrf.mxu1  ;;  %v772_v16 = vadd.f32 %v771_v14, %v360_v13 }
 0x112   : > { %v773_v18 = vpop.f32.mrf.mxu0 }
 0x113   : > { %v826_v19 = vpop.f32.mrf.mxu1  ;;  %v825_v20 = vadd.f32 %v824_v15, %v772_v16  ;;  %v774_v21 = vadd.f32 %v773_v18, %v360_v13 }
 0x114   : > { %v775_v22 = vpop.f32.mrf.mxu0 }
 0x115   : > { %v828_v23 = vpop.f32.mrf.mxu1  ;;  %v827_v24 = vadd.f32 %v826_v19, %v774_v21  ;;  %v776_v25 = vadd.f32 %v775_v22, %v365_v17  ;;  %v843_v29 = vmax.f32 %v825_v20, 0.0 }
 0x116   : > { %v777_v27 = vpop.f32.mrf.mxu0 }
 0x117   : > { %v830_v28 = vpop.f32.mrf.mxu1  ;;  %v844_v30 = vmax.f32 %v827_v24, 0.0  ;;  %v829_v31 = vadd.f32 %v828_v23, %v776_v25  ;;  %v778_v32 = vadd.f32 %v777_v27, %v365_v17 }
 0x118   : > { %v781_v33 = vpop.f32.mrf.mxu0 }
 0x119   : > { %v834_v34 = vpop.f32.mrf.mxu1  ;;  %v1110_v35 = vpack.c.bf16 %v844_v30, %v843_v29  ;;  %v831_v36 = vadd.f32 %v830_v28, %v778_v32  ;;  %v782_v37 = vadd.f32 %v781_v33, %v370_v26  ;;  %v845_v40 = vmax.f32 %v829_v31, 0.0 }
 0x11a   : > { %v783_v38 = vpop.f32.mrf.mxu0 }
 0x11b   : > { %v836_v39 = vpop.f32.mrf.mxu1  ;;  %875 = vst [vmem:[%s1409_s30] sm:$0xff] %v1110_v35  ;;  %v846_v41 = vmax.f32 %v831_v36, 0.0  ;;  %v835_v42 = vadd.f32 %v834_v34, %v782_v37  ;;  %v784_v44 = vadd.f32 %v783_v38, %v370_v26 }
 0x11c   : > { %v785_v45 = vpop.f32.mrf.mxu0 }
 0x11d   : > { %v838_v46 = vpop.f32.mrf.mxu1  ;;  %v1111_v47 = vpack.c.bf16 %v846_v41, %v845_v40  ;;  %v837_v48 = vadd.f32 %v836_v39, %v784_v44  ;;  %v786_v49 = vadd.f32 %v785_v45, %v375_v43  ;;  %v847_v51 = vmax.f32 %v835_v42, 0.0 }
 0x11e   : > { %v787_v50 = vpop.f32.mrf.mxu0 }
 0x11f   : > { %876 = vst [vmem:[%s1409_s30 + $0x8] sm:$0xff] %v1111_v47  ;;  %v848_v52 = vmax.f32 %v837_v48, 0.0  ;;  %v839_v53 = vadd.f32 %v838_v46, %v786_v49  ;;  %v788_v54 = vadd.f32 %v787_v50, %v375_v43  ;;  %v840_v55 = vpop.f32.mrf.mxu1 }
 0x121   : > { %v1112_v56 = vpack.c.bf16 %v848_v52, %v847_v51  ;;  %v841_v57 = vadd.f32 %v840_v55, %v788_v54  ;;  %v849_v58 = vmax.f32 %v839_v53, 0.0 }
 0x123   : > { %877 = vst [vmem:[%s1409_s30 + $0x10] sm:$0xff] %v1112_v56  ;;  %v850_v59 = vmax.f32 %v841_v57, 0.0 }
 0x125   : > { %v1113_v60 = vpack.c.bf16 %v850_v59, %v849_v58 }
 0x127   : > { %878 = vst [vmem:[%s1409_s30 + $0x18] sm:$0xff] %v1113_v60 }
 0x128 PF: > { %s13_s14 = sadd.s32 1, %s1271_s14   ;;  %s1428_s12 = smov %s1267_s13 }
 0x129   : > { %p10_p5 = scmp.ge.s32.totalorder %s13_s14, 6   ;;  %s1429_s13 = smov %s1431_s15 }
 0x12b   :  { %12 = sbr.rel (!%p10_p5) target bundleno = 2 (0x2), region = 68 }

// kernel: _lambda_.29
= control target key start
LH: loop header
LB: loop body
LE: loop exit
PB: predicated region body
PF: predicated region fallthrough
CT: control target
= control target key end

     0   :  { %s1692_s12 = smov 0   ;;  %s1694_s13 = smov 0   ;;  %s1896_s0 = inlined_call_operand.vmem [shape: bf16[4,16,256], index: 0, kind: input, shape index: {}]   ;;  %s1897_s1 = inlined_call_operand.vmem [shape: bf16[1,4,256,1024], index: 1, kind: input, shape index: {}]   ;;  %s1898_s2 = inlined_call_operand.vmem [shape: f32[4,16,1], index: 2, kind: input, shape index: {}]   ;;  %s1899_s3 = inlined_call_operand.vmem [shape: bf16[1,4,16,1024], index: 3, kind: output, shape index: {}]  }
   0x1   :  { %s1696_s14 = smov 0  }
   0x2 LB: > { %s28_s15 = sadd.s32 1, %s1665_s13  ;;  %p1457_p0 = scmp.ge.s32.totalorder %s1669_s14, 1  ;;  %s1669_s14 = sphi %s1696_s14, %s13_s14   ;;  %s1665_s13 = sphi %s1694_s13, %s1901_s13   ;;  %s1661_s12 = sphi %s1692_s12, %s1900_s12  }
   0x3   : > { %p30_p1 = scmp.ge.s32.totalorder %s28_s15, 4  ;;  %p193_p2 = scmp.lt.s32.totalorder %s1669_s14, 5 }
   0x5   : > { %s1903_s15 = smov (%p30_p1, %s28_s15), 0  ;;  %p194_p3 = pnand %p1457_p0, %p193_p2 }
   0x6   : > { %p243_p4 = scmp.lt.s32.totalorder (!%p194_p3), %s1661_s12, 3 }
   0x7   : > { %197 = sbr.rel (%p194_p3) target bundleno = 353 (0x161), region = 32 }
   0xc   : > { %s1905_s12 = smov (!%p243_p4, %s1661_s12), 3  ;;  %v1671_v26 = vmov 0  }
   0xd   : > { %s1607_s16 = sshll.u32 %s1905_s12, 10  ;;  %1643 = vset.pattern.permute.xlu0 %v1671_v26  ;;  %s1606_s20 = sshll.u32 %s1905_s12, 4 }
   0xe   : > { %s1716_s19 = scalar_lea.vmem %s1897_s1, %s1607_s16  ;;  %s1752_s23 = scalar_lea.vmem %s1896_s0, %s1606_s20 }
   0xf   : > { %v339_v0 = vld [vmem:[%s1716_s19 + $0x1c0] sm:$0xff]  ;;  %v340_v2 = vld [vmem:[%s1716_s19 + $0x1c8] sm:$0xff]  ;;  %s266_s26 = scalar_lea.vmem %s1898_s2, %s1606_s20  ;;  %s1609_s27 = sshll.u32 %s1905_s12, 6 }
  0x10   : > { %v343_v1 = vld [vmem:[%s1716_s19 + $0x1e0] sm:$0xff]  ;;  %v344_v4 = vld [vmem:[%s1716_s19 + $0x1e8] sm:$0xff]  ;;  %s1877_s30 = scalar_lea.vmem %s1899_s3, %s1609_s27 }
  0x11   : > { %v1525_v3 = vcombine.high %v339_v0, %v343_v1  ;;  %v1524_v5 = vcombine.low %v339_v0, %v343_v1  ;;  %v331_v6 = vld [vmem:[%s1716_s19 + $0x180] sm:$0xff]  ;;  %v1527_v8 = vcombine.high %v340_v2, %v344_v4  ;;  %v1526_v9 = vcombine.low %v340_v2, %v344_v4  ;;  %v332_v11 = vld [vmem:[%s1716_s19 + $0x188] sm:$0xff] }
  0x12   : > { %v335_v7 = vld [vmem:[%s1716_s19 + $0x1a0] sm:$0xff]  ;;  %v336_v12 = vld [vmem:[%s1716_s19 + $0x1a8] sm:$0xff] }
  0x13   : > { %v1517_v10 = vcombine.high %v331_v6, %v335_v7  ;;  %v323_v13 = vld [vmem:[%s1716_s19 + $0x140] sm:$0xff]  ;;  %1073 = vmatprep.subr.bf16.mxu0 %v1525_v3  ;;  %v1519_v14 = vcombine.high %v332_v11, %v336_v12  ;;  %v324_v16 = vld [vmem:[%s1716_s19 + $0x148] sm:$0xff]  ;;  %1116 = vmatprep.subr.bf16.mxu1 %v1527_v8  ;;  %v1516_v18 = vcombine.low %v331_v6, %v335_v7 }
  0x14   : > { %v327_v15 = vld [vmem:[%s1716_s19 + $0x160] sm:$0xff]  ;;  %v328_v17 = vld [vmem:[%s1716_s19 + $0x168] sm:$0xff]  ;;  %1074 = vmatpush1.bf16.msra.mxu0 %v1524_v5  ;;  %1117 = vmatpush1.bf16.msra.mxu1 %v1526_v9  ;;  %v1518_v19 = vcombine.low %v332_v11, %v336_v12 }
  0x15   : > { %1075 = vmatprep.subr.bf16.mxu0 %v1517_v10  ;;  %v1509_v20 = vcombine.high %v323_v13, %v327_v15  ;;  %1118 = vmatprep.subr.bf16.mxu1 %v1519_v14  ;;  %v1511_v21 = vcombine.high %v324_v16, %v328_v17  ;;  %v315_v22 = vld [vmem:[%s1716_s19 + $0x100] sm:$0xff]  ;;  %v316_v24 = vld [vmem:[%s1716_s19 + $0x108] sm:$0xff]  ;;  %v1508_v27 = vcombine.low %v323_v13, %v327_v15 }
  0x16   : > { %v319_v23 = vld [vmem:[%s1716_s19 + $0x120] sm:$0xff]  ;;  %v320_v25 = vld [vmem:[%s1716_s19 + $0x128] sm:$0xff]  ;;  %v1510_v28 = vcombine.low %v324_v16, %v328_v17 }
  0x17   : > { %v1501_v29 = vcombine.high %v315_v22, %v319_v23  ;;  %v1503_v30 = vcombine.high %v316_v24, %v320_v25  ;;  %v307_v31 = vld [vmem:[%s1716_s19 + $0xc0] sm:$0xff]  ;;  %v308_v33 = vld [vmem:[%s1716_s19 + $0xc8] sm:$0xff]  ;;  %v1500_v35 = vcombine.low %v315_v22, %v319_v23  ;;  %v1502_v36 = vcombine.low %v316_v24, %v320_v25 }
  0x18   : > { %1076 = vmatpush1.bf16.msra.mxu0 %v1516_v18  ;;  %1119 = vmatpush1.bf16.msra.mxu1 %v1518_v19  ;;  %v311_v32 = vld [vmem:[%s1716_s19 + $0xe0] sm:$0xff]  ;;  %v312_v34 = vld [vmem:[%s1716_s19 + $0xe8] sm:$0xff] }
  0x19   : > { %1077 = vmatprep.subr.bf16.mxu0 %v1509_v20  ;;  %1120 = vmatprep.subr.bf16.mxu1 %v1511_v21  ;;  %v1493_v37 = vcombine.high %v307_v31, %v311_v32  ;;  %v1495_v38 = vcombine.high %v308_v33, %v312_v34  ;;  %v299_v39 = vld [vmem:[%s1716_s19 + $0x80] sm:$0xff]  ;;  %v300_v41 = vld [vmem:[%s1716_s19 + $0x88] sm:$0xff]  ;;  %v1492_v43 = vcombine.low %v307_v31, %v311_v32 }
  0x1a   : > { %v303_v40 = vld [vmem:[%s1716_s19 + $0xa0] sm:$0xff]  ;;  %v304_v42 = vld [vmem:[%s1716_s19 + $0xa8] sm:$0xff]  ;;  %v1494_v44 = vcombine.low %v308_v33, %v312_v34 }
  0x1b   : > { %v1485_v45 = vcombine.high %v299_v39, %v303_v40  ;;  %v1487_v46 = vcombine.high %v300_v41, %v304_v42  ;;  %v291_v47 = vld [vmem:[%s1716_s19 + $0x40] sm:$0xff]  ;;  %v292_v49 = vld [vmem:[%s1716_s19 + $0x48] sm:$0xff]  ;;  %v1484_v51 = vcombine.low %v299_v39, %v303_v40  ;;  %v1486_v52 = vcombine.low %v300_v41, %v304_v42 }
  0x1c   : > { %1078 = vmatpush1.bf16.msra.mxu0 %v1508_v27  ;;  %1121 = vmatpush1.bf16.msra.mxu1 %v1510_v28  ;;  %v295_v48 = vld [vmem:[%s1716_s19 + $0x60] sm:$0xff]  ;;  %v296_v50 = vld [vmem:[%s1716_s19 + $0x68] sm:$0xff] }
  0x1d   : > { %1079 = vmatprep.subr.bf16.mxu0 %v1501_v29  ;;  %1122 = vmatprep.subr.bf16.mxu1 %v1503_v30  ;;  %v1477_v53 = vcombine.high %v291_v47, %v295_v48  ;;  %v1479_v54 = vcombine.high %v292_v49, %v296_v50  ;;  %v283_v55 = vld [vmem:[%s1716_s19] sm:$0xff]  ;;  %v284_v58 = vld [vmem:[%s1716_s19 + $0x8] sm:$0xff]  ;;  %v1476_v60 = vcombine.low %v291_v47, %v295_v48 }
  0x1e   : > { %v287_v56 = vld [vmem:[%s1716_s19 + $0x20] sm:$0xff]  ;;  %v288_v59 = vld [vmem:[%s1716_s19 + $0x28] sm:$0xff]  ;;  %v1478_v61 = vcombine.low %v292_v49, %v296_v50 }
  0x1f   : > { %v1757_v57 = vld [vmem:[%s1752_s23 + $0x4] ss:$8 sps:$4 sm:$0xff]   ;;  %v1469_v62 = vcombine.high %v283_v55, %v287_v56  ;;  %v1471_v63 = vcombine.high %v284_v58, %v288_v59  ;;  %v1468_v4 = vcombine.low %v283_v55, %v287_v56  ;;  %v1470_v5 = vcombine.low %v284_v58, %v288_v59 }
  0x20   : > { %1080 = vmatpush1.bf16.msra.mxu0 %v1500_v35  ;;  %1123 = vmatpush1.bf16.msra.mxu1 %v1502_v36  ;;  %v403_v0 = vld [vmem:[%s1716_s19 + $0x3c0] sm:$0xff]  ;;  %v404_v2 = vld [vmem:[%s1716_s19 + $0x3c8] sm:$0xff] }
  0x21   : > { %1081 = vmatprep.subr.bf16.mxu0 %v1493_v37  ;;  %1124 = vmatprep.subr.bf16.mxu1 %v1495_v38  ;;  %v407_v1 = vld [vmem:[%s1716_s19 + $0x3e0] sm:$0xff]  ;;  %v408_v3 = vld [vmem:[%s1716_s19 + $0x3e8] sm:$0xff] }
  0x22   : > { %1105 = vmatprep.mubr.bf16.mxu0 %v1757_v57  ;;  %1148 = vmatprep.mubr.bf16.mxu1 %v1757_v57  ;;  %v1589_v6 = vcombine.high %v403_v0, %v407_v1  ;;  %v1591_v7 = vcombine.high %v404_v2, %v408_v3  ;;  %v395_v8 = vld [vmem:[%s1716_s19 + $0x380] sm:$0xff]  ;;  %v396_v10 = vld [vmem:[%s1716_s19 + $0x388] sm:$0xff]  ;;  %v1588_v12 = vcombine.low %v403_v0, %v407_v1 }
  0x23   : > { %v399_v9 = vld [vmem:[%s1716_s19 + $0x3a0] sm:$0xff]  ;;  %v400_v11 = vld [vmem:[%s1716_s19 + $0x3a8] sm:$0xff]  ;;  %v1590_v13 = vcombine.low %v404_v2, %v408_v3  ;;  %v341_v3 = vld [vmem:[%s1716_s19 + $0x1d0] sm:$0xff] }
  0x24   : > { %1082 = vmatpush1.bf16.msra.mxu0 %v1492_v43  ;;  %1125 = vmatpush1.bf16.msra.mxu1 %v1494_v44  ;;  %v1581_v14 = vcombine.high %v395_v8, %v399_v9  ;;  %v1583_v15 = vcombine.high %v396_v10, %v400_v11  ;;  %v387_v16 = vld [vmem:[%s1716_s19 + $0x340] sm:$0xff]  ;;  %v388_v18 = vld [vmem:[%s1716_s19 + $0x348] sm:$0xff]  ;;  %v1580_v20 = vcombine.low %v395_v8, %v399_v9 }
  0x25   : > { %1083 = vmatprep.subr.bf16.mxu0 %v1485_v45  ;;  %1126 = vmatprep.subr.bf16.mxu1 %v1487_v46  ;;  %v391_v17 = vld [vmem:[%s1716_s19 + $0x360] sm:$0xff]  ;;  %v392_v19 = vld [vmem:[%s1716_s19 + $0x368] sm:$0xff]  ;;  %v1582_v21 = vcombine.low %v396_v10, %v400_v11  ;;  %v333_v11 = vld [vmem:[%s1716_s19 + $0x190] sm:$0xff] }
  0x26   : > { %v1573_v22 = vcombine.high %v387_v16, %v391_v17  ;;  %v1575_v23 = vcombine.high %v388_v18, %v392_v19  ;;  %v379_v24 = vld [vmem:[%s1716_s19 + $0x300] sm:$0xff]  ;;  %v380_v26 = vld [vmem:[%s1716_s19 + $0x308] sm:$0xff]  ;;  %v1572_v28 = vcombine.low %v387_v16, %v391_v17  ;;  %v1574_v29 = vcombine.low %v388_v18, %v392_v19 }
  0x27   : > { %v383_v25 = vld [vmem:[%s1716_s19 + $0x320] sm:$0xff]  ;;  %v384_v27 = vld [vmem:[%s1716_s19 + $0x328] sm:$0xff] }
  0x28   : > { %1084 = vmatpush1.bf16.msra.mxu0 %v1484_v51  ;;  %1127 = vmatpush1.bf16.msra.mxu1 %v1486_v52  ;;  %v1565_v30 = vcombine.high %v379_v24, %v383_v25  ;;  %v1567_v31 = vcombine.high %v380_v26, %v384_v27  ;;  %v371_v32 = vld [vmem:[%s1716_s19 + $0x2c0] sm:$0xff]  ;;  %v372_v34 = vld [vmem:[%s1716_s19 + $0x2c8] sm:$0xff]  ;;  %v1564_v36 = vcombine.low %v379_v24, %v383_v25 }
  0x29   : > { %1085 = vmatprep.subr.bf16.mxu0 %v1477_v53  ;;  %1128 = vmatprep.subr.bf16.mxu1 %v1479_v54  ;;  %v375_v33 = vld [vmem:[%s1716_s19 + $0x2e0] sm:$0xff]  ;;  %v376_v35 = vld [vmem:[%s1716_s19 + $0x2e8] sm:$0xff]  ;;  %v1566_v38 = vcombine.low %v380_v26, %v384_v27 }
  0x2a   : > { %v411_v37 = vld [vmem:[%s266_s26] sm:$0xff]  ;;  %v1557_v39 = vcombine.high %v371_v32, %v375_v33  ;;  %v1559_v40 = vcombine.high %v372_v34, %v376_v35  ;;  %v364_v43 = vld [vmem:[%s1716_s19 + $0x288] sm:$0xff]  ;;  %v1556_v46 = vcombine.low %v371_v32, %v375_v33  ;;  %v1558_v47 = vcombine.low %v372_v34, %v376_v35 }
  0x2b   : > { %v363_v41 = vld [vmem:[%s1716_s19 + $0x280] sm:$0xff]  ;;  %415 = vperm.xlu0 %1643, %v411_v37   ;;  %v368_v44 = vld [vmem:[%s1716_s19 + $0x2a8] sm:$0xff]  ;;  %v313_v37 = vld [vmem:[%s1716_s19 + $0xf0] sm:$0xff] }
  0x2c   : > { %1086 = vmatpush1.bf16.msra.mxu0 %v1476_v60  ;;  %1129 = vmatpush1.bf16.msra.mxu1 %v1478_v61  ;;  %v367_v42 = vld [vmem:[%s1716_s19 + $0x2a0] sm:$0xff]  ;;  %v412_v45 = vld [vmem:[%s266_s26 + $0x8] sm:$0xff]  ;;  %v1551_v49 = vcombine.high %v364_v43, %v368_v44  ;;  %v1550_v55 = vcombine.low %v364_v43, %v368_v44  ;;  %v301_v43 = vld [vmem:[%s1716_s19 + $0x90] sm:$0xff] }
  0x2d   : > { %1087 = vmatprep.subr.bf16.mxu0 %v1469_v62  ;;  %1130 = vmatprep.subr.bf16.mxu1 %v1471_v63  ;;  %v1549_v48 = vcombine.high %v363_v41, %v367_v42  ;;  %v355_v50 = vld [vmem:[%s1716_s19 + $0x240] sm:$0xff]  ;;  %v356_v52 = vld [vmem:[%s1716_s19 + $0x248] sm:$0xff]  ;;  %v1548_v54 = vcombine.low %v363_v41, %v367_v42  ;;  %v305_v44 = vld [vmem:[%s1716_s19 + $0xb0] sm:$0xff] }
  0x2e   : > { %v359_v51 = vld [vmem:[%s1716_s19 + $0x260] sm:$0xff]  ;;  %v360_v53 = vld [vmem:[%s1716_s19 + $0x268] sm:$0xff] }
  0x2f   : > { %420 = vperm.xlu0 %1643, %v412_v45   ;;  %v1541_v56 = vcombine.high %v355_v50, %v359_v51  ;;  %v1543_v58 = vcombine.high %v356_v52, %v360_v53  ;;  %v347_v59 = vld [vmem:[%s1716_s19 + $0x200] sm:$0xff]  ;;  %v348_v61 = vld [vmem:[%s1716_s19 + $0x208] sm:$0xff]  ;;  %v1540_v63 = vcombine.low %v355_v50, %v359_v51  ;;  %v1542_v0 = vcombine.low %v356_v52, %v360_v53  ;;  %v302_v45 = vld [vmem:[%s1716_s19 + $0x98] sm:$0xff] }
  0x30   : > { %1088 = vmatpush1.bf16.msra.mxu0 %v1468_v4  ;;  %1131 = vmatpush1.bf16.msra.mxu1 %v1470_v5  ;;  %v351_v60 = vld [vmem:[%s1716_s19 + $0x220] sm:$0xff]  ;;  %v352_v62 = vld [vmem:[%s1716_s19 + $0x228] sm:$0xff]  ;;  %v345_v4 = vld [vmem:[%s1716_s19 + $0x1f0] sm:$0xff] }
  0x31   : > { %1089 = vmatprep.subr.bf16.mxu0 %v1589_v6  ;;  %1132 = vmatprep.subr.bf16.mxu1 %v1591_v7  ;;  %v1533_v1 = vcombine.high %v347_v59, %v351_v60  ;;  %v1535_v2 = vcombine.high %v348_v61, %v352_v62  ;;  %v342_v5 = vld [vmem:[%s1716_s19 + $0x1d8] sm:$0xff]  ;;  %v1532_v7 = vcombine.low %v347_v59, %v351_v60  ;;  %v293_v51 = vld [vmem:[%s1716_s19 + $0x50] sm:$0xff] }
  0x32   : > { %v346_v6 = vld [vmem:[%s1716_s19 + $0x1f8] sm:$0xff]  ;;  %v1534_v8 = vcombine.low %v348_v61, %v352_v62  ;;  %v1529_v9 = vcombine.high %v341_v3, %v345_v4  ;;  %v1528_v16 = vcombine.low %v341_v3, %v345_v4  ;;  %v297_v52 = vld [vmem:[%s1716_s19 + $0x70] sm:$0xff] }
  0x33   : > { %v1531_v10 = vcombine.high %v342_v5, %v346_v6  ;;  %v1530_v17 = vcombine.low %v342_v5, %v346_v6  ;;  %v294_v53 = vld [vmem:[%s1716_s19 + $0x58] sm:$0xff]  ;;  %v285_v60 = vld [vmem:[%s1716_s19 + $0x10] sm:$0xff] }
  0x34   : > { %1090 = vmatpush2.bf16.msra.mxu0 %v1588_v12  ;;  %1133 = vmatpush2.bf16.msra.mxu1 %v1590_v13  ;;  %v337_v12 = vld [vmem:[%s1716_s19 + $0x1b0] sm:$0xff]  ;;  %v1807_v13 = vld [vmem:[%s1752_s23] ss:$8 sps:$4 sm:$0xff]   ;;  %v286_v62 = vld [vmem:[%s1716_s19 + $0x18] sm:$0xff] }
  0x35   : > { %1091 = vmatprep.subr.bf16.mxu0 %v1581_v14  ;;  %1134 = vmatprep.subr.bf16.mxu1 %v1583_v15  ;;  %v334_v14 = vld [vmem:[%s1716_s19 + $0x198] sm:$0xff]  ;;  %v1521_v18 = vcombine.high %v333_v11, %v337_v12  ;;  %v1520_v24 = vcombine.low %v333_v11, %v337_v12  ;;  %v289_v61 = vld [vmem:[%s1716_s19 + $0x30] sm:$0xff] }
  0x36   : > { %v338_v15 = vld [vmem:[%s1716_s19 + $0x1b8] sm:$0xff]  ;;  %v405_v4 = vld [vmem:[%s1716_s19 + $0x3d0] sm:$0xff] }
  0x37   : > { %v1523_v19 = vcombine.high %v334_v14, %v338_v15  ;;  %v1522_v25 = vcombine.low %v334_v14, %v338_v15  ;;  %v409_v5 = vld [vmem:[%s1716_s19 + $0x3f0] sm:$0xff]  ;;  %v406_v6 = vld [vmem:[%s1716_s19 + $0x3d8] sm:$0xff] }
  0x38   : > { %1092 = vmatpush2.bf16.msra.mxu0 %v1580_v20  ;;  %1135 = vmatpush2.bf16.msra.mxu1 %v1582_v21  ;;  %v325_v20 = vld [vmem:[%s1716_s19 + $0x150] sm:$0xff]  ;;  %v398_v15 = vld [vmem:[%s1716_s19 + $0x398] sm:$0xff] }
  0x39   : > { %1093 = vmatprep.subr.bf16.mxu0 %v1573_v22  ;;  %1136 = vmatprep.subr.bf16.mxu1 %v1575_v23  ;;  %v329_v21 = vld [vmem:[%s1716_s19 + $0x170] sm:$0xff]  ;;  %v326_v22 = vld [vmem:[%s1716_s19 + $0x158] sm:$0xff] }
  0x3a   : > { %v330_v23 = vld [vmem:[%s1716_s19 + $0x178] sm:$0xff]  ;;  %v1513_v26 = vcombine.high %v325_v20, %v329_v21  ;;  %v1512_v32 = vcombine.low %v325_v20, %v329_v21  ;;  %v397_v12 = vld [vmem:[%s1716_s19 + $0x390] sm:$0xff] }
  0x3b   : > { %v1515_v27 = vcombine.high %v326_v22, %v330_v23  ;;  %v1514_v33 = vcombine.low %v326_v22, %v330_v23  ;;  %v401_v14 = vld [vmem:[%s1716_s19 + $0x3b0] sm:$0xff]  ;;  %v390_v23 = vld [vmem:[%s1716_s19 + $0x358] sm:$0xff] }
  0x3c   : > { %1094 = vmatpush2.bf16.msra.mxu0 %v1572_v28  ;;  %1137 = vmatpush2.bf16.msra.mxu1 %v1574_v29  ;;  %v317_v28 = vld [vmem:[%s1716_s19 + $0x110] sm:$0xff] }
  0x3d   : > { %1095 = vmatprep.subr.bf16.mxu0 %v1565_v30  ;;  %1138 = vmatprep.subr.bf16.mxu1 %v1567_v31  ;;  %v321_v29 = vld [vmem:[%s1716_s19 + $0x130] sm:$0xff]  ;;  %v318_v30 = vld [vmem:[%s1716_s19 + $0x118] sm:$0xff] }
  0x3e   : > { %v322_v31 = vld [vmem:[%s1716_s19 + $0x138] sm:$0xff]  ;;  %v1505_v34 = vcombine.high %v317_v28, %v321_v29  ;;  %v389_v21 = vld [vmem:[%s1716_s19 + $0x350] sm:$0xff] }
  0x3f   : > { %v1507_v35 = vcombine.high %v318_v30, %v322_v31  ;;  %v393_v22 = vld [vmem:[%s1716_s19 + $0x370] sm:$0xff] }
  0x40   : > { %1096 = vmatpush2.bf16.msra.mxu0 %v1564_v36  ;;  %1139 = vmatpush2.bf16.msra.mxu1 %v1566_v38  ;;  %v309_v36 = vld [vmem:[%s1716_s19 + $0xd0] sm:$0xff]  ;;  %v310_v38 = vld [vmem:[%s1716_s19 + $0xd8] sm:$0xff] }
  0x41   : > { %1097 = vmatprep.subr.bf16.mxu0 %v1557_v39  ;;  %1140 = vmatprep.subr.bf16.mxu1 %v1559_v40  ;;  %v314_v39 = vld [vmem:[%s1716_s19 + $0xf8] sm:$0xff]  ;;  %v1504_v40 = vcombine.low %v317_v28, %v321_v29  ;;  %v1497_v41 = vcombine.high %v309_v36, %v313_v37  ;;  %v381_v29 = vld [vmem:[%s1716_s19 + $0x310] sm:$0xff] }
  0x42   : > { %v1499_v42 = vcombine.high %v310_v38, %v314_v39 }
  0x44   : > { %1098 = vmatpush2.bf16.msra.mxu0 %v1556_v46  ;;  %1141 = vmatpush2.bf16.msra.mxu1 %v1558_v47  ;;  %v306_v46 = vld [vmem:[%s1716_s19 + $0xb8] sm:$0xff]  ;;  %v1496_v47 = vcombine.low %v309_v36, %v313_v37  ;;  %v373_v37 = vld [vmem:[%s1716_s19 + $0x2d0] sm:$0xff] }
  0x45   : > { %1099 = vmatprep.subr.bf16.mxu0 %v1549_v48  ;;  %1142 = vmatprep.subr.bf16.mxu1 %v1551_v49  ;;  %v1498_v48 = vcombine.low %v310_v38, %v314_v39  ;;  %v1489_v49 = vcombine.high %v301_v43, %v305_v44  ;;  %v1491_v50 = vcombine.high %v302_v45, %v306_v46  ;;  %v377_v38 = vld [vmem:[%s1716_s19 + $0x2f0] sm:$0xff]  ;;  %v374_v39 = vld [vmem:[%s1716_s19 + $0x2d8] sm:$0xff] }
  0x48   : > { %1100 = vmatpush2.bf16.msra.mxu0 %v1548_v54  ;;  %1143 = vmatpush2.bf16.msra.mxu1 %v1550_v55  ;;  %v298_v54 = vld [vmem:[%s1716_s19 + $0x78] sm:$0xff]  ;;  %v1488_v55 = vcombine.low %v301_v43, %v305_v44  ;;  %v365_v44 = vld [vmem:[%s1716_s19 + $0x290] sm:$0xff] }
  0x49   : > { %1101 = vmatprep.subr.bf16.mxu0 %v1541_v56  ;;  %1144 = vmatprep.subr.bf16.mxu1 %v1543_v58  ;;  %v1490_v56 = vcombine.low %v302_v45, %v306_v46  ;;  %v1481_v58 = vcombine.high %v293_v51, %v297_v52  ;;  %v1483_v59 = vcombine.high %v294_v53, %v298_v54  ;;  %v369_v45 = vld [vmem:[%s1716_s19 + $0x2b0] sm:$0xff]  ;;  %v366_v46 = vld [vmem:[%s1716_s19 + $0x298] sm:$0xff] }
  0x4c   : > { %1102 = vmatpush2.bf16.msra.mxu0 %v1540_v63  ;;  %1145 = vmatpush2.bf16.msra.mxu1 %v1542_v0  ;;  %v290_v63 = vld [vmem:[%s1716_s19 + $0x38] sm:$0xff]  ;;  %v1480_v0 = vcombine.low %v293_v51, %v297_v52  ;;  %v357_v52 = vld [vmem:[%s1716_s19 + $0x250] sm:$0xff] }
  0x4d   : > { %1103 = vmatprep.subr.bf16.mxu0 %v1533_v1  ;;  %1146 = vmatprep.subr.bf16.mxu1 %v1535_v2  ;;  %v1482_v1 = vcombine.low %v294_v53, %v298_v54  ;;  %v1473_v2 = vcombine.high %v285_v60, %v289_v61  ;;  %v1475_v3 = vcombine.high %v286_v62, %v290_v63  ;;  %v361_v53 = vld [vmem:[%s1716_s19 + $0x270] sm:$0xff]  ;;  %v358_v54 = vld [vmem:[%s1716_s19 + $0x258] sm:$0xff] }
  0x50   : > { %1104 = vmatpush2.bf16.msra.mxu0 %v1532_v7  ;;  %1147 = vmatpush2.bf16.msra.mxu1 %v1534_v8  ;;  %v410_v7 = vld [vmem:[%s1716_s19 + $0x3f8] sm:$0xff]  ;;  %v1472_v8 = vcombine.low %v285_v60, %v289_v61  ;;  %v349_v61 = vld [vmem:[%s1716_s19 + $0x210] sm:$0xff] }
  0x51   : > { %1159 = vmatprep.subr.bf16.mxu0 %v1529_v9  ;;  %1202 = vmatprep.subr.bf16.mxu1 %v1531_v10  ;;  %v1474_v9 = vcombine.low %v286_v62, %v290_v63  ;;  %v1593_v10 = vcombine.high %v405_v4, %v409_v5  ;;  %v1595_v11 = vcombine.high %v406_v6, %v410_v7  ;;  %v353_v62 = vld [vmem:[%s1716_s19 + $0x230] sm:$0xff]  ;;  %v350_v63 = vld [vmem:[%s1716_s19 + $0x218] sm:$0xff] }
  0x53   : > { %1106 = vmatmul.mubr.bf16.vlgmr.msra.gmra.mxu0 %v1807_v13  ;;  %1149 = vmatmul.mubr.bf16.vlgmr.msra.gmra.mxu1 %v1807_v13 }
  0x54   : > { %1160 = vmatpush1.bf16.msra.mxu0 %v1528_v16  ;;  %1203 = vmatpush1.bf16.msra.mxu1 %v1530_v17  ;;  %v402_v16 = vld [vmem:[%s1716_s19 + $0x3b8] sm:$0xff]  ;;  %v1592_v17 = vcombine.low %v405_v4, %v409_v5  ;;  %v1536_v5 = vcombine.low %v349_v61, %v353_v62 }
  0x55   : > { %1161 = vmatprep.subr.bf16.mxu0 %v1521_v18  ;;  %1204 = vmatprep.subr.bf16.mxu1 %v1523_v19  ;;  %v1594_v18 = vcombine.low %v406_v6, %v410_v7  ;;  %v1585_v19 = vcombine.high %v397_v12, %v401_v14  ;;  %v1587_v20 = vcombine.high %v398_v15, %v402_v16 }
  0x56   : > { %1191 = vmatprep.mubr.bf16.mxu0 %v1757_v57  ;;  %1234 = vmatprep.mubr.bf16.mxu1 %v1757_v57  ;;  %v1506_v57 = vcombine.low %v318_v30, %v322_v31  ;;  %v385_v30 = vld [vmem:[%s1716_s19 + $0x330] sm:$0xff]  ;;  %v382_v31 = vld [vmem:[%s1716_s19 + $0x318] sm:$0xff] }
  0x58   : > { %1162 = vmatpush1.bf16.msra.mxu0 %v1520_v24  ;;  %1205 = vmatpush1.bf16.msra.mxu1 %v1522_v25  ;;  %v394_v24 = vld [vmem:[%s1716_s19 + $0x378] sm:$0xff]  ;;  %v1584_v25 = vcombine.low %v397_v12, %v401_v14 }
  0x59   : > { %1163 = vmatprep.subr.bf16.mxu0 %v1513_v26  ;;  %1206 = vmatprep.subr.bf16.mxu1 %v1515_v27  ;;  %v1586_v26 = vcombine.low %v398_v15, %v402_v16  ;;  %v1577_v27 = vcombine.high %v389_v21, %v393_v22  ;;  %v1579_v28 = vcombine.high %v390_v23, %v394_v24 }
  0x5c   : > { %1164 = vmatpush1.bf16.msra.mxu0 %v1512_v32  ;;  %1207 = vmatpush1.bf16.msra.mxu1 %v1514_v33  ;;  %v386_v32 = vld [vmem:[%s1716_s19 + $0x338] sm:$0xff]  ;;  %v1576_v33 = vcombine.low %v389_v21, %v393_v22 }
  0x5d   : > { %1165 = vmatprep.subr.bf16.mxu0 %v1505_v34  ;;  %1208 = vmatprep.subr.bf16.mxu1 %v1507_v35  ;;  %v1578_v34 = vcombine.low %v390_v23, %v394_v24  ;;  %v1569_v35 = vcombine.high %v381_v29, %v385_v30  ;;  %v1571_v36 = vcombine.high %v382_v31, %v386_v32 }
  0x60   : > { %1166 = vmatpush1.bf16.msra.mxu0 %v1504_v40  ;;  %1209 = vmatpush1.bf16.msra.mxu1 %v1506_v57  ;;  %v378_v40 = vld [vmem:[%s1716_s19 + $0x2f8] sm:$0xff]  ;;  %v1568_v57 = vcombine.low %v381_v29, %v385_v30 }
  0x61   : > { %1167 = vmatprep.subr.bf16.mxu0 %v1497_v41  ;;  %1210 = vmatprep.subr.bf16.mxu1 %v1499_v42  ;;  %v1570_v41 = vcombine.low %v382_v31, %v386_v32  ;;  %v1561_v42 = vcombine.high %v373_v37, %v377_v38  ;;  %v1563_v43 = vcombine.high %v374_v39, %v378_v40 }
  0x64   : > { %1168 = vmatpush1.bf16.msra.mxu0 %v1496_v47  ;;  %1211 = vmatpush1.bf16.msra.mxu1 %v1498_v48  ;;  %v370_v47 = vld [vmem:[%s1716_s19 + $0x2b8] sm:$0xff]  ;;  %v1560_v48 = vcombine.low %v373_v37, %v377_v38 }
  0x65   : > { %1169 = vmatprep.subr.bf16.mxu0 %v1489_v49  ;;  %1212 = vmatprep.subr.bf16.mxu1 %v1491_v50  ;;  %v1562_v49 = vcombine.low %v374_v39, %v378_v40  ;;  %v1553_v50 = vcombine.high %v365_v44, %v369_v45  ;;  %v1555_v51 = vcombine.high %v366_v46, %v370_v47 }
  0x68   : > { %1170 = vmatpush1.bf16.msra.mxu0 %v1488_v55  ;;  %1213 = vmatpush1.bf16.msra.mxu1 %v1490_v56  ;;  %v362_v55 = vld [vmem:[%s1716_s19 + $0x278] sm:$0xff]  ;;  %v1552_v56 = vcombine.low %v365_v44, %v369_v45 }
  0x69   : > { %1171 = vmatprep.subr.bf16.mxu0 %v1481_v58  ;;  %1214 = vmatprep.subr.bf16.mxu1 %v1483_v59  ;;  %v1554_v58 = vcombine.low %v366_v46, %v370_v47  ;;  %v1545_v59 = vcombine.high %v357_v52, %v361_v53  ;;  %v1547_v60 = vcombine.high %v358_v54, %v362_v55 }
  0x6c   : > { %1172 = vmatpush1.bf16.msra.mxu0 %v1480_v0  ;;  %1215 = vmatpush1.bf16.msra.mxu1 %v1482_v1  ;;  %v354_v0 = vld [vmem:[%s1716_s19 + $0x238] sm:$0xff]  ;;  %v1544_v1 = vcombine.low %v357_v52, %v361_v53 }
  0x6d   : > { %1173 = vmatprep.subr.bf16.mxu0 %v1473_v2  ;;  %1216 = vmatprep.subr.bf16.mxu1 %v1475_v3  ;;  %v1546_v2 = vcombine.low %v358_v54, %v362_v55  ;;  %v1537_v3 = vcombine.high %v349_v61, %v353_v62  ;;  %v1539_v4 = vcombine.high %v350_v63, %v354_v0 }
  0x6e   : > { %v1538_v6 = vcombine.low %v350_v63, %v354_v0 }
  0x70   : > { %1174 = vmatpush1.bf16.msra.mxu0 %v1472_v8  ;;  %1217 = vmatpush1.bf16.msra.mxu1 %v1474_v9 }
  0x71   : > { %1175 = vmatprep.subr.bf16.mxu0 %v1593_v10  ;;  %1218 = vmatprep.subr.bf16.mxu1 %v1595_v11 }
  0x74   : > { %1176 = vmatpush2.bf16.msra.mxu0 %v1592_v17  ;;  %1219 = vmatpush2.bf16.msra.mxu1 %v1594_v18 }
  0x75   : > { %1177 = vmatprep.subr.bf16.mxu0 %v1585_v19  ;;  %1220 = vmatprep.subr.bf16.mxu1 %v1587_v20 }
  0x78   : > { %1178 = vmatpush2.bf16.msra.mxu0 %v1584_v25  ;;  %1221 = vmatpush2.bf16.msra.mxu1 %v1586_v26 }
  0x79   : > { %1179 = vmatprep.subr.bf16.mxu0 %v1577_v27  ;;  %1222 = vmatprep.subr.bf16.mxu1 %v1579_v28 }
  0x7c   : > { %1180 = vmatpush2.bf16.msra.mxu0 %v1576_v33  ;;  %1223 = vmatpush2.bf16.msra.mxu1 %v1578_v34 }
  0x7d   : > { %1181 = vmatprep.subr.bf16.mxu0 %v1569_v35  ;;  %1224 = vmatprep.subr.bf16.mxu1 %v1571_v36 }
  0x80   : > { %1182 = vmatpush2.bf16.msra.mxu0 %v1568_v57  ;;  %1225 = vmatpush2.bf16.msra.mxu1 %v1570_v41 }
  0x81   : > { %1183 = vmatprep.subr.bf16.mxu0 %v1561_v42  ;;  %1226 = vmatprep.subr.bf16.mxu1 %v1563_v43 }
  0x84   : > { %1184 = vmatpush2.bf16.msra.mxu0 %v1560_v48  ;;  %1227 = vmatpush2.bf16.msra.mxu1 %v1562_v49 }
  0x85   : > { %1185 = vmatprep.subr.bf16.mxu0 %v1553_v50  ;;  %1228 = vmatprep.subr.bf16.mxu1 %v1555_v51 }
  0x88   : > { %1186 = vmatpush2.bf16.msra.mxu0 %v1552_v56  ;;  %1229 = vmatpush2.bf16.msra.mxu1 %v1554_v58 }
  0x89   : > { %1187 = vmatprep.subr.bf16.mxu0 %v1545_v59  ;;  %1230 = vmatprep.subr.bf16.mxu1 %v1547_v60 }
  0x8c   : > { %1188 = vmatpush2.bf16.msra.mxu0 %v1544_v1  ;;  %1231 = vmatpush2.bf16.msra.mxu1 %v1546_v2 }
  0x8d   : > { %1189 = vmatprep.subr.bf16.mxu0 %v1537_v3  ;;  %1232 = vmatprep.subr.bf16.mxu1 %v1539_v4 }
  0x90   : > { %1190 = vmatpush2.bf16.msra.mxu0 %v1536_v5  ;;  %1233 = vmatpush2.bf16.msra.mxu1 %v1538_v6 }
  0x93   : > { %1192 = vmatmul.mubr.bf16.vlgmr.msra.gmra.mxu0 %v1807_v13  ;;  %1235 = vmatmul.mubr.bf16.vlgmr.msra.gmra.mxu1 %v1807_v13 }
  0xa6   : > { %v416_v7 = vpop.permute.xlu0 %415 }
  0xaa   : > { %v421_v14 = vpop.permute.xlu0 %420 }
 0x113   : > { %v1107_v8 = vpop.f32.mrf.mxu0  ;;  %v1150_v10 = vpop.f32.mrf.mxu1 }
 0x114   : > { %v1108_v9 = vadd.f32 %v1107_v8, %v416_v7  ;;  %v1151_v11 = vadd.f32 %v1150_v10, %v416_v7 }
 0x115   : > { %v1109_v12 = vpop.f32.mrf.mxu0  ;;  %v1152_v17 = vpop.f32.mrf.mxu1 }
 0x116   : > { %v1245_v15 = vmax.f32 %v1108_v9, 0.0  ;;  %v1110_v16 = vadd.f32 %v1109_v12, %v416_v7  ;;  %v1247_v18 = vmax.f32 %v1151_v11, 0.0  ;;  %v1153_v19 = vadd.f32 %v1152_v17, %v416_v7 }
 0x117   : > { %v1111_v20 = vpop.f32.mrf.mxu0  ;;  %v1154_v23 = vpop.f32.mrf.mxu1 }
 0x118   : > { %v1246_v21 = vmax.f32 %v1110_v16, 0.0  ;;  %v1112_v22 = vadd.f32 %v1111_v20, %v421_v14  ;;  %v1248_v13 = vmax.f32 %v1153_v19, 0.0  ;;  %v1155_v24 = vadd.f32 %v1154_v23, %v421_v14 }
 0x119   : > { %v1113_v25 = vpop.f32.mrf.mxu0  ;;  %v1156_v28 = vpop.f32.mrf.mxu1 }
 0x11a   : > { %v1610_v26 = vpack.c.bf16 %v1246_v21, %v1245_v15  ;;  %v1114_v27 = vadd.f32 %v1113_v25, %v421_v14  ;;  %v1611_v29 = vpack.c.bf16 %v1248_v13, %v1247_v18  ;;  %v1157_v30 = vadd.f32 %v1156_v28, %v421_v14 }
 0x11b   : > { %v1253_v31 = vmax.f32 %v1112_v22, 0.0  ;;  %v1255_v33 = vmax.f32 %v1155_v24, 0.0 }
 0x11c   : > { %1309 = vst [vmem:[%s1877_s30] sm:$0xff] %v1610_v26  ;;  %v1254_v32 = vmax.f32 %v1114_v27, 0.0  ;;  %1310 = vst [vmem:[%s1877_s30 + $0x8] sm:$0xff] %v1611_v29  ;;  %v1256_v34 = vmax.f32 %v1157_v30, 0.0 }
 0x11e   : > { %v1614_v35 = vpack.c.bf16 %v1254_v32, %v1253_v31  ;;  %v1615_v36 = vpack.c.bf16 %v1256_v34, %v1255_v33 }
 0x120   : > { %1313 = vst [vmem:[%s1877_s30 + $0x20] sm:$0xff] %v1614_v35  ;;  %1314 = vst [vmem:[%s1877_s30 + $0x28] sm:$0xff] %v1615_v36 }
 0x153   : > { %v1193_v37 = vpop.f32.mrf.mxu0  ;;  %v1236_v39 = vpop.f32.mrf.mxu1 }
 0x154   : > { %v1194_v38 = vadd.f32 %v1193_v37, %v416_v7  ;;  %v1237_v40 = vadd.f32 %v1236_v39, %v416_v7 }
 0x155   : > { %v1195_v57 = vpop.f32.mrf.mxu0  ;;  %v1238_v42 = vpop.f32.mrf.mxu1 }
 0x156   : > { %v1196_v41 = vadd.f32 %v1195_v57, %v416_v7  ;;  %v1239_v43 = vadd.f32 %v1238_v42, %v416_v7  ;;  %v1249_v45 = vmax.f32 %v1194_v38, 0.0  ;;  %v1251_v49 = vmax.f32 %v1237_v40, 0.0 }
 0x157   : > { %v1197_v44 = vpop.f32.mrf.mxu0  ;;  %v1240_v48 = vpop.f32.mrf.mxu1 }
 0x158   : > { %v1250_v46 = vmax.f32 %v1196_v41, 0.0  ;;  %v1198_v47 = vadd.f32 %v1197_v44, %v421_v14  ;;  %v1252_v50 = vmax.f32 %v1239_v43, 0.0  ;;  %v1241_v51 = vadd.f32 %v1240_v48, %v421_v14 }
 0x159   : > { %v1199_v52 = vpop.f32.mrf.mxu0  ;;  %v1242_v55 = vpop.f32.mrf.mxu1 }
 0x15a   : > { %v1612_v53 = vpack.c.bf16 %v1250_v46, %v1249_v45  ;;  %v1200_v54 = vadd.f32 %v1199_v52, %v421_v14  ;;  %v1613_v56 = vpack.c.bf16 %v1252_v50, %v1251_v49  ;;  %v1243_v58 = vadd.f32 %v1242_v55, %v421_v14 }
 0x15b   : > { %v1257_v59 = vmax.f32 %v1198_v47, 0.0  ;;  %v1259_v61 = vmax.f32 %v1241_v51, 0.0 }
 0x15c   : > { %1311 = vst [vmem:[%s1877_s30 + $0x10] sm:$0xff] %v1612_v53  ;;  %v1258_v60 = vmax.f32 %v1200_v54, 0.0  ;;  %1312 = vst [vmem:[%s1877_s30 + $0x18] sm:$0xff] %v1613_v56  ;;  %v1260_v62 = vmax.f32 %v1243_v58, 0.0 }
 0x15e   : > { %v1616_v63 = vpack.c.bf16 %v1258_v60, %v1257_v59  ;;  %v1617_v0 = vpack.c.bf16 %v1260_v62, %v1259_v61 }
 0x160   : > { %1315 = vst [vmem:[%s1877_s30 + $0x30] sm:$0xff] %v1616_v63  ;;  %1316 = vst [vmem:[%s1877_s30 + $0x38] sm:$0xff] %v1617_v0 }
 0x161 PF: > { %s13_s14 = sadd.s32 1, %s1669_s14   ;;  %s1900_s12 = smov %s1665_s13 }
 0x162   : > { %p10_p5 = scmp.ge.s32.totalorder %s13_s14, 6   ;;  %s1901_s13 = smov %s1903_s15 }
 0x164   :  { %12 = sbr.rel (!%p10_p5) target bundleno = 2 (0x2), region = 68 }

// kernel: _lambda_.30
= control target key start
LH: loop header
LB: loop body
LE: loop exit
PB: predicated region body
PF: predicated region fallthrough
CT: control target
= control target key end

     0   :  { %s2154_s12 = smov 0   ;;  %s2156_s13 = smov 0   ;;  %s2692_s0 = inlined_call_operand.vmem [shape: bf16[4,8,128], index: 0, kind: input, shape index: {}]   ;;  %s2693_s1 = inlined_call_operand.vmem [shape: bf16[1,4,128,4096], index: 1, kind: input, shape index: {}]   ;;  %s2694_s2 = inlined_call_operand.vmem [shape: f32[4,8,1], index: 2, kind: input, shape index: {}]   ;;  %s2695_s3 = inlined_call_operand.vmem [shape: bf16[1,4,8,4096], index: 3, kind: output, shape index: {}]  }
   0x1   :  { %s2158_s14 = smov 0   ;;  %s2160_s15 = smov 0  }
   0x2   :  { %s2162_s16 = smov 0   ;;  %s2164_s17 = smov 0  }
   0x3   :  { %s2166_s18 = smov 0  }
   0x4 LB: > { %s25_s19 = sadd.s32 1, %s2123_s16  ;;  %s28_s20 = sadd.s32 1, %s2127_s17  ;;  %s2131_s18 = sphi %s2166_s18, %s13_s18   ;;  %s2127_s17 = sphi %s2164_s17, %s2701_s17   ;;  %s2123_s16 = sphi %s2162_s16, %s2700_s16   ;;  %s2119_s15 = sphi %s2160_s15, %s2699_s15   ;;  %s2115_s14 = sphi %s2158_s14, %s2698_s14   ;;  %s2111_s13 = sphi %s2156_s13, %s2697_s13   ;;  %s2107_s12 = sphi %s2154_s12, %s2696_s12  }
   0x5   : > { %p26_p0 = scmp.ge.s32.totalorder %s25_s19, 2  ;;  %p76_p1 = scmp.ne.s32.totalorder %s2111_s13, %s2107_s12 }
   0x6   : > { %p77_p2 = scmp.eq.s32.totalorder %s2131_s18, 0  ;;  %s69_s24 = sadd.s32 1, %s2111_s13 }
   0x7   : > { %s2703_s19 = smov (%p26_p0, %s25_s19), 0  ;;  %s2705_s20 = smov (!%p26_p0, %s28_s20), %s2127_s17 }
   0x8   : > { %p78_p3 = por %p77_p2, %p76_p1  ;;  %p30_p4 = scmp.ge.s32.totalorder %s2705_s20, 4 }
   0x9   : > { %s65_s21 = ssub.s32 %s2123_s16, %s2703_s19  ;;  %p1861_p6 = scmp.ge.s32.totalorder %s2131_s18, 8 }
   0xa   : > { %s2707_s20 = smov (%p30_p4, %s2705_s20), 0 }
   0xb   : > { %s63_s22 = ssub.s32 %s2127_s17, %s2707_s20  ;;  %158 = sbr.rel (%p1861_p6) target bundleno = 87 (0x57), region = 16 }
   0xc   : > { %s66_s23 = sor.u32 %s65_s21, %s63_s22 }
   0xd   : > { %p67_p5 = scmp.eq.s32.totalorder %s66_s23, 0 }
   0xf   : > { %s2205_s25 = scalar_select %p67_p5, %s2111_s13, %s69_s24  }
  0x10   : > { %168 = sbr.rel (!%p78_p3) target bundleno = 87 (0x57), region = 24  ;;  %s170_s26 = sand.u32 (%p78_p3), 1, %s2111_s13  }
  0x11   : > { %s1863_s27 = sshll.u32 (%p78_p3), %s2123_s16, 4  ;;  %s1862_s28 = sshll.u32 (%p78_p3), %s170_s26, 10 }
  0x12   : > { %s1864_s29 = sshll.u32 (%p78_p3), %s2127_s17, 9  ;;  %s2219_s8 = scalar_lea.vmem (%p78_p3), [#allocation2], %s1862_s28 }
  0x13   : > { %s175_s30 = sadd.s32 (%p78_p3), %s1864_s29, %s1863_s27 }
  0x14   : > { %s1865_s4 = sshll.u32 (%p78_p3), %s175_s30, 2 }
  0x15   : > { %s2214_s7 = scalar_lea.vmem %s2693_s1, %s1865_s4 }
  0x16   : > { %v192_v0 = vld [vmem:[%s2214_s7] sm:$0xff]  ;;  %v194_v1 = vld [vmem:[%s2214_s7 + $0x8] sm:$0xff]  ;;  %v196_v2 = vld [vmem:[%s2214_s7 + $0x10] sm:$0xff] }
  0x17   : > { %193 = vst [vmem:[%s2219_s8] sm:$0xff] %v192_v0  ;;  %195 = vst [vmem:[%s2219_s8 + $0x8] sm:$0xff] %v194_v1  ;;  %v198_v3 = vld [vmem:[%s2214_s7 + $0x18] sm:$0xff]  ;;  %v200_v4 = vld [vmem:[%s2214_s7 + $0x20] sm:$0xff] }
  0x18   : > { %197 = vst [vmem:[%s2219_s8 + $0x10] sm:$0xff] %v196_v2  ;;  %v202_v5 = vld [vmem:[%s2214_s7 + $0x28] sm:$0xff]  ;;  %199 = vst [vmem:[%s2219_s8 + $0x18] sm:$0xff] %v198_v3  ;;  %v204_v6 = vld [vmem:[%s2214_s7 + $0x30] sm:$0xff] }
  0x19   : > { %201 = vst [vmem:[%s2219_s8 + $0x20] sm:$0xff] %v200_v4  ;;  %203 = vst [vmem:[%s2219_s8 + $0x28] sm:$0xff] %v202_v5  ;;  %v206_v7 = vld [vmem:[%s2214_s7 + $0x38] sm:$0xff]  ;;  %v208_v8 = vld [vmem:[%s2214_s7 + $0x80] sm:$0xff] }
  0x1a   : > { %205 = vst [vmem:[%s2219_s8 + $0x30] sm:$0xff] %v204_v6  ;;  %207 = vst [vmem:[%s2219_s8 + $0x38] sm:$0xff] %v206_v7  ;;  %v210_v9 = vld [vmem:[%s2214_s7 + $0x88] sm:$0xff]  ;;  %v212_v10 = vld [vmem:[%s2214_s7 + $0x90] sm:$0xff] }
  0x1b   : > { %209 = vst [vmem:[%s2219_s8 + $0x40] sm:$0xff] %v208_v8  ;;  %v214_v11 = vld [vmem:[%s2214_s7 + $0x98] sm:$0xff]  ;;  %211 = vst [vmem:[%s2219_s8 + $0x48] sm:$0xff] %v210_v9  ;;  %v216_v12 = vld [vmem:[%s2214_s7 + $0xa0] sm:$0xff] }
  0x1c   : > { %213 = vst [vmem:[%s2219_s8 + $0x50] sm:$0xff] %v212_v10  ;;  %215 = vst [vmem:[%s2219_s8 + $0x58] sm:$0xff] %v214_v11  ;;  %v218_v13 = vld [vmem:[%s2214_s7 + $0xa8] sm:$0xff]  ;;  %v220_v14 = vld [vmem:[%s2214_s7 + $0xb0] sm:$0xff] }
  0x1d   : > { %217 = vst [vmem:[%s2219_s8 + $0x60] sm:$0xff] %v216_v12  ;;  %219 = vst [vmem:[%s2219_s8 + $0x68] sm:$0xff] %v218_v13  ;;  %v222_v15 = vld [vmem:[%s2214_s7 + $0xb8] sm:$0xff]  ;;  %v224_v16 = vld [vmem:[%s2214_s7 + $0x100] sm:$0xff] }
  0x1e   : > { %221 = vst [vmem:[%s2219_s8 + $0x70] sm:$0xff] %v220_v14  ;;  %v226_v17 = vld [vmem:[%s2214_s7 + $0x108] sm:$0xff]  ;;  %223 = vst [vmem:[%s2219_s8 + $0x78] sm:$0xff] %v222_v15  ;;  %v228_v18 = vld [vmem:[%s2214_s7 + $0x110] sm:$0xff] }
  0x1f   : > { %225 = vst [vmem:[%s2219_s8 + $0x80] sm:$0xff] %v224_v16  ;;  %227 = vst [vmem:[%s2219_s8 + $0x88] sm:$0xff] %v226_v17  ;;  %v230_v19 = vld [vmem:[%s2214_s7 + $0x118] sm:$0xff]  ;;  %v232_v20 = vld [vmem:[%s2214_s7 + $0x120] sm:$0xff] }
  0x20   : > { %229 = vst [vmem:[%s2219_s8 + $0x90] sm:$0xff] %v228_v18  ;;  %231 = vst [vmem:[%s2219_s8 + $0x98] sm:$0xff] %v230_v19  ;;  %v234_v21 = vld [vmem:[%s2214_s7 + $0x128] sm:$0xff]  ;;  %v236_v22 = vld [vmem:[%s2214_s7 + $0x130] sm:$0xff] }
  0x21   : > { %233 = vst [vmem:[%s2219_s8 + $0xa0] sm:$0xff] %v232_v20  ;;  %v238_v23 = vld [vmem:[%s2214_s7 + $0x138] sm:$0xff]  ;;  %235 = vst [vmem:[%s2219_s8 + $0xa8] sm:$0xff] %v234_v21  ;;  %v240_v24 = vld [vmem:[%s2214_s7 + $0x180] sm:$0xff] }
  0x22   : > { %237 = vst [vmem:[%s2219_s8 + $0xb0] sm:$0xff] %v236_v22  ;;  %239 = vst [vmem:[%s2219_s8 + $0xb8] sm:$0xff] %v238_v23  ;;  %v242_v25 = vld [vmem:[%s2214_s7 + $0x188] sm:$0xff]  ;;  %v244_v26 = vld [vmem:[%s2214_s7 + $0x190] sm:$0xff] }
  0x23   : > { %241 = vst [vmem:[%s2219_s8 + $0xc0] sm:$0xff] %v240_v24  ;;  %243 = vst [vmem:[%s2219_s8 + $0xc8] sm:$0xff] %v242_v25  ;;  %v246_v27 = vld [vmem:[%s2214_s7 + $0x198] sm:$0xff]  ;;  %v248_v28 = vld [vmem:[%s2214_s7 + $0x1a0] sm:$0xff] }
  0x24   : > { %245 = vst [vmem:[%s2219_s8 + $0xd0] sm:$0xff] %v244_v26  ;;  %v250_v29 = vld [vmem:[%s2214_s7 + $0x1a8] sm:$0xff]  ;;  %247 = vst [vmem:[%s2219_s8 + $0xd8] sm:$0xff] %v246_v27  ;;  %v252_v30 = vld [vmem:[%s2214_s7 + $0x1b0] sm:$0xff] }
  0x25   : > { %249 = vst [vmem:[%s2219_s8 + $0xe0] sm:$0xff] %v248_v28  ;;  %251 = vst [vmem:[%s2219_s8 + $0xe8] sm:$0xff] %v250_v29  ;;  %v254_v31 = vld [vmem:[%s2214_s7 + $0x1b8] sm:$0xff]  ;;  %v256_v32 = vld [vmem:[%s2214_s7 + $0x200] sm:$0xff] }
  0x26   : > { %253 = vst [vmem:[%s2219_s8 + $0xf0] sm:$0xff] %v252_v30  ;;  %255 = vst [vmem:[%s2219_s8 + $0xf8] sm:$0xff] %v254_v31  ;;  %v258_v33 = vld [vmem:[%s2214_s7 + $0x208] sm:$0xff]  ;;  %v260_v34 = vld [vmem:[%s2214_s7 + $0x210] sm:$0xff] }
  0x27   : > { %257 = vst [vmem:[%s2219_s8 + $0x100] sm:$0xff] %v256_v32  ;;  %v262_v35 = vld [vmem:[%s2214_s7 + $0x218] sm:$0xff]  ;;  %259 = vst [vmem:[%s2219_s8 + $0x108] sm:$0xff] %v258_v33  ;;  %v264_v36 = vld [vmem:[%s2214_s7 + $0x220] sm:$0xff] }
  0x28   : > { %261 = vst [vmem:[%s2219_s8 + $0x110] sm:$0xff] %v260_v34  ;;  %263 = vst [vmem:[%s2219_s8 + $0x118] sm:$0xff] %v262_v35  ;;  %v266_v37 = vld [vmem:[%s2214_s7 + $0x228] sm:$0xff]  ;;  %v268_v38 = vld [vmem:[%s2214_s7 + $0x230] sm:$0xff] }
  0x29   : > { %265 = vst [vmem:[%s2219_s8 + $0x120] sm:$0xff] %v264_v36  ;;  %267 = vst [vmem:[%s2219_s8 + $0x128] sm:$0xff] %v266_v37  ;;  %v270_v39 = vld [vmem:[%s2214_s7 + $0x238] sm:$0xff]  ;;  %v272_v40 = vld [vmem:[%s2214_s7 + $0x280] sm:$0xff] }
  0x2a   : > { %269 = vst [vmem:[%s2219_s8 + $0x130] sm:$0xff] %v268_v38  ;;  %v274_v41 = vld [vmem:[%s2214_s7 + $0x288] sm:$0xff]  ;;  %271 = vst [vmem:[%s2219_s8 + $0x138] sm:$0xff] %v270_v39  ;;  %v276_v42 = vld [vmem:[%s2214_s7 + $0x290] sm:$0xff] }
  0x2b   : > { %273 = vst [vmem:[%s2219_s8 + $0x140] sm:$0xff] %v272_v40  ;;  %275 = vst [vmem:[%s2219_s8 + $0x148] sm:$0xff] %v274_v41  ;;  %v278_v43 = vld [vmem:[%s2214_s7 + $0x298] sm:$0xff]  ;;  %v280_v44 = vld [vmem:[%s2214_s7 + $0x2a0] sm:$0xff] }
  0x2c   : > { %277 = vst [vmem:[%s2219_s8 + $0x150] sm:$0xff] %v276_v42  ;;  %279 = vst [vmem:[%s2219_s8 + $0x158] sm:$0xff] %v278_v43  ;;  %v282_v45 = vld [vmem:[%s2214_s7 + $0x2a8] sm:$0xff]  ;;  %v284_v46 = vld [vmem:[%s2214_s7 + $0x2b0] sm:$0xff] }
  0x2d   : > { %281 = vst [vmem:[%s2219_s8 + $0x160] sm:$0xff] %v280_v44  ;;  %v286_v47 = vld [vmem:[%s2214_s7 + $0x2b8] sm:$0xff]  ;;  %283 = vst [vmem:[%s2219_s8 + $0x168] sm:$0xff] %v282_v45  ;;  %v288_v48 = vld [vmem:[%s2214_s7 + $0x300] sm:$0xff] }
  0x2e   : > { %285 = vst [vmem:[%s2219_s8 + $0x170] sm:$0xff] %v284_v46  ;;  %287 = vst [vmem:[%s2219_s8 + $0x178] sm:$0xff] %v286_v47  ;;  %v290_v49 = vld [vmem:[%s2214_s7 + $0x308] sm:$0xff]  ;;  %v292_v50 = vld [vmem:[%s2214_s7 + $0x310] sm:$0xff] }
  0x2f   : > { %289 = vst [vmem:[%s2219_s8 + $0x180] sm:$0xff] %v288_v48  ;;  %291 = vst [vmem:[%s2219_s8 + $0x188] sm:$0xff] %v290_v49  ;;  %v294_v51 = vld [vmem:[%s2214_s7 + $0x318] sm:$0xff]  ;;  %v296_v52 = vld [vmem:[%s2214_s7 + $0x320] sm:$0xff] }
  0x30   : > { %293 = vst [vmem:[%s2219_s8 + $0x190] sm:$0xff] %v292_v50  ;;  %v298_v53 = vld [vmem:[%s2214_s7 + $0x328] sm:$0xff]  ;;  %295 = vst [vmem:[%s2219_s8 + $0x198] sm:$0xff] %v294_v51  ;;  %v300_v54 = vld [vmem:[%s2214_s7 + $0x330] sm:$0xff] }
  0x31   : > { %297 = vst [vmem:[%s2219_s8 + $0x1a0] sm:$0xff] %v296_v52  ;;  %299 = vst [vmem:[%s2219_s8 + $0x1a8] sm:$0xff] %v298_v53  ;;  %v302_v55 = vld [vmem:[%s2214_s7 + $0x338] sm:$0xff]  ;;  %v304_v56 = vld [vmem:[%s2214_s7 + $0x380] sm:$0xff] }
  0x32   : > { %301 = vst [vmem:[%s2219_s8 + $0x1b0] sm:$0xff] %v300_v54  ;;  %303 = vst [vmem:[%s2219_s8 + $0x1b8] sm:$0xff] %v302_v55  ;;  %v306_v57 = vld [vmem:[%s2214_s7 + $0x388] sm:$0xff]  ;;  %v308_v58 = vld [vmem:[%s2214_s7 + $0x390] sm:$0xff] }
  0x33   : > { %305 = vst [vmem:[%s2219_s8 + $0x1c0] sm:$0xff] %v304_v56  ;;  %v310_v59 = vld [vmem:[%s2214_s7 + $0x398] sm:$0xff]  ;;  %307 = vst [vmem:[%s2219_s8 + $0x1c8] sm:$0xff] %v306_v57  ;;  %v312_v60 = vld [vmem:[%s2214_s7 + $0x3a0] sm:$0xff] }
  0x34   : > { %309 = vst [vmem:[%s2219_s8 + $0x1d0] sm:$0xff] %v308_v58  ;;  %311 = vst [vmem:[%s2219_s8 + $0x1d8] sm:$0xff] %v310_v59  ;;  %v314_v61 = vld [vmem:[%s2214_s7 + $0x3a8] sm:$0xff]  ;;  %v316_v62 = vld [vmem:[%s2214_s7 + $0x3b0] sm:$0xff] }
  0x35   : > { %313 = vst [vmem:[%s2219_s8 + $0x1e0] sm:$0xff] %v312_v60  ;;  %315 = vst [vmem:[%s2219_s8 + $0x1e8] sm:$0xff] %v314_v61  ;;  %v318_v63 = vld [vmem:[%s2214_s7 + $0x3b8] sm:$0xff]  ;;  %v320_v0 = vld [vmem:[%s2214_s7 + $0x400] sm:$0xff] }
  0x36   : > { %317 = vst [vmem:[%s2219_s8 + $0x1f0] sm:$0xff] %v316_v62  ;;  %v322_v1 = vld [vmem:[%s2214_s7 + $0x408] sm:$0xff]  ;;  %319 = vst [vmem:[%s2219_s8 + $0x1f8] sm:$0xff] %v318_v63  ;;  %v324_v2 = vld [vmem:[%s2214_s7 + $0x410] sm:$0xff] }
  0x37   : > { %321 = vst [vmem:[%s2219_s8 + $0x200] sm:$0xff] %v320_v0  ;;  %323 = vst [vmem:[%s2219_s8 + $0x208] sm:$0xff] %v322_v1  ;;  %v326_v3 = vld [vmem:[%s2214_s7 + $0x418] sm:$0xff]  ;;  %v328_v4 = vld [vmem:[%s2214_s7 + $0x420] sm:$0xff] }
  0x38   : > { %325 = vst [vmem:[%s2219_s8 + $0x210] sm:$0xff] %v324_v2  ;;  %327 = vst [vmem:[%s2219_s8 + $0x218] sm:$0xff] %v326_v3  ;;  %v330_v5 = vld [vmem:[%s2214_s7 + $0x428] sm:$0xff]  ;;  %v332_v6 = vld [vmem:[%s2214_s7 + $0x430] sm:$0xff] }
  0x39   : > { %329 = vst [vmem:[%s2219_s8 + $0x220] sm:$0xff] %v328_v4  ;;  %v334_v7 = vld [vmem:[%s2214_s7 + $0x438] sm:$0xff]  ;;  %331 = vst [vmem:[%s2219_s8 + $0x228] sm:$0xff] %v330_v5  ;;  %v336_v8 = vld [vmem:[%s2214_s7 + $0x480] sm:$0xff] }
  0x3a   : > { %333 = vst [vmem:[%s2219_s8 + $0x230] sm:$0xff] %v332_v6  ;;  %335 = vst [vmem:[%s2219_s8 + $0x238] sm:$0xff] %v334_v7  ;;  %v338_v9 = vld [vmem:[%s2214_s7 + $0x488] sm:$0xff]  ;;  %v340_v10 = vld [vmem:[%s2214_s7 + $0x490] sm:$0xff] }
  0x3b   : > { %337 = vst [vmem:[%s2219_s8 + $0x240] sm:$0xff] %v336_v8  ;;  %339 = vst [vmem:[%s2219_s8 + $0x248] sm:$0xff] %v338_v9  ;;  %v342_v11 = vld [vmem:[%s2214_s7 + $0x498] sm:$0xff]  ;;  %v344_v12 = vld [vmem:[%s2214_s7 + $0x4a0] sm:$0xff] }
  0x3c   : > { %341 = vst [vmem:[%s2219_s8 + $0x250] sm:$0xff] %v340_v10  ;;  %v346_v13 = vld [vmem:[%s2214_s7 + $0x4a8] sm:$0xff]  ;;  %343 = vst [vmem:[%s2219_s8 + $0x258] sm:$0xff] %v342_v11  ;;  %v348_v14 = vld [vmem:[%s2214_s7 + $0x4b0] sm:$0xff] }
  0x3d   : > { %345 = vst [vmem:[%s2219_s8 + $0x260] sm:$0xff] %v344_v12  ;;  %347 = vst [vmem:[%s2219_s8 + $0x268] sm:$0xff] %v346_v13  ;;  %v350_v15 = vld [vmem:[%s2214_s7 + $0x4b8] sm:$0xff]  ;;  %v352_v16 = vld [vmem:[%s2214_s7 + $0x500] sm:$0xff] }
  0x3e   : > { %349 = vst [vmem:[%s2219_s8 + $0x270] sm:$0xff] %v348_v14  ;;  %351 = vst [vmem:[%s2219_s8 + $0x278] sm:$0xff] %v350_v15  ;;  %v354_v17 = vld [vmem:[%s2214_s7 + $0x508] sm:$0xff]  ;;  %v356_v18 = vld [vmem:[%s2214_s7 + $0x510] sm:$0xff] }
  0x3f   : > { %353 = vst [vmem:[%s2219_s8 + $0x280] sm:$0xff] %v352_v16  ;;  %v358_v19 = vld [vmem:[%s2214_s7 + $0x518] sm:$0xff]  ;;  %355 = vst [vmem:[%s2219_s8 + $0x288] sm:$0xff] %v354_v17  ;;  %v360_v20 = vld [vmem:[%s2214_s7 + $0x520] sm:$0xff] }
  0x40   : > { %357 = vst [vmem:[%s2219_s8 + $0x290] sm:$0xff] %v356_v18  ;;  %359 = vst [vmem:[%s2219_s8 + $0x298] sm:$0xff] %v358_v19  ;;  %v362_v21 = vld [vmem:[%s2214_s7 + $0x528] sm:$0xff]  ;;  %v364_v22 = vld [vmem:[%s2214_s7 + $0x530] sm:$0xff] }
  0x41   : > { %361 = vst [vmem:[%s2219_s8 + $0x2a0] sm:$0xff] %v360_v20  ;;  %363 = vst [vmem:[%s2219_s8 + $0x2a8] sm:$0xff] %v362_v21  ;;  %v366_v23 = vld [vmem:[%s2214_s7 + $0x538] sm:$0xff]  ;;  %v368_v24 = vld [vmem:[%s2214_s7 + $0x580] sm:$0xff] }
  0x42   : > { %365 = vst [vmem:[%s2219_s8 + $0x2b0] sm:$0xff] %v364_v22  ;;  %v370_v25 = vld [vmem:[%s2214_s7 + $0x588] sm:$0xff]  ;;  %367 = vst [vmem:[%s2219_s8 + $0x2b8] sm:$0xff] %v366_v23  ;;  %v372_v26 = vld [vmem:[%s2214_s7 + $0x590] sm:$0xff] }
  0x43   : > { %369 = vst [vmem:[%s2219_s8 + $0x2c0] sm:$0xff] %v368_v24  ;;  %371 = vst [vmem:[%s2219_s8 + $0x2c8] sm:$0xff] %v370_v25  ;;  %v374_v27 = vld [vmem:[%s2214_s7 + $0x598] sm:$0xff]  ;;  %v376_v28 = vld [vmem:[%s2214_s7 + $0x5a0] sm:$0xff] }
  0x44   : > { %373 = vst [vmem:[%s2219_s8 + $0x2d0] sm:$0xff] %v372_v26  ;;  %375 = vst [vmem:[%s2219_s8 + $0x2d8] sm:$0xff] %v374_v27  ;;  %v378_v29 = vld [vmem:[%s2214_s7 + $0x5a8] sm:$0xff]  ;;  %v380_v30 = vld [vmem:[%s2214_s7 + $0x5b0] sm:$0xff] }
  0x45   : > { %377 = vst [vmem:[%s2219_s8 + $0x2e0] sm:$0xff] %v376_v28  ;;  %v382_v31 = vld [vmem:[%s2214_s7 + $0x5b8] sm:$0xff]  ;;  %379 = vst [vmem:[%s2219_s8 + $0x2e8] sm:$0xff] %v378_v29  ;;  %v384_v32 = vld [vmem:[%s2214_s7 + $0x600] sm:$0xff] }
  0x46   : > { %381 = vst [vmem:[%s2219_s8 + $0x2f0] sm:$0xff] %v380_v30  ;;  %383 = vst [vmem:[%s2219_s8 + $0x2f8] sm:$0xff] %v382_v31  ;;  %v386_v33 = vld [vmem:[%s2214_s7 + $0x608] sm:$0xff]  ;;  %v388_v34 = vld [vmem:[%s2214_s7 + $0x610] sm:$0xff] }
  0x47   : > { %385 = vst [vmem:[%s2219_s8 + $0x300] sm:$0xff] %v384_v32  ;;  %387 = vst [vmem:[%s2219_s8 + $0x308] sm:$0xff] %v386_v33  ;;  %v390_v35 = vld [vmem:[%s2214_s7 + $0x618] sm:$0xff]  ;;  %v392_v36 = vld [vmem:[%s2214_s7 + $0x620] sm:$0xff] }
  0x48   : > { %389 = vst [vmem:[%s2219_s8 + $0x310] sm:$0xff] %v388_v34  ;;  %v394_v37 = vld [vmem:[%s2214_s7 + $0x628] sm:$0xff]  ;;  %391 = vst [vmem:[%s2219_s8 + $0x318] sm:$0xff] %v390_v35  ;;  %v396_v38 = vld [vmem:[%s2214_s7 + $0x630] sm:$0xff] }
  0x49   : > { %393 = vst [vmem:[%s2219_s8 + $0x320] sm:$0xff] %v392_v36  ;;  %395 = vst [vmem:[%s2219_s8 + $0x328] sm:$0xff] %v394_v37  ;;  %v398_v39 = vld [vmem:[%s2214_s7 + $0x638] sm:$0xff]  ;;  %v400_v40 = vld [vmem:[%s2214_s7 + $0x680] sm:$0xff] }
  0x4a   : > { %397 = vst [vmem:[%s2219_s8 + $0x330] sm:$0xff] %v396_v38  ;;  %399 = vst [vmem:[%s2219_s8 + $0x338] sm:$0xff] %v398_v39  ;;  %v402_v41 = vld [vmem:[%s2214_s7 + $0x688] sm:$0xff]  ;;  %v404_v42 = vld [vmem:[%s2214_s7 + $0x690] sm:$0xff] }
  0x4b   : > { %401 = vst [vmem:[%s2219_s8 + $0x340] sm:$0xff] %v400_v40  ;;  %v406_v43 = vld [vmem:[%s2214_s7 + $0x698] sm:$0xff]  ;;  %403 = vst [vmem:[%s2219_s8 + $0x348] sm:$0xff] %v402_v41  ;;  %v408_v44 = vld [vmem:[%s2214_s7 + $0x6a0] sm:$0xff] }
  0x4c   : > { %405 = vst [vmem:[%s2219_s8 + $0x350] sm:$0xff] %v404_v42  ;;  %407 = vst [vmem:[%s2219_s8 + $0x358] sm:$0xff] %v406_v43  ;;  %v410_v45 = vld [vmem:[%s2214_s7 + $0x6a8] sm:$0xff]  ;;  %v412_v46 = vld [vmem:[%s2214_s7 + $0x6b0] sm:$0xff] }
  0x4d   : > { %409 = vst [vmem:[%s2219_s8 + $0x360] sm:$0xff] %v408_v44  ;;  %411 = vst [vmem:[%s2219_s8 + $0x368] sm:$0xff] %v410_v45  ;;  %v414_v47 = vld [vmem:[%s2214_s7 + $0x6b8] sm:$0xff]  ;;  %v416_v48 = vld [vmem:[%s2214_s7 + $0x700] sm:$0xff] }
  0x4e   : > { %413 = vst [vmem:[%s2219_s8 + $0x370] sm:$0xff] %v412_v46  ;;  %v418_v49 = vld [vmem:[%s2214_s7 + $0x708] sm:$0xff]  ;;  %415 = vst [vmem:[%s2219_s8 + $0x378] sm:$0xff] %v414_v47  ;;  %v420_v50 = vld [vmem:[%s2214_s7 + $0x710] sm:$0xff] }
  0x4f   : > { %417 = vst [vmem:[%s2219_s8 + $0x380] sm:$0xff] %v416_v48  ;;  %419 = vst [vmem:[%s2219_s8 + $0x388] sm:$0xff] %v418_v49  ;;  %v422_v51 = vld [vmem:[%s2214_s7 + $0x718] sm:$0xff]  ;;  %v424_v52 = vld [vmem:[%s2214_s7 + $0x720] sm:$0xff] }
  0x50   : > { %421 = vst [vmem:[%s2219_s8 + $0x390] sm:$0xff] %v420_v50  ;;  %423 = vst [vmem:[%s2219_s8 + $0x398] sm:$0xff] %v422_v51  ;;  %v426_v53 = vld [vmem:[%s2214_s7 + $0x728] sm:$0xff]  ;;  %v428_v54 = vld [vmem:[%s2214_s7 + $0x730] sm:$0xff] }
  0x51   : > { %425 = vst [vmem:[%s2219_s8 + $0x3a0] sm:$0xff] %v424_v52  ;;  %v430_v55 = vld [vmem:[%s2214_s7 + $0x738] sm:$0xff]  ;;  %427 = vst [vmem:[%s2219_s8 + $0x3a8] sm:$0xff] %v426_v53  ;;  %v432_v56 = vld [vmem:[%s2214_s7 + $0x780] sm:$0xff] }
  0x52   : > { %429 = vst [vmem:[%s2219_s8 + $0x3b0] sm:$0xff] %v428_v54  ;;  %431 = vst [vmem:[%s2219_s8 + $0x3b8] sm:$0xff] %v430_v55  ;;  %v434_v57 = vld [vmem:[%s2214_s7 + $0x788] sm:$0xff]  ;;  %v436_v58 = vld [vmem:[%s2214_s7 + $0x790] sm:$0xff] }
  0x53   : > { %433 = vst [vmem:[%s2219_s8 + $0x3c0] sm:$0xff] %v432_v56  ;;  %435 = vst [vmem:[%s2219_s8 + $0x3c8] sm:$0xff] %v434_v57  ;;  %v438_v59 = vld [vmem:[%s2214_s7 + $0x798] sm:$0xff]  ;;  %v440_v60 = vld [vmem:[%s2214_s7 + $0x7a0] sm:$0xff] }
  0x54   : > { %437 = vst [vmem:[%s2219_s8 + $0x3d0] sm:$0xff] %v436_v58  ;;  %v442_v61 = vld [vmem:[%s2214_s7 + $0x7a8] sm:$0xff]  ;;  %439 = vst [vmem:[%s2219_s8 + $0x3d8] sm:$0xff] %v438_v59  ;;  %v444_v62 = vld [vmem:[%s2214_s7 + $0x7b0] sm:$0xff] }
  0x55   : > { %441 = vst [vmem:[%s2219_s8 + $0x3e0] sm:$0xff] %v440_v60  ;;  %443 = vst [vmem:[%s2219_s8 + $0x3e8] sm:$0xff] %v442_v61  ;;  %v446_v63 = vld [vmem:[%s2214_s7 + $0x7b8] sm:$0xff] }
  0x56   : > { %445 = vst [vmem:[%s2219_s8 + $0x3f0] sm:$0xff] %v444_v62  ;;  %447 = vst [vmem:[%s2219_s8 + $0x3f8] sm:$0xff] %v446_v63 }
  0x57 PF: > { %p1866_p7 = scmp.ge.s32.totalorder %s2131_s18, 1  ;;  %p459_p8 = scmp.lt.s32.totalorder %s2131_s18, 9 }
  0x59   : > { %p460_p9 = pnand %p1866_p7, %p459_p8 }
  0x5a   : > { %s466_s9 = sand.u32 (!%p460_p9), 1, %s2107_s12   ;;  %p505_p10 = scmp.lt.s32.totalorder (!%p460_p9), %s2119_s15, 3 }
  0x5b   : > { %463 = sbr.rel (%p460_p9) target bundleno = 430 (0x1ae), region = 51  ;;  %s1867_s10 = sshll.u32 (!%p460_p9), %s466_s9, 10 }
  0x5c   : > { %s2480_s11 = scalar_lea.vmem (!%p460_p9), [#allocation2], %s1867_s10  ;;  %s1870_s29 = sshll.u32 (!%p460_p9), %s2115_s14, 4 }
  0x5d   : > { %p519_p11 = scmp.lt.s32.totalorder (!%p460_p9), %s1870_s29, 31 }
  0x60   : > { %v2133_v0 = vmov 0   ;;  %v642_v1 = vld [vmem:[%s2480_s11 + $0x380] sm:$0xff]  ;;  %v643_v3 = vld [vmem:[%s2480_s11 + $0x388] sm:$0xff]  ;;  %s2709_s15 = smov (!%p505_p10, %s2119_s15), 3  ;;  %v644_v63 = vld [vmem:[%s2480_s11 + $0x390] sm:$0xff]  ;;  %s2711_s29 = smov (!%p519_p11, %s1870_s29), 31 }
  0x61   : > { %1336 = vmatprep.mubr.bf16.mxu0 %v2133_v0  ;;  %1377 = vmatprep.mubr.bf16.mxu1 %v2133_v0  ;;  %v650_v2 = vld [vmem:[%s2480_s11 + $0x3c0] sm:$0xff]  ;;  %v651_v5 = vld [vmem:[%s2480_s11 + $0x3c8] sm:$0xff]  ;;  %s1868_s12 = sshll.u32 %s2709_s15, 2  ;;  %s1869_s24 = sshll.u32 %s2709_s15, 3 }
  0x62   : > { %2076 = vset.pattern.permute.xlu0 %v2133_v0  ;;  %v1986_v4 = vcombine.high %v642_v1, %v650_v2  ;;  %v1985_v6 = vcombine.low %v642_v1, %v650_v2  ;;  %v626_v7 = vld [vmem:[%s2480_s11 + $0x300] sm:$0xff]  ;;  %v1988_v9 = vcombine.high %v643_v3, %v651_v5  ;;  %v1987_v10 = vcombine.low %v643_v3, %v651_v5  ;;  %v627_v12 = vld [vmem:[%s2480_s11 + $0x308] sm:$0xff]  ;;  %v652_v1 = vld [vmem:[%s2480_s11 + $0x3d0] sm:$0xff]  ;;  %s508_s23 = scalar_lea.vmem %s2692_s0, %s1868_s12  ;;  %s513_s28 = scalar_lea.vmem %s2694_s2, %s1869_s24 }
  0x63   : > { %v634_v8 = vld [vmem:[%s2480_s11 + $0x340] sm:$0xff]  ;;  %v635_v13 = vld [vmem:[%s2480_s11 + $0x348] sm:$0xff]  ;;  %v645_v2 = vld [vmem:[%s2480_s11 + $0x398] sm:$0xff]  ;;  %s1871_s30 = sshll.u32 %s2709_s15, 5 }
  0x64   : > { %v1970_v11 = vcombine.high %v626_v7, %v634_v8  ;;  %v610_v14 = vld [vmem:[%s2480_s11 + $0x280] sm:$0xff]  ;;  %1304 = vmatprep.subr.bf16.mxu0 %v1986_v4  ;;  %v1972_v15 = vcombine.high %v627_v12, %v635_v13  ;;  %v611_v17 = vld [vmem:[%s2480_s11 + $0x288] sm:$0xff]  ;;  %1345 = vmatprep.subr.bf16.mxu1 %v1988_v9  ;;  %v1969_v19 = vcombine.low %v626_v7, %v634_v8  ;;  %v653_v3 = vld [vmem:[%s2480_s11 + $0x3d8] sm:$0xff]  ;;  %s522_s4 = sadd.s32 %s1871_s30, %s2711_s29 }
  0x65   : > { %v618_v16 = vld [vmem:[%s2480_s11 + $0x2c0] sm:$0xff]  ;;  %v619_v18 = vld [vmem:[%s2480_s11 + $0x2c8] sm:$0xff]  ;;  %1305 = vmatpush1.bf16.msra.mxu0 %v1985_v6  ;;  %1346 = vmatpush1.bf16.msra.mxu1 %v1987_v10  ;;  %v1971_v20 = vcombine.low %v627_v12, %v635_v13  ;;  %v1990_v6 = vcombine.high %v644_v63, %v652_v1  ;;  %v1992_v7 = vcombine.high %v645_v2, %v653_v3  ;;  %v628_v8 = vld [vmem:[%s2480_s11 + $0x310] sm:$0xff]  ;;  %s1872_s5 = sshll.u32 %s522_s4, 2 }
  0x66   : > { %1306 = vmatprep.subr.bf16.mxu0 %v1970_v11  ;;  %v1954_v21 = vcombine.high %v610_v14, %v618_v16  ;;  %1347 = vmatprep.subr.bf16.mxu1 %v1972_v15  ;;  %v1956_v22 = vcombine.high %v611_v17, %v619_v18  ;;  %v594_v23 = vld [vmem:[%s2480_s11 + $0x200] sm:$0xff]  ;;  %v595_v25 = vld [vmem:[%s2480_s11 + $0x208] sm:$0xff]  ;;  %v1953_v27 = vcombine.low %v610_v14, %v618_v16  ;;  %v636_v9 = vld [vmem:[%s2480_s11 + $0x350] sm:$0xff]  ;;  %s2649_s6 = scalar_lea.vmem %s2695_s3, %s1872_s5 }
  0x67   : > { %v602_v24 = vld [vmem:[%s2480_s11 + $0x240] sm:$0xff]  ;;  %v603_v26 = vld [vmem:[%s2480_s11 + $0x248] sm:$0xff]  ;;  %v1955_v28 = vcombine.low %v611_v17, %v619_v18  ;;  %v629_v10 = vld [vmem:[%s2480_s11 + $0x318] sm:$0xff]  ;;  %v1989_v13 = vcombine.low %v644_v63, %v652_v1  ;;  %v1991_v14 = vcombine.low %v645_v2, %v653_v3  ;;  %v1974_v15 = vcombine.high %v628_v8, %v636_v9 }
  0x68   : > { %v1938_v29 = vcombine.high %v594_v23, %v602_v24  ;;  %v1940_v30 = vcombine.high %v595_v25, %v603_v26  ;;  %v578_v31 = vld [vmem:[%s2480_s11 + $0x180] sm:$0xff]  ;;  %v579_v33 = vld [vmem:[%s2480_s11 + $0x188] sm:$0xff]  ;;  %v1937_v35 = vcombine.low %v594_v23, %v602_v24  ;;  %v1939_v36 = vcombine.low %v595_v25, %v603_v26  ;;  %v637_v11 = vld [vmem:[%s2480_s11 + $0x358] sm:$0xff] }
  0x69   : > { %1307 = vmatpush1.bf16.msra.mxu0 %v1969_v19  ;;  %1348 = vmatpush1.bf16.msra.mxu1 %v1971_v20  ;;  %v586_v32 = vld [vmem:[%s2480_s11 + $0x1c0] sm:$0xff]  ;;  %v587_v34 = vld [vmem:[%s2480_s11 + $0x1c8] sm:$0xff]  ;;  %v1976_v16 = vcombine.high %v629_v10, %v637_v11  ;;  %v612_v17 = vld [vmem:[%s2480_s11 + $0x290] sm:$0xff]  ;;  %v1975_v23 = vcombine.low %v629_v10, %v637_v11 }
  0x6a   : > { %1308 = vmatprep.subr.bf16.mxu0 %v1954_v21  ;;  %1349 = vmatprep.subr.bf16.mxu1 %v1956_v22  ;;  %v1922_v37 = vcombine.high %v578_v31, %v586_v32  ;;  %v1924_v38 = vcombine.high %v579_v33, %v587_v34  ;;  %v562_v39 = vld [vmem:[%s2480_s11 + $0x100] sm:$0xff]  ;;  %v563_v41 = vld [vmem:[%s2480_s11 + $0x108] sm:$0xff]  ;;  %v1921_v43 = vcombine.low %v578_v31, %v586_v32  ;;  %v620_v18 = vld [vmem:[%s2480_s11 + $0x2d0] sm:$0xff] }
  0x6b   : > { %v570_v40 = vld [vmem:[%s2480_s11 + $0x140] sm:$0xff]  ;;  %v571_v42 = vld [vmem:[%s2480_s11 + $0x148] sm:$0xff]  ;;  %v1923_v44 = vcombine.low %v579_v33, %v587_v34  ;;  %v613_v19 = vld [vmem:[%s2480_s11 + $0x298] sm:$0xff]  ;;  %v1973_v21 = vcombine.low %v628_v8, %v636_v9  ;;  %v1958_v24 = vcombine.high %v612_v17, %v620_v18 }
  0x6c   : > { %v1906_v45 = vcombine.high %v562_v39, %v570_v40  ;;  %v1908_v46 = vcombine.high %v563_v41, %v571_v42  ;;  %v546_v47 = vld [vmem:[%s2480_s11 + $0x80] sm:$0xff]  ;;  %v547_v49 = vld [vmem:[%s2480_s11 + $0x88] sm:$0xff]  ;;  %v1905_v51 = vcombine.low %v562_v39, %v570_v40  ;;  %v1907_v52 = vcombine.low %v563_v41, %v571_v42  ;;  %v621_v20 = vld [vmem:[%s2480_s11 + $0x2d8] sm:$0xff] }
  0x6d   : > { %1309 = vmatpush1.bf16.msra.mxu0 %v1953_v27  ;;  %1350 = vmatpush1.bf16.msra.mxu1 %v1955_v28  ;;  %v554_v48 = vld [vmem:[%s2480_s11 + $0xc0] sm:$0xff]  ;;  %v555_v50 = vld [vmem:[%s2480_s11 + $0xc8] sm:$0xff]  ;;  %v1960_v25 = vcombine.high %v613_v19, %v621_v20  ;;  %v596_v26 = vld [vmem:[%s2480_s11 + $0x210] sm:$0xff]  ;;  %v1959_v31 = vcombine.low %v613_v19, %v621_v20 }
  0x6e   : > { %1310 = vmatprep.subr.bf16.mxu0 %v1938_v29  ;;  %1351 = vmatprep.subr.bf16.mxu1 %v1940_v30  ;;  %v1890_v53 = vcombine.high %v546_v47, %v554_v48  ;;  %v1892_v54 = vcombine.high %v547_v49, %v555_v50  ;;  %v530_v55 = vld [vmem:[%s2480_s11] sm:$0xff]  ;;  %v531_v57 = vld [vmem:[%s2480_s11 + $0x8] sm:$0xff]  ;;  %v1889_v59 = vcombine.low %v546_v47, %v554_v48  ;;  %v604_v27 = vld [vmem:[%s2480_s11 + $0x250] sm:$0xff] }
  0x6f   : > { %v538_v56 = vld [vmem:[%s2480_s11 + $0x40] sm:$0xff]  ;;  %v539_v58 = vld [vmem:[%s2480_s11 + $0x48] sm:$0xff]  ;;  %v1891_v60 = vcombine.low %v547_v49, %v555_v50  ;;  %v597_v28 = vld [vmem:[%s2480_s11 + $0x218] sm:$0xff]  ;;  %v1957_v30 = vcombine.low %v612_v17, %v620_v18  ;;  %v1942_v32 = vcombine.high %v596_v26, %v604_v27 }
  0x70   : > { %v1874_v61 = vcombine.high %v530_v55, %v538_v56  ;;  %v1876_v62 = vcombine.high %v531_v57, %v539_v58  ;;  %v1873_v4 = vcombine.low %v530_v55, %v538_v56  ;;  %v1875_v5 = vcombine.low %v531_v57, %v539_v58  ;;  %v2531_v12 = vld [vmem:[%s508_s23] sm:$0xf]  ;;  %v605_v29 = vld [vmem:[%s2480_s11 + $0x258] sm:$0xff]  ;;  %v580_v34 = vld [vmem:[%s2480_s11 + $0x190] sm:$0xff] }
  0x71   : > { %1311 = vmatpush1.bf16.msra.mxu0 %v1937_v35  ;;  %1352 = vmatpush1.bf16.msra.mxu1 %v1939_v36  ;;  %v658_v22 = vld [vmem:[%s513_s28] sm:$0xff]  ;;  %v1944_v33 = vcombine.high %v597_v28, %v605_v29  ;;  %v588_v35 = vld [vmem:[%s2480_s11 + $0x1d0] sm:$0xff]  ;;  %v581_v36 = vld [vmem:[%s2480_s11 + $0x198] sm:$0xff]  ;;  %v1943_v39 = vcombine.low %v597_v28, %v605_v29 }
  0x72   : > { %1312 = vmatprep.subr.bf16.mxu0 %v1922_v37  ;;  %1353 = vmatprep.subr.bf16.mxu1 %v1924_v38  ;;  %v589_v37 = vld [vmem:[%s2480_s11 + $0x1d8] sm:$0xff]  ;;  %v1941_v38 = vcombine.low %v596_v26, %v604_v27  ;;  %v1926_v40 = vcombine.high %v580_v34, %v588_v35  ;;  %v564_v42 = vld [vmem:[%s2480_s11 + $0x110] sm:$0xff]  ;;  %v646_v3 = vld [vmem:[%s2480_s11 + $0x3a0] sm:$0xff] }
  0x73   : > { %661 = vperm.xlu0 %2076, %v658_v22   ;;  %v1928_v41 = vcombine.high %v581_v36, %v589_v37  ;;  %v1927_v47 = vcombine.low %v581_v36, %v589_v37  ;;  %v548_v50 = vld [vmem:[%s2480_s11 + $0x90] sm:$0xff]  ;;  %v630_v11 = vld [vmem:[%s2480_s11 + $0x320] sm:$0xff]  ;;  %v615_v22 = vld [vmem:[%s2480_s11 + $0x2a8] sm:$0xff] }
  0x74   : > { %v532_v58 = vld [vmem:[%s2480_s11 + $0x10] sm:$0xff]  ;;  %v614_v20 = vld [vmem:[%s2480_s11 + $0x2a0] sm:$0xff] }
  0x75   : > { %1313 = vmatpush1.bf16.msra.mxu0 %v1921_v43  ;;  %1354 = vmatpush1.bf16.msra.mxu1 %v1923_v44  ;;  %v572_v43 = vld [vmem:[%s2480_s11 + $0x150] sm:$0xff]  ;;  %v565_v44 = vld [vmem:[%s2480_s11 + $0x118] sm:$0xff]  ;;  %v598_v28 = vld [vmem:[%s2480_s11 + $0x220] sm:$0xff] }
  0x76   : > { %1314 = vmatprep.subr.bf16.mxu0 %v1906_v45  ;;  %1355 = vmatprep.subr.bf16.mxu1 %v1908_v46  ;;  %v573_v45 = vld [vmem:[%s2480_s11 + $0x158] sm:$0xff]  ;;  %v1925_v46 = vcombine.low %v580_v34, %v588_v35  ;;  %v1910_v48 = vcombine.high %v564_v42, %v572_v43  ;;  %v606_v29 = vld [vmem:[%s2480_s11 + $0x260] sm:$0xff] }
  0x77   : > { %v1912_v49 = vcombine.high %v565_v44, %v573_v45  ;;  %v1911_v55 = vcombine.low %v565_v44, %v573_v45  ;;  %v1946_v34 = vcombine.high %v598_v28, %v606_v29  ;;  %v582_v36 = vld [vmem:[%s2480_s11 + $0x1a0] sm:$0xff] }
  0x78   : > { %v590_v37 = vld [vmem:[%s2480_s11 + $0x1e0] sm:$0xff] }
  0x79   : > { %1315 = vmatpush1.bf16.msra.mxu0 %v1905_v51  ;;  %1356 = vmatpush1.bf16.msra.mxu1 %v1907_v52  ;;  %v556_v51 = vld [vmem:[%s2480_s11 + $0xd0] sm:$0xff]  ;;  %v549_v52 = vld [vmem:[%s2480_s11 + $0x98] sm:$0xff]  ;;  %v566_v44 = vld [vmem:[%s2480_s11 + $0x120] sm:$0xff] }
  0x7a   : > { %1316 = vmatprep.subr.bf16.mxu0 %v1890_v53  ;;  %1357 = vmatprep.subr.bf16.mxu1 %v1892_v54  ;;  %v557_v53 = vld [vmem:[%s2480_s11 + $0xd8] sm:$0xff]  ;;  %v1909_v54 = vcombine.low %v564_v42, %v572_v43  ;;  %v1894_v56 = vcombine.high %v548_v50, %v556_v51  ;;  %v1930_v42 = vcombine.high %v582_v36, %v590_v37  ;;  %v574_v45 = vld [vmem:[%s2480_s11 + $0x160] sm:$0xff] }
  0x7b   : > { %v1896_v57 = vcombine.high %v549_v52, %v557_v53  ;;  %v1895_v63 = vcombine.low %v549_v52, %v557_v53  ;;  %v550_v52 = vld [vmem:[%s2480_s11 + $0xa0] sm:$0xff] }
  0x7c   : > { %v558_v53 = vld [vmem:[%s2480_s11 + $0xe0] sm:$0xff] }
  0x7d   : > { %1317 = vmatpush1.bf16.msra.mxu0 %v1889_v59  ;;  %1358 = vmatpush1.bf16.msra.mxu1 %v1891_v60  ;;  %v540_v59 = vld [vmem:[%s2480_s11 + $0x50] sm:$0xff]  ;;  %v533_v60 = vld [vmem:[%s2480_s11 + $0x18] sm:$0xff] }
  0x7e   : > { %1318 = vmatprep.subr.bf16.mxu0 %v1874_v61  ;;  %1359 = vmatprep.subr.bf16.mxu1 %v1876_v62  ;;  %v541_v61 = vld [vmem:[%s2480_s11 + $0x58] sm:$0xff]  ;;  %v1893_v62 = vcombine.low %v548_v50, %v556_v51  ;;  %v1878_v1 = vcombine.high %v532_v58, %v540_v59  ;;  %v1914_v50 = vcombine.high %v566_v44, %v574_v45 }
  0x7f   : > { %v1880_v2 = vcombine.high %v533_v60, %v541_v61  ;;  %v1879_v8 = vcombine.low %v533_v60, %v541_v61  ;;  %v534_v60 = vld [vmem:[%s2480_s11 + $0x20] sm:$0xff] }
  0x80   : > { %v542_v61 = vld [vmem:[%s2480_s11 + $0x60] sm:$0xff] }
  0x81   : > { %1319 = vmatpush1.bf16.msra.mxu0 %v1873_v4  ;;  %1360 = vmatpush1.bf16.msra.mxu1 %v1875_v5  ;;  %v654_v4 = vld [vmem:[%s2480_s11 + $0x3e0] sm:$0xff]  ;;  %v647_v5 = vld [vmem:[%s2480_s11 + $0x3a8] sm:$0xff] }
  0x82   : > { %1386 = vmatprep.subr.bf16.mxu0 %v1990_v6  ;;  %1427 = vmatprep.subr.bf16.mxu1 %v1992_v7  ;;  %v655_v6 = vld [vmem:[%s2480_s11 + $0x3e8] sm:$0xff]  ;;  %v1877_v7 = vcombine.low %v532_v58, %v540_v59  ;;  %v1994_v9 = vcombine.high %v646_v3, %v654_v4  ;;  %v1898_v58 = vcombine.high %v550_v52, %v558_v53 }
  0x83   : > { %v1996_v10 = vcombine.high %v647_v5, %v655_v6  ;;  %v1995_v17 = vcombine.low %v647_v5, %v655_v6  ;;  %v648_v5 = vld [vmem:[%s2480_s11 + $0x3b0] sm:$0xff] }
  0x84   : > { %1337 = vmatmul.mubr.bf16.vlgmr.msra.gmra.mxu0 %v2531_v12  ;;  %1378 = vmatmul.mubr.bf16.vlgmr.msra.gmra.mxu1 %v2531_v12  ;;  %v656_v6 = vld [vmem:[%s2480_s11 + $0x3f0] sm:$0xff] }
  0x85   : > { %1387 = vmatpush1.bf16.msra.mxu0 %v1989_v13  ;;  %1428 = vmatpush1.bf16.msra.mxu1 %v1991_v14  ;;  %v638_v13 = vld [vmem:[%s2480_s11 + $0x360] sm:$0xff]  ;;  %v631_v14 = vld [vmem:[%s2480_s11 + $0x328] sm:$0xff] }
  0x86   : > { %1388 = vmatprep.subr.bf16.mxu0 %v1974_v15  ;;  %1429 = vmatprep.subr.bf16.mxu1 %v1976_v16  ;;  %v639_v15 = vld [vmem:[%s2480_s11 + $0x368] sm:$0xff]  ;;  %v1993_v16 = vcombine.low %v646_v3, %v654_v4  ;;  %v1978_v18 = vcombine.high %v630_v11, %v638_v13  ;;  %v1882_v3 = vcombine.high %v534_v60, %v542_v61 }
  0x87   : > { %1418 = vmatprep.mubr.bf16.mxu0 %v2133_v0  ;;  %1459 = vmatprep.mubr.bf16.mxu1 %v2133_v0  ;;  %v1980_v19 = vcombine.high %v631_v14, %v639_v15 }
  0x89   : > { %1389 = vmatpush1.bf16.msra.mxu0 %v1973_v21  ;;  %1430 = vmatpush1.bf16.msra.mxu1 %v1975_v23  ;;  %v622_v21 = vld [vmem:[%s2480_s11 + $0x2e0] sm:$0xff]  ;;  %v623_v23 = vld [vmem:[%s2480_s11 + $0x2e8] sm:$0xff] }
  0x8a   : > { %1390 = vmatprep.subr.bf16.mxu0 %v1958_v24  ;;  %1431 = vmatprep.subr.bf16.mxu1 %v1960_v25  ;;  %v1977_v24 = vcombine.low %v630_v11, %v638_v13  ;;  %v1979_v25 = vcombine.low %v631_v14, %v639_v15  ;;  %v1962_v26 = vcombine.high %v614_v20, %v622_v21  ;;  %v632_v14 = vld [vmem:[%s2480_s11 + $0x330] sm:$0xff] }
  0x8b   : > { %v1964_v27 = vcombine.high %v615_v22, %v623_v23  ;;  %v1998_v11 = vcombine.high %v648_v5, %v656_v6  ;;  %v640_v15 = vld [vmem:[%s2480_s11 + $0x370] sm:$0xff] }
  0x8d   : > { %1391 = vmatpush1.bf16.msra.mxu0 %v1957_v30  ;;  %1432 = vmatpush1.bf16.msra.mxu1 %v1959_v31  ;;  %v599_v30 = vld [vmem:[%s2480_s11 + $0x228] sm:$0xff] }
  0x8e   : > { %1392 = vmatprep.subr.bf16.mxu0 %v1942_v32  ;;  %1433 = vmatprep.subr.bf16.mxu1 %v1944_v33  ;;  %v607_v31 = vld [vmem:[%s2480_s11 + $0x268] sm:$0xff]  ;;  %v1961_v32 = vcombine.low %v614_v20, %v622_v21  ;;  %v1963_v33 = vcombine.low %v615_v22, %v623_v23  ;;  %v1982_v20 = vcombine.high %v632_v14, %v640_v15  ;;  %v616_v22 = vld [vmem:[%s2480_s11 + $0x2b0] sm:$0xff] }
  0x8f   : > { %v1948_v35 = vcombine.high %v599_v30, %v607_v31  ;;  %v624_v23 = vld [vmem:[%s2480_s11 + $0x2f0] sm:$0xff] }
  0x91   : > { %1393 = vmatpush1.bf16.msra.mxu0 %v1941_v38  ;;  %1434 = vmatpush1.bf16.msra.mxu1 %v1943_v39  ;;  %v583_v38 = vld [vmem:[%s2480_s11 + $0x1a8] sm:$0xff] }
  0x92   : > { %1394 = vmatprep.subr.bf16.mxu0 %v1926_v40  ;;  %1435 = vmatprep.subr.bf16.mxu1 %v1928_v41  ;;  %v591_v39 = vld [vmem:[%s2480_s11 + $0x1e8] sm:$0xff]  ;;  %v1945_v40 = vcombine.low %v598_v28, %v606_v29  ;;  %v1947_v41 = vcombine.low %v599_v30, %v607_v31  ;;  %v1966_v28 = vcombine.high %v616_v22, %v624_v23  ;;  %v600_v30 = vld [vmem:[%s2480_s11 + $0x230] sm:$0xff] }
  0x93   : > { %v1932_v43 = vcombine.high %v583_v38, %v591_v39  ;;  %v608_v31 = vld [vmem:[%s2480_s11 + $0x270] sm:$0xff] }
  0x95   : > { %1395 = vmatpush1.bf16.msra.mxu0 %v1925_v46  ;;  %1436 = vmatpush1.bf16.msra.mxu1 %v1927_v47  ;;  %v567_v46 = vld [vmem:[%s2480_s11 + $0x128] sm:$0xff] }
  0x96   : > { %1396 = vmatprep.subr.bf16.mxu0 %v1910_v48  ;;  %1437 = vmatprep.subr.bf16.mxu1 %v1912_v49  ;;  %v575_v47 = vld [vmem:[%s2480_s11 + $0x168] sm:$0xff]  ;;  %v1929_v48 = vcombine.low %v582_v36, %v590_v37  ;;  %v1931_v49 = vcombine.low %v583_v38, %v591_v39  ;;  %v1950_v36 = vcombine.high %v600_v30, %v608_v31  ;;  %v584_v38 = vld [vmem:[%s2480_s11 + $0x1b0] sm:$0xff] }
  0x97   : > { %v1916_v51 = vcombine.high %v567_v46, %v575_v47  ;;  %v592_v39 = vld [vmem:[%s2480_s11 + $0x1f0] sm:$0xff] }
  0x99   : > { %1397 = vmatpush1.bf16.msra.mxu0 %v1909_v54  ;;  %1438 = vmatpush1.bf16.msra.mxu1 %v1911_v55  ;;  %v551_v54 = vld [vmem:[%s2480_s11 + $0xa8] sm:$0xff] }
  0x9a   : > { %1398 = vmatprep.subr.bf16.mxu0 %v1894_v56  ;;  %1439 = vmatprep.subr.bf16.mxu1 %v1896_v57  ;;  %v559_v55 = vld [vmem:[%s2480_s11 + $0xe8] sm:$0xff]  ;;  %v1913_v56 = vcombine.low %v566_v44, %v574_v45  ;;  %v1915_v57 = vcombine.low %v567_v46, %v575_v47  ;;  %v568_v45 = vld [vmem:[%s2480_s11 + $0x130] sm:$0xff]  ;;  %v569_v47 = vld [vmem:[%s2480_s11 + $0x138] sm:$0xff] }
  0x9b   : > { %v1900_v59 = vcombine.high %v551_v54, %v559_v55  ;;  %v576_v46 = vld [vmem:[%s2480_s11 + $0x170] sm:$0xff] }
  0x9d   : > { %1399 = vmatpush1.bf16.msra.mxu0 %v1893_v62  ;;  %1440 = vmatpush1.bf16.msra.mxu1 %v1895_v63  ;;  %v535_v62 = vld [vmem:[%s2480_s11 + $0x28] sm:$0xff] }
  0x9e   : > { %1400 = vmatprep.subr.bf16.mxu0 %v1878_v1  ;;  %1441 = vmatprep.subr.bf16.mxu1 %v1880_v2  ;;  %v543_v63 = vld [vmem:[%s2480_s11 + $0x68] sm:$0xff]  ;;  %v1897_v1 = vcombine.low %v550_v52, %v558_v53  ;;  %v1899_v2 = vcombine.low %v551_v54, %v559_v55  ;;  %v552_v53 = vld [vmem:[%s2480_s11 + $0xb0] sm:$0xff]  ;;  %v553_v55 = vld [vmem:[%s2480_s11 + $0xb8] sm:$0xff] }
  0x9f   : > { %v1884_v4 = vcombine.high %v535_v62, %v543_v63  ;;  %v560_v54 = vld [vmem:[%s2480_s11 + $0xf0] sm:$0xff] }
  0xa1   : > { %1401 = vmatpush1.bf16.msra.mxu0 %v1877_v7  ;;  %1442 = vmatpush1.bf16.msra.mxu1 %v1879_v8  ;;  %v649_v7 = vld [vmem:[%s2480_s11 + $0x3b8] sm:$0xff] }
  0xa2   : > { %1468 = vmatprep.subr.bf16.mxu0 %v1994_v9  ;;  %1509 = vmatprep.subr.bf16.mxu1 %v1996_v10  ;;  %v657_v8 = vld [vmem:[%s2480_s11 + $0x3f8] sm:$0xff]  ;;  %v1881_v9 = vcombine.low %v534_v60, %v542_v61  ;;  %v1883_v10 = vcombine.low %v535_v62, %v543_v63  ;;  %v536_v61 = vld [vmem:[%s2480_s11 + $0x30] sm:$0xff] }
  0xa3   : > { %v2000_v13 = vcombine.high %v649_v7, %v657_v8  ;;  %v544_v62 = vld [vmem:[%s2480_s11 + $0x70] sm:$0xff]  ;;  %v537_v63 = vld [vmem:[%s2480_s11 + $0x38] sm:$0xff] }
  0xa4   : > { %1419 = vmatmul.mubr.bf16.vlgmr.msra.gmra.mxu0 %v2531_v12  ;;  %1460 = vmatmul.mubr.bf16.vlgmr.msra.gmra.mxu1 %v2531_v12 }
  0xa5   : > { %1469 = vmatpush1.bf16.msra.mxu0 %v1993_v16  ;;  %1510 = vmatpush1.bf16.msra.mxu1 %v1995_v17  ;;  %v633_v16 = vld [vmem:[%s2480_s11 + $0x338] sm:$0xff] }
  0xa6   : > { %1470 = vmatprep.subr.bf16.mxu0 %v1978_v18  ;;  %1511 = vmatprep.subr.bf16.mxu1 %v1980_v19  ;;  %v641_v17 = vld [vmem:[%s2480_s11 + $0x378] sm:$0xff]  ;;  %v1997_v18 = vcombine.low %v648_v5, %v656_v6  ;;  %v1999_v19 = vcombine.low %v649_v7, %v657_v8  ;;  %v1885_v6 = vcombine.low %v536_v61, %v544_v62 }
  0xa7   : > { %1500 = vmatprep.mubr.bf16.mxu0 %v2133_v0  ;;  %1541 = vmatprep.mubr.bf16.mxu1 %v2133_v0  ;;  %v1984_v21 = vcombine.high %v633_v16, %v641_v17 }
  0xa9   : > { %1471 = vmatpush1.bf16.msra.mxu0 %v1977_v24  ;;  %1512 = vmatpush1.bf16.msra.mxu1 %v1979_v25  ;;  %v617_v24 = vld [vmem:[%s2480_s11 + $0x2b8] sm:$0xff] }
  0xaa   : > { %1472 = vmatprep.subr.bf16.mxu0 %v1962_v26  ;;  %1513 = vmatprep.subr.bf16.mxu1 %v1964_v27  ;;  %v625_v25 = vld [vmem:[%s2480_s11 + $0x2f8] sm:$0xff]  ;;  %v1981_v26 = vcombine.low %v632_v14, %v640_v15  ;;  %v1983_v27 = vcombine.low %v633_v16, %v641_v17 }
  0xab   : > { %v1968_v29 = vcombine.high %v617_v24, %v625_v25 }
  0xad   : > { %1473 = vmatpush1.bf16.msra.mxu0 %v1961_v32  ;;  %1514 = vmatpush1.bf16.msra.mxu1 %v1963_v33  ;;  %v601_v32 = vld [vmem:[%s2480_s11 + $0x238] sm:$0xff] }
  0xae   : > { %1474 = vmatprep.subr.bf16.mxu0 %v1946_v34  ;;  %1515 = vmatprep.subr.bf16.mxu1 %v1948_v35  ;;  %v609_v33 = vld [vmem:[%s2480_s11 + $0x278] sm:$0xff]  ;;  %v1965_v34 = vcombine.low %v616_v22, %v624_v23  ;;  %v1967_v35 = vcombine.low %v617_v24, %v625_v25 }
  0xaf   : > { %v1952_v37 = vcombine.high %v601_v32, %v609_v33 }
  0xb1   : > { %1475 = vmatpush1.bf16.msra.mxu0 %v1945_v40  ;;  %1516 = vmatpush1.bf16.msra.mxu1 %v1947_v41  ;;  %v585_v40 = vld [vmem:[%s2480_s11 + $0x1b8] sm:$0xff] }
  0xb2   : > { %1476 = vmatprep.subr.bf16.mxu0 %v1930_v42  ;;  %1517 = vmatprep.subr.bf16.mxu1 %v1932_v43  ;;  %v593_v41 = vld [vmem:[%s2480_s11 + $0x1f8] sm:$0xff]  ;;  %v1949_v42 = vcombine.low %v600_v30, %v608_v31  ;;  %v1934_v43 = vcombine.high %v584_v38, %v592_v39 }
  0xb3   : > { %v1936_v44 = vcombine.high %v585_v40, %v593_v41 }
  0xb5   : > { %1477 = vmatpush1.bf16.msra.mxu0 %v1929_v48  ;;  %1518 = vmatpush1.bf16.msra.mxu1 %v1931_v49  ;;  %v577_v48 = vld [vmem:[%s2480_s11 + $0x178] sm:$0xff]  ;;  %v1933_v49 = vcombine.low %v584_v38, %v592_v39 }
  0xb6   : > { %1478 = vmatprep.subr.bf16.mxu0 %v1914_v50  ;;  %1519 = vmatprep.subr.bf16.mxu1 %v1916_v51  ;;  %v1935_v50 = vcombine.low %v585_v40, %v593_v41  ;;  %v1918_v51 = vcombine.high %v568_v45, %v576_v46  ;;  %v1920_v52 = vcombine.high %v569_v47, %v577_v48 }
  0xb9   : > { %1479 = vmatpush1.bf16.msra.mxu0 %v1913_v56  ;;  %1520 = vmatpush1.bf16.msra.mxu1 %v1915_v57  ;;  %v561_v56 = vld [vmem:[%s2480_s11 + $0xf8] sm:$0xff]  ;;  %v1917_v57 = vcombine.low %v568_v45, %v576_v46 }
  0xba   : > { %1480 = vmatprep.subr.bf16.mxu0 %v1898_v58  ;;  %1521 = vmatprep.subr.bf16.mxu1 %v1900_v59  ;;  %v1919_v58 = vcombine.low %v569_v47, %v577_v48  ;;  %v1902_v59 = vcombine.high %v552_v53, %v560_v54  ;;  %v1904_v60 = vcombine.high %v553_v55, %v561_v56 }
  0xbd   : > { %1481 = vmatpush1.bf16.msra.mxu0 %v1897_v1  ;;  %1522 = vmatpush1.bf16.msra.mxu1 %v1899_v2  ;;  %v545_v1 = vld [vmem:[%s2480_s11 + $0x78] sm:$0xff]  ;;  %v1901_v2 = vcombine.low %v552_v53, %v560_v54 }
  0xbe   : > { %1482 = vmatprep.subr.bf16.mxu0 %v1882_v3  ;;  %1523 = vmatprep.subr.bf16.mxu1 %v1884_v4  ;;  %v1903_v3 = vcombine.low %v553_v55, %v561_v56  ;;  %v1886_v4 = vcombine.high %v536_v61, %v544_v62  ;;  %v1888_v5 = vcombine.high %v537_v63, %v545_v1 }
  0xbf   : > { %v1887_v7 = vcombine.low %v537_v63, %v545_v1 }
  0xc1   : > { %1483 = vmatpush1.bf16.msra.mxu0 %v1881_v9  ;;  %1524 = vmatpush1.bf16.msra.mxu1 %v1883_v10 }
  0xc2   : > { %1550 = vmatprep.subr.bf16.mxu0 %v1998_v11  ;;  %1591 = vmatprep.subr.bf16.mxu1 %v2000_v13 }
  0xc4   : > { %1501 = vmatmul.mubr.bf16.vlgmr.msra.gmra.mxu0 %v2531_v12  ;;  %1542 = vmatmul.mubr.bf16.vlgmr.msra.gmra.mxu1 %v2531_v12 }
  0xc5   : > { %1551 = vmatpush1.bf16.msra.mxu0 %v1997_v18  ;;  %1592 = vmatpush1.bf16.msra.mxu1 %v1999_v19 }
  0xc6   : > { %1552 = vmatprep.subr.bf16.mxu0 %v1982_v20  ;;  %1593 = vmatprep.subr.bf16.mxu1 %v1984_v21 }
  0xc7   : > { %1582 = vmatprep.mubr.bf16.mxu0 %v2133_v0  ;;  %1623 = vmatprep.mubr.bf16.mxu1 %v2133_v0  ;;  %v1951_v0 = vcombine.low %v601_v32, %v609_v33 }
  0xc9   : > { %1553 = vmatpush1.bf16.msra.mxu0 %v1981_v26  ;;  %1594 = vmatpush1.bf16.msra.mxu1 %v1983_v27 }
  0xca   : > { %1554 = vmatprep.subr.bf16.mxu0 %v1966_v28  ;;  %1595 = vmatprep.subr.bf16.mxu1 %v1968_v29 }
  0xcd   : > { %1555 = vmatpush1.bf16.msra.mxu0 %v1965_v34  ;;  %1596 = vmatpush1.bf16.msra.mxu1 %v1967_v35 }
  0xce   : > { %1556 = vmatprep.subr.bf16.mxu0 %v1950_v36  ;;  %1597 = vmatprep.subr.bf16.mxu1 %v1952_v37 }
  0xd1   : > { %1557 = vmatpush1.bf16.msra.mxu0 %v1949_v42  ;;  %1598 = vmatpush1.bf16.msra.mxu1 %v1951_v0 }
  0xd2   : > { %1558 = vmatprep.subr.bf16.mxu0 %v1934_v43  ;;  %1599 = vmatprep.subr.bf16.mxu1 %v1936_v44 }
  0xd5   : > { %1559 = vmatpush1.bf16.msra.mxu0 %v1933_v49  ;;  %1600 = vmatpush1.bf16.msra.mxu1 %v1935_v50 }
  0xd6   : > { %1560 = vmatprep.subr.bf16.mxu0 %v1918_v51  ;;  %1601 = vmatprep.subr.bf16.mxu1 %v1920_v52 }
  0xd9   : > { %1561 = vmatpush1.bf16.msra.mxu0 %v1917_v57  ;;  %1602 = vmatpush1.bf16.msra.mxu1 %v1919_v58 }
  0xda   : > { %1562 = vmatprep.subr.bf16.mxu0 %v1902_v59  ;;  %1603 = vmatprep.subr.bf16.mxu1 %v1904_v60 }
  0xdd   : > { %1563 = vmatpush1.bf16.msra.mxu0 %v1901_v2  ;;  %1604 = vmatpush1.bf16.msra.mxu1 %v1903_v3 }
  0xde   : > { %1564 = vmatprep.subr.bf16.mxu0 %v1886_v4  ;;  %1605 = vmatprep.subr.bf16.mxu1 %v1888_v5 }
  0xe1   : > { %1565 = vmatpush1.bf16.msra.mxu0 %v1885_v6  ;;  %1606 = vmatpush1.bf16.msra.mxu1 %v1887_v7 }
  0xe4   : > { %1583 = vmatmul.mubr.bf16.vlgmr.msra.gmra.mxu0 %v2531_v12  ;;  %1624 = vmatmul.mubr.bf16.vlgmr.msra.gmra.mxu1 %v2531_v12 }
  0xee   : > { %v2640_v8 = vpop.permute.xlu0 %661 }
 0x144   : > { %v1338_v9 = vpop.f32.mrf.mxu0  ;;  %v1379_v10 = vpop.f32.mrf.mxu1 }
 0x145   : > { %v1339_v11 = vadd.f32 %v1338_v9, %v2640_v8  ;;  %v1380_v14 = vadd.f32 %v1379_v10, %v2640_v8 }
 0x146   : > { %v1340_v13 = vpop.f32.mrf.mxu0  ;;  %v1381_v17 = vpop.f32.mrf.mxu1 }
 0x147   : > { %v1341_v15 = vadd.f32 %v1340_v13, %v2640_v8  ;;  %v1632_v16 = vmax.f32 %v1339_v11, 0.0  ;;  %v1382_v12 = vadd.f32 %v1381_v17, %v2640_v8  ;;  %v1634_v18 = vmax.f32 %v1380_v14, 0.0 }
 0x148   : > { %v1342_v19 = vpop.f32.mrf.mxu0  ;;  %v1383_v21 = vpop.f32.mrf.mxu1 }
 0x149   : > { %v1633_v20 = vmax.f32 %v1341_v15, 0.0  ;;  %v1635_v22 = vmax.f32 %v1382_v12, 0.0 }
 0x14a   : > { %v1343_v23 = vpop.f32.mrf.mxu0  ;;  %v1384_v25 = vpop.f32.mrf.mxu1 }
 0x14b   : > { %v2011_v24 = vpack.c.bf16 %v1633_v20, %v1632_v16  ;;  %v2012_v26 = vpack.c.bf16 %v1635_v22, %v1634_v18 }
 0x14d   : > { %1712 = vst [vmem:[%s2649_s6] sm:$0xff] %v2011_v24  ;;  %1713 = vst [vmem:[%s2649_s6 + $0x8] sm:$0xff] %v2012_v26 }
 0x164   : > { %v1420_v27 = vpop.f32.mrf.mxu0  ;;  %v1461_v29 = vpop.f32.mrf.mxu1 }
 0x165   : > { %v1421_v28 = vadd.f32 %v1420_v27, %v2640_v8  ;;  %v1462_v30 = vadd.f32 %v1461_v29, %v2640_v8 }
 0x166   : > { %v1422_v31 = vpop.f32.mrf.mxu0  ;;  %v1463_v34 = vpop.f32.mrf.mxu1 }
 0x167   : > { %v1636_v32 = vmax.f32 %v1421_v28, 0.0  ;;  %v1423_v33 = vadd.f32 %v1422_v31, %v2640_v8  ;;  %v1638_v35 = vmax.f32 %v1462_v30, 0.0  ;;  %v1464_v36 = vadd.f32 %v1463_v34, %v2640_v8 }
 0x168   : > { %v1424_v37 = vpop.f32.mrf.mxu0  ;;  %v1465_v39 = vpop.f32.mrf.mxu1 }
 0x169   : > { %v1637_v38 = vmax.f32 %v1423_v33, 0.0  ;;  %v1639_v40 = vmax.f32 %v1464_v36, 0.0 }
 0x16a   : > { %v1425_v41 = vpop.f32.mrf.mxu0  ;;  %v1466_v0 = vpop.f32.mrf.mxu1 }
 0x16b   : > { %v2013_v42 = vpack.c.bf16 %v1637_v38, %v1636_v32  ;;  %v2014_v43 = vpack.c.bf16 %v1639_v40, %v1638_v35 }
 0x16d   : > { %1714 = vst [vmem:[%s2649_s6 + $0x10] sm:$0xff] %v2013_v42  ;;  %1715 = vst [vmem:[%s2649_s6 + $0x18] sm:$0xff] %v2014_v43 }
 0x184   : > { %v1502_v44 = vpop.f32.mrf.mxu0  ;;  %v1543_v46 = vpop.f32.mrf.mxu1 }
 0x185   : > { %v1503_v45 = vadd.f32 %v1502_v44, %v2640_v8  ;;  %v1544_v47 = vadd.f32 %v1543_v46, %v2640_v8 }
 0x186   : > { %v1504_v48 = vpop.f32.mrf.mxu0  ;;  %v1545_v51 = vpop.f32.mrf.mxu1 }
 0x187   : > { %v1640_v49 = vmax.f32 %v1503_v45, 0.0  ;;  %v1505_v50 = vadd.f32 %v1504_v48, %v2640_v8  ;;  %v1642_v52 = vmax.f32 %v1544_v47, 0.0  ;;  %v1546_v53 = vadd.f32 %v1545_v51, %v2640_v8 }
 0x188   : > { %v1506_v54 = vpop.f32.mrf.mxu0  ;;  %v1547_v56 = vpop.f32.mrf.mxu1 }
 0x189   : > { %v1641_v55 = vmax.f32 %v1505_v50, 0.0  ;;  %v1643_v57 = vmax.f32 %v1546_v53, 0.0 }
 0x18a   : > { %v1507_v58 = vpop.f32.mrf.mxu0  ;;  %v1548_v60 = vpop.f32.mrf.mxu1 }
 0x18b   : > { %v2015_v59 = vpack.c.bf16 %v1641_v55, %v1640_v49  ;;  %v2016_v61 = vpack.c.bf16 %v1643_v57, %v1642_v52 }
 0x18d   : > { %1716 = vst [vmem:[%s2649_s6 + $0x20] sm:$0xff] %v2015_v59  ;;  %1717 = vst [vmem:[%s2649_s6 + $0x28] sm:$0xff] %v2016_v61 }
 0x1a4   : > { %v1584_v62 = vpop.f32.mrf.mxu0  ;;  %v1625_v1 = vpop.f32.mrf.mxu1 }
 0x1a5   : > { %v1585_v63 = vadd.f32 %v1584_v62, %v2640_v8  ;;  %v1626_v2 = vadd.f32 %v1625_v1, %v2640_v8 }
 0x1a6   : > { %v1586_v3 = vpop.f32.mrf.mxu0  ;;  %v1627_v5 = vpop.f32.mrf.mxu1 }
 0x1a7   : > { %v1587_v4 = vadd.f32 %v1586_v3, %v2640_v8  ;;  %v1628_v6 = vadd.f32 %v1627_v5, %v2640_v8  ;;  %v1644_v9 = vmax.f32 %v1585_v63, 0.0  ;;  %v1646_v13 = vmax.f32 %v1626_v2, 0.0 }
 0x1a8   : > { %v1588_v7 = vpop.f32.mrf.mxu0  ;;  %v1629_v11 = vpop.f32.mrf.mxu1 }
 0x1a9   : > { %v1645_v10 = vmax.f32 %v1587_v4, 0.0  ;;  %v1647_v14 = vmax.f32 %v1628_v6, 0.0 }
 0x1aa   : > { %v1589_v15 = vpop.f32.mrf.mxu0  ;;  %v1630_v17 = vpop.f32.mrf.mxu1 }
 0x1ab   : > { %v2017_v16 = vpack.c.bf16 %v1645_v10, %v1644_v9  ;;  %v2018_v12 = vpack.c.bf16 %v1647_v14, %v1646_v13 }
 0x1ad   : > { %1718 = vst [vmem:[%s2649_s6 + $0x30] sm:$0xff] %v2017_v16  ;;  %1719 = vst [vmem:[%s2649_s6 + $0x38] sm:$0xff] %v2018_v12 }
 0x1ae PF: > { %s13_s18 = sadd.s32 1, %s2131_s18   ;;  %s2696_s12 = smov %s2111_s13 }
 0x1af   : > { %p10_p12 = scmp.ge.s32.totalorder %s13_s18, 10   ;;  %s2697_s13 = smov %s2205_s25 }
 0x1b0   : > { %s2698_s14 = smov %s2123_s16  ;;  %s2699_s15 = smov %s2127_s17 }
 0x1b1   : > { %s2700_s16 = smov %s2703_s19  ;;  %s2701_s17 = smov %s2707_s20 }
 0x1b2   :  { %12 = sbr.rel (!%p10_p12) target bundleno = 4 (0x4), region = 96 }

// kernel: _lambda_.31
= control target key start
LH: loop header
LB: loop body
LE: loop exit
PB: predicated region body
PF: predicated region fallthrough
CT: control target
= control target key end

     0   :  { %s1675_s12 = smov 0   ;;  %s1677_s13 = smov 0   ;;  %s2077_s0 = inlined_call_operand.vmem [shape: bf16[4,3,64], index: 0, kind: input, shape index: {}]   ;;  %s2078_s1 = inlined_call_operand.vmem [shape: bf16[1,4,64,16384], index: 1, kind: input, shape index: {}]   ;;  %s2079_s2 = inlined_call_operand.vmem [shape: f32[4,3,1], index: 2, kind: input, shape index: {}]   ;;  %s2080_s3 = inlined_call_operand.vmem [shape: bf16[1,4,3,16384], index: 3, kind: output, shape index: {}]  }
   0x1   :  { %s1679_s14 = smov 0   ;;  %s1681_s15 = smov 0  }
   0x2   :  { %s1683_s16 = smov 0   ;;  %s1685_s17 = smov 0  }
   0x3   :  { %s1687_s18 = smov 0  }
   0x4 LB: > { %s25_s19 = sadd.s32 1, %s1643_s16  ;;  %s28_s20 = sadd.s32 1, %s1647_s17  ;;  %s1651_s18 = sphi %s1687_s18, %s13_s18   ;;  %s1647_s17 = sphi %s1685_s17, %s2094_s17   ;;  %s1643_s16 = sphi %s1683_s16, %s2093_s16   ;;  %s1639_s15 = sphi %s1681_s15, %s2092_s15   ;;  %s1635_s14 = sphi %s1679_s14, %s2091_s14   ;;  %s1631_s13 = sphi %s1677_s13, %s2090_s13   ;;  %s1627_s12 = sphi %s1675_s12, %s2089_s12  }
   0x5   : > { %p26_p0 = scmp.ge.s32.totalorder %s25_s19, 8  ;;  %p76_p1 = scmp.ne.s32.totalorder %s1631_s13, %s1627_s12 }
   0x6   : > { %p77_p2 = scmp.eq.s32.totalorder %s1651_s18, 0  ;;  %s69_s24 = sadd.s32 1, %s1631_s13 }
   0x7   : > { %s2096_s19 = smov (%p26_p0, %s25_s19), 0  ;;  %s2098_s20 = smov (!%p26_p0, %s28_s20), %s1647_s17 }
   0x8   : > { %p78_p3 = por %p77_p2, %p76_p1  ;;  %p30_p4 = scmp.ge.s32.totalorder %s2098_s20, 4 }
   0x9   : > { %s65_s21 = ssub.s32 %s1643_s16, %s2096_s19  ;;  %p1412_p6 = scmp.ge.s32.totalorder %s1651_s18, 32 }
   0xa   : > { %s2100_s20 = smov (%p30_p4, %s2098_s20), 0 }
   0xb   : > { %s63_s22 = ssub.s32 %s1647_s17, %s2100_s20  ;;  %158 = sbr.rel (%p1412_p6) target bundleno = 55 (0x37), region = 16 }
   0xc   : > { %s66_s23 = sor.u32 %s65_s21, %s63_s22 }
   0xd   : > { %p67_p5 = scmp.eq.s32.totalorder %s66_s23, 0 }
   0xf   : > { %s1726_s25 = scalar_select %p67_p5, %s1631_s13, %s69_s24  }
  0x10   : > { %168 = sbr.rel (!%p78_p3) target bundleno = 55 (0x37), region = 24  ;;  %s170_s26 = sand.u32 (%p78_p3), 1, %s1631_s13  }
  0x11   : > { %s1414_s27 = sshll.u32 (%p78_p3), %s1643_s16, 4  ;;  %s1413_s28 = sshll.u32 (%p78_p3), %s170_s26, 9 }
  0x12   : > { %s1415_s29 = sshll.u32 (%p78_p3), %s1647_s17, 10  ;;  %s1740_s8 = scalar_lea.vmem (%p78_p3), [#allocation2], %s1413_s28 }
  0x13   : > { %s175_s30 = sadd.s32 (%p78_p3), %s1415_s29, %s1414_s27 }
  0x14   : > { %s1416_s4 = sshll.u32 (%p78_p3), %s175_s30, 2 }
  0x15   : > { %s1735_s7 = scalar_lea.vmem %s2078_s1, %s1416_s4 }
  0x16   : > { %v192_v0 = vld [vmem:[%s1735_s7] sm:$0xff]  ;;  %v194_v1 = vld [vmem:[%s1735_s7 + $0x8] sm:$0xff]  ;;  %v196_v2 = vld [vmem:[%s1735_s7 + $0x10] sm:$0xff] }
  0x17   : > { %193 = vst [vmem:[%s1740_s8] sm:$0xff] %v192_v0  ;;  %195 = vst [vmem:[%s1740_s8 + $0x8] sm:$0xff] %v194_v1  ;;  %v198_v3 = vld [vmem:[%s1735_s7 + $0x18] sm:$0xff]  ;;  %v200_v4 = vld [vmem:[%s1735_s7 + $0x20] sm:$0xff] }
  0x18   : > { %197 = vst [vmem:[%s1740_s8 + $0x10] sm:$0xff] %v196_v2  ;;  %v202_v5 = vld [vmem:[%s1735_s7 + $0x28] sm:$0xff]  ;;  %199 = vst [vmem:[%s1740_s8 + $0x18] sm:$0xff] %v198_v3  ;;  %v204_v6 = vld [vmem:[%s1735_s7 + $0x30] sm:$0xff] }
  0x19   : > { %201 = vst [vmem:[%s1740_s8 + $0x20] sm:$0xff] %v200_v4  ;;  %203 = vst [vmem:[%s1740_s8 + $0x28] sm:$0xff] %v202_v5  ;;  %v206_v7 = vld [vmem:[%s1735_s7 + $0x38] sm:$0xff]  ;;  %v208_v8 = vld [vmem:[%s1735_s7 + $0x200] sm:$0xff] }
  0x1a   : > { %205 = vst [vmem:[%s1740_s8 + $0x30] sm:$0xff] %v204_v6  ;;  %207 = vst [vmem:[%s1740_s8 + $0x38] sm:$0xff] %v206_v7  ;;  %v210_v9 = vld [vmem:[%s1735_s7 + $0x208] sm:$0xff]  ;;  %v212_v10 = vld [vmem:[%s1735_s7 + $0x210] sm:$0xff] }
  0x1b   : > { %209 = vst [vmem:[%s1740_s8 + $0x40] sm:$0xff] %v208_v8  ;;  %v214_v11 = vld [vmem:[%s1735_s7 + $0x218] sm:$0xff]  ;;  %211 = vst [vmem:[%s1740_s8 + $0x48] sm:$0xff] %v210_v9  ;;  %v216_v12 = vld [vmem:[%s1735_s7 + $0x220] sm:$0xff] }
  0x1c   : > { %213 = vst [vmem:[%s1740_s8 + $0x50] sm:$0xff] %v212_v10  ;;  %215 = vst [vmem:[%s1740_s8 + $0x58] sm:$0xff] %v214_v11  ;;  %v218_v13 = vld [vmem:[%s1735_s7 + $0x228] sm:$0xff]  ;;  %v220_v14 = vld [vmem:[%s1735_s7 + $0x230] sm:$0xff] }
  0x1d   : > { %217 = vst [vmem:[%s1740_s8 + $0x60] sm:$0xff] %v216_v12  ;;  %219 = vst [vmem:[%s1740_s8 + $0x68] sm:$0xff] %v218_v13  ;;  %v222_v15 = vld [vmem:[%s1735_s7 + $0x238] sm:$0xff]  ;;  %v224_v16 = vld [vmem:[%s1735_s7 + $0x400] sm:$0xff] }
  0x1e   : > { %221 = vst [vmem:[%s1740_s8 + $0x70] sm:$0xff] %v220_v14  ;;  %v226_v17 = vld [vmem:[%s1735_s7 + $0x408] sm:$0xff]  ;;  %223 = vst [vmem:[%s1740_s8 + $0x78] sm:$0xff] %v222_v15  ;;  %v228_v18 = vld [vmem:[%s1735_s7 + $0x410] sm:$0xff] }
  0x1f   : > { %225 = vst [vmem:[%s1740_s8 + $0x80] sm:$0xff] %v224_v16  ;;  %227 = vst [vmem:[%s1740_s8 + $0x88] sm:$0xff] %v226_v17  ;;  %v230_v19 = vld [vmem:[%s1735_s7 + $0x418] sm:$0xff]  ;;  %v232_v20 = vld [vmem:[%s1735_s7 + $0x420] sm:$0xff] }
  0x20   : > { %229 = vst [vmem:[%s1740_s8 + $0x90] sm:$0xff] %v228_v18  ;;  %231 = vst [vmem:[%s1740_s8 + $0x98] sm:$0xff] %v230_v19  ;;  %v234_v21 = vld [vmem:[%s1735_s7 + $0x428] sm:$0xff]  ;;  %v236_v22 = vld [vmem:[%s1735_s7 + $0x430] sm:$0xff] }
  0x21   : > { %233 = vst [vmem:[%s1740_s8 + $0xa0] sm:$0xff] %v232_v20  ;;  %v238_v23 = vld [vmem:[%s1735_s7 + $0x438] sm:$0xff]  ;;  %235 = vst [vmem:[%s1740_s8 + $0xa8] sm:$0xff] %v234_v21  ;;  %v240_v24 = vld [vmem:[%s1735_s7 + $0x600] sm:$0xff] }
  0x22   : > { %237 = vst [vmem:[%s1740_s8 + $0xb0] sm:$0xff] %v236_v22  ;;  %239 = vst [vmem:[%s1740_s8 + $0xb8] sm:$0xff] %v238_v23  ;;  %v242_v25 = vld [vmem:[%s1735_s7 + $0x608] sm:$0xff]  ;;  %v244_v26 = vld [vmem:[%s1735_s7 + $0x610] sm:$0xff] }
  0x23   : > { %241 = vst [vmem:[%s1740_s8 + $0xc0] sm:$0xff] %v240_v24  ;;  %243 = vst [vmem:[%s1740_s8 + $0xc8] sm:$0xff] %v242_v25  ;;  %v246_v27 = vld [vmem:[%s1735_s7 + $0x618] sm:$0xff]  ;;  %v248_v28 = vld [vmem:[%s1735_s7 + $0x620] sm:$0xff] }
  0x24   : > { %245 = vst [vmem:[%s1740_s8 + $0xd0] sm:$0xff] %v244_v26  ;;  %v250_v29 = vld [vmem:[%s1735_s7 + $0x628] sm:$0xff]  ;;  %247 = vst [vmem:[%s1740_s8 + $0xd8] sm:$0xff] %v246_v27  ;;  %v252_v30 = vld [vmem:[%s1735_s7 + $0x630] sm:$0xff] }
  0x25   : > { %249 = vst [vmem:[%s1740_s8 + $0xe0] sm:$0xff] %v248_v28  ;;  %251 = vst [vmem:[%s1740_s8 + $0xe8] sm:$0xff] %v250_v29  ;;  %v254_v31 = vld [vmem:[%s1735_s7 + $0x638] sm:$0xff]  ;;  %v256_v32 = vld [vmem:[%s1735_s7 + $0x800] sm:$0xff] }
  0x26   : > { %253 = vst [vmem:[%s1740_s8 + $0xf0] sm:$0xff] %v252_v30  ;;  %255 = vst [vmem:[%s1740_s8 + $0xf8] sm:$0xff] %v254_v31  ;;  %v258_v33 = vld [vmem:[%s1735_s7 + $0x808] sm:$0xff]  ;;  %v260_v34 = vld [vmem:[%s1735_s7 + $0x810] sm:$0xff] }
  0x27   : > { %257 = vst [vmem:[%s1740_s8 + $0x100] sm:$0xff] %v256_v32  ;;  %v262_v35 = vld [vmem:[%s1735_s7 + $0x818] sm:$0xff]  ;;  %259 = vst [vmem:[%s1740_s8 + $0x108] sm:$0xff] %v258_v33  ;;  %v264_v36 = vld [vmem:[%s1735_s7 + $0x820] sm:$0xff] }
  0x28   : > { %261 = vst [vmem:[%s1740_s8 + $0x110] sm:$0xff] %v260_v34  ;;  %263 = vst [vmem:[%s1740_s8 + $0x118] sm:$0xff] %v262_v35  ;;  %v266_v37 = vld [vmem:[%s1735_s7 + $0x828] sm:$0xff]  ;;  %v268_v38 = vld [vmem:[%s1735_s7 + $0x830] sm:$0xff] }
  0x29   : > { %265 = vst [vmem:[%s1740_s8 + $0x120] sm:$0xff] %v264_v36  ;;  %267 = vst [vmem:[%s1740_s8 + $0x128] sm:$0xff] %v266_v37  ;;  %v270_v39 = vld [vmem:[%s1735_s7 + $0x838] sm:$0xff]  ;;  %v272_v40 = vld [vmem:[%s1735_s7 + $0xa00] sm:$0xff] }
  0x2a   : > { %269 = vst [vmem:[%s1740_s8 + $0x130] sm:$0xff] %v268_v38  ;;  %v274_v41 = vld [vmem:[%s1735_s7 + $0xa08] sm:$0xff]  ;;  %271 = vst [vmem:[%s1740_s8 + $0x138] sm:$0xff] %v270_v39  ;;  %v276_v42 = vld [vmem:[%s1735_s7 + $0xa10] sm:$0xff] }
  0x2b   : > { %273 = vst [vmem:[%s1740_s8 + $0x140] sm:$0xff] %v272_v40  ;;  %275 = vst [vmem:[%s1740_s8 + $0x148] sm:$0xff] %v274_v41  ;;  %v278_v43 = vld [vmem:[%s1735_s7 + $0xa18] sm:$0xff]  ;;  %v280_v44 = vld [vmem:[%s1735_s7 + $0xa20] sm:$0xff] }
  0x2c   : > { %277 = vst [vmem:[%s1740_s8 + $0x150] sm:$0xff] %v276_v42  ;;  %279 = vst [vmem:[%s1740_s8 + $0x158] sm:$0xff] %v278_v43  ;;  %v282_v45 = vld [vmem:[%s1735_s7 + $0xa28] sm:$0xff]  ;;  %v284_v46 = vld [vmem:[%s1735_s7 + $0xa30] sm:$0xff] }
  0x2d   : > { %281 = vst [vmem:[%s1740_s8 + $0x160] sm:$0xff] %v280_v44  ;;  %v286_v47 = vld [vmem:[%s1735_s7 + $0xa38] sm:$0xff]  ;;  %283 = vst [vmem:[%s1740_s8 + $0x168] sm:$0xff] %v282_v45  ;;  %v288_v48 = vld [vmem:[%s1735_s7 + $0xc00] sm:$0xff] }
  0x2e   : > { %285 = vst [vmem:[%s1740_s8 + $0x170] sm:$0xff] %v284_v46  ;;  %287 = vst [vmem:[%s1740_s8 + $0x178] sm:$0xff] %v286_v47  ;;  %v290_v49 = vld [vmem:[%s1735_s7 + $0xc08] sm:$0xff]  ;;  %v292_v50 = vld [vmem:[%s1735_s7 + $0xc10] sm:$0xff] }
  0x2f   : > { %289 = vst [vmem:[%s1740_s8 + $0x180] sm:$0xff] %v288_v48  ;;  %291 = vst [vmem:[%s1740_s8 + $0x188] sm:$0xff] %v290_v49  ;;  %v294_v51 = vld [vmem:[%s1735_s7 + $0xc18] sm:$0xff]  ;;  %v296_v52 = vld [vmem:[%s1735_s7 + $0xc20] sm:$0xff] }
  0x30   : > { %293 = vst [vmem:[%s1740_s8 + $0x190] sm:$0xff] %v292_v50  ;;  %v298_v53 = vld [vmem:[%s1735_s7 + $0xc28] sm:$0xff]  ;;  %295 = vst [vmem:[%s1740_s8 + $0x198] sm:$0xff] %v294_v51  ;;  %v300_v54 = vld [vmem:[%s1735_s7 + $0xc30] sm:$0xff] }
  0x31   : > { %297 = vst [vmem:[%s1740_s8 + $0x1a0] sm:$0xff] %v296_v52  ;;  %299 = vst [vmem:[%s1740_s8 + $0x1a8] sm:$0xff] %v298_v53  ;;  %v302_v55 = vld [vmem:[%s1735_s7 + $0xc38] sm:$0xff]  ;;  %v304_v56 = vld [vmem:[%s1735_s7 + $0xe00] sm:$0xff] }
  0x32   : > { %301 = vst [vmem:[%s1740_s8 + $0x1b0] sm:$0xff] %v300_v54  ;;  %303 = vst [vmem:[%s1740_s8 + $0x1b8] sm:$0xff] %v302_v55  ;;  %v306_v57 = vld [vmem:[%s1735_s7 + $0xe08] sm:$0xff]  ;;  %v308_v58 = vld [vmem:[%s1735_s7 + $0xe10] sm:$0xff] }
  0x33   : > { %305 = vst [vmem:[%s1740_s8 + $0x1c0] sm:$0xff] %v304_v56  ;;  %v310_v59 = vld [vmem:[%s1735_s7 + $0xe18] sm:$0xff]  ;;  %307 = vst [vmem:[%s1740_s8 + $0x1c8] sm:$0xff] %v306_v57  ;;  %v312_v60 = vld [vmem:[%s1735_s7 + $0xe20] sm:$0xff] }
  0x34   : > { %309 = vst [vmem:[%s1740_s8 + $0x1d0] sm:$0xff] %v308_v58  ;;  %311 = vst [vmem:[%s1740_s8 + $0x1d8] sm:$0xff] %v310_v59  ;;  %v314_v61 = vld [vmem:[%s1735_s7 + $0xe28] sm:$0xff]  ;;  %v316_v62 = vld [vmem:[%s1735_s7 + $0xe30] sm:$0xff] }
  0x35   : > { %313 = vst [vmem:[%s1740_s8 + $0x1e0] sm:$0xff] %v312_v60  ;;  %315 = vst [vmem:[%s1740_s8 + $0x1e8] sm:$0xff] %v314_v61  ;;  %v318_v63 = vld [vmem:[%s1735_s7 + $0xe38] sm:$0xff] }
  0x36   : > { %317 = vst [vmem:[%s1740_s8 + $0x1f0] sm:$0xff] %v316_v62  ;;  %319 = vst [vmem:[%s1740_s8 + $0x1f8] sm:$0xff] %v318_v63 }
  0x37 PF: > { %p1417_p7 = scmp.ge.s32.totalorder %s1651_s18, 1  ;;  %p331_p8 = scmp.lt.s32.totalorder %s1651_s18, 33 }
  0x39   : > { %p332_p9 = pnand %p1417_p7, %p331_p8 }
  0x3a   : > { %s338_s9 = sand.u32 (!%p332_p9), 1, %s1627_s12   ;;  %p377_p10 = scmp.lt.s32.totalorder (!%p332_p9), %s1639_s15, 3 }
  0x3b   : > { %335 = sbr.rel (%p332_p9) target bundleno = 352 (0x160), region = 51  ;;  %s1418_s10 = sshll.u32 (!%p332_p9), %s338_s9, 9 }
  0x3c   : > { %s1873_s11 = scalar_lea.vmem (!%p332_p9), [#allocation2], %s1418_s10  ;;  %s1421_s29 = sshll.u32 (!%p332_p9), %s1635_s14, 4 }
  0x3d   : > { %p391_p11 = scmp.lt.s32.totalorder (!%p332_p9), %s1421_s29, 127 }
  0x40   : > { %v1653_v0 = vmov 0   ;;  %v450_v1 = vld [vmem:[%s1873_s11 + $0x180] sm:$0xff]  ;;  %v451_v3 = vld [vmem:[%s1873_s11 + $0x188] sm:$0xff]  ;;  %s2102_s15 = smov (!%p377_p10, %s1639_s15), 3  ;;  %v452_v31 = vld [vmem:[%s1873_s11 + $0x190] sm:$0xff]  ;;  %vm792_vm0 = vcmask 523264  }
  0x41   : > { %828 = vmatprep.mubr.bf16.mxu0 %v1653_v0  ;;  %869 = vmatprep.mubr.bf16.mxu1 %v1653_v0  ;;  %v458_v2 = vld [vmem:[%s1873_s11 + $0x1c0] sm:$0xff]  ;;  %v459_v5 = vld [vmem:[%s1873_s11 + $0x1c8] sm:$0xff]  ;;  %s1419_s12 = sshll.u32 %s2102_s15, 1  ;;  %v460_v32 = vld [vmem:[%s1873_s11 + $0x1d0] sm:$0xff]  ;;  %s1420_s24 = sshll.u32 %s2102_s15, 2  ;;  %vm1244_vm1 = vcmask 1041408  }
  0x42   : > { %1564 = vset.pattern.permute.xlu0 %v1653_v0  ;;  %v1473_v4 = vcombine.high %v450_v1, %v458_v2  ;;  %v1472_v6 = vcombine.low %v450_v1, %v458_v2  ;;  %v434_v7 = vld [vmem:[%s1873_s11 + $0x100] sm:$0xff]  ;;  %v1475_v9 = vcombine.high %v451_v3, %v459_v5  ;;  %v1474_v10 = vcombine.low %v451_v3, %v459_v5  ;;  %v435_v12 = vld [vmem:[%s1873_s11 + $0x108] sm:$0xff]  ;;  %v453_v33 = vld [vmem:[%s1873_s11 + $0x198] sm:$0xff]  ;;  %s380_s23 = scalar_lea.vmem %s2077_s0, %s1419_s12  ;;  %s385_s28 = scalar_lea.vmem %s2079_s2, %s1420_s24 }
  0x43   : > { %v442_v8 = vld [vmem:[%s1873_s11 + $0x140] sm:$0xff]  ;;  %v443_v13 = vld [vmem:[%s1873_s11 + $0x148] sm:$0xff]  ;;  %v461_v34 = vld [vmem:[%s1873_s11 + $0x1d8] sm:$0xff]  ;;  %v1477_v37 = vcombine.high %v452_v31, %v460_v32  ;;  %v1476_v44 = vcombine.low %v452_v31, %v460_v32  ;;  %vm1245_vm2 = vsmask.f32 1280  ;;  %vm1247_vm3 = vcmask 1043458  }
  0x44   : > { %v1457_v11 = vcombine.high %v434_v7, %v442_v8  ;;  %v418_v14 = vld [vmem:[%s1873_s11 + $0x80] sm:$0xff]  ;;  %804 = vmatprep.subr.bf16.mxu0 %v1473_v4  ;;  %v1459_v15 = vcombine.high %v435_v12, %v443_v13  ;;  %v419_v17 = vld [vmem:[%s1873_s11 + $0x88] sm:$0xff]  ;;  %845 = vmatprep.subr.bf16.mxu1 %v1475_v9  ;;  %v1456_v19 = vcombine.low %v434_v7, %v442_v8  ;;  %v436_v39 = vld [vmem:[%s1873_s11 + $0x110] sm:$0xff]  ;;  %vm1248_vm4 = vsmask.f32 3328  ;;  %s2104_s29 = smov (!%p391_p11, %s1421_s29), 127 }
  0x45   : > { %v426_v16 = vld [vmem:[%s1873_s11 + $0xc0] sm:$0xff]  ;;  %v427_v18 = vld [vmem:[%s1873_s11 + $0xc8] sm:$0xff]  ;;  %805 = vmatpush1.bf16.msra.mxu0 %v1472_v6  ;;  %846 = vmatpush1.bf16.msra.mxu1 %v1474_v10  ;;  %v1458_v20 = vcombine.low %v435_v12, %v443_v13  ;;  %v1479_v38 = vcombine.high %v453_v33, %v461_v34  ;;  %v444_v40 = vld [vmem:[%s1873_s11 + $0x150] sm:$0xff]  ;;  %v1478_v45 = vcombine.low %v453_v33, %v461_v34  ;;  %s1422_s14 = sshll.u32 %s2102_s15, 7  ;;  %vm1251_vm7 = vcmask 1045508  }
  0x46   : > { %806 = vmatprep.subr.bf16.mxu0 %v1457_v11  ;;  %v1441_v21 = vcombine.high %v418_v14, %v426_v16  ;;  %847 = vmatprep.subr.bf16.mxu1 %v1459_v15  ;;  %v1443_v22 = vcombine.high %v419_v17, %v427_v18  ;;  %v402_v23 = vld [vmem:[%s1873_s11] sm:$0xff]  ;;  %v403_v25 = vld [vmem:[%s1873_s11 + $0x8] sm:$0xff]  ;;  %v1440_v27 = vcombine.low %v418_v14, %v426_v16  ;;  %v437_v41 = vld [vmem:[%s1873_s11 + $0x118] sm:$0xff]  ;;  %vm1252_vm8 = vsmask.f32 5376  ;;  %s394_s30 = sadd.s32 %s1422_s14, %s2104_s29 }
  0x47   : > { %v410_v24 = vld [vmem:[%s1873_s11 + $0x40] sm:$0xff]  ;;  %v411_v26 = vld [vmem:[%s1873_s11 + $0x48] sm:$0xff]  ;;  %v1442_v28 = vcombine.low %v419_v17, %v427_v18  ;;  %v445_v42 = vld [vmem:[%s1873_s11 + $0x158] sm:$0xff]  ;;  %v1461_v46 = vcombine.high %v436_v39, %v444_v40  ;;  %v1460_v52 = vcombine.low %v436_v39, %v444_v40  ;;  %s1423_s15 = sshll.u32 %s394_s30, 1  ;;  %vm1255_vm11 = vcmask 1047558  }
  0x48   : > { %v1425_v29 = vcombine.high %v402_v23, %v410_v24  ;;  %v1427_v30 = vcombine.high %v403_v25, %v411_v26  ;;  %v1424_v35 = vcombine.low %v402_v23, %v410_v24  ;;  %v1426_v36 = vcombine.low %v403_v25, %v411_v26  ;;  %v1910_v43 = vld [vmem:[%s380_s23] sm:$0x3]  ;;  %v420_v48 = vld [vmem:[%s1873_s11 + $0x90] sm:$0xff]  ;;  %v421_v50 = vld [vmem:[%s1873_s11 + $0x98] sm:$0xff]  ;;  %s2014_s6 = scalar_lea.vmem %s2080_s3, %s1423_s15 }
  0x49   : > { %807 = vmatpush1.bf16.msra.mxu0 %v1456_v19  ;;  %848 = vmatpush1.bf16.msra.mxu1 %v1458_v20  ;;  %v1463_v47 = vcombine.high %v437_v41, %v445_v42  ;;  %v428_v49 = vld [vmem:[%s1873_s11 + $0xd0] sm:$0xff]  ;;  %v429_v51 = vld [vmem:[%s1873_s11 + $0xd8] sm:$0xff]  ;;  %v1462_v53 = vcombine.low %v437_v41, %v445_v42  ;;  %v466_v55 = vld [vmem:[%s385_s28] sm:$0x7]  ;;  %vm1256_vm12 = vsmask.f32 7424 }
  0x4a   : > { %808 = vmatprep.subr.bf16.mxu0 %v1441_v21  ;;  %849 = vmatprep.subr.bf16.mxu1 %v1443_v22  ;;  %v1445_v54 = vcombine.high %v420_v48, %v428_v49  ;;  %v1447_v56 = vcombine.high %v421_v50, %v429_v51  ;;  %v404_v57 = vld [vmem:[%s1873_s11 + $0x10] sm:$0xff]  ;;  %v405_v59 = vld [vmem:[%s1873_s11 + $0x18] sm:$0xff]  ;;  %v1444_v61 = vcombine.low %v420_v48, %v428_v49  ;;  %v454_v2 = vld [vmem:[%s1873_s11 + $0x1a0] sm:$0xff] }
  0x4b   : > { %v412_v58 = vld [vmem:[%s1873_s11 + $0x50] sm:$0xff]  ;;  %v413_v60 = vld [vmem:[%s1873_s11 + $0x58] sm:$0xff]  ;;  %469 = vperm.xlu0 %1564, %v466_v55   ;;  %v1446_v62 = vcombine.low %v421_v50, %v429_v51  ;;  %v462_v3 = vld [vmem:[%s1873_s11 + $0x1e0] sm:$0xff] }
  0x4c   : > { %v1429_v63 = vcombine.high %v404_v57, %v412_v58  ;;  %v1431_v1 = vcombine.high %v405_v59, %v413_v60  ;;  %v455_v4 = vld [vmem:[%s1873_s11 + $0x1a8] sm:$0xff]  ;;  %v1428_v6 = vcombine.low %v404_v57, %v412_v58  ;;  %v1430_v7 = vcombine.low %v405_v59, %v413_v60  ;;  %v438_v10 = vld [vmem:[%s1873_s11 + $0x120] sm:$0xff]  ;;  %v456_v34 = vld [vmem:[%s1873_s11 + $0x1b0] sm:$0xff] }
  0x4d   : > { %809 = vmatpush1.bf16.msra.mxu0 %v1440_v27  ;;  %850 = vmatpush1.bf16.msra.mxu1 %v1442_v28  ;;  %v463_v5 = vld [vmem:[%s1873_s11 + $0x1e8] sm:$0xff]  ;;  %v1481_v8 = vcombine.high %v454_v2, %v462_v3  ;;  %v446_v11 = vld [vmem:[%s1873_s11 + $0x160] sm:$0xff]  ;;  %v1480_v14 = vcombine.low %v454_v2, %v462_v3  ;;  %v440_v42 = vld [vmem:[%s1873_s11 + $0x130] sm:$0xff] }
  0x4e   : > { %810 = vmatprep.subr.bf16.mxu0 %v1425_v29  ;;  %851 = vmatprep.subr.bf16.mxu1 %v1427_v30  ;;  %v1483_v9 = vcombine.high %v455_v4, %v463_v5  ;;  %v439_v12 = vld [vmem:[%s1873_s11 + $0x128] sm:$0xff]  ;;  %v1482_v15 = vcombine.low %v455_v4, %v463_v5  ;;  %v1465_v16 = vcombine.high %v438_v10, %v446_v11  ;;  %v422_v18 = vld [vmem:[%s1873_s11 + $0xa0] sm:$0xff]  ;;  %v424_v51 = vld [vmem:[%s1873_s11 + $0xb0] sm:$0xff] }
  0x4f   : > { %v447_v13 = vld [vmem:[%s1873_s11 + $0x168] sm:$0xff]  ;;  %v430_v19 = vld [vmem:[%s1873_s11 + $0xe0] sm:$0xff]  ;;  %v1464_v22 = vcombine.low %v438_v10, %v446_v11  ;;  %v408_v59 = vld [vmem:[%s1873_s11 + $0x30] sm:$0xff] }
  0x50   : > { %v1467_v17 = vcombine.high %v439_v12, %v447_v13  ;;  %v423_v20 = vld [vmem:[%s1873_s11 + $0xa8] sm:$0xff]  ;;  %v1466_v23 = vcombine.low %v439_v12, %v447_v13  ;;  %v1449_v24 = vcombine.high %v422_v18, %v430_v19  ;;  %v406_v26 = vld [vmem:[%s1873_s11 + $0x20] sm:$0xff]  ;;  %v1448_v30 = vcombine.low %v422_v18, %v430_v19  ;;  %v416_v60 = vld [vmem:[%s1873_s11 + $0x70] sm:$0xff] }
  0x51   : > { %811 = vmatpush1.bf16.msra.mxu0 %v1424_v35  ;;  %852 = vmatpush1.bf16.msra.mxu1 %v1426_v36  ;;  %v431_v21 = vld [vmem:[%s1873_s11 + $0xe8] sm:$0xff]  ;;  %v414_v27 = vld [vmem:[%s1873_s11 + $0x60] sm:$0xff]  ;;  %v464_v35 = vld [vmem:[%s1873_s11 + $0x1f0] sm:$0xff]  ;;  %v1437_v2 = vcombine.high %v408_v59, %v416_v60  ;;  %v1436_v4 = vcombine.low %v408_v59, %v416_v60  ;;  %v1177_v19 = vlaneseq }
  0x52   : > { %886 = vmatprep.subr.bf16.mxu0 %v1477_v37  ;;  %927 = vmatprep.subr.bf16.mxu1 %v1479_v38  ;;  %v1451_v25 = vcombine.high %v423_v20, %v431_v21  ;;  %v407_v28 = vld [vmem:[%s1873_s11 + $0x28] sm:$0xff]  ;;  %v1450_v31 = vcombine.low %v423_v20, %v431_v21  ;;  %v1433_v32 = vcombine.high %v406_v26, %v414_v27  ;;  %v457_v36 = vld [vmem:[%s1873_s11 + $0x1b8] sm:$0xff]  ;;  %vm1985_vm5 = vmand %vm1244_vm1, %vm1245_vm2 }
  0x53   : > { %v415_v29 = vld [vmem:[%s1873_s11 + $0x68] sm:$0xff]  ;;  %v465_v37 = vld [vmem:[%s1873_s11 + $0x1f8] sm:$0xff]  ;;  %v1432_v38 = vcombine.low %v406_v26, %v414_v27  ;;  %v1485_v40 = vcombine.high %v456_v34, %v464_v35  ;;  %vm1989_vm6 = vmand %vm1247_vm3, %vm1248_vm4 }
  0x54   : > { %1488 = vmatmul.mubr.msk.bf16.vlgmr.msra.gmra.mxu0 %vm792_vm0, %v1910_v43  ;;  %1489 = vmatmul.mubr.msk.bf16.vlgmr.msra.gmra.mxu1 %vm792_vm0, %v1910_v43  ;;  %v1435_v33 = vcombine.high %v407_v28, %v415_v29  ;;  %v1434_v39 = vcombine.low %v407_v28, %v415_v29  ;;  %v1487_v41 = vcombine.high %v457_v36, %v465_v37  ;;  %vm1250_vm9 = vmor %vm1989_vm6, %vm1985_vm5 }
  0x55   : > { %887 = vmatpush1.bf16.msra.mxu0 %v1476_v44  ;;  %928 = vmatpush1.bf16.msra.mxu1 %v1478_v45  ;;  %v448_v44 = vld [vmem:[%s1873_s11 + $0x170] sm:$0xff]  ;;  %v441_v45 = vld [vmem:[%s1873_s11 + $0x138] sm:$0xff]  ;;  %v1486_v48 = vcombine.low %v457_v36, %v465_v37  ;;  %vm1253_vm10 = vmand %vm1251_vm7, %vm1252_vm8 }
  0x56   : > { %888 = vmatprep.subr.bf16.mxu0 %v1461_v46  ;;  %929 = vmatprep.subr.bf16.mxu1 %v1463_v47  ;;  %v449_v46 = vld [vmem:[%s1873_s11 + $0x178] sm:$0xff]  ;;  %v1484_v47 = vcombine.low %v456_v34, %v464_v35  ;;  %v1469_v49 = vcombine.high %v440_v42, %v448_v44  ;;  %v1468_v55 = vcombine.low %v440_v42, %v448_v44  ;;  %vm2006_vm13 = vmor %vm1253_vm10, %vm1250_vm9 }
  0x57   : > { %910 = vmatprep.mubr.bf16.mxu0 %v1653_v0  ;;  %951 = vmatprep.mubr.bf16.mxu1 %v1653_v0  ;;  %v1471_v50 = vcombine.high %v441_v45, %v449_v46  ;;  %vm1257_vm14 = vmand %vm1255_vm11, %vm1256_vm12 }
  0x58   : > { %vm2022_vm15 = vmor %vm1257_vm14, %vm2006_vm13 }
  0x59   : > { %889 = vmatpush1.bf16.msra.mxu0 %v1460_v52  ;;  %930 = vmatpush1.bf16.msra.mxu1 %v1462_v53  ;;  %v432_v52 = vld [vmem:[%s1873_s11 + $0xf0] sm:$0xff]  ;;  %v425_v53 = vld [vmem:[%s1873_s11 + $0xb8] sm:$0xff] }
  0x5a   : > { %890 = vmatprep.subr.bf16.mxu0 %v1445_v54  ;;  %931 = vmatprep.subr.bf16.mxu1 %v1447_v56  ;;  %v433_v54 = vld [vmem:[%s1873_s11 + $0xf8] sm:$0xff]  ;;  %v1470_v56 = vcombine.low %v441_v45, %v449_v46  ;;  %v1453_v57 = vcombine.high %v424_v51, %v432_v52 }
  0x5b   : > { %v1455_v58 = vcombine.high %v425_v53, %v433_v54 }
  0x5d   : > { %891 = vmatpush1.bf16.msra.mxu0 %v1444_v61  ;;  %932 = vmatpush1.bf16.msra.mxu1 %v1446_v62  ;;  %v409_v61 = vld [vmem:[%s1873_s11 + $0x38] sm:$0xff] }
  0x5e   : > { %892 = vmatprep.subr.bf16.mxu0 %v1429_v63  ;;  %933 = vmatprep.subr.bf16.mxu1 %v1431_v1  ;;  %v417_v62 = vld [vmem:[%s1873_s11 + $0x78] sm:$0xff]  ;;  %v1452_v63 = vcombine.low %v424_v51, %v432_v52  ;;  %v1454_v1 = vcombine.low %v425_v53, %v433_v54 }
  0x5f   : > { %v1439_v3 = vcombine.high %v409_v61, %v417_v62  ;;  %v1438_v5 = vcombine.low %v409_v61, %v417_v62 }
  0x61   : > { %893 = vmatpush1.bf16.msra.mxu0 %v1428_v6  ;;  %934 = vmatpush1.bf16.msra.mxu1 %v1430_v7 }
  0x62   : > { %968 = vmatprep.subr.bf16.mxu0 %v1481_v8  ;;  %1009 = vmatprep.subr.bf16.mxu1 %v1483_v9 }
  0x64   : > { %1490 = vmatmul.mubr.msk.bf16.vlgmr.msra.gmra.mxu0 %vm792_vm0, %v1910_v43  ;;  %1491 = vmatmul.mubr.msk.bf16.vlgmr.msra.gmra.mxu1 %vm792_vm0, %v1910_v43 }
  0x65   : > { %969 = vmatpush1.bf16.msra.mxu0 %v1480_v14  ;;  %1010 = vmatpush1.bf16.msra.mxu1 %v1482_v15 }
  0x66   : > { %970 = vmatprep.subr.bf16.mxu0 %v1465_v16  ;;  %1011 = vmatprep.subr.bf16.mxu1 %v1467_v17  ;;  %v1654_v17 = vmov 1983009808  }
  0x67   : > { %992 = vmatprep.mubr.bf16.mxu0 %v1653_v0  ;;  %1033 = vmatprep.mubr.bf16.mxu1 %v1653_v0  ;;  %v1175_v18 = vunpack.c.l.s4 %v1654_v17 }
  0x69   : > { %971 = vmatpush1.bf16.msra.mxu0 %v1464_v22  ;;  %1012 = vmatpush1.bf16.msra.mxu1 %v1466_v23  ;;  %v1176_v22 = vunpack.c.0.s8 %v1175_v18  ;;  %v1178_v23 = vshrl.u32 %v1177_v19, 7 }
  0x6a   : > { %972 = vmatprep.subr.bf16.mxu0 %v1449_v24  ;;  %1013 = vmatprep.subr.bf16.mxu1 %v1451_v25 }
  0x6b   : > { %v1997_v27 = vsub.s32 %v1176_v22, %v1178_v23 }
  0x6d   : > { %973 = vmatpush1.bf16.msra.mxu0 %v1448_v30  ;;  %1014 = vmatpush1.bf16.msra.mxu1 %v1450_v31 }
  0x6e   : > { %974 = vmatprep.subr.bf16.mxu0 %v1433_v32  ;;  %1015 = vmatprep.subr.bf16.mxu1 %v1435_v33 }
  0x71   : > { %975 = vmatpush1.bf16.msra.mxu0 %v1432_v38  ;;  %1016 = vmatpush1.bf16.msra.mxu1 %v1434_v39 }
  0x72   : > { %1050 = vmatprep.subr.bf16.mxu0 %v1485_v40  ;;  %1091 = vmatprep.subr.bf16.mxu1 %v1487_v41 }
  0x74   : > { %1492 = vmatmul.mubr.msk.bf16.vlgmr.msra.gmra.mxu0 %vm792_vm0, %v1910_v43  ;;  %1493 = vmatmul.mubr.msk.bf16.vlgmr.msra.gmra.mxu1 %vm792_vm0, %v1910_v43 }
  0x75   : > { %1051 = vmatpush1.bf16.msra.mxu0 %v1484_v47  ;;  %1092 = vmatpush1.bf16.msra.mxu1 %v1486_v48  ;;  %v1259_v47 = vld [vmem:[%s2014_s6] sm:$0xff] }
  0x76   : > { %1052 = vmatprep.subr.bf16.mxu0 %v1469_v49  ;;  %1093 = vmatprep.subr.bf16.mxu1 %v1471_v50 }
  0x77   : > { %1074 = vmatprep.mubr.bf16.mxu0 %v1653_v0  ;;  %1115 = vmatprep.mubr.bf16.mxu1 %v1653_v0 }
  0x79   : > { %1053 = vmatpush1.bf16.msra.mxu0 %v1468_v55  ;;  %1094 = vmatpush1.bf16.msra.mxu1 %v1470_v56 }
  0x7a   : > { %1054 = vmatprep.subr.bf16.mxu0 %v1453_v57  ;;  %1095 = vmatprep.subr.bf16.mxu1 %v1455_v58 }
  0x7d   : > { %1055 = vmatpush1.bf16.msra.mxu0 %v1452_v63  ;;  %1096 = vmatpush1.bf16.msra.mxu1 %v1454_v1 }
  0x7e   : > { %1056 = vmatprep.subr.bf16.mxu0 %v1437_v2  ;;  %1097 = vmatprep.subr.bf16.mxu1 %v1439_v3 }
  0x81   : > { %1057 = vmatpush1.bf16.msra.mxu0 %v1436_v4  ;;  %1098 = vmatpush1.bf16.msra.mxu1 %v1438_v5 }
  0x84   : > { %1494 = vmatmul.mubr.msk.bf16.vlgmr.msra.gmra.mxu0 %vm792_vm0, %v1910_v43  ;;  %1495 = vmatmul.mubr.msk.bf16.vlgmr.msra.gmra.mxu1 %vm792_vm0, %v1910_v43 }
  0xc6   : > { %v1977_v0 = vpop.permute.xlu0 %469 }
 0x114   : > { %v830_v6 = vpop.f32.mrf.mxu0  ;;  %v871_v7 = vpop.f32.mrf.mxu1 }
 0x115   : > { %v831_v8 = vadd.f32 %v830_v6, %v1977_v0  ;;  %v872_v10 = vadd.f32 %v871_v7, %v1977_v0  ;;  %v1262_v7 = vld [vmem:[%s2014_s6 + $0x8] sm:$0xff] }
 0x116   : > { %v832_v9 = vpop.f32.mrf.mxu0  ;;  %v873_v12 = vpop.f32.mrf.mxu1 }
 0x117   : > { %v833_v11 = vadd.f32 %v832_v9, %v1977_v0  ;;  %1565 = vtanh.f32 %v831_v8  ;;  %v874_v13 = vadd.f32 %v873_v12, %v1977_v0 }
 0x118   : > { %1567 = vtanh.f32 %v872_v10  ;;  %v834_v14 = vpop.f32.mrf.mxu0  ;;  %v875_v43 = vpop.f32.mrf.mxu1 }
 0x119   : > { %1569 = vtanh.f32 %v833_v11 }
 0x11a   : > { %1571 = vtanh.f32 %v874_v13  ;;  %v835_v15 = vpop.f32.mrf.mxu0  ;;  %v876_v16 = vpop.f32.mrf.mxu1 }
 0x124   : > { %v1566_v24 = vpop.eup %1565  ;;  %v912_v25 = vpop.f32.mrf.mxu0 }
 0x125   : > { %v1568_v26 = vpop.eup %1567  ;;  %v913_v28 = vadd.f32 %v912_v25, %v1977_v0  ;;  %v953_v29 = vpop.f32.mrf.mxu1 }
 0x126   : > { %v1570_v30 = vpop.eup %1569  ;;  %v954_v31 = vadd.f32 %v953_v29, %v1977_v0  ;;  %v914_v32 = vpop.f32.mrf.mxu0 }
 0x127   : > { %v1572_v33 = vpop.eup %1571  ;;  %v1496_v34 = vpack.c.bf16 %v1570_v30, %v1566_v24  ;;  %1573 = vtanh.f32 %v913_v28  ;;  %v915_v36 = vadd.f32 %v914_v32, %v1977_v0  ;;  %v955_v37 = vpop.f32.mrf.mxu1  ;;  %v1265_v30 = vld [vmem:[%s2014_s6 + $0x10] sm:$0xff] }
 0x128   : > { %v1497_v38 = vpack.c.bf16 %v1572_v33, %v1568_v26  ;;  %1575 = vtanh.f32 %v954_v31  ;;  %v956_v39 = vadd.f32 %v955_v37, %v1977_v0  ;;  %v916_v40 = vpop.f32.mrf.mxu0 }
 0x129   : > { %v1180_v41 = vrot.slane %v1496_v34, %v1997_v27  ;;  %1577 = vtanh.f32 %v915_v36  ;;  %v957_v42 = vpop.f32.mrf.mxu1 }
 0x12a   : > { %v1187_v44 = vrot.slane %v1497_v38, %v1997_v27  ;;  %1579 = vtanh.f32 %v956_v39  ;;  %v917_v45 = vpop.f32.mrf.mxu0 }
 0x12b   : > { %v958_v48 = vpop.f32.mrf.mxu1 }
 0x12c   : > { %v1188_v49 = vcombine.low %v1180_v41, %v1187_v44  ;;  %v1268_v41 = vld [vmem:[%s2014_s6 + $0x18] sm:$0xff] }
 0x12e   : > { %v1260_v50 = vsel %vm2022_vm15, %v1188_v49, %v1259_v47 }
 0x12f   : > { %1261 = vst [vmem:[%s2014_s6] sm:$0xff] %v1260_v50 }
 0x134   : > { %v1574_v51 = vpop.eup %1573  ;;  %v994_v52 = vpop.f32.mrf.mxu0 }
 0x135   : > { %v1576_v53 = vpop.eup %1575  ;;  %v995_v54 = vadd.f32 %v994_v52, %v1977_v0  ;;  %v1035_v55 = vpop.f32.mrf.mxu1 }
 0x136   : > { %v1578_v56 = vpop.eup %1577  ;;  %v1036_v57 = vadd.f32 %v1035_v55, %v1977_v0  ;;  %v996_v58 = vpop.f32.mrf.mxu0 }
 0x137   : > { %v1580_v59 = vpop.eup %1579  ;;  %v1498_v60 = vpack.c.bf16 %v1578_v56, %v1574_v51  ;;  %1581 = vtanh.f32 %v995_v54  ;;  %v997_v61 = vadd.f32 %v996_v58, %v1977_v0  ;;  %v1037_v62 = vpop.f32.mrf.mxu1 }
 0x138   : > { %v1499_v63 = vpack.c.bf16 %v1580_v59, %v1576_v53  ;;  %1583 = vtanh.f32 %v1036_v57  ;;  %v1038_v1 = vadd.f32 %v1037_v62, %v1977_v0  ;;  %v998_v2 = vpop.f32.mrf.mxu0 }
 0x139   : > { %v1197_v3 = vrot.slane %v1498_v60, %v1997_v27  ;;  %1585 = vtanh.f32 %v997_v61  ;;  %v1039_v4 = vpop.f32.mrf.mxu1 }
 0x13a   : > { %v1204_v5 = vrot.slane %v1499_v63, %v1997_v27  ;;  %1587 = vtanh.f32 %v1038_v1  ;;  %v999_v6 = vpop.f32.mrf.mxu0 }
 0x13b   : > { %v1040_v8 = vpop.f32.mrf.mxu1 }
 0x13c   : > { %v1205_v9 = vcombine.low %v1197_v3, %v1204_v5 }
 0x13e   : > { %v1263_v10 = vsel %vm2022_vm15, %v1205_v9, %v1262_v7 }
 0x13f   : > { %1264 = vst [vmem:[%s2014_s6 + $0x8] sm:$0xff] %v1263_v10 }
 0x144   : > { %v1582_v11 = vpop.eup %1581  ;;  %v1076_v12 = vpop.f32.mrf.mxu0 }
 0x145   : > { %v1584_v13 = vpop.eup %1583  ;;  %v1077_v14 = vadd.f32 %v1076_v12, %v1977_v0  ;;  %v1117_v43 = vpop.f32.mrf.mxu1 }
 0x146   : > { %v1586_v15 = vpop.eup %1585  ;;  %v1118_v16 = vadd.f32 %v1117_v43, %v1977_v0  ;;  %v1078_v17 = vpop.f32.mrf.mxu0 }
 0x147   : > { %v1588_v18 = vpop.eup %1587  ;;  %v1500_v19 = vpack.c.bf16 %v1586_v15, %v1582_v11  ;;  %1589 = vtanh.f32 %v1077_v14  ;;  %v1079_v20 = vadd.f32 %v1078_v17, %v1977_v0  ;;  %v1119_v21 = vpop.f32.mrf.mxu1 }
 0x148   : > { %v1501_v22 = vpack.c.bf16 %v1588_v18, %v1584_v13  ;;  %1591 = vtanh.f32 %v1118_v16  ;;  %v1120_v23 = vadd.f32 %v1119_v21, %v1977_v0  ;;  %v1080_v24 = vpop.f32.mrf.mxu0 }
 0x149   : > { %v1214_v25 = vrot.slane %v1500_v19, %v1997_v27  ;;  %1593 = vtanh.f32 %v1079_v20  ;;  %v1121_v26 = vpop.f32.mrf.mxu1 }
 0x14a   : > { %v1221_v28 = vrot.slane %v1501_v22, %v1997_v27  ;;  %1595 = vtanh.f32 %v1120_v23  ;;  %v1081_v29 = vpop.f32.mrf.mxu0 }
 0x14b   : > { %v1122_v31 = vpop.f32.mrf.mxu1 }
 0x14c   : > { %v1222_v32 = vcombine.low %v1214_v25, %v1221_v28 }
 0x14e   : > { %v1266_v33 = vsel %vm2022_vm15, %v1222_v32, %v1265_v30 }
 0x14f   : > { %1267 = vst [vmem:[%s2014_s6 + $0x10] sm:$0xff] %v1266_v33 }
 0x154   : > { %v1590_v34 = vpop.eup %1589 }
 0x155   : > { %v1592_v0 = vpop.eup %1591 }
 0x156   : > { %v1594_v35 = vpop.eup %1593 }
 0x157   : > { %v1596_v36 = vpop.eup %1595  ;;  %v1502_v37 = vpack.c.bf16 %v1594_v35, %v1590_v34 }
 0x158   : > { %v1503_v38 = vpack.c.bf16 %v1596_v36, %v1592_v0 }
 0x159   : > { %v1231_v39 = vrot.slane %v1502_v37, %v1997_v27 }
 0x15a   : > { %v1238_v40 = vrot.slane %v1503_v38, %v1997_v27 }
 0x15c   : > { %v1239_v42 = vcombine.low %v1231_v39, %v1238_v40 }
 0x15e   : > { %v1269_v44 = vsel %vm2022_vm15, %v1239_v42, %v1268_v41 }
 0x15f   : > { %1270 = vst [vmem:[%s2014_s6 + $0x18] sm:$0xff] %v1269_v44 }
 0x160 PF: > { %s13_s18 = sadd.s32 1, %s1651_s18   ;;  %s2089_s12 = smov %s1631_s13 }
 0x161   : > { %p10_p12 = scmp.ge.s32.totalorder %s13_s18, 34   ;;  %s2090_s13 = smov %s1726_s25 }
 0x162   : > { %s2091_s14 = smov %s1643_s16  ;;  %s2092_s15 = smov %s1647_s17 }
 0x163   : > { %s2093_s16 = smov %s2096_s19  ;;  %s2094_s17 = smov %s2100_s20 }
 0x164   :  { %12 = sbr.rel (!%p10_p12) target bundleno = 4 (0x4), region = 96 }

</bundles_post_ra>
